<compile_context>
chip_gen: v7x
topology: tpu7x:2x2x1
jax: 0.10.0
libtpu: 0.0.40
codegen_flags: <defaults>
</compile_context>

<pallas_src>
import math
from functools import partial

import jax
import jax.numpy as jnp
from jax import lax
from jax.experimental import pallas as pl
from jax.experimental.pallas import tpu as pltpu


# ----------------------------- in-kernel helpers -----------------------------

def _layernorm(x, gamma, beta, eps=1e-6):
    # PyTorch nn.LayerNorm: biased variance, eps inside rsqrt.
    mu = jnp.mean(x, axis=-1, keepdims=True)
    var = jnp.mean((x - mu) ** 2, axis=-1, keepdims=True)
    return (x - mu) * lax.rsqrt(var + eps) * gamma + beta


def _gelu_exact(x):
    # nn.GELU() default = exact erf-based GELU (kept exact for torch parity).
    return 0.5 * x * (1.0 + lax.erf(x * (1.0 / math.sqrt(2.0))))


# (S, c) x (S, c) -> (S, S): q @ k.T without an explicit transpose.
_NT = (((1,), (1,)), ((), ()))


# --------------------------------- kernel ------------------------------------

def encoder_stack_kernel(x_ref, pos_ref,
                         ln1_g_ref, ln1_b_ref,
                         wqkv_ref, bqkv_ref,
                         wo_ref, bo_ref,
                         ln2_g_ref, ln2_b_ref,
                         w1_ref, b1_ref, w2_ref, b2_ref,
                         lnf_g_ref, lnf_b_ref,
                         o_ref,
                         x_vmem,
                         *, num_heads):
    layer = pl.program_id(1)
    n_layers = pl.num_programs(1)
    j = pl.program_id(2)                      # sample index within the batch block

    # ---- layer 0: load the input row once, add positional embedding ----
    # (self.dropout is identity in eval mode)
    @pl.when(layer == 0)
    def _():
        x_vmem[j] = x_ref[j] + pos_ref[0]

    x = x_vmem[j]                             # (S, D) fp32, VMEM-resident across layers
    S, D = x.shape
    H = num_heads
    hd = D // H

    # ---- LN1 + single (S, D) x (D, 3D) QKV matmul (1/sqrt(hd) folded into Wq/bq) ----
    xn = _layernorm(x, ln1_g_ref[0], ln1_b_ref[0])
    qkv = jnp.dot(xn.astype(jnp.bfloat16), wqkv_ref[0],
                  preferred_element_type=jnp.float32)
    qkv = (qkv + bqkv_ref[0]).astype(jnp.bfloat16)          # (S, 3D), cast once

    # ---- attention on lane-aligned per-head slices; normalize AFTER p@v ----
    ctx_heads = []
    for h in range(H):                                      # static unroll, no transposes
        q = qkv[:, h * hd:(h + 1) * hd]                     # (S, hd) bf16 (pre-scaled)
        k = qkv[:, D + h * hd:D + (h + 1) * hd]
        v = qkv[:, 2 * D + h * hd:2 * D + (h + 1) * hd]
        s = lax.dot_general(q, k, _NT, preferred_element_type=jnp.float32)   # (S, S)
        s = s - jnp.max(s, axis=-1, keepdims=True)
        p = jnp.exp(s)
        denom = jnp.sum(p, axis=-1, keepdims=True)
        ctx = jnp.dot(p.astype(jnp.bfloat16), v,
                      preferred_element_type=jnp.float32)                    # (S, hd)
        ctx_heads.append(ctx * pl.reciprocal(denom, approx=True))
    ctx_all = ctx_heads[0] if H == 1 else jnp.concatenate(ctx_heads, axis=-1)  # (S, D)

    # Output projection: one (S, D) x (D, D) matmul (K = D full MXU depth).
    attn = jnp.dot(ctx_all.astype(jnp.bfloat16), wo_ref[0],
                   preferred_element_type=jnp.float32) + bo_ref[0]

    x2 = x + attn                             # residual 1 (dropout = identity)

    # ---- LN2 + MLP(GELU) ----
    yn = _layernorm(x2, ln2_g_ref[0], ln2_b_ref[0])
    h1 = jnp.dot(yn.astype(jnp.bfloat16), w1_ref[0],
                 preferred_element_type=jnp.float32) + b1_ref[0]
    h1 = _gelu_exact(h1)
    h2 = jnp.dot(h1.astype(jnp.bfloat16), w2_ref[0],
                 preferred_element_type=jnp.float32) + b2_ref[0]

    x_out = x2 + h2                           # residual 2
    x_vmem[j] = x_out

    # ---- last layer: fused final LayerNorm, lane-dense (S, D) store into row j ----
    @pl.when(layer == n_layers - 1)
    def _():
        o_ref[j] = _layernorm(x_out, lnf_g_ref[...], lnf_b_ref[...]).astype(o_ref.dtype)


# --------------------------------- wrapper -----------------------------------

def _vmem_limit_bytes():
    # Per-generation limit: ~3/4 of physical VMEM, capped at 100 MiB.
    # 128 MiB (v5e/v6e) -> 96 MiB ; 64 MiB (v7x) -> 48 MiB ; fallback safe everywhere.
    try:
        cap = int(pltpu.get_tpu_info().vmem_capacity_bytes)
    except Exception:
        return 48 * 1024 * 1024
    return min((cap * 3) // 4, 100 * 1024 * 1024)


def encoder_forward(x, params, num_heads, *, batch_block=None):
    B, S, D = x.shape
    st = params["stacked"]
    L = st["w1"].shape[0]
    M = st["w1"].shape[-1]

    # batch_block = samples whose activations stay VMEM-resident per layer sweep.
    # NB (= B // batch_block) is the parallel (megacore) axis; weights are DMA'd
    # NB * L times total. Use batch_block = B // 2 on v7x to feed both TensorCores.
    if batch_block is None:
        batch_block = B
    assert B % batch_block == 0, (B, batch_block)
    NB, BB = B // batch_block, batch_block

    xmap = lambda i, l, j: (i, 0, 0)
    wmap = lambda i, l, j: (l, 0, 0)

    in_specs = [
        pl.BlockSpec((BB, S, D), xmap),                        # x (once per batch block)
        pl.BlockSpec((1, S, D), lambda i, l, j: (0, 0, 0)),    # pos_embedding
        pl.BlockSpec((1, 1, D), wmap),                         # ln1 gamma
        pl.BlockSpec((1, 1, D), wmap),                         # ln1 beta
        pl.BlockSpec((1, D, 3 * D), wmap),                     # wqkv  (in, out=[Q|K|V])
        pl.BlockSpec((1, 1, 3 * D), wmap),                     # bqkv
        pl.BlockSpec((1, D, D), wmap),                         # wo
        pl.BlockSpec((1, 1, D), wmap),                         # bo
        pl.BlockSpec((1, 1, D), wmap),                         # ln2 gamma
        pl.BlockSpec((1, 1, D), wmap),                         # ln2 beta
        pl.BlockSpec((1, D, M), wmap),                         # w1
        pl.BlockSpec((1, 1, M), wmap),                         # b1
        pl.BlockSpec((1, M, D), wmap),                         # w2
        pl.BlockSpec((1, 1, D), wmap),                         # b2
        pl.BlockSpec((1, D), lambda i, l, j: (0, 0)),          # final ln gamma
        pl.BlockSpec((1, D), lambda i, l, j: (0, 0)),          # final ln beta
    ]

    return pl.pallas_call(
        partial(encoder_stack_kernel, num_heads=num_heads),
        out_shape=jax.ShapeDtypeStruct((B, S, D), x.dtype),
        grid=(NB, L, BB),
        in_specs=in_specs,
        # Output block index depends only on the outer batch-block axis and is
        # revisited across the two innermost axes -> flushed once per batch block.
        out_specs=pl.BlockSpec((BB, S, D), xmap),
        scratch_shapes=[pltpu.VMEM((BB, S, D), jnp.float32)],
        compiler_params=pltpu.CompilerParams(
            dimension_semantics=("parallel", "arbitrary", "arbitrary"),
            vmem_limit_bytes=_vmem_limit_bytes()),
    )(x, params["pos_embedding"],
      st["ln1_g"], st["ln1_b"],
      st["wqkv"], st["bqkv"],
      st["wo"], st["bo"],
      st["ln2_g"], st["ln2_b"],
      st["w1"], st["b1"], st["w2"], st["b2"],
      params["ln_g"], params["ln_b"])


# ------------------------------ parameter init --------------------------------

def _xavier_uniform(key, shape, fan_in, fan_out):
    bound = math.sqrt(6.0 / (fan_in + fan_out))
    return jax.random.uniform(key, shape, jnp.float32, -bound, bound)


def init_encoder_params(key, seq_length, num_layers, num_heads, hidden_dim, mlp_dim):
    D, M, H = hidden_dim, mlp_dim, num_heads
    hd = D // H
    scale = 1.0 / math.sqrt(hd)
    keys = jax.random.split(key, 1 + num_layers)
    params = {
        "pos_embedding": 0.02 * jax.random.normal(keys[0], (1, seq_length, D), jnp.float32),
        "ln_g": jnp.ones((1, D), jnp.float32),
        "ln_b": jnp.zeros((1, D), jnp.float32),
    }

    names = ["ln1_g", "ln1_b", "wqkv", "bqkv", "wo", "bo",
             "ln2_g", "ln2_b", "w1", "b1", "w2", "b2"]
    layer_lists = {k: [] for k in names}
    for i in range(num_layers):
        ks = jax.random.split(keys[1 + i], 6)
        # MHA in_proj (xavier in torch), stored (in, out) so y = x @ W; columns = [Q|K|V].
        wqkv = _xavier_uniform(ks[0], (D, 3 * D), D, 3 * D)
        bqkv = jnp.zeros((1, 3 * D), jnp.float32)
        # Fold the 1/sqrt(head_dim) attention scale into Wq / bq (exact rewrite).
        wqkv = wqkv.at[:, :D].multiply(scale)
        bqkv = bqkv.at[:, :D].multiply(scale)
        wo = _xavier_uniform(ks[1], (D, D), D, D)             # out_proj, stored (in, out)

        layer_lists["ln1_g"].append(jnp.ones((1, D), jnp.float32))
        layer_lists["ln1_b"].append(jnp.zeros((1, D), jnp.float32))
        layer_lists["wqkv"].append(wqkv.astype(jnp.bfloat16))
        layer_lists["bqkv"].append(bqkv)
        layer_lists["wo"].append(wo.astype(jnp.bfloat16))
        layer_lists["bo"].append(jnp.zeros((1, D), jnp.float32))
        layer_lists["ln2_g"].append(jnp.ones((1, D), jnp.float32))
        layer_lists["ln2_b"].append(jnp.zeros((1, D), jnp.float32))
        layer_lists["w1"].append(_xavier_uniform(ks[2], (D, M), D, M).astype(jnp.bfloat16))
        layer_lists["b1"].append(1e-6 * jax.random.normal(ks[3], (1, M), jnp.float32))
        layer_lists["w2"].append(_xavier_uniform(ks[4], (M, D), M, D).astype(jnp.bfloat16))
        layer_lists["b2"].append(1e-6 * jax.random.normal(ks[5], (1, D), jnp.float32))

    params["stacked"] = {k: jnp.stack(v, axis=0) for k, v in layer_lists.items()}
    return params


# ----------------------------------- main --------------------------------------

if __name__ == "__main__":
    # Small, (8,128)-aligned ViT-encoder-like shapes: head_dim = 128, lane-dense blocks.
    B, S, D = 4, 128, 256
    num_layers, num_heads, mlp_dim = 2, 2, 512

    root = jax.random.PRNGKey(0)
    k_x, k_p = jax.random.split(root)
    x = jax.random.normal(k_x, (B, S, D), jnp.float32)
    params = init_encoder_params(k_p, S, num_layers, num_heads, D, mlp_dim)

    # batch_block=2 -> 2 parallel batch blocks (megacore) x 2 layer-resident samples each.
    out = encoder_forward(x, params, num_heads, batch_block=2)
    out = jax.block_until_ready(out)

    assert out.shape == (B, S, D), out.shape
    assert bool(jnp.all(jnp.isfinite(out))), "non-finite values in output"
    print("KERNEL_OK")
</pallas_src>

<mosaic_0001>
module attributes {stable_mosaic.version = 11 : i64} {
  func.func @encoder_stack_kernel(%arg0: i32, %arg1: i32, %arg2: i32, %arg3: memref<2x128x256xf32, #tpu.memory_space<vmem>>, %arg4: memref<1x128x256xf32, #tpu.memory_space<vmem>>, %arg5: memref<1x1x256xf32, #tpu.memory_space<vmem>>, %arg6: memref<1x1x256xf32, #tpu.memory_space<vmem>>, %arg7: memref<1x256x768xbf16, #tpu.memory_space<vmem>>, %arg8: memref<1x1x768xf32, #tpu.memory_space<vmem>>, %arg9: memref<1x256x256xbf16, #tpu.memory_space<vmem>>, %arg10: memref<1x1x256xf32, #tpu.memory_space<vmem>>, %arg11: memref<1x1x256xf32, #tpu.memory_space<vmem>>, %arg12: memref<1x1x256xf32, #tpu.memory_space<vmem>>, %arg13: memref<1x256x512xbf16, #tpu.memory_space<vmem>>, %arg14: memref<1x1x512xf32, #tpu.memory_space<vmem>>, %arg15: memref<1x512x256xbf16, #tpu.memory_space<vmem>>, %arg16: memref<1x1x256xf32, #tpu.memory_space<vmem>>, %arg17: memref<1x256xf32, #tpu.memory_space<vmem>>, %arg18: memref<1x256xf32, #tpu.memory_space<vmem>>, %arg19: memref<2x128x256xf32, #tpu.memory_space<vmem>>, %arg20: memref<2x128x256xf32, #tpu.memory_space<vmem>>) attributes {dimension_semantics = [#tpu.dimension_semantics<parallel>, #tpu.dimension_semantics<arbitrary>, #tpu.dimension_semantics<arbitrary>], iteration_bounds = array<i64: 2, 2, 2>, scalar_prefetch = 0 : i64, scratch_operands = 1 : i64, tpu.core_type = #tpu.core_type<tc>, window_params = [{transform_indices = @transform_0, window_bounds = array<i64: 2, 128, 256>}, {pipeline_mode = #tpu.pipeline_mode<synchronous>, transform_indices = @transform_1, window_bounds = array<i64: 1, 128, 256>}, {transform_indices = @transform_2, window_bounds = array<i64: 1, 1, 256>}, {transform_indices = @transform_3, window_bounds = array<i64: 1, 1, 256>}, {transform_indices = @transform_4, window_bounds = array<i64: 1, 256, 768>}, {transform_indices = @transform_5, window_bounds = array<i64: 1, 1, 768>}, {transform_indices = @transform_6, window_bounds = array<i64: 1, 256, 256>}, {transform_indices = @transform_7, window_bounds = array<i64: 1, 1, 256>}, {transform_indices = @transform_8, window_bounds = array<i64: 1, 1, 256>}, {transform_indices = @transform_9, window_bounds = array<i64: 1, 1, 256>}, {transform_indices = @transform_10, window_bounds = array<i64: 1, 256, 512>}, {transform_indices = @transform_11, window_bounds = array<i64: 1, 1, 512>}, {transform_indices = @transform_12, window_bounds = array<i64: 1, 512, 256>}, {transform_indices = @transform_13, window_bounds = array<i64: 1, 1, 256>}, {pipeline_mode = #tpu.pipeline_mode<synchronous>, transform_indices = @transform_14, window_bounds = array<i64: 1, 256>}, {pipeline_mode = #tpu.pipeline_mode<synchronous>, transform_indices = @transform_15, window_bounds = array<i64: 1, 256>}, {transform_indices = @transform_16, window_bounds = array<i64: 2, 128, 256>}]} {
    %c0_i32 = arith.constant 0 : i32
    %0 = arith.cmpi eq, %arg1, %c0_i32 : i32
    %1 = arith.extui %0 : i1 to i32
    %c0_i32_0 = arith.constant 0 : i32
    %2 = arith.cmpi ne, %1, %c0_i32_0 : i32
    scf.if %2 {
      %141 = arith.index_cast %arg2 : i32 to index
      %c0_65 = arith.constant 0 : index
      %c0_66 = arith.constant 0 : index
      %142 = vector.load %arg3[%141, %c0_65, %c0_66] : memref<2x128x256xf32, #tpu.memory_space<vmem>>, vector<1x128x256xf32>
      %143 = vector.shape_cast %142 : vector<1x128x256xf32> to vector<128x256xf32>
      %c0_67 = arith.constant 0 : index
      %c0_68 = arith.constant 0 : index
      %c0_69 = arith.constant 0 : index
      %144 = vector.load %arg4[%c0_67, %c0_68, %c0_69] : memref<1x128x256xf32, #tpu.memory_space<vmem>>, vector<1x128x256xf32>
      %145 = vector.shape_cast %144 : vector<1x128x256xf32> to vector<128x256xf32>
      %146 = arith.addf %143, %145 : vector<128x256xf32>
      %147 = arith.index_cast %arg2 : i32 to index
      %c0_70 = arith.constant 0 : index
      %c0_71 = arith.constant 0 : index
      %148 = vector.load %arg20[%147, %c0_70, %c0_71] : memref<2x128x256xf32, #tpu.memory_space<vmem>>, vector<1x128x256xf32>
      %149 = vector.shape_cast %148 : vector<1x128x256xf32> to vector<128x256xf32>
      %150 = vector.shape_cast %146 : vector<128x256xf32> to vector<1x128x256xf32>
      tpu.vector_store %arg20[%147, %c0_70, %c0_71], %150 {strides = array<i32>} : memref<2x128x256xf32, #tpu.memory_space<vmem>>, vector<1x128x256xf32>,
    } else {
    }
    %3 = arith.index_cast %arg2 : i32 to index
    %c0 = arith.constant 0 : index
    %c0_1 = arith.constant 0 : index
    %4 = vector.load %arg20[%3, %c0, %c0_1] : memref<2x128x256xf32, #tpu.memory_space<vmem>>, vector<1x128x256xf32>
    %5 = vector.shape_cast %4 : vector<1x128x256xf32> to vector<128x256xf32>
    %c0_2 = arith.constant 0 : index
    %c0_3 = arith.constant 0 : index
    %c0_4 = arith.constant 0 : index
    %6 = vector.load %arg5[%c0_2, %c0_3, %c0_4] : memref<1x1x256xf32, #tpu.memory_space<vmem>>, vector<1x1x256xf32>
    %7 = vector.shape_cast %6 : vector<1x1x256xf32> to vector<1x256xf32>
    %c0_5 = arith.constant 0 : index
    %c0_6 = arith.constant 0 : index
    %c0_7 = arith.constant 0 : index
    %8 = vector.load %arg6[%c0_5, %c0_6, %c0_7] : memref<1x1x256xf32, #tpu.memory_space<vmem>>, vector<1x1x256xf32>
    %9 = vector.shape_cast %8 : vector<1x1x256xf32> to vector<1x256xf32>
    %cst = arith.constant dense<0.000000e+00> : vector<128xf32>
    %10 = vector.multi_reduction <add>, %5, %cst [1] : vector<128x256xf32> to vector<128xf32>
    %11 = vector.shape_cast %10 : vector<128xf32> to vector<128x1xf32>
    %cst_8 = arith.constant 2.560000e+02 : f32
    %12 = vector.broadcast %cst_8 : f32 to vector<128x1xf32>
    %13 = arith.divf %11, %12 : vector<128x1xf32>
    %14 = vector.broadcast %13 : vector<128x1xf32> to vector<128x256xf32>
    %15 = arith.subf %5, %14 : vector<128x256xf32>
    %16 = arith.mulf %15, %15 : vector<128x256xf32>
    %cst_9 = arith.constant dense<0.000000e+00> : vector<128xf32>
    %17 = vector.multi_reduction <add>, %16, %cst_9 [1] : vector<128x256xf32> to vector<128xf32>
    %18 = vector.shape_cast %17 : vector<128xf32> to vector<128x1xf32>
    %cst_10 = arith.constant 2.560000e+02 : f32
    %19 = vector.broadcast %cst_10 : f32 to vector<128x1xf32>
    %20 = arith.divf %18, %19 : vector<128x1xf32>
    %21 = vector.broadcast %13 : vector<128x1xf32> to vector<128x256xf32>
    %22 = arith.subf %5, %21 : vector<128x256xf32>
    %cst_11 = arith.constant 9.99999997E-7 : f32
    %23 = vector.broadcast %cst_11 : f32 to vector<128x1xf32>
    %24 = arith.addf %20, %23 : vector<128x1xf32>
    %25 = math.rsqrt %24 : vector<128x1xf32>
    %26 = vector.broadcast %25 : vector<128x1xf32> to vector<128x256xf32>
    %27 = arith.mulf %22, %26 : vector<128x256xf32>
    %28 = vector.broadcast %7 : vector<1x256xf32> to vector<128x256xf32>
    %29 = arith.mulf %27, %28 : vector<128x256xf32>
    %30 = vector.broadcast %9 : vector<1x256xf32> to vector<128x256xf32>
    %31 = arith.addf %29, %30 : vector<128x256xf32>
    %32 = arith.truncf %31 : vector<128x256xf32> to vector<128x256xbf16>
    %c0_12 = arith.constant 0 : index
    %c0_13 = arith.constant 0 : index
    %c0_14 = arith.constant 0 : index
    %33 = vector.load %arg7[%c0_12, %c0_13, %c0_14] : memref<1x256x768xbf16, #tpu.memory_space<vmem>>, vector<1x256x768xbf16>
    %34 = vector.shape_cast %33 : vector<1x256x768xbf16> to vector<256x768xbf16>
    %cst_15 = arith.constant dense<0.000000e+00> : vector<128x768xf32>
    %35 = tpu.matmul %32, %34, %cst_15 {dimension_numbers = #tpu.dot_dimension_numbers<[1], [0], [0], [1], [0, 0, 1, 1], [], []>} : vector<128x256xbf16>, vector<256x768xbf16>, vector<128x768xf32> -> vector<128x768xf32>
    %c0_16 = arith.constant 0 : index
    %c0_17 = arith.constant 0 : index
    %c0_18 = arith.constant 0 : index
    %36 = vector.load %arg8[%c0_16, %c0_17, %c0_18] : memref<1x1x768xf32, #tpu.memory_space<vmem>>, vector<1x1x768xf32>
    %37 = vector.shape_cast %36 : vector<1x1x768xf32> to vector<1x768xf32>
    %38 = vector.broadcast %37 : vector<1x768xf32> to vector<128x768xf32>
    %39 = arith.addf %35, %38 : vector<128x768xf32>
    %40 = arith.truncf %39 : vector<128x768xf32> to vector<128x768xbf16>
    %41 = vector.extract_strided_slice %40 {offsets = [0, 0], sizes = [128, 128], strides = [1, 1]} : vector<128x768xbf16> to vector<128x128xbf16>
    %42 = vector.extract_strided_slice %40 {offsets = [0, 256], sizes = [128, 128], strides = [1, 1]} : vector<128x768xbf16> to vector<128x128xbf16>
    %43 = vector.extract_strided_slice %40 {offsets = [0, 512], sizes = [128, 128], strides = [1, 1]} : vector<128x768xbf16> to vector<128x128xbf16>
    %cst_19 = arith.constant dense<0.000000e+00> : vector<128x128xf32>
    %44 = tpu.matmul %41, %42, %cst_19 {dimension_numbers = #tpu.dot_dimension_numbers<[1], [1], [0], [0], [0, 0, 1, 0], [], []>} : vector<128x128xbf16>, vector<128x128xbf16>, vector<128x128xf32> -> vector<128x128xf32>
    %cst_20 = arith.constant dense<0xFF800000> : vector<128xf32>
    %45 = vector.multi_reduction <maximumf>, %44, %cst_20 [1] : vector<128x128xf32> to vector<128xf32>
    %46 = vector.shape_cast %45 : vector<128xf32> to vector<128x1xf32>
    %47 = vector.broadcast %46 : vector<128x1xf32> to vector<128x128xf32>
    %48 = arith.subf %44, %47 : vector<128x128xf32>
    %49 = math.exp %48 : vector<128x128xf32>
    %cst_21 = arith.constant dense<0.000000e+00> : vector<128xf32>
    %50 = vector.multi_reduction <add>, %49, %cst_21 [1] : vector<128x128xf32> to vector<128xf32>
    %51 = vector.shape_cast %50 : vector<128xf32> to vector<128x1xf32>
    %52 = arith.truncf %49 : vector<128x128xf32> to vector<128x128xbf16>
    %cst_22 = arith.constant dense<0.000000e+00> : vector<128x128xf32>
    %53 = tpu.matmul %52, %43, %cst_22 {dimension_numbers = #tpu.dot_dimension_numbers<[1], [0], [0], [1], [0, 0, 1, 1], [], []>} : vector<128x128xbf16>, vector<128x128xbf16>, vector<128x128xf32> -> vector<128x128xf32>
    %54 = tpu.reciprocal %51 {approx = true} : vector<128x1xf32> -> vector<128x1xf32>
    %55 = vector.broadcast %54 : vector<128x1xf32> to vector<128x128xf32>
    %56 = arith.mulf %53, %55 : vector<128x128xf32>
    %57 = vector.extract_strided_slice %40 {offsets = [0, 128], sizes = [128, 128], strides = [1, 1]} : vector<128x768xbf16> to vector<128x128xbf16>
    %58 = vector.extract_strided_slice %40 {offsets = [0, 384], sizes = [128, 128], strides = [1, 1]} : vector<128x768xbf16> to vector<128x128xbf16>
    %59 = vector.extract_strided_slice %40 {offsets = [0, 640], sizes = [128, 128], strides = [1, 1]} : vector<128x768xbf16> to vector<128x128xbf16>
    %cst_23 = arith.constant dense<0.000000e+00> : vector<128x128xf32>
    %60 = tpu.matmul %57, %58, %cst_23 {dimension_numbers = #tpu.dot_dimension_numbers<[1], [1], [0], [0], [0, 0, 1, 0], [], []>} : vector<128x128xbf16>, vector<128x128xbf16>, vector<128x128xf32> -> vector<128x128xf32>
    %cst_24 = arith.constant dense<0xFF800000> : vector<128xf32>
    %61 = vector.multi_reduction <maximumf>, %60, %cst_24 [1] : vector<128x128xf32> to vector<128xf32>
    %62 = vector.shape_cast %61 : vector<128xf32> to vector<128x1xf32>
    %63 = vector.broadcast %62 : vector<128x1xf32> to vector<128x128xf32>
    %64 = arith.subf %60, %63 : vector<128x128xf32>
    %65 = math.exp %64 : vector<128x128xf32>
    %cst_25 = arith.constant dense<0.000000e+00> : vector<128xf32>
    %66 = vector.multi_reduction <add>, %65, %cst_25 [1] : vector<128x128xf32> to vector<128xf32>
    %67 = vector.shape_cast %66 : vector<128xf32> to vector<128x1xf32>
    %68 = arith.truncf %65 : vector<128x128xf32> to vector<128x128xbf16>
    %cst_26 = arith.constant dense<0.000000e+00> : vector<128x128xf32>
    %69 = tpu.matmul %68, %59, %cst_26 {dimension_numbers = #tpu.dot_dimension_numbers<[1], [0], [0], [1], [0, 0, 1, 1], [], []>} : vector<128x128xbf16>, vector<128x128xbf16>, vector<128x128xf32> -> vector<128x128xf32>
    %70 = tpu.reciprocal %67 {approx = true} : vector<128x1xf32> -> vector<128x1xf32>
    %71 = vector.broadcast %70 : vector<128x1xf32> to vector<128x128xf32>
    %72 = arith.mulf %69, %71 : vector<128x128xf32>
    %73 = tpu.concatenate %56, %72 in 1 : vector<128x128xf32>, vector<128x128xf32> -> vector<128x256xf32>
    %74 = arith.truncf %73 : vector<128x256xf32> to vector<128x256xbf16>
    %c0_27 = arith.constant 0 : index
    %c0_28 = arith.constant 0 : index
    %c0_29 = arith.constant 0 : index
    %75 = vector.load %arg9[%c0_27, %c0_28, %c0_29] : memref<1x256x256xbf16, #tpu.memory_space<vmem>>, vector<1x256x256xbf16>
    %76 = vector.shape_cast %75 : vector<1x256x256xbf16> to vector<256x256xbf16>
    %cst_30 = arith.constant dense<0.000000e+00> : vector<128x256xf32>
    %77 = tpu.matmul %74, %76, %cst_30 {dimension_numbers = #tpu.dot_dimension_numbers<[1], [0], [0], [1], [0, 0, 1, 1], [], []>} : vector<128x256xbf16>, vector<256x256xbf16>, vector<128x256xf32> -> vector<128x256xf32>
    %c0_31 = arith.constant 0 : index
    %c0_32 = arith.constant 0 : index
    %c0_33 = arith.constant 0 : index
    %78 = vector.load %arg10[%c0_31, %c0_32, %c0_33] : memref<1x1x256xf32, #tpu.memory_space<vmem>>, vector<1x1x256xf32>
    %79 = vector.shape_cast %78 : vector<1x1x256xf32> to vector<1x256xf32>
    %80 = vector.broadcast %79 : vector<1x256xf32> to vector<128x256xf32>
    %81 = arith.addf %77, %80 : vector<128x256xf32>
    %82 = arith.addf %5, %81 : vector<128x256xf32>
    %c0_34 = arith.constant 0 : index
    %c0_35 = arith.constant 0 : index
    %c0_36 = arith.constant 0 : index
    %83 = vector.load %arg11[%c0_34, %c0_35, %c0_36] : memref<1x1x256xf32, #tpu.memory_space<vmem>>, vector<1x1x256xf32>
    %84 = vector.shape_cast %83 : vector<1x1x256xf32> to vector<1x256xf32>
    %c0_37 = arith.constant 0 : index
    %c0_38 = arith.constant 0 : index
    %c0_39 = arith.constant 0 : index
    %85 = vector.load %arg12[%c0_37, %c0_38, %c0_39] : memref<1x1x256xf32, #tpu.memory_space<vmem>>, vector<1x1x256xf32>
    %86 = vector.shape_cast %85 : vector<1x1x256xf32> to vector<1x256xf32>
    %cst_40 = arith.constant dense<0.000000e+00> : vector<128xf32>
    %87 = vector.multi_reduction <add>, %82, %cst_40 [1] : vector<128x256xf32> to vector<128xf32>
    %88 = vector.shape_cast %87 : vector<128xf32> to vector<128x1xf32>
    %cst_41 = arith.constant 2.560000e+02 : f32
    %89 = vector.broadcast %cst_41 : f32 to vector<128x1xf32>
    %90 = arith.divf %88, %89 : vector<128x1xf32>
    %91 = vector.broadcast %90 : vector<128x1xf32> to vector<128x256xf32>
    %92 = arith.subf %82, %91 : vector<128x256xf32>
    %93 = arith.mulf %92, %92 : vector<128x256xf32>
    %cst_42 = arith.constant dense<0.000000e+00> : vector<128xf32>
    %94 = vector.multi_reduction <add>, %93, %cst_42 [1] : vector<128x256xf32> to vector<128xf32>
    %95 = vector.shape_cast %94 : vector<128xf32> to vector<128x1xf32>
    %cst_43 = arith.constant 2.560000e+02 : f32
    %96 = vector.broadcast %cst_43 : f32 to vector<128x1xf32>
    %97 = arith.divf %95, %96 : vector<128x1xf32>
    %98 = vector.broadcast %90 : vector<128x1xf32> to vector<128x256xf32>
    %99 = arith.subf %82, %98 : vector<128x256xf32>
    %cst_44 = arith.constant 9.99999997E-7 : f32
    %100 = vector.broadcast %cst_44 : f32 to vector<128x1xf32>
    %101 = arith.addf %97, %100 : vector<128x1xf32>
    %102 = math.rsqrt %101 : vector<128x1xf32>
    %103 = vector.broadcast %102 : vector<128x1xf32> to vector<128x256xf32>
    %104 = arith.mulf %99, %103 : vector<128x256xf32>
    %105 = vector.broadcast %84 : vector<1x256xf32> to vector<128x256xf32>
    %106 = arith.mulf %104, %105 : vector<128x256xf32>
    %107 = vector.broadcast %86 : vector<1x256xf32> to vector<128x256xf32>
    %108 = arith.addf %106, %107 : vector<128x256xf32>
    %109 = arith.truncf %108 : vector<128x256xf32> to vector<128x256xbf16>
    %c0_45 = arith.constant 0 : index
    %c0_46 = arith.constant 0 : index
    %c0_47 = arith.constant 0 : index
    %110 = vector.load %arg13[%c0_45, %c0_46, %c0_47] : memref<1x256x512xbf16, #tpu.memory_space<vmem>>, vector<1x256x512xbf16>
    %111 = vector.shape_cast %110 : vector<1x256x512xbf16> to vector<256x512xbf16>
    %cst_48 = arith.constant dense<0.000000e+00> : vector<128x512xf32>
    %112 = tpu.matmul %109, %111, %cst_48 {dimension_numbers = #tpu.dot_dimension_numbers<[1], [0], [0], [1], [0, 0, 1, 1], [], []>} : vector<128x256xbf16>, vector<256x512xbf16>, vector<128x512xf32> -> vector<128x512xf32>
    %c0_49 = arith.constant 0 : index
    %c0_50 = arith.constant 0 : index
    %c0_51 = arith.constant 0 : index
    %113 = vector.load %arg14[%c0_49, %c0_50, %c0_51] : memref<1x1x512xf32, #tpu.memory_space<vmem>>, vector<1x1x512xf32>
    %114 = vector.shape_cast %113 : vector<1x1x512xf32> to vector<1x512xf32>
    %115 = vector.broadcast %114 : vector<1x512xf32> to vector<128x512xf32>
    %116 = arith.addf %112, %115 : vector<128x512xf32>
    %cst_52 = arith.constant 5.000000e-01 : f32
    %117 = vector.broadcast %cst_52 : f32 to vector<128x512xf32>
    %118 = arith.mulf %117, %116 : vector<128x512xf32>
    %cst_53 = arith.constant 0.707106769 : f32
    %119 = vector.broadcast %cst_53 : f32 to vector<128x512xf32>
    %120 = arith.mulf %116, %119 : vector<128x512xf32>
    %121 = math.erf %120 : vector<128x512xf32>
    %cst_54 = arith.constant 1.000000e+00 : f32
    %122 = vector.broadcast %cst_54 : f32 to vector<128x512xf32>
    %123 = arith.addf %122, %121 : vector<128x512xf32>
    %124 = arith.mulf %118, %123 : vector<128x512xf32>
    %125 = arith.truncf %124 : vector<128x512xf32> to vector<128x512xbf16>
    %c0_55 = arith.constant 0 : index
    %c0_56 = arith.constant 0 : index
    %c0_57 = arith.constant 0 : index
    %126 = vector.load %arg15[%c0_55, %c0_56, %c0_57] : memref<1x512x256xbf16, #tpu.memory_space<vmem>>, vector<1x512x256xbf16>
    %127 = vector.shape_cast %126 : vector<1x512x256xbf16> to vector<512x256xbf16>
    %cst_58 = arith.constant dense<0.000000e+00> : vector<128x256xf32>
    %128 = tpu.matmul %125, %127, %cst_58 {dimension_numbers = #tpu.dot_dimension_numbers<[1], [0], [0], [1], [0, 0, 1, 1], [], []>} : vector<128x512xbf16>, vector<512x256xbf16>, vector<128x256xf32> -> vector<128x256xf32>
    %c0_59 = arith.constant 0 : index
    %c0_60 = arith.constant 0 : index
    %c0_61 = arith.constant 0 : index
    %129 = vector.load %arg16[%c0_59, %c0_60, %c0_61] : memref<1x1x256xf32, #tpu.memory_space<vmem>>, vector<1x1x256xf32>
    %130 = vector.shape_cast %129 : vector<1x1x256xf32> to vector<1x256xf32>
    %131 = vector.broadcast %130 : vector<1x256xf32> to vector<128x256xf32>
    %132 = arith.addf %128, %131 : vector<128x256xf32>
    %133 = arith.addf %82, %132 : vector<128x256xf32>
    %134 = arith.index_cast %arg2 : i32 to index
    %c0_62 = arith.constant 0 : index
    %c0_63 = arith.constant 0 : index
    %135 = vector.load %arg20[%134, %c0_62, %c0_63] : memref<2x128x256xf32, #tpu.memory_space<vmem>>, vector<1x128x256xf32>
    %136 = vector.shape_cast %135 : vector<1x128x256xf32> to vector<128x256xf32>
    %137 = vector.shape_cast %133 : vector<128x256xf32> to vector<1x128x256xf32>
    tpu.vector_store %arg20[%134, %c0_62, %c0_63], %137 {strides = array<i32>} : memref<2x128x256xf32, #tpu.memory_space<vmem>>, vector<1x128x256xf32>,
    %c1_i32 = arith.constant 1 : i32
    %138 = arith.cmpi eq, %arg1, %c1_i32 : i32
    %139 = arith.extui %138 : i1 to i32
    %c0_i32_64 = arith.constant 0 : i32
    %140 = arith.cmpi ne, %139, %c0_i32_64 : i32
    scf.if %140 {
      %c0_65 = arith.constant 0 : index
      %c0_66 = arith.constant 0 : index
      %141 = vector.load %arg17[%c0_65, %c0_66] : memref<1x256xf32, #tpu.memory_space<vmem>>, vector<1x256xf32>
      %c0_67 = arith.constant 0 : index
      %c0_68 = arith.constant 0 : index
      %142 = vector.load %arg18[%c0_67, %c0_68] : memref<1x256xf32, #tpu.memory_space<vmem>>, vector<1x256xf32>
      %cst_69 = arith.constant dense<0.000000e+00> : vector<128xf32>
      %143 = vector.multi_reduction <add>, %133, %cst_69 [1] : vector<128x256xf32> to vector<128xf32>
      %144 = vector.shape_cast %143 : vector<128xf32> to vector<128x1xf32>
      %cst_70 = arith.constant 2.560000e+02 : f32
      %145 = vector.broadcast %cst_70 : f32 to vector<128x1xf32>
      %146 = arith.divf %144, %145 : vector<128x1xf32>
      %147 = vector.broadcast %146 : vector<128x1xf32> to vector<128x256xf32>
      %148 = arith.subf %133, %147 : vector<128x256xf32>
      %149 = arith.mulf %148, %148 : vector<128x256xf32>
      %cst_71 = arith.constant dense<0.000000e+00> : vector<128xf32>
      %150 = vector.multi_reduction <add>, %149, %cst_71 [1] : vector<128x256xf32> to vector<128xf32>
      %151 = vector.shape_cast %150 : vector<128xf32> to vector<128x1xf32>
      %cst_72 = arith.constant 2.560000e+02 : f32
      %152 = vector.broadcast %cst_72 : f32 to vector<128x1xf32>
      %153 = arith.divf %151, %152 : vector<128x1xf32>
      %154 = vector.broadcast %146 : vector<128x1xf32> to vector<128x256xf32>
      %155 = arith.subf %133, %154 : vector<128x256xf32>
      %cst_73 = arith.constant 9.99999997E-7 : f32
      %156 = vector.broadcast %cst_73 : f32 to vector<128x1xf32>
      %157 = arith.addf %153, %156 : vector<128x1xf32>
      %158 = math.rsqrt %157 : vector<128x1xf32>
      %159 = vector.broadcast %158 : vector<128x1xf32> to vector<128x256xf32>
      %160 = arith.mulf %155, %159 : vector<128x256xf32>
      %161 = vector.broadcast %141 : vector<1x256xf32> to vector<128x256xf32>
      %162 = arith.mulf %160, %161 : vector<128x256xf32>
      %163 = vector.broadcast %142 : vector<1x256xf32> to vector<128x256xf32>
      %164 = arith.addf %162, %163 : vector<128x256xf32>
      %165 = arith.index_cast %arg2 : i32 to index
      %c0_74 = arith.constant 0 : index
      %c0_75 = arith.constant 0 : index
      %166 = vector.load %arg19[%165, %c0_74, %c0_75] : memref<2x128x256xf32, #tpu.memory_space<vmem>>, vector<1x128x256xf32>
      %167 = vector.shape_cast %166 : vector<1x128x256xf32> to vector<128x256xf32>
      %168 = vector.shape_cast %164 : vector<128x256xf32> to vector<1x128x256xf32>
      tpu.vector_store %arg19[%165, %c0_74, %c0_75], %168 {strides = array<i32>} : memref<2x128x256xf32, #tpu.memory_space<vmem>>, vector<1x128x256xf32>,
    } else {
    }
    return
  }
  func.func @transform_0(%arg0: i32, %arg1: i32, %arg2: i32) -> (i32, i32, i32) {
    %c0_i32 = arith.constant 0 : i32
    %c0_i32_0 = arith.constant 0 : i32
    %c0_i32_1 = arith.constant 0 : i32
    return %arg0, %c0_i32, %c0_i32_0 : i32, i32, i32
  }
  func.func @transform_1(%arg0: i32, %arg1: i32, %arg2: i32) -> (i32, i32, i32) {
    %c0_i32 = arith.constant 0 : i32
    %c0_i32_0 = arith.constant 0 : i32
    %c0_i32_1 = arith.constant 0 : i32
    %c0_i32_2 = arith.constant 0 : i32
    return %c0_i32, %c0_i32_0, %c0_i32_1 : i32, i32, i32
  }
  func.func @transform_2(%arg0: i32, %arg1: i32, %arg2: i32) -> (i32, i32, i32) {
    %c0_i32 = arith.constant 0 : i32
    %c0_i32_0 = arith.constant 0 : i32
    %c0_i32_1 = arith.constant 0 : i32
    return %arg1, %c0_i32, %c0_i32_0 : i32, i32, i32
  }
  func.func @transform_3(%arg0: i32, %arg1: i32, %arg2: i32) -> (i32, i32, i32) {
    %c0_i32 = arith.constant 0 : i32
    %c0_i32_0 = arith.constant 0 : i32
    %c0_i32_1 = arith.constant 0 : i32
    return %arg1, %c0_i32, %c0_i32_0 : i32, i32, i32
  }
  func.func @transform_4(%arg0: i32, %arg1: i32, %arg2: i32) -> (i32, i32, i32) {
    %c0_i32 = arith.constant 0 : i32
    %c0_i32_0 = arith.constant 0 : i32
    %c0_i32_1 = arith.constant 0 : i32
    return %arg1, %c0_i32, %c0_i32_0 : i32, i32, i32
  }
  func.func @transform_5(%arg0: i32, %arg1: i32, %arg2: i32) -> (i32, i32, i32) {
    %c0_i32 = arith.constant 0 : i32
    %c0_i32_0 = arith.constant 0 : i32
    %c0_i32_1 = arith.constant 0 : i32
    return %arg1, %c0_i32, %c0_i32_0 : i32, i32, i32
  }
  func.func @transform_6(%arg0: i32, %arg1: i32, %arg2: i32) -> (i32, i32, i32) {
    %c0_i32 = arith.constant 0 : i32
    %c0_i32_0 = arith.constant 0 : i32
    %c0_i32_1 = arith.constant 0 : i32
    return %arg1, %c0_i32, %c0_i32_0 : i32, i32, i32
  }
  func.func @transform_7(%arg0: i32, %arg1: i32, %arg2: i32) -> (i32, i32, i32) {
    %c0_i32 = arith.constant 0 : i32
    %c0_i32_0 = arith.constant 0 : i32
    %c0_i32_1 = arith.constant 0 : i32
    return %arg1, %c0_i32, %c0_i32_0 : i32, i32, i32
  }
  func.func @transform_8(%arg0: i32, %arg1: i32, %arg2: i32) -> (i32, i32, i32) {
    %c0_i32 = arith.constant 0 : i32
    %c0_i32_0 = arith.constant 0 : i32
    %c0_i32_1 = arith.constant 0 : i32
    return %arg1, %c0_i32, %c0_i32_0 : i32, i32, i32
  }
  func.func @transform_9(%arg0: i32, %arg1: i32, %arg2: i32) -> (i32, i32, i32) {
    %c0_i32 = arith.constant 0 : i32
    %c0_i32_0 = arith.constant 0 : i32
    %c0_i32_1 = arith.constant 0 : i32
    return %arg1, %c0_i32, %c0_i32_0 : i32, i32, i32
  }
  func.func @transform_10(%arg0: i32, %arg1: i32, %arg2: i32) -> (i32, i32, i32) {
    %c0_i32 = arith.constant 0 : i32
    %c0_i32_0 = arith.constant 0 : i32
    %c0_i32_1 = arith.constant 0 : i32
    return %arg1, %c0_i32, %c0_i32_0 : i32, i32, i32
  }
  func.func @transform_11(%arg0: i32, %arg1: i32, %arg2: i32) -> (i32, i32, i32) {
    %c0_i32 = arith.constant 0 : i32
    %c0_i32_0 = arith.constant 0 : i32
    %c0_i32_1 = arith.constant 0 : i32
    return %arg1, %c0_i32, %c0_i32_0 : i32, i32, i32
  }
  func.func @transform_12(%arg0: i32, %arg1: i32, %arg2: i32) -> (i32, i32, i32) {
    %c0_i32 = arith.constant 0 : i32
    %c0_i32_0 = arith.constant 0 : i32
    %c0_i32_1 = arith.constant 0 : i32
    return %arg1, %c0_i32, %c0_i32_0 : i32, i32, i32
  }
  func.func @transform_13(%arg0: i32, %arg1: i32, %arg2: i32) -> (i32, i32, i32) {
    %c0_i32 = arith.constant 0 : i32
    %c0_i32_0 = arith.constant 0 : i32
    %c0_i32_1 = arith.constant 0 : i32
    return %arg1, %c0_i32, %c0_i32_0 : i32, i32, i32
  }
  func.func @transform_14(%arg0: i32, %arg1: i32, %arg2: i32) -> (i32, i32) {
    %c0_i32 = arith.constant 0 : i32
    %c0_i32_0 = arith.constant 0 : i32
    %c0_i32_1 = arith.constant 0 : i32
    return %c0_i32, %c0_i32_0 : i32, i32
  }
  func.func @transform_15(%arg0: i32, %arg1: i32, %arg2: i32) -> (i32, i32) {
    %c0_i32 = arith.constant 0 : i32
    %c0_i32_0 = arith.constant 0 : i32
    %c0_i32_1 = arith.constant 0 : i32
    return %c0_i32, %c0_i32_0 : i32, i32
  }
  func.func @transform_16(%arg0: i32, %arg1: i32, %arg2: i32) -> (i32, i32, i32) {
    %c0_i32 = arith.constant 0 : i32
    %c0_i32_0 = arith.constant 0 : i32
    %c0_i32_1 = arith.constant 0 : i32
    return %arg0, %c0_i32, %c0_i32_0 : i32, i32, i32
  }
}

</mosaic_0001>

<bundles_post_ra>
// kernel: tpu_custom_call.1
= control target key start
LH: loop header
LB: loop body
LE: loop exit
PB: predicated region body
PF: predicated region fallthrough
CT: control target
= control target key end

     0   :  { %s11547_s0 = inlined_call_operand.hbm [shape: f32[4,128,256], index: 0, kind: input, shape index: {}]   ;;  %s11548_s1 = inlined_call_operand.hbm [shape: f32[1,128,256], index: 1, kind: input, shape index: {}]   ;;  %s11549_s2 = inlined_call_operand.hbm [shape: f32[2,1,256], index: 2, kind: input, shape index: {}]   ;;  %s11550_s3 = inlined_call_operand.hbm [shape: f32[2,1,256], index: 3, kind: input, shape index: {}]   ;;  %s11551_s4 = inlined_call_operand.hbm [shape: bf16[2,256,768], index: 4, kind: input, shape index: {}]   ;;  %s11552_s5 = inlined_call_operand.vmem [shape: f32[2,1,768], index: 5, kind: input, shape index: {}]   ;;  %s11553_s6 = inlined_call_operand.hbm [shape: bf16[2,256,256], index: 6, kind: input, shape index: {}]   ;;  %s11554_s7 = inlined_call_operand.vmem [shape: f32[2,1,256], index: 7, kind: input, shape index: {}]   ;;  %s11555_s8 = inlined_call_operand.vmem [shape: f32[2,1,256], index: 8, kind: input, shape index: {}]   ;;  %s11556_s9 = inlined_call_operand.vmem [shape: f32[2,1,256], index: 9, kind: input, shape index: {}]   ;;  %s11557_s10 = inlined_call_operand.hbm [shape: bf16[2,256,512], index: 10, kind: input, shape index: {}]   ;;  %s11558_s11 = inlined_call_operand.vmem [shape: f32[2,1,512], index: 11, kind: input, shape index: {}]   ;;  %s11559_s12 = inlined_call_operand.hbm [shape: bf16[2,512,256], index: 12, kind: input, shape index: {}]   ;;  %s11560_s13 = inlined_call_operand.vmem [shape: f32[2,1,256], index: 13, kind: input, shape index: {}]   ;;  %s11561_s14 = inlined_call_operand.vmem [shape: f32[1,256], index: 14, kind: input, shape index: {}]   ;;  %s11562_s15 = inlined_call_operand.vmem [shape: f32[1,256], index: 15, kind: input, shape index: {}]   ;;  %s11563_s16 = inlined_call_operand.hbm [shape: f32[4,128,256], index: 16, kind: output, shape index: {}]  }
   0x1   :  { %11650 = sst [smem:[#allocation87_spill]] %s11547_s0 }
   0x2   :  { %11651 = sst [smem:[#allocation88_spill]] %s11548_s1 }
   0x3   :  { %11652 = sst [smem:[#allocation89_spill]] %s11549_s2 }
   0x4   :  { %11653 = sst [smem:[#allocation90_spill]] %s11550_s3 }
   0x5   :  { %11654 = sst [smem:[#allocation91_spill]] %s11551_s4 }
   0x6   :  { %11655 = sst [smem:[#allocation92_spill]] %s11552_s5 }
   0x7   :  { %11656 = sst [smem:[#allocation93_spill]] %s11553_s6 }
   0x8   :  { %11657 = sst [smem:[#allocation94_spill]] %s11554_s7 }
   0x9   :  { %11658 = sst [smem:[#allocation95_spill]] %s11555_s8 }
   0xa   :  { %11659 = sst [smem:[#allocation96_spill]] %s11556_s9 }
   0xb   :  { %11660 = sst [smem:[#allocation97_spill]] %s11557_s10 }
   0xc   :  { %11661 = sst [smem:[#allocation98_spill]] %s11558_s11 }
   0xd   :  { %11662 = sst [smem:[#allocation99_spill]] %s11559_s12 }
   0xe   :  { %11663 = sst [smem:[#allocation100_spill]] %s11560_s13 }
   0xf   :  { %11664 = sst [smem:[#allocation101_spill]] %s11561_s14 }
  0x10   :  { %11665 = sst [smem:[#allocation102_spill]] %s11562_s15 }
  0x11   :  { %11666 = sst [smem:[#allocation103_spill]] %s11563_s16 }
  0x12   :  { %21 = vsyncpa [#allocation4], 0 }
  0x13   :  { %23 = vsyncpa [#allocation4 + $0x1], 0 }
  0x14   :  { %24 = vsyncpa [#allocation7], 0 }
  0x15   :  { %25 = vsyncpa [#allocation5], 0 }
  0x16   :  { %27 = vsyncpa [#allocation5 + $0x1], 0  ;;  %s8215_s21 = smov 0   ;;  %s8217_s22 = smov 0  }
  0x17   :  { %s8219_s23 = smov 0   ;;  %s8221_s24 = smov 0  }
  0x18   :  { %s8223_s25 = smov 0   ;;  %s8225_s26 = smov 0  }
  0x19   :  { %s8227_s27 = smov 0   ;;  %s8229_s28 = smov 0  }
  0x1a   :  { %s8231_s29 = smov 0   ;;  %s8233_s30 = smov 0  }
  0x1b   :  { %s8235_s0 = smov 0   ;;  %s8237_s17 = smov 0  }
  0x1c   :  { %s8239_s18 = smov 0  }
  0x1d LB: > { %11667 = sst [smem:[#allocation19_spill]] %s8067_s22  ;;  %s45_s19 = sadd.s32 1, %s8099_s30  ;;  %s8111_s18 = sphi %s8239_s18, %s33_s18   ;;  %s8107_s17 = sphi %s8237_s17, %s11866_s17   ;;  %s8103_s0 = sphi %s8235_s0, %s11865_s0   ;;  %s8099_s30 = sphi %s8233_s30, %s11868_s30   ;;  %s8095_s29 = sphi %s8231_s29, %s11863_s29   ;;  %s8091_s28 = sphi %s8229_s28, %s11862_s28   ;;  %s8087_s27 = sphi %s8227_s27, %s11861_s27   ;;  %s8083_s26 = sphi %s8225_s26, %s11860_s26   ;;  %s8079_s25 = sphi %s8223_s25, %s11859_s25   ;;  %s8075_s24 = sphi %s8221_s24, %s11858_s24   ;;  %s8071_s23 = sphi %s8219_s23, %s11857_s23   ;;  %s8067_s22 = sphi %s8217_s22, %s11856_s22   ;;  %s8063_s21 = sphi %s8215_s21, %s11855_s21  }
  0x1e   : > { %11668 = sst [smem:[#allocation20_spill]] %s8071_s23  ;;  %s48_s20 = sadd.s32 1, %s8103_s0 }
  0x1f   : > { %11669 = sst [smem:[#allocation21_spill]] %s8075_s24  ;;  %p46_p0 = scmp.ge.s32.totalorder %s45_s19, 2 }
  0x20   : > { %11670 = sst [smem:[#allocation22_spill]] %s8079_s25  ;;  %s52_s16 = sadd.s32 1, %s8107_s17 }
  0x21   : > { %11671 = sst [smem:[#allocation23_spill]] %s8083_s26  ;;  %p11570_p1 = scmp.ne.s32.totalorder %s8083_s26, %s8079_s25 }
  0x22   : > { %11672 = sst [smem:[#allocation24_spill]] %s8087_s27  ;;  %s11870_s19 = smov (%p46_p0, %s45_s19), 0 }
  0x23   : > { %11673 = sst [smem:[#allocation25_spill]] %s8091_s28  ;;  %s11872_s20 = smov (!%p46_p0, %s48_s20), %s8103_s0 }
  0x24   : > { %11674 = sst [smem:[#allocation26_spill]] %s8095_s29  ;;  %s59_s29 = sadd.s32 1, %s8083_s26 }
  0x25   : > { %11675 = sst [smem:[#allocation27_spill]] %s8099_s30  ;;  %p67_p2 = scmp.eq.s32.totalorder %s8111_s18, 0 }
  0x26   : > { %11676 = sst [smem:[#allocation28_spill]] %s8103_s0  ;;  %p50_p3 = scmp.ge.s32.totalorder %s11872_s20, 2 }
  0x27   : > { %11677 = sst [smem:[#allocation29_spill]] %s8107_s17  ;;  %p8295_p4 = por %p67_p2, %p11570_p1 }
  0x28   : > { %11678 = sst [smem:[#allocation30_spill]] %s8111_s18  ;;  %s11874_s20 = smov (%p50_p3, %s11872_s20), 0 }
  0x29   : > { %11679 = sst [smem:[#allocation31_spill]] %s11870_s19  ;;  %s11876_s16 = smov (!%p50_p3, %s52_s16), %s8107_s17 }
  0x2a   : > { %11681 = sst [smem:[#allocation32_spill]] %s11874_s20  ;;  %p11571_p5 = scmp.lt.s32.totalorder %s8111_s18, 8 }
  0x2b   : > { %s516_s30 = sand.u32 1, %s8111_s18   ;;  %p54_p6 = scmp.ge.s32.totalorder %s11876_s16, 2 }
  0x2c   : > { %s518_s14 = sand.u32 1, %s8083_s26   ;;  %s6520_s19 = sshll.u32 %s8107_s17, 13 }
  0x2d   : > { %s11878_s16 = smov (%p54_p6, %s11876_s16), 0  ;;  %s6215_s27 = sshll.u32 %s518_s14, 9 }
  0x2e   : > { %11682 = sst [smem:[#allocation33_spill]] %s11878_s16  ;;  %s11683_s9 = sld [smem:[#allocation87_spill]] }
  0x2f   : > { %s56_s8 = ssub.s32 %s8107_s17, %s11878_s16  ;;  %s520_s7 = scalar_lea.vmem [#allocation3], %s6215_s27 }
  0x30   : > { %p57_p7 = scmp.eq.s32.totalorder %s56_s8, 0  ;;  %s528_s28 = sshll.u32 %s520_s7, 4  ;;  %s8315_s28 = int_to_ptr.vmem [resolvable:$true] %s528_s28 }
  0x31   : > { %p8321_p8 = pnand %p11571_p5, %p8295_p4  ;;  %s8328_s13 = scalar_lea.sflag [#allocation4], %s516_s30 }
  0x32   : > { %s8326_s11 = scalar_select %p57_p7, %s8083_s26, %s59_s29  }
  0x33   : > { %p7729_p10 = pneg %p8321_p8 }
  0x34   : > { %s8311_s5 = scalar_lea.hbm %s11683_s9, %s6520_s19  ;;  %11685 = sst [smem:[#allocation34_spill]] %s8326_s11 }
  0x35   : > { %s7727_s14 = scalar_lea.hbm %s8311_s5, 8192  ;;  %s7732_s15 = scalar_lea.hbm %s11683_s9, 16384 }
  0x36   : > { %p7728_p9 = scmp.ne.s32.totalorder %s8311_s5, %s7727_s14  ;;  %p7733_p13 = scmp.lt.u32.totalorder %s8311_s5, %s11683_s9 }
  0x37   : > { %p7734_p0 = scmp.lt.u32.totalorder %s7732_s15, %s7727_s14  ;;  %p7736_p4 = scmp.lt.u32.totalorder %s7727_s14, %s8311_s5 }
  0x38   : > { %p7730_p11 = pnand %p7729_p10, %p7728_p9 }
  0x39   : > { %p7735_p3 = por %p7734_p0, %p7733_p13 }
  0x3a   : > { %p7731_p12 = pneg %p7730_p11 }
  0x3b   : > { %p7737_p6 = por %p7736_p4, %p7735_p3 }
  0x3d   : > { %p7738_p7 = pnand %p7737_p6, %p7731_p12 }
  0x3f   : > { %7741 = shalt.err (!%p7738_p7)
}
  0x40   : > { %s7742_s29 = scalar_lea.vmem %s8315_s28, 8192  ;;  %s8113_s30 = smov [#allocation3]  }
  0x41   : > { %p7743_p9 = scmp.ne.s32.totalorder %s8315_s28, %s7742_s29  ;;  %s7747_s7 = sshll.u32 %s8113_s30, 4  ;;  %s7748_s7 = int_to_ptr.vmem [resolvable:$false] %s7747_s7 }
  0x42   : > { %s7749_s8 = scalar_lea.vmem %s7748_s7, 16384  ;;  %p7750_p5 = scmp.lt.s32.totalorder %s8315_s28, %s7748_s7 }
  0x43   : > { %p7745_p11 = pnand %p7743_p9, %p7729_p10  ;;  %p7751_p13 = scmp.lt.s32.totalorder %s7749_s8, %s7742_s29 }
  0x45   : > { %p7746_p1 = pneg %p7745_p11  ;;  %p7752_p0 = por %p7751_p13, %p7750_p5 }
  0x47   : > { %p7753_p3 = pnand %p7752_p0, %p7746_p1 }
  0x49   : > { %7756 = shalt.err (!%p7753_p3)
}
  0x4a   : > { %s11574_s14 = smov 256   ;;  %s11576_s15 = smov 16  }
  0x4b   : > { %6819 = dma.hbm_to_vmem [thread:$0]  (!%p8321_p8), %s8311_s5, 8192, %s8315_s28, %s8328_s13, %s11574_s14, %s11574_s14, %s11576_s15  }
  0x4c   : > { %s103_s27 = ssub.s32 %s8103_s0, %s11874_s20  ;;  %s106_s19 = sadd.s32 1, %s8071_s23 }
  0x4d   : > { %p104_p1 = scmp.eq.s32.totalorder %s103_s27, 0  ;;  %p113_p5 = scmp.ne.s32.totalorder %s8071_s23, %s8067_s22 }
  0x4e   : > { %s8365_s29 = sand.u32 1, %s8071_s23   ;;  %s6521_s8 = sshll.u32 %s8103_s0, 5 }
  0x4f   : > { %s8368_s30 = scalar_select %p104_p1, %s8071_s23, %s106_s19  }
  0x50   : > { %p115_p10 = por %p113_p5, %p67_p2  ;;  %s6219_s7 = sshll.u32 %s8365_s29, 1 }
  0x51   : > { %11686 = sst [smem:[#allocation35_spill]] %s8368_s30  ;;  %s11687_s2 = sld [smem:[#allocation89_spill]] }
  0x52   : > { %s542_s5 = scalar_lea.vmem [#allocation8], %s6219_s7  ;;  %p11688_p8 = scmp.lt.s32.totalorder %s8111_s18, 8 }
  0x53   : > { %s550_s28 = sshll.u32 %s542_s5, 4  ;;  %s11690_s3 = sld [smem:[#allocation90_spill]]  ;;  %s8379_s28 = int_to_ptr.vmem [resolvable:$true] %s550_s28 }
  0x54   : > { %p8383_p12 = pnand %p11688_p8, %p115_p10  ;;  %s8392_s16 = scalar_lea.vmem [#allocation9], %s6219_s7 }
  0x56   : > { %s11689_s27 = scalar_select %p8383_p12, 1, 0 }
  0x57   : > { %s8377_s1 = scalar_lea.hbm %s11687_s2, %s6521_s8  ;;  %p8399_p4 = pneg %p8383_p12 }
  0x58   : > { %s7757_s20 = scalar_lea.hbm %s8377_s1, 32  ;;  %p7763_p9 = scmp.lt.u32.totalorder %s8377_s1, %s11687_s2 }
  0x59   : > { %s8390_s9 = scalar_lea.hbm %s11690_s3, %s6521_s8  ;;  %p7758_p2 = scmp.ne.s32.totalorder %s8377_s1, %s7757_s20 }
  0x5a   : > { %s7762_s8 = scalar_lea.hbm %s11687_s2, 64  ;;  %p7766_p0 = scmp.lt.u32.totalorder %s7757_s20, %s8377_s1 }
  0x5b   : > { %p7760_p6 = pnand %p8399_p4, %p7758_p2  ;;  %p7764_p11 = scmp.lt.u32.totalorder %s7762_s8, %s7757_s20 }
  0x5d   : > { %p7761_p7 = pneg %p7760_p6  ;;  %p7765_p13 = por %p7764_p11, %p7763_p9 }
  0x5f   : > { %p7767_p3 = por %p7766_p0, %p7765_p13 }
  0x61   : > { %p7768_p1 = pnand %p7767_p3, %p7761_p7 }
  0x63   : > { %7771 = shalt.err (!%p7768_p1)
}
  0x64   : > { %s7772_s15 = scalar_lea.vmem %s8379_s28, 32  ;;  %s8116_s17 = smov [#allocation8]  }
  0x65   : > { %p7773_p5 = scmp.ne.s32.totalorder %s8379_s28, %s7772_s15  ;;  %s7777_s14 = sshll.u32 %s8116_s17, 4  ;;  %s7778_s14 = int_to_ptr.vmem [resolvable:$false] %s7777_s14 }
  0x66   : > { %s7779_s19 = scalar_lea.vmem %s7778_s14, 64  ;;  %p7780_p2 = scmp.lt.s32.totalorder %s8379_s28, %s7778_s14 }
  0x67   : > { %p7775_p10 = pnand %p7773_p5, %p8399_p4  ;;  %p7781_p6 = scmp.lt.s32.totalorder %s7779_s19, %s7772_s15 }
  0x69   : > { %p7776_p8 = pneg %p7775_p10  ;;  %p7782_p9 = por %p7781_p6, %p7780_p2 }
  0x6b   : > { %p7783_p11 = pnand %p7782_p9, %p7776_p8 }
  0x6d   : > { %7786 = shalt.err (!%p7783_p11)
}
  0x6e   : > { %6822 = dma.hbm_to_vmem [thread:$0]  (!%p8383_p12), %s8377_s1, 32, %s8379_s28, %s8328_s13  }
  0x6f   : > { %s11692_s20 = sshll.u32 %s8392_s16, 4  ;;  %s6788_s8 = smul.u32 768, %s8365_s29  ;;  %s570_s20 = int_to_ptr.vmem [resolvable:$true] %s11692_s20 }
  0x70   : > { %s7787_s15 = scalar_lea.hbm %s8390_s9, 32  ;;  %s7792_s14 = scalar_lea.hbm %s11690_s3, 64 }
  0x71   : > { %p7788_p7 = scmp.ne.s32.totalorder %s8390_s9, %s7787_s15  ;;  %p7793_p3 = scmp.lt.u32.totalorder %s8390_s9, %s11690_s3 }
  0x72   : > { %p7794_p1 = scmp.lt.u32.totalorder %s7792_s14, %s7787_s15  ;;  %p7796_p10 = scmp.lt.u32.totalorder %s7787_s15, %s8390_s9 }
  0x73   : > { %p7790_p13 = pnand %p7788_p7, %p8399_p4 }
  0x74   : > { %p7795_p5 = por %p7794_p1, %p7793_p3 }
  0x75   : > { %p7791_p0 = pneg %p7790_p13 }
  0x76   : > { %p7797_p8 = por %p7796_p10, %p7795_p5 }
  0x78   : > { %p7798_p2 = pnand %p7797_p8, %p7791_p0 }
  0x7a   : > { %7801 = shalt.err (!%p7798_p2)
}
  0x7b   : > { %s7802_s1 = scalar_lea.vmem %s570_s20, 32  ;;  %s8117_s28 = smov [#allocation9]  }
  0x7c   : > { %p7803_p6 = scmp.ne.s32.totalorder %s570_s20, %s7802_s1  ;;  %s7807_s16 = sshll.u32 %s8117_s28, 4  ;;  %s7808_s16 = int_to_ptr.vmem [resolvable:$false] %s7807_s16 }
  0x7d   : > { %s7809_s7 = scalar_lea.vmem %s7808_s16, 64  ;;  %p7810_p7 = scmp.lt.s32.totalorder %s570_s20, %s7808_s16 }
  0x7e   : > { %p7805_p9 = pnand %p7803_p6, %p8399_p4  ;;  %p7811_p13 = scmp.lt.s32.totalorder %s7809_s7, %s7802_s1 }
  0x80   : > { %p7806_p11 = pneg %p7805_p9  ;;  %p7812_p12 = por %p7811_p13, %p7810_p7 }
  0x82   : > { %p7813_p1 = pnand %p7812_p12, %p7806_p11 }
  0x84   : > { %7816 = shalt.err (!%p7813_p1)
}
  0x85   : > { %p11693_p3 = scmp.ne.s32.totalorder %s11689_s27, 0  ;;  %s6789_s2 = smul.u32 12288, %s8103_s0 }
  0x86   : > { %s580_s15 = scalar_lea.vmem [#allocation10], %s6788_s8  ;;  %s11694_s4 = sld [smem:[#allocation91_spill]] }
  0x87   : > { %6825 = dma.hbm_to_vmem [thread:$0]  (!%p11693_p3), %s8390_s9, 32, %s570_s20, %s8328_s13  }
  0x88   : > { %s587_s17 = sshll.u32 %s580_s15, 4  ;;  %s6226_s1 = sshll.u32 %s8365_s29, 8  ;;  %s8450_s17 = int_to_ptr.vmem [resolvable:$true] %s587_s17 }
  0x8c   : > { %s8448_s28 = scalar_lea.hbm %s11694_s4, %s6789_s2  ;;  %s7822_s8 = scalar_lea.hbm %s11694_s4, 24576 }
  0x8d   : > { %s7817_s16 = scalar_lea.hbm %s8448_s28, 12288  ;;  %p7823_p10 = scmp.lt.u32.totalorder %s8448_s28, %s11694_s4 }
  0x8e   : > { %p7818_p12 = scmp.ne.s32.totalorder %s8448_s28, %s7817_s16  ;;  %p7824_p8 = scmp.lt.u32.totalorder %s7822_s8, %s7817_s16 }
  0x8f   : > { %p7826_p6 = scmp.lt.u32.totalorder %s7817_s16, %s8448_s28 }
  0x90   : > { %p7820_p0 = pnand %p7818_p12, %p8399_p4  ;;  %p7825_p2 = por %p7824_p8, %p7823_p10 }
  0x92   : > { %p7821_p5 = pneg %p7820_p0  ;;  %p7827_p9 = por %p7826_p6, %p7825_p2 }
  0x94   : > { %p7828_p11 = pnand %p7827_p9, %p7821_p5 }
  0x96   : > { %7831 = shalt.err (!%p7828_p11)
}
  0x97   : > { %s7832_s2 = scalar_lea.vmem %s8450_s17, 12288  ;;  %s8118_s14 = smov [#allocation10]  }
  0x98   : > { %p7833_p7 = scmp.ne.s32.totalorder %s8450_s17, %s7832_s2  ;;  %s7837_s19 = sshll.u32 %s8118_s14, 4  ;;  %s7838_s19 = int_to_ptr.vmem [resolvable:$false] %s7837_s19 }
  0x99   : > { %s7839_s9 = scalar_lea.vmem %s7838_s19, 24576  ;;  %p7840_p12 = scmp.lt.s32.totalorder %s8450_s17, %s7838_s19 }
  0x9a   : > { %p7835_p13 = pnand %p7833_p7, %p8399_p4  ;;  %p7841_p0 = scmp.lt.s32.totalorder %s7839_s9, %s7832_s2 }
  0x9c   : > { %p7836_p1 = pneg %p7835_p13  ;;  %p7842_p10 = por %p7841_p0, %p7840_p12 }
  0x9e   : > { %p7843_p8 = pnand %p7842_p10, %p7836_p1 }
  0xa0   : > { %7846 = shalt.err (!%p7843_p8)
}
  0xa1   : > { %s8119_s16 = smov 384   ;;  %s8120_s20 = smov 24  }
  0xa2   : > { %6828 = dma.hbm_to_vmem [thread:$0]  (!%p11693_p3), %s8448_s28, 12288, %s8450_s17, %s8328_s13, %s8119_s16, %s8119_s16, %s8120_s20  }
  0xa3   : > { %s6523_s8 = sshll.u32 %s8103_s0, 12  ;;  %s11695_s6 = sld [smem:[#allocation93_spill]] }
  0xa4   : > { %s608_s14 = scalar_lea.vmem [#allocation11], %s6226_s1  ;;  %s11585_s9 = sshll.u32 %s8365_s29, 9 }
  0xa5   : > { %s615_s19 = sshll.u32 %s608_s14, 4  ;;  %s8483_s19 = int_to_ptr.vmem [resolvable:$true] %s615_s19 }
  0xa9   : > { %s8479_s2 = scalar_lea.hbm %s11695_s6, %s6523_s8  ;;  %s7852_s16 = scalar_lea.hbm %s11695_s6, 8192 }
  0xaa   : > { %s7847_s3 = scalar_lea.hbm %s8479_s2, 4096  ;;  %p7853_p9 = scmp.lt.u32.totalorder %s8479_s2, %s11695_s6 }
  0xab   : > { %p7848_p5 = scmp.ne.s32.totalorder %s8479_s2, %s7847_s3  ;;  %p7854_p11 = scmp.lt.u32.totalorder %s7852_s16, %s7847_s3 }
  0xac   : > { %p7856_p13 = scmp.lt.u32.totalorder %s7847_s3, %s8479_s2 }
  0xad   : > { %p7850_p2 = pnand %p7848_p5, %p8399_p4  ;;  %p7855_p7 = por %p7854_p11, %p7853_p9 }
  0xaf   : > { %p7851_p6 = pneg %p7850_p2  ;;  %p7857_p1 = por %p7856_p13, %p7855_p7 }
  0xb1   : > { %p7858_p12 = pnand %p7857_p1, %p7851_p6 }
  0xb3   : > { %7861 = shalt.err (!%p7858_p12)
}
  0xb4   : > { %s7862_s1 = scalar_lea.vmem %s8483_s19, 4096  ;;  %s8121_s7 = smov [#allocation11]  }
  0xb5   : > { %p7863_p0 = scmp.ne.s32.totalorder %s8483_s19, %s7862_s1  ;;  %s7867_s15 = sshll.u32 %s8121_s7, 4  ;;  %s7868_s15 = int_to_ptr.vmem [resolvable:$false] %s7867_s15 }
  0xb6   : > { %s7869_s14 = scalar_lea.vmem %s7868_s15, 8192  ;;  %p7870_p5 = scmp.lt.s32.totalorder %s8483_s19, %s7868_s15 }
  0xb7   : > { %p7865_p10 = pnand %p7863_p0, %p8399_p4  ;;  %p7871_p2 = scmp.lt.s32.totalorder %s7869_s14, %s7862_s1 }
  0xb9   : > { %p7866_p8 = pneg %p7865_p10  ;;  %p7872_p9 = por %p7871_p2, %p7870_p5 }
  0xbb   : > { %p7873_p11 = pnand %p7872_p9, %p7866_p8 }
  0xbd   : > { %7876 = shalt.err (!%p7873_p11)
}
  0xbe   : > { %s11583_s3 = smov 128   ;;  %s11584_s17 = smov 8  }
  0xbf   : > { %6831 = dma.hbm_to_vmem [thread:$0]  (!%p11693_p3), %s8479_s2, 4096, %s8483_s19, %s8328_s13, %s11583_s3, %s11583_s3, %s11584_s17  }
  0xc0   : > { %s6524_s28 = sshll.u32 %s8103_s0, 13  ;;  %s11696_s10 = sld [smem:[#allocation97_spill]] }
  0xc1   : > { %s650_s1 = scalar_lea.vmem [#allocation12], %s11585_s9 }
  0xc2   : > { %s657_s7 = sshll.u32 %s650_s1, 4  ;;  %s8521_s7 = int_to_ptr.vmem [resolvable:$true] %s657_s7 }
  0xc6   : > { %s8517_s8 = scalar_lea.hbm %s11696_s10, %s6524_s28  ;;  %s7882_s14 = scalar_lea.hbm %s11696_s10, 16384 }
  0xc7   : > { %s7877_s15 = scalar_lea.hbm %s8517_s8, 8192  ;;  %p7883_p1 = scmp.lt.u32.totalorder %s8517_s8, %s11696_s10 }
  0xc8   : > { %p7878_p6 = scmp.ne.s32.totalorder %s8517_s8, %s7877_s15  ;;  %p7884_p12 = scmp.lt.u32.totalorder %s7882_s14, %s7877_s15 }
  0xc9   : > { %p7886_p10 = scmp.lt.u32.totalorder %s7877_s15, %s8517_s8 }
  0xca   : > { %p7880_p7 = pnand %p7878_p6, %p8399_p4  ;;  %p7885_p0 = por %p7884_p12, %p7883_p1 }
  0xcc   : > { %p7881_p13 = pneg %p7880_p7  ;;  %p7887_p8 = por %p7886_p10, %p7885_p0 }
  0xce   : > { %p7888_p5 = pnand %p7887_p8, %p7881_p13 }
  0xd0   : > { %7891 = shalt.err (!%p7888_p5)
}
  0xd1   : > { %s7892_s1 = scalar_lea.vmem %s8521_s7, 8192  ;;  %s8124_s2 = smov [#allocation12]  }
  0xd2   : > { %p7893_p2 = scmp.ne.s32.totalorder %s8521_s7, %s7892_s1  ;;  %s7897_s19 = sshll.u32 %s8124_s2, 4  ;;  %s7898_s19 = int_to_ptr.vmem [resolvable:$false] %s7897_s19 }
  0xd3   : > { %s7899_s16 = scalar_lea.vmem %s7898_s19, 16384  ;;  %p7900_p6 = scmp.lt.s32.totalorder %s8521_s7, %s7898_s19 }
  0xd4   : > { %p7895_p9 = pnand %p7893_p2, %p8399_p4  ;;  %p7901_p7 = scmp.lt.s32.totalorder %s7899_s16, %s7892_s1 }
  0xd6   : > { %p7896_p11 = pneg %p7895_p9  ;;  %p7902_p1 = por %p7901_p7, %p7900_p6 }
  0xd8   : > { %p7903_p12 = pnand %p7902_p1, %p7896_p11 }
  0xda   : > { %7906 = shalt.err (!%p7903_p12)
}
  0xdb   : > { %s11697_s15 = smov 16   ;;  %s11698_s14 = smov 256  }
  0xdc   : > { %6834 = dma.hbm_to_vmem [thread:$0]  (!%p11693_p3), %s8517_s8, 8192, %s8521_s7, %s8328_s13, %s11698_s14, %s11698_s14, %s11697_s15  }
  0xdd   : > { %s8549_s20 = sadd.s32 4294967295, %s8111_s18   ;;  %s6211_s1 = sadd.s32 4294967294, %s8111_s18  }
  0xde   : > { %p72_p13 = scmp.ne.s32.totalorder %s8079_s25, %s8075_s24  ;;  %p11587_p0 = scmp.eq.s32.totalorder %s8549_s20, 0 }
  0xdf   : > { %p119_p10 = scmp.ne.s32.totalorder %s8067_s22, %s8063_s21  ;;  %p471_p8 = scmp.eq.s32.totalorder %s8549_s20, 7 }
  0xe0   : > { %p477_p5 = scmp.eq.s32.totalorder %s6211_s1, 7  ;;  %p8560_p2 = por %p11587_p0, %p72_p13 }
  0xe1   : > { %p8566_p9 = por %p119_p10, %p11587_p0  ;;  %p11701_p11 = scmp.ne.s32.totalorder %s8083_s26, %s8079_s25 }
  0xe2   : > { %s11699_s2 = scalar_select %p8560_p2, 1, 0 }
  0xe3   : > { %s11700_s8 = scalar_select %p8566_p9, 1, 0 }
  0xe4   : > { %p8573_p6 = por %p471_p8, %p11701_p11  ;;  %p8577_p7 = por %p477_p5, %p72_p13 }
  0xe5   : > { %p6212_p1 = scmp.ge.s32.totalorder %s8111_s18, 1  ;;  %p484_p12 = scmp.lt.s32.totalorder %s8111_s18, 9 }
  0xe6   : > { %s11702_s7 = scalar_select %p8573_p6, 1, 0 }
  0xe7   : > { %s11704_s21 = scalar_select %p8577_p7, 1, 0 }
  0xe8   : > { %11703 = sst [smem:[#allocation36_spill]] %s11702_s7  ;;  %p8583_p3 = pnand %p6212_p1, %p484_p12 }
  0xe9   : > { %11705 = sst [smem:[#allocation37_spill]] %s11704_s21  ;;  %s8125_s16 = smov [#allocation6]  }
  0xea   : > { %s11706_s19 = scalar_select %p8583_p3, 1, 0 }
  0xeb   : > { %s496_s1 = sshll.u32 %s8125_s16, 4  ;;  %p6812_p10 = pneg %p8583_p3  ;;  %s8596_s1 = int_to_ptr.vmem [resolvable:$true] %s496_s1 }
  0xec   : > { %s11707_s12 = sld [smem:[#allocation99_spill]]  ;;  %s11708_s4 = sshll.u32 %s8365_s29, 9 }
  0xed   : > { %s678_s6 = scalar_lea.vmem [#allocation13], %s11708_s4  ;;  %p8602_p13 = pnand %p6812_p10, %p11587_p0 }
  0xee   : > { %s685_s10 = sshll.u32 %s678_s6, 4  ;;  %s8606_s10 = int_to_ptr.vmem [resolvable:$true] %s685_s10 }
  0xf2   : > { %s8594_s9 = scalar_lea.hbm %s11707_s12, %s6524_s28  ;;  %s7912_s28 = scalar_lea.hbm %s11707_s12, 16384 }
  0xf3   : > { %s7907_s0 = scalar_lea.hbm %s8594_s9, 8192  ;;  %p7913_p1 = scmp.lt.u32.totalorder %s8594_s9, %s11707_s12 }
  0xf4   : > { %p7908_p8 = scmp.ne.s32.totalorder %s8594_s9, %s7907_s0  ;;  %p7914_p12 = scmp.lt.u32.totalorder %s7912_s28, %s7907_s0 }
  0xf5   : > { %p7916_p0 = scmp.lt.u32.totalorder %s7907_s0, %s8594_s9 }
  0xf6   : > { %p7910_p5 = pnand %p7908_p8, %p8399_p4  ;;  %p7915_p10 = por %p7914_p12, %p7913_p1 }
  0xf8   : > { %p7911_p11 = pneg %p7910_p5  ;;  %p7917_p7 = por %p7916_p0, %p7915_p10 }
  0xfa   : > { %p7918_p6 = pnand %p7917_p7, %p7911_p11 }
  0xfc   : > { %7921 = shalt.err (!%p7918_p6)
}
  0xfd   : > { %s7922_s4 = scalar_lea.vmem %s8606_s10, 8192  ;;  %s8126_s6 = smov [#allocation13]  }
  0xfe   : > { %p7923_p8 = scmp.ne.s32.totalorder %s8606_s10, %s7922_s4  ;;  %s7927_s3 = sshll.u32 %s8126_s6, 4  ;;  %s7928_s3 = int_to_ptr.vmem [resolvable:$false] %s7927_s3 }
  0xff   : > { %s7929_s11 = scalar_lea.vmem %s7928_s3, 16384  ;;  %p7930_p2 = scmp.lt.s32.totalorder %s8606_s10, %s7928_s3 }
 0x100   : > { %p7925_p5 = pnand %p7923_p8, %p8399_p4  ;;  %p7931_p3 = scmp.lt.s32.totalorder %s7929_s11, %s7922_s4 }
 0x102   : > { %p7926_p9 = pneg %p7925_p5  ;;  %p7932_p1 = por %p7931_p3, %p7930_p2 }
 0x104   : > { %p7933_p12 = pnand %p7932_p1, %p7926_p9 }
 0x106   : > { %7936 = shalt.err (!%p7933_p12)
}
 0x107   : > { %p11710_p0 = scmp.ne.s32.totalorder %s11689_s27, 0  ;;  %s11711_s0 = smov 8  }
 0x108   : > { %s11712_s17 = smov 128   ;;  %s11713_s29 = sld [smem:[#allocation88_spill]] }
 0x109   : > { %6837 = dma.hbm_to_vmem [thread:$0]  (!%p11710_p0), %s8594_s9, 8192, %s8606_s10, %s8328_s13, %s11712_s17, %s11712_s17, %s11711_s0  }
 0x10a   : > { %p7939_p3 = pneg %p8602_p13 }
 0x10e   : > { %s11714_s6 = smov %s11713_s29  ;;  %s7937_s12 = scalar_lea.hbm %s11713_s29, 4096 }
 0x10f   : > { %p7938_p4 = scmp.ne.s32.totalorder %s11714_s6, %s7937_s12  ;;  %p7944_p6 = scmp.lt.u32.totalorder %s7937_s12, %s11714_s6 }
 0x111   : > { %p7940_p2 = pnand %p7939_p3, %p7938_p4 }
 0x113   : > { %p7941_p9 = pneg %p7940_p2 }
 0x115   : > { %p7946_p7 = pnand %p7944_p6, %p7941_p9 }
 0x117   : > { %7949 = shalt.err (!%p7946_p7)
}
 0x118   : > { %s7950_s10 = scalar_lea.vmem %s8596_s1, 4096  ;;  %p7958_p5 = scmp.lt.s32.totalorder %s8596_s1, %s8596_s1 }
 0x119   : > { %p7951_p11 = scmp.ne.s32.totalorder %s8596_s1, %s7950_s10  ;;  %p7959_p1 = scmp.lt.s32.totalorder %s7950_s10, %s7950_s10 }
 0x11b   : > { %p7953_p10 = pnand %p7951_p11, %p7939_p3  ;;  %p7960_p12 = por %p7959_p1, %p7958_p5 }
 0x11d   : > { %p7954_p8 = pneg %p7953_p10 }
 0x11f   : > { %p7961_p0 = pnand %p7960_p12, %p7954_p8 }
 0x121   : > { %7964 = shalt.err (!%p7961_p0)
}
 0x122   : > { %6815 = dma.hbm_to_vmem [thread:$0]  (!%p8602_p13), %s11714_s6, 4096, %s8596_s1, [#allocation7], %s11698_s14, %s11698_s14, %s11697_s15  }
 0x123   : > { %p11715_p4 = scmp.ne.s32.totalorder %s11706_s19, 0 }
 0x125   : > { %704 = sbr.rel (%p11715_p4) target bundleno = 3093 (0xc15), region = 84 }
 0x12c   : > { %s706_s13 = sand.u32 1, %s8549_s20   ;;  %s11593_s9 = sand.u32 1, %s8079_s25  }
 0x12d   : > { %s8663_s11 = sshll.u32 %s11593_s9, 9  ;;  %s707_s16 = scalar_lea.sflag [#allocation4], %s706_s13 }
 0x12e   : > { %p11716_p3 = scmp.ne.s32.totalorder %s11699_s2, 0 }
 0x130   : > { %8046 = dma.done.wait (%p11716_p3), %s707_s16, 8192  }
 0x131   : > { %8048 = vsyncadd (%p11716_p3), %s707_s16, 4294959104  ;;  %p11717_p13 = scmp.eq.s32.totalorder %s8549_s20, 0 }
 0x133   : > { %8050 = dma.done.wait (%p11717_p13), [#allocation7], 4096   ;;  %p11718_p2 = pmov %p11717_p13 }
 0x134   : > { %s721_s15 = sand.u32 1, %s8067_s22   ;;  %p11719_p9 = scmp.ne.s32.totalorder %s11700_s8, 0 }
 0x135   : > { %8052 = vsyncadd (%p11718_p2), [#allocation7], 4294963200  ;;  %s6238_s14 = sshll.u32 %s721_s15, 1 }
 0x136   : > { %s8675_s19 = scalar_lea.vmem [#allocation8], %s6238_s14 }
 0x137   : > { %8054 = dma.done.wait (%p11719_p9), %s707_s16, 32832  }
 0x138   : > { %8056 = vsyncadd (%p11719_p9), %s707_s16, 4294934464  ;;  %s11720_s1 = sld [smem:[#allocation25_spill]]  ;;  %s6790_s2 = smul.u32 768, %s721_s15 }
 0x139   : > { %s6240_s17 = sshll.u32 %s721_s15, 8  ;;  %s6241_s5 = sshll.u32 %s721_s15, 9 }
 0x13a   : > { %s11722_s26 = sld [smem:[#allocation95_spill]]  ;;  %s11723_s9 = sld [smem:[#allocation92_spill]] }
 0x13b   : > { %s11724_s23 = sld [smem:[#allocation96_spill]]  ;;  %s11725_s27 = sld [smem:[#allocation100_spill]] }
 0x13c   : > { %s11726_s8 = sld [smem:[#allocation98_spill]]  ;;  %s8711_s10 = scalar_lea.vmem [#allocation9], %s6238_s14 }
 0x13d   : > { %s8713_s12 = scalar_lea.vmem [#allocation10], %s6790_s2  ;;  %s8719_s30 = scalar_lea.vmem [#allocation13], %s6241_s5 }
 0x13e   : > { %p872_p6 = scmp.lt.s32.totalorder %s11720_s1, 1  ;;  %p6249_p7 = scmp.ne.s32.totalorder %s11720_s1, 0 }
 0x13f   : > { %s11727_s24 = sld [smem:[#allocation24_spill]] (!%p6249_p7)  ;;  %v937_v0 = vld [vmem:[#allocation6] sm:$0xff] (!%p6249_p7)  ;;  %v938_v1 = vld [vmem:[#allocation6 + $0x8] sm:$0xff] (!%p6249_p7)  ;;  %v939_v2 = vld [vmem:[#allocation6 + $0x10] sm:$0xff] (!%p6249_p7)  ;;  %s11728_s7 = scalar_lea.vmem (!%p6249_p7), [#allocation3], %s8663_s11 }
 0x140   : > { %s873_s20 = scalar_select %p872_p6, %s11720_s1, 1 }
 0x141   : > { %901 = sbr.rel (%p6249_p7) target bundleno = 352 (0x160), region = 120  ;;  %v940_v3 = vld [vmem:[#allocation6 + $0x18] sm:$0xff] (!%p6249_p7)  ;;  %v941_v4 = vld [vmem:[#allocation6 + $0x20] sm:$0xff] (!%p6249_p7)  ;;  %v942_v5 = vld [vmem:[#allocation6 + $0x28] sm:$0xff] (!%p6249_p7) }
 0x142   : > { %s6791_s28 = smul.u32 6, %s873_s20  ;;  %s8683_s29 = sshll.u32 %s873_s20, 1  ;;  %v943_v19 = vld [vmem:[#allocation6 + $0x30] sm:$0xff] (!%p6249_p7)  ;;  %v944_v22 = vld [vmem:[#allocation6 + $0x38] sm:$0xff] (!%p6249_p7)  ;;  %v945_v24 = vld [vmem:[#allocation6 + $0x40] sm:$0xff] (!%p6249_p7) }
 0x143   : > { %s883_s13 = scalar_lea.vmem %s11722_s26, %s8683_s29  ;;  %s887_s22 = scalar_lea.vmem %s11724_s23, %s8683_s29  ;;  %v946_v28 = vld [vmem:[#allocation6 + $0x48] sm:$0xff] (!%p6249_p7)  ;;  %v947_v31 = vld [vmem:[#allocation6 + $0x50] sm:$0xff] (!%p6249_p7)  ;;  %v948_v33 = vld [vmem:[#allocation6 + $0x58] sm:$0xff] (!%p6249_p7) }
 0x144   : > { %s8696_s0 = scalar_lea.vmem %s11723_s9, %s6791_s28  ;;  %s6247_s21 = sshll.u32 %s873_s20, 2  ;;  %v949_v37 = vld [vmem:[#allocation6 + $0x60] sm:$0xff] (!%p6249_p7)  ;;  %v950_v40 = vld [vmem:[#allocation6 + $0x68] sm:$0xff] (!%p6249_p7)  ;;  %v951_v42 = vld [vmem:[#allocation6 + $0x70] sm:$0xff] (!%p6249_p7) }
 0x145   : > { %s895_s18 = scalar_lea.vmem %s11725_s27, %s8683_s29  ;;  %s8709_s25 = scalar_lea.vmem %s11726_s8, %s6247_s21  ;;  %v952_v46 = vld [vmem:[#allocation6 + $0x78] sm:$0xff] (!%p6249_p7)  ;;  %v953_v49 = vld [vmem:[#allocation6 + $0x80] sm:$0xff] (!%p6249_p7)  ;;  %v954_v51 = vld [vmem:[#allocation6 + $0x88] sm:$0xff] (!%p6249_p7) }
 0x146   : > { %s8715_s9 = scalar_lea.vmem [#allocation11], %s6240_s17  ;;  %s8717_s28 = scalar_lea.vmem [#allocation12], %s6241_s5  ;;  %v955_v55 = vld [vmem:[#allocation6 + $0x90] sm:$0xff] (!%p6249_p7)  ;;  %v956_v58 = vld [vmem:[#allocation6 + $0x98] sm:$0xff] (!%p6249_p7)  ;;  %v957_v60 = vld [vmem:[#allocation6 + $0xa0] sm:$0xff] (!%p6249_p7) }
 0x147   : > { %s870_s23 = scalar_lea.vmem [#allocation14], %s8663_s11  ;;  %s6526_s6 = sshll.u32 (!%p6249_p7), %s11727_s24, 8 }
 0x148   : > { %s8726_s21 = scalar_lea.vmem %s11728_s7, %s6526_s6 [#allocation3]  ;;  %s8736_s14 = scalar_lea.vmem [#allocation2], %s6526_s6 }
 0x149   : > { %v905_v6 = vld [vmem:[%s8726_s21] sm:$0xff]  ;;  %v906_v7 = vld [vmem:[%s8726_s21 + $0x8] sm:$0xff]  ;;  %v907_v8 = vld [vmem:[%s8726_s21 + $0x10] sm:$0xff] }
 0x14a   : > { %v969_v9 = vadd.f32 %v937_v0, %v905_v6  ;;  %v970_v10 = vadd.f32 %v938_v1, %v906_v7  ;;  %v971_v11 = vadd.f32 %v939_v2, %v907_v8  ;;  %v908_v12 = vld [vmem:[%s8726_s21 + $0x18] sm:$0xff]  ;;  %v909_v13 = vld [vmem:[%s8726_s21 + $0x20] sm:$0xff]  ;;  %v910_v14 = vld [vmem:[%s8726_s21 + $0x28] sm:$0xff] }
 0x14b   : > { %v972_v15 = vadd.f32 %v940_v3, %v908_v12  ;;  %v973_v16 = vadd.f32 %v941_v4, %v909_v13  ;;  %v974_v17 = vadd.f32 %v942_v5, %v910_v14  ;;  %v911_v18 = vld [vmem:[%s8726_s21 + $0x30] sm:$0xff]  ;;  %v912_v20 = vld [vmem:[%s8726_s21 + $0x38] sm:$0xff]  ;;  %v913_v23 = vld [vmem:[%s8726_s21 + $0x40] sm:$0xff] }
 0x14c   : > { %1003 = vst [vmem:[%s8736_s14] sm:$0xff] %v969_v9  ;;  %1004 = vst [vmem:[%s8736_s14 + $0x8] sm:$0xff] %v970_v10  ;;  %v975_v21 = vadd.f32 %v943_v19, %v911_v18  ;;  %v976_v25 = vadd.f32 %v944_v22, %v912_v20  ;;  %v977_v26 = vadd.f32 %v945_v24, %v913_v23  ;;  %v914_v27 = vld [vmem:[%s8726_s21 + $0x48] sm:$0xff]  ;;  %v915_v29 = vld [vmem:[%s8726_s21 + $0x50] sm:$0xff] }
 0x14d   : > { %1005 = vst [vmem:[%s8736_s14 + $0x10] sm:$0xff] %v971_v11  ;;  %1006 = vst [vmem:[%s8736_s14 + $0x18] sm:$0xff] %v972_v15  ;;  %v978_v30 = vadd.f32 %v946_v28, %v914_v27  ;;  %v916_v32 = vld [vmem:[%s8726_s21 + $0x58] sm:$0xff]  ;;  %v979_v34 = vadd.f32 %v947_v31, %v915_v29  ;;  %v917_v36 = vld [vmem:[%s8726_s21 + $0x60] sm:$0xff] }
 0x14e   : > { %1007 = vst [vmem:[%s8736_s14 + $0x20] sm:$0xff] %v973_v16  ;;  %1008 = vst [vmem:[%s8736_s14 + $0x28] sm:$0xff] %v974_v17  ;;  %v980_v35 = vadd.f32 %v948_v33, %v916_v32  ;;  %v918_v38 = vld [vmem:[%s8726_s21 + $0x68] sm:$0xff]  ;;  %v981_v39 = vadd.f32 %v949_v37, %v917_v36  ;;  %v919_v41 = vld [vmem:[%s8726_s21 + $0x70] sm:$0xff] }
 0x14f   : > { %1009 = vst [vmem:[%s8736_s14 + $0x30] sm:$0xff] %v975_v21  ;;  %1010 = vst [vmem:[%s8736_s14 + $0x38] sm:$0xff] %v976_v25  ;;  %v982_v43 = vadd.f32 %v950_v40, %v918_v38  ;;  %v983_v44 = vadd.f32 %v951_v42, %v919_v41  ;;  %v920_v45 = vld [vmem:[%s8726_s21 + $0x78] sm:$0xff]  ;;  %v921_v47 = vld [vmem:[%s8726_s21 + $0x80] sm:$0xff] }
 0x150   : > { %1011 = vst [vmem:[%s8736_s14 + $0x40] sm:$0xff] %v977_v26  ;;  %1012 = vst [vmem:[%s8736_s14 + $0x48] sm:$0xff] %v978_v30  ;;  %v984_v48 = vadd.f32 %v952_v46, %v920_v45  ;;  %v922_v50 = vld [vmem:[%s8726_s21 + $0x88] sm:$0xff]  ;;  %v985_v52 = vadd.f32 %v953_v49, %v921_v47  ;;  %v923_v54 = vld [vmem:[%s8726_s21 + $0x90] sm:$0xff] }
 0x151   : > { %1013 = vst [vmem:[%s8736_s14 + $0x50] sm:$0xff] %v979_v34  ;;  %1014 = vst [vmem:[%s8736_s14 + $0x58] sm:$0xff] %v980_v35  ;;  %v986_v53 = vadd.f32 %v954_v51, %v922_v50  ;;  %v924_v56 = vld [vmem:[%s8726_s21 + $0x98] sm:$0xff]  ;;  %v987_v57 = vadd.f32 %v955_v55, %v923_v54  ;;  %v925_v59 = vld [vmem:[%s8726_s21 + $0xa0] sm:$0xff] }
 0x152   : > { %1015 = vst [vmem:[%s8736_s14 + $0x60] sm:$0xff] %v981_v39  ;;  %1016 = vst [vmem:[%s8736_s14 + $0x68] sm:$0xff] %v982_v43  ;;  %v988_v61 = vadd.f32 %v956_v58, %v924_v56  ;;  %v989_v62 = vadd.f32 %v957_v60, %v925_v59  ;;  %v926_v63 = vld [vmem:[%s8726_s21 + $0xa8] sm:$0xff]  ;;  %v927_v1 = vld [vmem:[%s8726_s21 + $0xb0] sm:$0xff] }
 0x153   : > { %1017 = vst [vmem:[%s8736_s14 + $0x70] sm:$0xff] %v983_v44  ;;  %1018 = vst [vmem:[%s8736_s14 + $0x78] sm:$0xff] %v984_v48  ;;  %v958_v0 = vld [vmem:[#allocation6 + $0xa8] sm:$0xff]  ;;  %v959_v3 = vld [vmem:[#allocation6 + $0xb0] sm:$0xff] }
 0x154   : > { %1019 = vst [vmem:[%s8736_s14 + $0x80] sm:$0xff] %v985_v52  ;;  %1020 = vst [vmem:[%s8736_s14 + $0x88] sm:$0xff] %v986_v53  ;;  %v990_v2 = vadd.f32 %v958_v0, %v926_v63  ;;  %v928_v4 = vld [vmem:[%s8726_s21 + $0xb8] sm:$0xff]  ;;  %v991_v6 = vadd.f32 %v959_v3, %v927_v1  ;;  %v929_v8 = vld [vmem:[%s8726_s21 + $0xc0] sm:$0xff] }
 0x155   : > { %1021 = vst [vmem:[%s8736_s14 + $0x90] sm:$0xff] %v987_v57  ;;  %v960_v5 = vld [vmem:[#allocation6 + $0xb8] sm:$0xff]  ;;  %1022 = vst [vmem:[%s8736_s14 + $0x98] sm:$0xff] %v988_v61  ;;  %v961_v9 = vld [vmem:[#allocation6 + $0xc0] sm:$0xff] }
 0x156   : > { %1023 = vst [vmem:[%s8736_s14 + $0xa0] sm:$0xff] %v989_v62  ;;  %v992_v7 = vadd.f32 %v960_v5, %v928_v4  ;;  %v930_v10 = vld [vmem:[%s8726_s21 + $0xc8] sm:$0xff]  ;;  %1024 = vst [vmem:[%s8736_s14 + $0xa8] sm:$0xff] %v990_v2  ;;  %v993_v11 = vadd.f32 %v961_v9, %v929_v8  ;;  %v931_v13 = vld [vmem:[%s8726_s21 + $0xd0] sm:$0xff] }
 0x157   : > { %v962_v12 = vld [vmem:[#allocation6 + $0xc8] sm:$0xff]  ;;  %v963_v14 = vld [vmem:[#allocation6 + $0xd0] sm:$0xff]  ;;  %1025 = vst [vmem:[%s8736_s14 + $0xb0] sm:$0xff] %v991_v6  ;;  %v932_v17 = vld [vmem:[%s8726_s21 + $0xd8] sm:$0xff] }
 0x158   : > { %1026 = vst [vmem:[%s8736_s14 + $0xb8] sm:$0xff] %v992_v7  ;;  %v994_v15 = vadd.f32 %v962_v12, %v930_v10  ;;  %v995_v16 = vadd.f32 %v963_v14, %v931_v13  ;;  %v964_v18 = vld [vmem:[#allocation6 + $0xd8] sm:$0xff]  ;;  %v933_v19 = vld [vmem:[%s8726_s21 + $0xe0] sm:$0xff]  ;;  %1027 = vst [vmem:[%s8736_s14 + $0xc0] sm:$0xff] %v993_v11 }
 0x159   : > { %v996_v20 = vadd.f32 %v964_v18, %v932_v17  ;;  %v965_v21 = vld [vmem:[#allocation6 + $0xe0] sm:$0xff]  ;;  %v934_v22 = vld [vmem:[%s8726_s21 + $0xe8] sm:$0xff]  ;;  %v935_v26 = vld [vmem:[%s8726_s21 + $0xf0] sm:$0xff] }
 0x15a   : > { %v966_v23 = vld [vmem:[#allocation6 + $0xe8] sm:$0xff]  ;;  %1028 = vst [vmem:[%s8736_s14 + $0xc8] sm:$0xff] %v994_v15  ;;  %1029 = vst [vmem:[%s8736_s14 + $0xd0] sm:$0xff] %v995_v16  ;;  %v997_v24 = vadd.f32 %v965_v21, %v933_v19  ;;  %v967_v27 = vld [vmem:[#allocation6 + $0xf0] sm:$0xff] }
 0x15b   : > { %v998_v25 = vadd.f32 %v966_v23, %v934_v22  ;;  %v936_v28 = vld [vmem:[%s8726_s21 + $0xf8] sm:$0xff]  ;;  %1030 = vst [vmem:[%s8736_s14 + $0xd8] sm:$0xff] %v996_v20  ;;  %v999_v29 = vadd.f32 %v967_v27, %v935_v26 }
 0x15c   : > { %v968_v30 = vld [vmem:[#allocation6 + $0xf8] sm:$0xff]  ;;  %1031 = vst [vmem:[%s8736_s14 + $0xe0] sm:$0xff] %v997_v24 }
 0x15d   : > { %1032 = vst [vmem:[%s8736_s14 + $0xe8] sm:$0xff] %v998_v25  ;;  %v1000_v31 = vadd.f32 %v968_v30, %v936_v28  ;;  %1033 = vst [vmem:[%s8736_s14 + $0xf0] sm:$0xff] %v999_v29 }
 0x15f   : > { %1034 = vst [vmem:[%s8736_s14 + $0xf8] sm:$0xff] %v1000_v31 }
 0x160 PF: > { %s11729_s1 = sld [smem:[#allocation24_spill]]  ;;  %v6959_v16 = vld [vmem:[%s8713_s12 + $0x4] ss:$24 sps:$4 sm:$0xff]   ;;  %v6963_v18 = vld [vmem:[%s8713_s12] ss:$24 sps:$4 sm:$0xff]   ;;  %s11732_s5 = sld [smem:[#allocation94_spill]] }
 0x161   : > { %v6961_v17 = vld [vmem:[%s8713_s12 + $0xc] ss:$24 sps:$4 sm:$0xff]   ;;  %v6964_v19 = vld [vmem:[%s8713_s12 + $0x8] ss:$24 sps:$4 sm:$0xff]   ;;  %v6967_v21 = vld [vmem:[%s8713_s12 + $0x3c] ss:$24 sps:$4 sm:$0xff]   ;;  %2039 = vmatprep.subr.bf16.mxu0 %v6959_v16 }
 0x162   : > { %v6965_v20 = vld [vmem:[%s8713_s12 + $0x34] ss:$24 sps:$4 sm:$0xff]   ;;  %2152 = vmatprep.subr.bf16.mxu1 %v6961_v17  ;;  %2040 = vmatpush1.bf16.msra.mxu0 %v6963_v18  ;;  %v6969_v22 = vld [vmem:[%s8713_s12 + $0x30] ss:$24 sps:$4 sm:$0xff]   ;;  %v6971_v24 = vld [vmem:[%s8713_s12 + $0x64] ss:$24 sps:$4 sm:$0xff]  }
 0x163   : > { %2153 = vmatpush1.bf16.msra.mxu1 %v6964_v19  ;;  %v6970_v23 = vld [vmem:[%s8713_s12 + $0x38] ss:$24 sps:$4 sm:$0xff]   ;;  %2041 = vmatprep.subr.bf16.mxu0 %v6965_v20  ;;  %v6973_v25 = vld [vmem:[%s8713_s12 + $0x6c] ss:$24 sps:$4 sm:$0xff]   ;;  %v6976_v27 = vld [vmem:[%s8713_s12 + $0x68] ss:$24 sps:$4 sm:$0xff]  }
 0x164   : > { %2154 = vmatprep.subr.bf16.mxu1 %v6967_v21  ;;  %v6975_v26 = vld [vmem:[%s8713_s12 + $0x60] ss:$24 sps:$4 sm:$0xff]   ;;  %v6977_v28 = vld [vmem:[%s8713_s12 + $0x94] ss:$24 sps:$4 sm:$0xff]   ;;  %v6981_v30 = vld [vmem:[%s8713_s12 + $0x90] ss:$24 sps:$4 sm:$0xff]  }
 0x165   : > { %v6979_v29 = vld [vmem:[%s8713_s12 + $0x9c] ss:$24 sps:$4 sm:$0xff]   ;;  %v6982_v31 = vld [vmem:[%s8713_s12 + $0x98] ss:$24 sps:$4 sm:$0xff]   ;;  %v7009_v17 = vld [vmem:[%s8713_s12 + $0x18c] ss:$24 sps:$4 sm:$0xff]  }
 0x166   : > { %s6528_s2 = sshll.u32 %s11729_s1, 8  ;;  %2042 = vmatpush1.bf16.msra.mxu0 %v6969_v22  ;;  %v7007_v16 = vld [vmem:[%s8713_s12 + $0x184] ss:$24 sps:$4 sm:$0xff]   ;;  %v7011_v18 = vld [vmem:[%s8713_s12 + $0x180] ss:$24 sps:$4 sm:$0xff]   ;;  %s11733_s20 = scalar_lea.vmem %s11732_s5, %s8683_s29 }
 0x167   : > { %s8797_s17 = scalar_lea.vmem [#allocation2], %s6528_s2  ;;  %2155 = vmatpush1.bf16.msra.mxu1 %v6970_v23  ;;  %2043 = vmatprep.subr.bf16.mxu0 %v6971_v24  ;;  %v7012_v19 = vld [vmem:[%s8713_s12 + $0x188] ss:$24 sps:$4 sm:$0xff]  }
 0x168   : > { %v8800_v32 = vld [vmem:[%s8797_s17] sm:$0xff]  ;;  %v8803_v33 = vld [vmem:[%s8797_s17 + $0x8] sm:$0xff]  ;;  %v8814_v37 = vld [vmem:[%s8797_s17 + $0x10] sm:$0xff]  ;;  %2156 = vmatprep.subr.bf16.mxu1 %v6973_v25 }
 0x169   : > { %v8806_v34 = vld [vmem:[%s8797_s17 + $0x20] sm:$0xff]  ;;  %v1072_v35 = vadd.f32 %v8803_v33, %v8800_v32  ;;  %v8811_v36 = vld [vmem:[%s8797_s17 + $0x28] sm:$0xff]  ;;  %v8817_v38 = vld [vmem:[%s8797_s17 + $0x18] sm:$0xff] }
 0x16a   : > { %v1078_v39 = vadd.f32 %v8811_v36, %v8806_v34  ;;  %v8822_v40 = vld [vmem:[%s8797_s17 + $0x30] sm:$0xff]  ;;  %v8825_v41 = vld [vmem:[%s8797_s17 + $0x38] sm:$0xff]  ;;  %v1075_v42 = vadd.f32 %v8817_v38, %v8814_v37  ;;  %v8832_v44 = vld [vmem:[%s8797_s17 + $0x40] sm:$0xff]  ;;  %2044 = vmatpush1.bf16.msra.mxu0 %v6975_v26 }
 0x16b   : > { %1073 = vadd.xlane.f32.xlu0 %v1072_v35  ;;  %v1081_v43 = vadd.f32 %v8825_v41, %v8822_v40  ;;  %v8835_v45 = vld [vmem:[%s8797_s17 + $0x48] sm:$0xff]  ;;  %v8838_v46 = vld [vmem:[%s8797_s17 + $0x50] sm:$0xff]  ;;  %v8841_v47 = vld [vmem:[%s8797_s17 + $0x58] sm:$0xff]  ;;  %2157 = vmatpush1.bf16.msra.mxu1 %v6976_v27 }
 0x16c   : > { %1079 = vadd.xlane.f32.xlu1 %v1078_v39  ;;  %v1084_v48 = vadd.f32 %v8835_v45, %v8832_v44  ;;  %v1087_v49 = vadd.f32 %v8841_v47, %v8838_v46  ;;  %v8848_v50 = vld [vmem:[%s8797_s17 + $0x60] sm:$0xff]  ;;  %v8851_v51 = vld [vmem:[%s8797_s17 + $0x68] sm:$0xff]  ;;  %v8854_v52 = vld [vmem:[%s8797_s17 + $0x70] sm:$0xff]  ;;  %2045 = vmatprep.subr.bf16.mxu0 %v6977_v28 }
 0x16d   : > { %v8857_v53 = vld [vmem:[%s8797_s17 + $0x78] sm:$0xff]  ;;  %v8860_v54 = vld [vmem:[%s8797_s17 + $0x80] sm:$0xff]  ;;  %v8863_v55 = vld [vmem:[%s8797_s17 + $0x88] sm:$0xff]  ;;  %v1090_v56 = vadd.f32 %v8851_v51, %v8848_v50  ;;  %2158 = vmatprep.subr.bf16.mxu1 %v6979_v29 }
 0x16e   : > { %v8868_v57 = vld [vmem:[%s8797_s17 + $0x90] sm:$0xff]  ;;  %v8871_v58 = vld [vmem:[%s8797_s17 + $0x98] sm:$0xff]  ;;  %v1093_v59 = vadd.f32 %v8857_v53, %v8854_v52  ;;  %v8876_v60 = vld [vmem:[%s8797_s17 + $0xa0] sm:$0xff]  ;;  %v1096_v62 = vadd.f32 %v8863_v55, %v8860_v54  ;;  %2046 = vmatpush1.bf16.msra.mxu0 %v6981_v30 }
 0x16f   : > { %1076 = vadd.xlane.f32.xlu0 %v1075_v42  ;;  %v8879_v61 = vld [vmem:[%s8797_s17 + $0xa8] sm:$0xff]  ;;  %v8884_v63 = vld [vmem:[%s8797_s17 + $0xb0] sm:$0xff]  ;;  %v8887_v0 = vld [vmem:[%s8797_s17 + $0xb8] sm:$0xff]  ;;  %v1099_v1 = vadd.f32 %v8871_v58, %v8868_v57  ;;  %2159 = vmatpush1.bf16.msra.mxu1 %v6982_v31 }
 0x170   : > { %1082 = vadd.xlane.f32.xlu1 %v1081_v43  ;;  %v8892_v2 = vld [vmem:[%s8797_s17 + $0xc0] sm:$0xff]  ;;  %v8895_v3 = vld [vmem:[%s8797_s17 + $0xc8] sm:$0xff]  ;;  %v1102_v4 = vadd.f32 %v8879_v61, %v8876_v60  ;;  %v8900_v5 = vld [vmem:[%s8797_s17 + $0xd0] sm:$0xff]  ;;  %v1105_v7 = vadd.f32 %v8887_v0, %v8884_v63 }
 0x171   : > { %v8903_v6 = vld [vmem:[%s8797_s17 + $0xd8] sm:$0xff]  ;;  %v8908_v8 = vld [vmem:[%s8797_s17 + $0xe0] sm:$0xff]  ;;  %v8911_v9 = vld [vmem:[%s8797_s17 + $0xe8] sm:$0xff]  ;;  %v1108_v10 = vadd.f32 %v8895_v3, %v8892_v2 }
 0x172   : > { %v8916_v11 = vld [vmem:[%s8797_s17 + $0xf0] sm:$0xff]  ;;  %v8919_v12 = vld [vmem:[%s8797_s17 + $0xf8] sm:$0xff]  ;;  %v1111_v13 = vadd.f32 %v8903_v6, %v8900_v5  ;;  %v1114_v14 = vadd.f32 %v8911_v9, %v8908_v8  ;;  %v6983_v35 = vld [vmem:[%s8713_s12 + $0xc4] ss:$24 sps:$4 sm:$0xff]  }
 0x173   : > { %1085 = vadd.xlane.f32.xlu0 %v1084_v48  ;;  %v1117_v15 = vadd.f32 %v8919_v12, %v8916_v11  ;;  %v6985_v39 = vld [vmem:[%s8713_s12 + $0xcc] ss:$24 sps:$4 sm:$0xff]   ;;  %v6987_v42 = vld [vmem:[%s8713_s12 + $0xc0] ss:$24 sps:$4 sm:$0xff]   ;;  %2047 = vmatprep.subr.bf16.mxu0 %v6983_v35 }
 0x174   : > { %1088 = vadd.xlane.f32.xlu1 %v1087_v49  ;;  %v6988_v43 = vld [vmem:[%s8713_s12 + $0xc8] ss:$24 sps:$4 sm:$0xff]   ;;  %v6989_v48 = vld [vmem:[%s8713_s12 + $0xf4] ss:$24 sps:$4 sm:$0xff]   ;;  %2160 = vmatprep.subr.bf16.mxu1 %v6985_v39 }
 0x175   : > { %v6991_v49 = vld [vmem:[%s8713_s12 + $0xfc] ss:$24 sps:$4 sm:$0xff]   ;;  %2048 = vmatpush1.bf16.msra.mxu0 %v6987_v42  ;;  %2161 = vmatpush1.bf16.msra.mxu1 %v6988_v43 }
 0x176   : > { %2049 = vmatprep.subr.bf16.mxu0 %v6989_v48  ;;  %2162 = vmatprep.subr.bf16.mxu1 %v6991_v49 }
 0x177   : > { %1091 = vadd.xlane.f32.xlu0 %v1090_v56  ;;  %v6993_v56 = vld [vmem:[%s8713_s12 + $0xf0] ss:$24 sps:$4 sm:$0xff]  }
 0x178   : > { %1094 = vadd.xlane.f32.xlu1 %v1093_v59  ;;  %v6994_v59 = vld [vmem:[%s8713_s12 + $0xf8] ss:$24 sps:$4 sm:$0xff]  }
 0x179   : > { %2050 = vmatpush1.bf16.msra.mxu0 %v6993_v56  ;;  %2163 = vmatpush1.bf16.msra.mxu1 %v6994_v59 }
 0x17b   : > { %1097 = vadd.xlane.f32.xlu0 %v1096_v62  ;;  %v6995_v62 = vld [vmem:[%s8713_s12 + $0x124] ss:$24 sps:$4 sm:$0xff]  }
 0x17c   : > { %1100 = vadd.xlane.f32.xlu1 %v1099_v1  ;;  %v6997_v1 = vld [vmem:[%s8713_s12 + $0x12c] ss:$24 sps:$4 sm:$0xff]   ;;  %2051 = vmatprep.subr.bf16.mxu0 %v6995_v62 }
 0x17d   : > { %2164 = vmatprep.subr.bf16.mxu1 %v6997_v1 }
 0x17f   : > { %1103 = vadd.xlane.f32.xlu0 %v1102_v4  ;;  %v6999_v4 = vld [vmem:[%s8713_s12 + $0x120] ss:$24 sps:$4 sm:$0xff]  }
 0x180   : > { %1106 = vadd.xlane.f32.xlu1 %v1105_v7  ;;  %v7000_v7 = vld [vmem:[%s8713_s12 + $0x128] ss:$24 sps:$4 sm:$0xff]   ;;  %2052 = vmatpush1.bf16.msra.mxu0 %v6999_v4 }
 0x181   : > { %2165 = vmatpush1.bf16.msra.mxu1 %v7000_v7 }
 0x183   : > { %1109 = vadd.xlane.f32.xlu0 %v1108_v10  ;;  %v7001_v10 = vld [vmem:[%s8713_s12 + $0x154] ss:$24 sps:$4 sm:$0xff]  }
 0x184   : > { %1112 = vadd.xlane.f32.xlu1 %v1111_v13  ;;  %v7003_v13 = vld [vmem:[%s8713_s12 + $0x15c] ss:$24 sps:$4 sm:$0xff]   ;;  %2053 = vmatprep.subr.bf16.mxu0 %v7001_v10 }
 0x185   : > { %2166 = vmatprep.subr.bf16.mxu1 %v7003_v13 }
 0x187   : > { %1115 = vadd.xlane.f32.xlu0 %v1114_v14  ;;  %v7005_v14 = vld [vmem:[%s8713_s12 + $0x150] ss:$24 sps:$4 sm:$0xff]  }
 0x188   : > { %1118 = vadd.xlane.f32.xlu1 %v1117_v15  ;;  %v7006_v15 = vld [vmem:[%s8713_s12 + $0x158] ss:$24 sps:$4 sm:$0xff]   ;;  %2054 = vmatpush1.bf16.msra.mxu0 %v7005_v14 }
 0x189   : > { %2167 = vmatpush1.bf16.msra.mxu1 %v7006_v15  ;;  %2055 = vmatprep.subr.bf16.mxu0 %v7007_v16 }
 0x18a   : > { %2168 = vmatprep.subr.bf16.mxu1 %v7009_v17 }
 0x18c   : > { %2056 = vmatpush1.bf16.msra.mxu0 %v7011_v18 }
 0x18d   : > { %2169 = vmatpush1.bf16.msra.mxu1 %v7012_v19 }
 0x1f8   : > { %v1074_v20 = vpop.xlane.xlu0 %1073 }
 0x1f9   : > { %v1121_v21 = vmul.f32 0.00390625, %v1074_v20  ;;  %v1080_v22 = vpop.xlane.xlu1 %1079 }
 0x1fa   : > { %v1123_v23 = vmul.f32 0.00390625, %v1080_v22 }
 0x1fb   : > { %v8964_v24 = vsub.f32 %v8800_v32, %v1121_v21  ;;  %v8967_v25 = vsub.f32 %v8803_v33, %v1121_v21 }
 0x1fc   : > { %v8970_v26 = vsub.f32 %v8806_v34, %v1123_v23  ;;  %v8973_v27 = vsub.f32 %v8811_v36, %v1123_v23  ;;  %v1077_v28 = vpop.xlane.xlu0 %1076 }
 0x1fd   : > { %v1122_v29 = vmul.f32 0.00390625, %v1077_v28  ;;  %v1083_v30 = vpop.xlane.xlu1 %1082  ;;  %v1169_v31 = vmul.f32 %v8964_v24, %v8964_v24  ;;  %v1170_v35 = vmul.f32 %v8967_v25, %v8967_v25 }
 0x1fe   : > { %v1124_v32 = vmul.f32 0.00390625, %v1083_v30  ;;  %v1173_v33 = vmul.f32 %v8970_v26, %v8970_v26  ;;  %v1174_v34 = vmul.f32 %v8973_v27, %v8973_v27 }
 0x1ff   : > { %v8984_v39 = vsub.f32 %v8814_v37, %v1122_v29  ;;  %v8987_v36 = vsub.f32 %v8817_v38, %v1122_v29  ;;  %v1201_v42 = vadd.f32 %v1170_v35, %v1169_v31 }
 0x200   : > { %v8990_v43 = vsub.f32 %v8822_v40, %v1124_v32  ;;  %v8993_v48 = vsub.f32 %v8825_v41, %v1124_v32  ;;  %v1086_v49 = vpop.xlane.xlu0 %1085  ;;  %v1207_v62 = vadd.f32 %v1174_v34, %v1173_v33 }
 0x201   : > { %v1125_v56 = vmul.f32 0.00390625, %v1086_v49  ;;  %1202 = vadd.xlane.f32.xlu0 %v1201_v42  ;;  %v1089_v59 = vpop.xlane.xlu1 %1088  ;;  %v1171_v1 = vmul.f32 %v8984_v39, %v8984_v39  ;;  %v1172_v37 = vmul.f32 %v8987_v36, %v8987_v36 }
 0x202   : > { %v1126_v38 = vmul.f32 0.00390625, %v1089_v59  ;;  %v1175_v4 = vmul.f32 %v8990_v43, %v8990_v43  ;;  %v1176_v40 = vmul.f32 %v8993_v48, %v8993_v48 }
 0x203   : > { %v9004_v41 = vsub.f32 %v8832_v44, %v1125_v56  ;;  %v9007_v7 = vsub.f32 %v8835_v45, %v1125_v56  ;;  %v1204_v10 = vadd.f32 %v1172_v37, %v1171_v1 }
 0x204   : > { %v9010_v13 = vsub.f32 %v8838_v46, %v1126_v38  ;;  %v9013_v14 = vsub.f32 %v8841_v47, %v1126_v38  ;;  %v1092_v15 = vpop.xlane.xlu0 %1091  ;;  %v1210_v18 = vadd.f32 %v1176_v40, %v1175_v4  ;;  %v7013_v38 = vld [vmem:[%s8713_s12 + $0x1b4] ss:$24 sps:$4 sm:$0xff]  }
 0x205   : > { %v1127_v16 = vmul.f32 0.00390625, %v1092_v15  ;;  %1208 = vadd.xlane.f32.xlu0 %v1207_v62  ;;  %1205 = vadd.xlane.f32.xlu1 %v1204_v10  ;;  %v1095_v17 = vpop.xlane.xlu1 %1094  ;;  %v1177_v44 = vmul.f32 %v9004_v41, %v9004_v41  ;;  %v1178_v45 = vmul.f32 %v9007_v7, %v9007_v7  ;;  %v7015_v4 = vld [vmem:[%s8713_s12 + $0x1bc] ss:$24 sps:$4 sm:$0xff]   ;;  %v7017_v10 = vld [vmem:[%s8713_s12 + $0x1b0] ss:$24 sps:$4 sm:$0xff]  }
 0x206   : > { %v1128_v19 = vmul.f32 0.00390625, %v1095_v17  ;;  %v1179_v46 = vmul.f32 %v9010_v13, %v9010_v13  ;;  %v1180_v47 = vmul.f32 %v9013_v14, %v9013_v14  ;;  %v7018_v15 = vld [vmem:[%s8713_s12 + $0x1b8] ss:$24 sps:$4 sm:$0xff]   ;;  %2057 = vmatprep.subr.bf16.mxu0 %v7013_v38  ;;  %2170 = vmatprep.subr.bf16.mxu1 %v7015_v4  ;;  %v7027_v38 = vld [vmem:[%s8713_s12 + $0x21c] ss:$24 sps:$4 sm:$0xff]  }
 0x207   : > { %v9024_v20 = vsub.f32 %v8848_v50, %v1127_v16  ;;  %v9027_v21 = vsub.f32 %v8851_v51, %v1127_v16  ;;  %v1213_v22 = vadd.f32 %v1178_v45, %v1177_v44  ;;  %2058 = vmatpush1.bf16.msra.mxu0 %v7017_v10  ;;  %2171 = vmatpush1.bf16.msra.mxu1 %v7018_v15  ;;  %v7030_v10 = vld [vmem:[%s8713_s12 + $0x218] ss:$24 sps:$4 sm:$0xff]  }
 0x208   : > { %v9030_v23 = vsub.f32 %v8854_v52, %v1128_v19  ;;  %v9033_v28 = vsub.f32 %v8857_v53, %v1128_v19  ;;  %v1098_v29 = vpop.xlane.xlu0 %1097  ;;  %v1216_v35 = vadd.f32 %v1180_v47, %v1179_v46 }
 0x209   : > { %v1129_v30 = vmul.f32 0.00390625, %v1098_v29  ;;  %1211 = vadd.xlane.f32.xlu1 %v1210_v18  ;;  %1214 = vadd.xlane.f32.xlu0 %v1213_v22  ;;  %v1101_v31 = vpop.xlane.xlu1 %1100  ;;  %v1181_v50 = vmul.f32 %v9024_v20, %v9024_v20  ;;  %v1182_v51 = vmul.f32 %v9027_v21, %v9027_v21 }
 0x20a   : > { %v1130_v32 = vmul.f32 0.00390625, %v1101_v31  ;;  %v1183_v52 = vmul.f32 %v9030_v23, %v9030_v23  ;;  %v1184_v53 = vmul.f32 %v9033_v28, %v9033_v28  ;;  %v7021_v31 = vld [vmem:[%s8713_s12 + $0x1ec] ss:$24 sps:$4 sm:$0xff]  }
 0x20b   : > { %v9044_v33 = vsub.f32 %v8860_v54, %v1129_v30  ;;  %v9047_v34 = vsub.f32 %v8863_v55, %v1129_v30  ;;  %v1219_v42 = vadd.f32 %v1182_v51, %v1181_v50  ;;  %v7019_v30 = vld [vmem:[%s8713_s12 + $0x1e4] ss:$24 sps:$4 sm:$0xff]   ;;  %2172 = vmatprep.subr.bf16.mxu1 %v7021_v31  ;;  %v7042_v31 = vld [vmem:[%s8713_s12 + $0x278] ss:$24 sps:$4 sm:$0xff]  }
 0x20c   : > { %v9050_v49 = vsub.f32 %v8868_v57, %v1130_v32  ;;  %v9053_v56 = vsub.f32 %v8871_v58, %v1130_v32  ;;  %v1104_v59 = vpop.xlane.xlu0 %1103  ;;  %v1222_v37 = vadd.f32 %v1184_v53, %v1183_v52  ;;  %v7023_v32 = vld [vmem:[%s8713_s12 + $0x1e0] ss:$24 sps:$4 sm:$0xff]   ;;  %2059 = vmatprep.subr.bf16.mxu0 %v7019_v30  ;;  %v7041_v30 = vld [vmem:[%s8713_s12 + $0x270] ss:$24 sps:$4 sm:$0xff]  }
 0x20d   : > { %v1131_v62 = vmul.f32 0.00390625, %v1104_v59  ;;  %1217 = vadd.xlane.f32.xlu1 %v1216_v35  ;;  %1220 = vadd.xlane.f32.xlu0 %v1219_v42  ;;  %v1107_v1 = vpop.xlane.xlu1 %1106  ;;  %v1185_v54 = vmul.f32 %v9044_v33, %v9044_v33  ;;  %v1186_v55 = vmul.f32 %v9047_v34, %v9047_v34  ;;  %v7024_v52 = vld [vmem:[%s8713_s12 + $0x1e8] ss:$24 sps:$4 sm:$0xff]  }
 0x20e   : > { %v1132_v57 = vmul.f32 0.00390625, %v1107_v1  ;;  %v1187_v40 = vmul.f32 %v9050_v49, %v9050_v49  ;;  %v1188_v58 = vmul.f32 %v9053_v56, %v9053_v56  ;;  %2060 = vmatpush1.bf16.msra.mxu0 %v7023_v32  ;;  %2173 = vmatpush1.bf16.msra.mxu1 %v7024_v52  ;;  %v7045_v32 = vld [vmem:[%s8713_s12 + $0x2ac] ss:$24 sps:$4 sm:$0xff]   ;;  %v7047_v52 = vld [vmem:[%s8713_s12 + $0x2a0] ss:$24 sps:$4 sm:$0xff]  }
 0x20f   : > { %v9068_v16 = vsub.f32 %v8876_v60, %v1131_v62  ;;  %v9071_v17 = vsub.f32 %v8879_v61, %v1131_v62  ;;  %v1225_v18 = vadd.f32 %v1186_v55, %v1185_v54  ;;  %v7025_v55 = vld [vmem:[%s8713_s12 + $0x214] ss:$24 sps:$4 sm:$0xff]   ;;  %2174 = vmatprep.subr.bf16.mxu1 %v7027_v38 }
 0x210   : > { %v9074_v44 = vsub.f32 %v8884_v63, %v1132_v57  ;;  %v9077_v45 = vsub.f32 %v8887_v0, %v1132_v57  ;;  %v1110_v19 = vpop.xlane.xlu0 %1109  ;;  %v1228_v46 = vadd.f32 %v1188_v58, %v1187_v40  ;;  %v7029_v58 = vld [vmem:[%s8713_s12 + $0x210] ss:$24 sps:$4 sm:$0xff]   ;;  %2061 = vmatprep.subr.bf16.mxu0 %v7025_v55  ;;  %v1330_v55 = vlaneseq }
 0x211   : > { %v1133_v60 = vmul.f32 0.00390625, %v1110_v19  ;;  %1223 = vadd.xlane.f32.xlu1 %v1222_v37  ;;  %1226 = vadd.xlane.f32.xlu0 %v1225_v18  ;;  %v1113_v61 = vpop.xlane.xlu1 %1112  ;;  %v1189_v47 = vmul.f32 %v9068_v16, %v9068_v16  ;;  %v1190_v63 = vmul.f32 %v9071_v17, %v9071_v17 }
 0x212   : > { %v1134_v22 = vmul.f32 0.00390625, %v1113_v61  ;;  %v1191_v0 = vmul.f32 %v9074_v44, %v9074_v44  ;;  %v1192_v29 = vmul.f32 %v9077_v45, %v9077_v45  ;;  %2062 = vmatpush1.bf16.msra.mxu0 %v7029_v58  ;;  %2175 = vmatpush1.bf16.msra.mxu1 %v7030_v10  ;;  %v7033_v61 = vld [vmem:[%s8713_s12 + $0x24c] ss:$24 sps:$4 sm:$0xff]  }
 0x213   : > { %v9090_v35 = vsub.f32 %v8892_v2, %v1133_v60  ;;  %v9093_v50 = vsub.f32 %v8895_v3, %v1133_v60  ;;  %v1231_v51 = vadd.f32 %v1190_v63, %v1189_v47  ;;  %v7031_v60 = vld [vmem:[%s8713_s12 + $0x244] ss:$24 sps:$4 sm:$0xff]   ;;  %v7035_v47 = vld [vmem:[%s8713_s12 + $0x240] ss:$24 sps:$4 sm:$0xff]   ;;  %2176 = vmatprep.subr.bf16.mxu1 %v7033_v61 }
 0x214   : > { %v9098_v53 = vsub.f32 %v8900_v5, %v1134_v22  ;;  %v9101_v42 = vsub.f32 %v8903_v6, %v1134_v22  ;;  %v1116_v59 = vpop.xlane.xlu0 %1115  ;;  %v1234_v3 = vadd.f32 %v1192_v29, %v1191_v0  ;;  %v7036_v63 = vld [vmem:[%s8713_s12 + $0x248] ss:$24 sps:$4 sm:$0xff]   ;;  %2063 = vmatprep.subr.bf16.mxu0 %v7031_v60  ;;  %v7037_v0 = vld [vmem:[%s8713_s12 + $0x274] ss:$24 sps:$4 sm:$0xff]  }
 0x215   : > { %v1135_v62 = vmul.f32 0.00390625, %v1116_v59  ;;  %1229 = vadd.xlane.f32.xlu1 %v1228_v46  ;;  %1232 = vadd.xlane.f32.xlu0 %v1231_v51  ;;  %v1119_v2 = vpop.xlane.xlu1 %1118  ;;  %v1193_v1 = vmul.f32 %v9090_v35, %v9090_v35  ;;  %v1194_v5 = vmul.f32 %v9093_v50, %v9093_v50  ;;  %v7039_v29 = vld [vmem:[%s8713_s12 + $0x27c] ss:$24 sps:$4 sm:$0xff]   ;;  %v7048_v59 = vld [vmem:[%s8713_s12 + $0x2a8] ss:$24 sps:$4 sm:$0xff]  }
 0x216   : > { %v1136_v6 = vmul.f32 0.00390625, %v1119_v2  ;;  %v1195_v37 = vmul.f32 %v9098_v53, %v9098_v53  ;;  %v1196_v54 = vmul.f32 %v9101_v42, %v9101_v42  ;;  %2064 = vmatpush1.bf16.msra.mxu0 %v7035_v47  ;;  %2177 = vmatpush1.bf16.msra.mxu1 %v7036_v63  ;;  %v7043_v51 = vld [vmem:[%s8713_s12 + $0x2a4] ss:$24 sps:$4 sm:$0xff]  }
 0x217   : > { %v9114_v4 = vsub.f32 %v8908_v8, %v1135_v62  ;;  %v9117_v57 = vsub.f32 %v8911_v9, %v1135_v62  ;;  %v1237_v40 = vadd.f32 %v1194_v5, %v1193_v1  ;;  %2065 = vmatprep.subr.bf16.mxu0 %v7037_v0  ;;  %2178 = vmatprep.subr.bf16.mxu1 %v7039_v29  ;;  %v7049_v62 = vld [vmem:[%s8713_s12 + $0x2d4] ss:$24 sps:$4 sm:$0xff]   ;;  %v7054_v1 = vld [vmem:[%s8713_s12 + $0x2d8] ss:$24 sps:$4 sm:$0xff]  }
 0x218   : > { %v9122_v15 = vsub.f32 %v8916_v11, %v1136_v6  ;;  %v9125_v18 = vsub.f32 %v8919_v12, %v1136_v6  ;;  %v1240_v8 = vadd.f32 %v1196_v54, %v1195_v37  ;;  %v7051_v2 = vld [vmem:[%s8713_s12 + $0x2dc] ss:$24 sps:$4 sm:$0xff]  }
 0x219   : > { %1235 = vadd.xlane.f32.xlu1 %v1234_v3  ;;  %1238 = vadd.xlane.f32.xlu0 %v1237_v40  ;;  %v1197_v9 = vmul.f32 %v9114_v4, %v9114_v4  ;;  %v1198_v19 = vmul.f32 %v9117_v57, %v9117_v57  ;;  %v7053_v3 = vld [vmem:[%s8713_s12 + $0x2d0] ss:$24 sps:$4 sm:$0xff]   ;;  %v7057_v5 = vld [vmem:[%s8713_s12 + $0x14] ss:$24 sps:$4 sm:$0xff]  }
 0x21a   : > { %v1199_v11 = vmul.f32 %v9122_v15, %v9122_v15  ;;  %v1200_v12 = vmul.f32 %v9125_v18, %v9125_v18  ;;  %2066 = vmatpush1.bf16.msra.mxu0 %v7041_v30  ;;  %2179 = vmatpush1.bf16.msra.mxu1 %v7042_v31  ;;  %v1070_v30 = vld [vmem:[%s8675_s19] sm:$0x3] }
 0x21b   : > { %v1243_v46 = vadd.f32 %v1198_v19, %v1197_v9  ;;  %2067 = vmatprep.subr.bf16.mxu0 %v7043_v51  ;;  %2180 = vmatprep.subr.bf16.mxu1 %v7045_v32  ;;  %v9152_v19 = vshrl.u32 %v1330_v55, 7 }
 0x21c   : > { %v1246_v22 = vadd.f32 %v1200_v12, %v1199_v11 }
 0x21d   : > { %1241 = vadd.xlane.f32.xlu1 %v1240_v8  ;;  %1244 = vadd.xlane.f32.xlu0 %v1243_v46  ;;  %v9155_v63 = vsub.s32 1, %v9152_v19 }
 0x21e   : > { %2068 = vmatpush1.bf16.msra.mxu0 %v7047_v52  ;;  %2181 = vmatpush1.bf16.msra.mxu1 %v7048_v59  ;;  %v1071_v59 = vld [vmem:[%s8711_s10] sm:$0x3] }
 0x21f   : > { %2069 = vmatprep.subr.bf16.mxu0 %v7049_v62  ;;  %2182 = vmatprep.subr.bf16.mxu1 %v7051_v2  ;;  %11730 = vst [vmem:[#allocation38_spill] sm:$0xff] %v9155_v63  ;;  %v9163_v62 = vrot.slane %v1070_v30, %v9155_v63  ;;  %v9171_v55 = vrot.slane %v1071_v59, %v9155_v63 }
 0x221   : > { %1247 = vadd.xlane.f32.xlu1 %v1246_v22  ;;  %v9158_v22 = vsub.s32 0, %v9152_v19 }
 0x222   : > { %2070 = vmatpush1.bf16.msra.mxu0 %v7053_v3  ;;  %2183 = vmatpush1.bf16.msra.mxu1 %v7054_v1 }
 0x223   : > { %2265 = vmatprep.subr.bf16.mxu0 %v7057_v5  ;;  %11731 = vst [vmem:[#allocation39_spill] sm:$0xff] %v9158_v22  ;;  %v9166_v2 = vrot.slane %v1070_v30, %v9158_v22 }
 0x28e   : > { %v1203_v6 = vpop.xlane.xlu0 %1202 }
 0x28f   : > { %v1249_v37 = vmul.f32 0.00390625, %v1203_v6 }
 0x291   : > { %v1265_v54 = vadd.f32 1e-06, %v1249_v37 }
 0x292   : > { %v1206_v38 = vpop.xlane.xlu1 %1205  ;;  %v1209_v40 = vpop.xlane.xlu0 %1208 }
 0x293   : > { %7343 = vrsqrt.f32 %v1265_v54  ;;  %v1250_v58 = vmul.f32 0.00390625, %v1206_v38  ;;  %v1251_v10 = vmul.f32 0.00390625, %v1209_v40 }
 0x295   : > { %v1266_v8 = vadd.f32 1e-06, %v1250_v58  ;;  %v1267_v9 = vadd.f32 1e-06, %v1251_v10 }
 0x296   : > { %v1212_v11 = vpop.xlane.xlu1 %1211  ;;  %v1215_v12 = vpop.xlane.xlu0 %1214 }
 0x297   : > { %7345 = vrsqrt.f32 %v1266_v8  ;;  %v1252_v60 = vmul.f32 0.00390625, %v1212_v11  ;;  %v1253_v61 = vmul.f32 0.00390625, %v1215_v12  ;;  %v9176_v8 = vrot.slane %v1071_v59, %v9158_v22 }
 0x298   : > { %7347 = vrsqrt.f32 %v1267_v9 }
 0x299   : > { %v1268_v46 = vadd.f32 1e-06, %v1252_v60  ;;  %v1269_v47 = vadd.f32 1e-06, %v1253_v61 }
 0x29a   : > { %v1218_v0 = vpop.xlane.xlu1 %1217  ;;  %v1221_v29 = vpop.xlane.xlu0 %1220 }
 0x29b   : > { %7349 = vrsqrt.f32 %v1268_v46  ;;  %v1254_v31 = vmul.f32 0.00390625, %v1218_v0  ;;  %v1255_v51 = vmul.f32 0.00390625, %v1221_v29 }
 0x29c   : > { %7351 = vrsqrt.f32 %v1269_v47 }
 0x29d   : > { %v7344_v32 = vpop.eup %7343  ;;  %v1270_v52 = vadd.f32 1e-06, %v1254_v31  ;;  %v1271_v3 = vadd.f32 1e-06, %v1255_v51 }
 0x29e   : > { %v1224_v1 = vpop.xlane.xlu1 %1223  ;;  %v1298_v5 = vmul.f32 %v7344_v32, %v8967_v25  ;;  %v1297_v6 = vmul.f32 %v7344_v32, %v8964_v24  ;;  %v1227_v54 = vpop.xlane.xlu0 %1226 }
 0x29f   : > { %7353 = vrsqrt.f32 %v1270_v52  ;;  %v1256_v37 = vmul.f32 0.00390625, %v1224_v1  ;;  %v1257_v12 = vmul.f32 0.00390625, %v1227_v54  ;;  %v7055_v54 = vld [vmem:[%s8713_s12 + $0x10] ss:$24 sps:$4 sm:$0xff]  }
 0x2a0   : > { %v1341_v58 = vmul.f32 %v9163_v62, %v1298_v5  ;;  %v1340_v10 = vmul.f32 %v9166_v2, %v1297_v6  ;;  %7355 = vrsqrt.f32 %v1271_v3 }
 0x2a1   : > { %v7346_v38 = vpop.eup %7345  ;;  %v1272_v40 = vadd.f32 1e-06, %v1256_v37  ;;  %v1273_v3 = vadd.f32 1e-06, %v1257_v12 }
 0x2a2   : > { %v7348_v9 = vpop.eup %7347  ;;  %v1230_v25 = vpop.xlane.xlu1 %1229  ;;  %v1300_v24 = vmul.f32 %v7346_v38, %v8987_v36  ;;  %v1299_v11 = vmul.f32 %v7346_v38, %v8984_v39  ;;  %v1384_v30 = vadd.f32 %v9171_v55, %v1341_v58  ;;  %v1383_v31 = vadd.f32 %v9176_v8, %v1340_v10 }
 0x2a3   : > { %7357 = vrsqrt.f32 %v1272_v40  ;;  %v1258_v60 = vmul.f32 0.00390625, %v1230_v25  ;;  %v1302_v61 = vmul.f32 %v7348_v9, %v8973_v27  ;;  %v1301_v1 = vmul.f32 %v7348_v9, %v8970_v26  ;;  %v1233_v5 = vpop.xlane.xlu0 %1232 }
 0x2a4   : > { %v1343_v46 = vmul.f32 %v9163_v62, %v1300_v24  ;;  %v1342_v47 = vmul.f32 %v9166_v2, %v1299_v11  ;;  %v1259_v24 = vmul.f32 0.00390625, %v1233_v5 }
 0x2a5   : > { %v7350_v0 = vpop.eup %7349  ;;  %v1274_v29 = vadd.f32 1e-06, %v1258_v60  ;;  %v1345_v36 = vmul.f32 %v9163_v62, %v1302_v61  ;;  %v1344_v11 = vmul.f32 %v9166_v2, %v1301_v1  ;;  %v7058_v61 = vld [vmem:[%s8713_s12 + $0x40] ss:$24 sps:$4 sm:$0xff]  }
 0x2a6   : > { %v1236_v51 = vpop.xlane.xlu1 %1235  ;;  %v1386_v39 = vadd.f32 %v9171_v55, %v1343_v46  ;;  %v1385_v32 = vadd.f32 %v9176_v8, %v1342_v47  ;;  %v1304_v27 = vmul.f32 %v7350_v0, %v8993_v48  ;;  %v1303_v52 = vmul.f32 %v7350_v0, %v8990_v43  ;;  %v7352_v59 = vpop.eup %7351  ;;  %v7060_v48 = vld [vmem:[%s8713_s12 + $0x44] ss:$24 sps:$4 sm:$0xff]   ;;  %v7063_v0 = vld [vmem:[%s8713_s12 + $0x74] ss:$24 sps:$4 sm:$0xff]  }
 0x2a7   : > { %7359 = vrsqrt.f32 %v1274_v29  ;;  %v1260_v58 = vmul.f32 0.00390625, %v1236_v51  ;;  %v1388_v10 = vadd.f32 %v9171_v55, %v1345_v36  ;;  %v1306_v9 = vmul.f32 %v7352_v59, %v9007_v7 }
 0x2a8   : > { %v9191_v6 = vpack.c.bf16 %v1386_v39, %v1384_v30  ;;  %v9193_v37 = vpack.c.bf16 %v1385_v32, %v1383_v31  ;;  %v1347_v38 = vmul.f32 %v9163_v62, %v1304_v27  ;;  %v1346_v43 = vmul.f32 %v9166_v2, %v1303_v52  ;;  %v1239_v27 = vpop.xlane.xlu0 %1238 }
 0x2a9   : > { %v7354_v40 = vpop.eup %7353  ;;  %7361 = vrsqrt.f32 %v1273_v3  ;;  %v1349_v46 = vmul.f32 %v9163_v62, %v1306_v9  ;;  %v1276_v7 = vadd.f32 1e-06, %v1260_v58  ;;  %v1275_v36 = vadd.f32 1e-06, %v1259_v24 }
 0x2aa   : > { %2071 = vmatprep.mubr.bf16.mxu0 %v9191_v6  ;;  %2184 = vmatprep.mubr.bf16.mxu1 %v9191_v6  ;;  %v1390_v26 = vadd.f32 %v9171_v55, %v1347_v38  ;;  %v1308_v25 = vmul.f32 %v7354_v40, %v9013_v14  ;;  %v7356_v12 = vpop.eup %7355  ;;  %v1389_v14 = vadd.f32 %v9176_v8, %v1346_v43  ;;  %v1242_v30 = vpop.xlane.xlu1 %1241 }
 0x2ab   : > { %2072 = vmatmul.mubr.bf16.vlgmr.msra.gmra.mrb[0].mxu0 %v9193_v37  ;;  %2185 = vmatmul.mubr.bf16.vlgmr.msra.gmra.mrb[0].mxu1 %v9193_v37  ;;  %v1307_v31 = vmul.f32 %v7354_v40, %v9010_v13  ;;  %v1387_v51 = vadd.f32 %v9176_v8, %v1344_v11  ;;  %v1305_v32 = vmul.f32 %v7352_v59, %v9004_v41  ;;  %7363 = vrsqrt.f32 %v1276_v7  ;;  %v7061_v13 = vld [vmem:[%s8713_s12 + $0x70] ss:$24 sps:$4 sm:$0xff]   ;;  %v7066_v41 = vld [vmem:[%s8713_s12 + $0xa4] ss:$24 sps:$4 sm:$0xff]   ;;  %v7069_v11 = vld [vmem:[%s8713_s12 + $0xd4] ss:$24 sps:$4 sm:$0xff]  }
 0x2ac   : > { %2266 = vmatpush1.bf16.msra.mxu0 %v7055_v54  ;;  %v9208_v60 = vpack.c.bf16 %v1390_v26, %v1388_v10  ;;  %v1351_v29 = vmul.f32 %v9163_v62, %v1308_v25  ;;  %v1392_v52 = vadd.f32 %v9171_v55, %v1349_v46  ;;  %v1310_v3 = vmul.f32 %v7356_v12, %v9027_v21  ;;  %v7064_v26 = vld [vmem:[%s8713_s12 + $0xa0] ss:$24 sps:$4 sm:$0xff]  }
 0x2ad   : > { %v7358_v47 = vpop.eup %7357  ;;  %2267 = vmatprep.subr.bf16.mxu0 %v7060_v48  ;;  %v1262_v5 = vmul.f32 0.00390625, %v1242_v30  ;;  %v9224_v54 = vpack.c.bf16 %v1389_v14, %v1387_v51  ;;  %v1350_v38 = vmul.f32 %v9166_v2, %v1307_v31  ;;  %7365 = vrsqrt.f32 %v1275_v36  ;;  %v7067_v36 = vld [vmem:[%s8713_s12 + $0xd0] ss:$24 sps:$4 sm:$0xff]  }
 0x2ae   : > { %2081 = vmatprep.mubr.bf16.mxu0 %v9208_v60  ;;  %2194 = vmatprep.mubr.bf16.mxu1 %v9208_v60  ;;  %v1394_v39 = vadd.f32 %v9171_v55, %v1351_v29  ;;  %v1312_v1 = vmul.f32 %v7358_v47, %v9033_v28  ;;  %v1261_v21 = vmul.f32 0.00390625, %v1239_v27  ;;  %v1348_v28 = vmul.f32 %v9166_v2, %v1305_v32  ;;  %v1248_v24 = vpop.xlane.xlu1 %1247  ;;  %v1245_v29 = vpop.xlane.xlu0 %1244 }
 0x2af   : > { %v1353_v10 = vmul.f32 %v9163_v62, %v1310_v3  ;;  %v1278_v43 = vadd.f32 1e-06, %v1262_v5  ;;  %v1393_v9 = vadd.f32 %v9176_v8, %v1350_v38  ;;  %v1311_v25 = vmul.f32 %v7358_v47, %v9030_v23  ;;  %v7075_v38 = vld [vmem:[%s8713_s12 + $0x134] ss:$24 sps:$4 sm:$0xff]  }
 0x2b0   : > { %2268 = vmatpush1.bf16.msra.mxu0 %v7058_v61  ;;  %v9228_v40 = vpack.c.bf16 %v1394_v39, %v1392_v52  ;;  %v1355_v59 = vmul.f32 %v9163_v62, %v1312_v1  ;;  %v1277_v7 = vadd.f32 1e-06, %v1261_v21  ;;  %v1391_v14 = vadd.f32 %v9176_v8, %v1348_v28  ;;  %v7072_v39 = vld [vmem:[%s8713_s12 + $0x104] ss:$24 sps:$4 sm:$0xff]   ;;  %v7070_v1 = vld [vmem:[%s8713_s12 + $0x100] ss:$24 sps:$4 sm:$0xff]  }
 0x2b1   : > { %2269 = vmatprep.subr.bf16.mxu0 %v7063_v0  ;;  %v7360_v58 = vpop.eup %7359  ;;  %v1309_v0 = vmul.f32 %v7356_v12, %v9024_v20  ;;  %v1396_v30 = vadd.f32 %v9171_v55, %v1353_v10  ;;  %7367 = vrsqrt.f32 %v1278_v43  ;;  %v1264_v23 = vmul.f32 0.00390625, %v1248_v24 }
 0x2b2   : > { %v1398_v61 = vadd.f32 %v9171_v55, %v1355_v59  ;;  %v1316_v46 = vmul.f32 %v7360_v58, %v9053_v56  ;;  %v9248_v47 = vpack.c.bf16 %v1393_v9, %v1391_v14  ;;  %v1354_v51 = vmul.f32 %v9166_v2, %v1311_v25  ;;  %v7081_v14 = vld [vmem:[%s8713_s12 + $0x194] ss:$24 sps:$4 sm:$0xff]  }
 0x2b3   : > { %2082 = vmatmul.mubr.bf16.gmra.mrb[4].mxu0 %v9224_v54  ;;  %2195 = vmatmul.mubr.bf16.gmra.mrb[4].mxu1 %v9224_v54  ;;  %v7362_v48 = vpop.eup %7361  ;;  %7369 = vrsqrt.f32 %v1277_v7  ;;  %v1263_v32 = vmul.f32 0.00390625, %v1245_v29  ;;  %v1280_v3 = vadd.f32 1e-06, %v1264_v23 }
 0x2b4   : > { %2091 = vmatprep.mubr.bf16.mxu0 %v9228_v40  ;;  %2204 = vmatprep.mubr.bf16.mxu1 %v9228_v40  ;;  %v1314_v31 = vmul.f32 %v7362_v48, %v9047_v34  ;;  %v9252_v56 = vpack.c.bf16 %v1398_v61, %v1396_v30  ;;  %v1359_v20 = vmul.f32 %v9163_v62, %v1316_v46  ;;  %v7076_v61 = vld [vmem:[%s8713_s12 + $0x160] ss:$24 sps:$4 sm:$0xff]  }
 0x2b5   : > { %2270 = vmatpush1.bf16.msra.mxu0 %v7061_v13  ;;  %v7364_v12 = vpop.eup %7363  ;;  %v1352_v34 = vmul.f32 %v9166_v2, %v1309_v0  ;;  %v1397_v5 = vadd.f32 %v9176_v8, %v1354_v51  ;;  %v1315_v13 = vmul.f32 %v7360_v58, %v9050_v49  ;;  %v1279_v21 = vadd.f32 1e-06, %v1263_v32  ;;  %v7073_v49 = vld [vmem:[%s8713_s12 + $0x130] ss:$24 sps:$4 sm:$0xff]  }
 0x2b6   : > { %2271 = vmatprep.subr.bf16.mxu0 %v7066_v41  ;;  %v1357_v27 = vmul.f32 %v9163_v62, %v1314_v31  ;;  %v1402_v41 = vadd.f32 %v9171_v55, %v1359_v20  ;;  %v1320_v59 = vmul.f32 %v7364_v12, %v9077_v45  ;;  %v1313_v10 = vmul.f32 %v7362_v48, %v9044_v33  ;;  %v7078_v45 = vld [vmem:[%s8713_s12 + $0x164] ss:$24 sps:$4 sm:$0xff]  }
 0x2b7   : > { %v7366_v52 = vpop.eup %7365  ;;  %v1395_v28 = vadd.f32 %v9176_v8, %v1352_v34  ;;  %7371 = vrsqrt.f32 %v1280_v3  ;;  %v1358_v58 = vmul.f32 %v9166_v2, %v1315_v13  ;;  %v1319_v7 = vmul.f32 %v7364_v12, %v9074_v44 }
 0x2b8   : > { %v1400_v43 = vadd.f32 %v9171_v55, %v1357_v27  ;;  %v1363_v24 = vmul.f32 %v9163_v62, %v1320_v59  ;;  %7373 = vrsqrt.f32 %v1279_v21  ;;  %v1317_v31 = vmul.f32 %v7366_v52, %v9068_v16  ;;  %v7082_v27 = vld [vmem:[%s8713_s12 + $0x1c0] ss:$24 sps:$4 sm:$0xff]  }
 0x2b9   : > { %2272 = vmatpush1.bf16.msra.mxu0 %v7064_v26  ;;  %v1318_v26 = vmul.f32 %v7366_v52, %v9071_v17  ;;  %v9272_v9 = vpack.c.bf16 %v1397_v5, %v1395_v28  ;;  %v1356_v17 = vmul.f32 %v9166_v2, %v1313_v10  ;;  %v1401_v46 = vadd.f32 %v9176_v8, %v1358_v58  ;;  %v7085_v10 = vld [vmem:[%s8713_s12 + $0x1f0] ss:$24 sps:$4 sm:$0xff]  }
 0x2ba   : > { %2273 = vmatprep.subr.bf16.mxu0 %v7069_v11  ;;  %v9276_v25 = vpack.c.bf16 %v1402_v41, %v1400_v43  ;;  %v1406_v0 = vadd.f32 %v9171_v55, %v1363_v24  ;;  %v1362_v44 = vmul.f32 %v9166_v2, %v1319_v7  ;;  %v1360_v16 = vmul.f32 %v9166_v2, %v1317_v31  ;;  %v7093_v24 = vld [vmem:[%s8713_s12 + $0x254] ss:$24 sps:$4 sm:$0xff]   ;;  %v7096_v7 = vld [vmem:[%s8713_s12 + $0x284] ss:$24 sps:$4 sm:$0xff]   ;;  %v7097_v31 = vld [vmem:[%s8713_s12 + $0x2b0] ss:$24 sps:$4 sm:$0xff]  }
 0x2bb   : > { %2092 = vmatmul.mubr.bf16.gmra.mrb[8].mxu0 %v9248_v47  ;;  %2205 = vmatmul.mubr.bf16.gmra.mrb[8].mxu1 %v9248_v47  ;;  %v7368_v33 = vpop.eup %7367  ;;  %v1361_v48 = vmul.f32 %v9163_v62, %v1318_v26  ;;  %v1399_v30 = vadd.f32 %v9176_v8, %v1356_v17  ;;  %v7090_v26 = vld [vmem:[%s8713_s12 + $0x224] ss:$24 sps:$4 sm:$0xff]  }
 0x2bc   : > { %2101 = vmatprep.mubr.bf16.mxu0 %v9252_v56  ;;  %2214 = vmatprep.mubr.bf16.mxu1 %v9252_v56  ;;  %v1324_v29 = vmul.f32 %v7368_v33, %v9101_v42  ;;  %v7084_v42 = vld [vmem:[%s8713_s12 + $0x1c4] ss:$24 sps:$4 sm:$0xff]   ;;  %v1405_v52 = vadd.f32 %v9176_v8, %v1362_v44  ;;  %v1323_v3 = vmul.f32 %v7368_v33, %v9098_v53 }
 0x2bd   : > { %2274 = vmatpush1.bf16.msra.mxu0 %v7067_v36  ;;  %v7370_v11 = vpop.eup %7369  ;;  %v1404_v23 = vadd.f32 %v9171_v55, %v1361_v48  ;;  %v9296_v51 = vpack.c.bf16 %v1401_v46, %v1399_v30 }
 0x2be   : > { %2275 = vmatprep.subr.bf16.mxu0 %v7072_v39  ;;  %v1322_v36 = vmul.f32 %v7370_v11, %v9093_v50  ;;  %v7079_v39 = vld [vmem:[%s8713_s12 + $0x190] ss:$24 sps:$4 sm:$0xff]   ;;  %v1367_v12 = vmul.f32 %v9163_v62, %v1324_v29  ;;  %v1321_v41 = vmul.f32 %v7370_v11, %v9090_v35  ;;  %v1366_v53 = vmul.f32 %v9166_v2, %v1323_v3 }
 0x2bf   : > { %v9300_v20 = vpack.c.bf16 %v1406_v0, %v1404_v23  ;;  %v7099_v0 = vld [vmem:[%s8713_s12 + $0x2b4] ss:$24 sps:$4 sm:$0xff]   ;;  %v7102_v23 = vld [vmem:[%s8713_s12 + $0x2e4] ss:$24 sps:$4 sm:$0xff]  }
 0x2c0   : > { %v1365_v50 = vmul.f32 %v9163_v62, %v1322_v36  ;;  %v1410_v5 = vadd.f32 %v9171_v55, %v1367_v12  ;;  %v1364_v35 = vmul.f32 %v9166_v2, %v1321_v41  ;;  %v1409_v58 = vadd.f32 %v9176_v8, %v1366_v53 }
 0x2c1   : > { %2276 = vmatpush1.bf16.msra.mxu0 %v7070_v1  ;;  %v7372_v32 = vpop.eup %7371  ;;  %v7087_v1 = vld [vmem:[%s8713_s12 + $0x1f4] ss:$24 sps:$4 sm:$0xff]  }
 0x2c2   : > { %2277 = vmatprep.subr.bf16.mxu0 %v7075_v38  ;;  %v7374_v34 = vpop.eup %7373  ;;  %v1328_v13 = vmul.f32 %v7372_v32, %v9125_v18  ;;  %v1403_v38 = vadd.f32 %v9176_v8, %v1360_v16  ;;  %v1408_v59 = vadd.f32 %v9171_v55, %v1365_v50  ;;  %v1407_v17 = vadd.f32 %v9176_v8, %v1364_v35 }
 0x2c3   : > { %2102 = vmatmul.mubr.bf16.gmra.mrb[12].mxu0 %v9272_v9  ;;  %2215 = vmatmul.mubr.bf16.gmra.mrb[12].mxu1 %v9272_v9  ;;  %v1326_v21 = vmul.f32 %v7374_v34, %v9117_v57  ;;  %v1325_v48 = vmul.f32 %v7374_v34, %v9114_v4  ;;  %v7094_v4 = vld [vmem:[%s8713_s12 + $0x280] ss:$24 sps:$4 sm:$0xff]  }
 0x2c4   : > { %2111 = vmatprep.mubr.bf16.mxu0 %v9276_v25  ;;  %2224 = vmatprep.mubr.bf16.mxu1 %v9276_v25  ;;  %v1425_v28 = vpack.c.bf16 %v1405_v52, %v1403_v38  ;;  %v1428_v43 = vpack.c.bf16 %v1410_v5, %v1408_v59  ;;  %v1371_v18 = vmul.f32 %v9163_v62, %v1328_v13 }
 0x2c5   : > { %2278 = vmatpush1.bf16.msra.mxu0 %v7073_v49  ;;  %v1369_v57 = vmul.f32 %v9163_v62, %v1326_v21  ;;  %v7088_v49 = vld [vmem:[%s8713_s12 + $0x220] ss:$24 sps:$4 sm:$0xff]   ;;  %v1427_v62 = vpack.c.bf16 %v1409_v58, %v1407_v17 }
 0x2c6   : > { %2279 = vmatprep.subr.bf16.mxu0 %v7078_v45  ;;  %v1327_v45 = vmul.f32 %v7372_v32, %v9122_v15  ;;  %v1414_v33 = vadd.f32 %v9171_v55, %v1371_v18 }
 0x2c7   : > { %v1412_v11 = vadd.f32 %v9171_v55, %v1369_v57 }
 0x2c8   : > { %v1370_v46 = vmul.f32 %v9166_v2, %v1327_v45 }
 0x2c9   : > { %2280 = vmatpush1.bf16.msra.mxu0 %v7076_v61  ;;  %v7091_v61 = vld [vmem:[%s8713_s12 + $0x250] ss:$24 sps:$4 sm:$0xff]   ;;  %v1430_v15 = vpack.c.bf16 %v1414_v33, %v1412_v11 }
 0x2ca   : > { %2281 = vmatprep.subr.bf16.mxu0 %v7081_v14  ;;  %v1368_v14 = vmul.f32 %v9166_v2, %v1325_v48  ;;  %v1413_v55 = vadd.f32 %v9176_v8, %v1370_v46  ;;  %v7100_v2 = vld [vmem:[%s8713_s12 + $0x2e0] ss:$24 sps:$4 sm:$0xff]  }
 0x2cb   : > { %2112 = vmatmul.mubr.bf16.gmra.mrb[16].mxu0 %v9296_v51  ;;  %2225 = vmatmul.mubr.bf16.gmra.mrb[16].mxu1 %v9296_v51 }
 0x2cc   : > { %2121 = vmatprep.mubr.bf16.mxu0 %v9300_v20  ;;  %2234 = vmatprep.mubr.bf16.mxu1 %v9300_v20  ;;  %v1411_v29 = vadd.f32 %v9176_v8, %v1368_v14  ;;  %v11605_v8 = vsub.s32 2, %v9152_v19 }
 0x2cd   : > { %2282 = vmatpush1.bf16.msra.mxu0 %v7079_v39 }
 0x2ce   : > { %2283 = vmatprep.subr.bf16.mxu0 %v7084_v42  ;;  %v1429_v30 = vpack.c.bf16 %v1413_v55, %v1411_v29 }
 0x2d1   : > { %2284 = vmatpush1.bf16.msra.mxu0 %v7082_v27 }
 0x2d2   : > { %2285 = vmatprep.subr.bf16.mxu0 %v7087_v1 }
 0x2d3   : > { %2122 = vmatmul.mubr.bf16.gmra.mrb[20].mxu0 %v1425_v28  ;;  %2235 = vmatmul.mubr.bf16.gmra.mrb[20].mxu1 %v1425_v28 }
 0x2d4   : > { %2131 = vmatprep.mubr.bf16.mxu0 %v1428_v43  ;;  %2244 = vmatprep.mubr.bf16.mxu1 %v1428_v43 }
 0x2d5   : > { %2286 = vmatpush1.bf16.msra.mxu0 %v7085_v10 }
 0x2d6   : > { %2287 = vmatprep.subr.bf16.mxu0 %v7090_v26 }
 0x2d9   : > { %2288 = vmatpush1.bf16.msra.mxu0 %v7088_v49 }
 0x2da   : > { %2289 = vmatprep.subr.bf16.mxu0 %v7093_v24 }
 0x2db   : > { %2132 = vmatmul.mubr.bf16.gmra.mrb[24].mxu0 %v1427_v62  ;;  %2245 = vmatmul.mubr.bf16.gmra.mrb[24].mxu1 %v1427_v62 }
 0x2dc   : > { %2141 = vmatprep.mubr.bf16.mxu0 %v1430_v15  ;;  %2254 = vmatprep.mubr.bf16.mxu1 %v1430_v15 }
 0x2dd   : > { %2290 = vmatpush1.bf16.msra.mxu0 %v7091_v61 }
 0x2de   : > { %2291 = vmatprep.subr.bf16.mxu0 %v7096_v7 }
 0x2e1   : > { %2292 = vmatpush1.bf16.msra.mxu0 %v7094_v4 }
 0x2e2   : > { %2293 = vmatprep.subr.bf16.mxu0 %v7099_v0 }
 0x2e3   : > { %2142 = vmatmul.mubr.bf16.gmra.mrb[28].mxu0 %v1429_v30  ;;  %2255 = vmatmul.mubr.bf16.gmra.mrb[28].mxu1 %v1429_v30 }
 0x2e4   : > { %2297 = vmatprep.mubr.bf16.mxu0 %v9191_v6  ;;  %v9358_v6 = vld [vmem:[%s8696_s0] sm:$0x3f] }
 0x2e5   : > { %2294 = vmatpush1.bf16.msra.mxu0 %v7097_v31 }
 0x2e6   : > { %2295 = vmatprep.subr.bf16.mxu0 %v7102_v23 }
 0x2e9   : > { %2296 = vmatpush1.bf16.msra.mxu0 %v7100_v2 }
 0x2ec   : > { %2298 = vmatmul.mubr.bf16.vlgmr.msra.gmra.mrb[32].mxu0 %v9193_v37  ;;  %v11604_v37 = vsub.s32 3, %v9152_v19 }
 0x2ed   : > { %2307 = vmatprep.mubr.bf16.mxu0 %v9208_v60  ;;  %v9363_v60 = vrot.slane %v9358_v6, %v9158_v22 }
 0x2f4   : > { %2308 = vmatmul.mubr.bf16.gmra.mrb[36].mxu0 %v9224_v54  ;;  %v9368_v54 = vrot.slane %v9358_v6, %v11605_v8 }
 0x2f5   : > { %2317 = vmatprep.mubr.bf16.mxu0 %v9228_v40 }
 0x2fc   : > { %2318 = vmatmul.mubr.bf16.gmra.mrb[40].mxu0 %v9248_v47 }
 0x2fd   : > { %2327 = vmatprep.mubr.bf16.mxu0 %v9252_v56  ;;  %v9372_v56 = vrot.slane %v9358_v6, %v9155_v63 }
 0x304   : > { %2328 = vmatmul.mubr.bf16.gmra.mrb[44].mxu0 %v9272_v9  ;;  %v9377_v9 = vrot.slane %v9358_v6, %v11604_v37 }
 0x305   : > { %2337 = vmatprep.mubr.bf16.mxu0 %v9276_v25 }
 0x30c   : > { %2338 = vmatmul.mubr.bf16.gmra.mrb[48].mxu0 %v9296_v51 }
 0x30d   : > { %2347 = vmatprep.mubr.bf16.mxu0 %v9300_v20 }
 0x314   : > { %2348 = vmatmul.mubr.bf16.gmra.mrb[52].mxu0 %v1425_v28 }
 0x315   : > { %2357 = vmatprep.mubr.bf16.mxu0 %v1428_v43 }
 0x31c   : > { %2358 = vmatmul.mubr.bf16.gmra.mrb[56].mxu0 %v1427_v62 }
 0x31d   : > { %2367 = vmatprep.mubr.bf16.mxu0 %v1430_v15 }
 0x324   : > { %2368 = vmatmul.mubr.bf16.gmra.mrb[60].mxu0 %v1429_v30 }
 0x37e   : > { %v2073_v40 = vpop.f32.mrb[0].mxu0  ;;  %v2186_v47 = vpop.f32.mrb[0].mxu1 }
 0x37f   : > { %v2075_v25 = vpop.f32.mrb[1].mxu0  ;;  %v2188_v36 = vpop.f32.mrb[1].mxu1  ;;  %v2074_v44 = vadd.f32 %v2073_v40, %v9363_v60  ;;  %v2187_v20 = vadd.f32 %v2186_v47, %v9368_v54 }
 0x380   : > { %v2077_v51 = vpop.f32.mrb[2].mxu0  ;;  %v2190_v39 = vpop.f32.mrb[2].mxu1  ;;  %v2076_v50 = vadd.f32 %v2075_v25, %v9372_v56  ;;  %v2189_v34 = vadd.f32 %v2188_v36, %v9377_v9 }
 0x381   : > { %v2078_v42 = vadd.f32 %v2077_v51, %v9363_v60  ;;  %v2191_v12 = vadd.f32 %v2190_v39, %v9368_v54  ;;  %v2079_v32 = vpop.f32.mrb[3].mxu0  ;;  %v2192_v16 = vpop.f32.mrb[3].mxu1 }
 0x382   : > { %v2080_v27 = vadd.f32 %v2079_v32, %v9372_v56  ;;  %v2193_v52 = vadd.f32 %v2192_v16, %v9377_v9 }
 0x383   : > { %v2378_v3 = vpack.c.bf16 %v2078_v42, %v2074_v44  ;;  %v2380_v1 = vpack.c.bf16 %v2191_v12, %v2187_v20 }
 0x384   : > { %v2379_v5 = vpack.c.bf16 %v2080_v27, %v2076_v50  ;;  %v2381_v13 = vpack.c.bf16 %v2193_v52, %v2189_v34 }
 0x385   : > { %6596 = vmatprep.subr.bf16.mxu1 %v2380_v1  ;;  %6612 = vmatprep.mubr.bf16.mxu1 %v2378_v3 }
 0x386   : > { %v2083_v38 = vpop.f32.mrb[4].mxu0  ;;  %v2196_v41 = vpop.f32.mrb[4].mxu1  ;;  %6597 = vmatpush3.bf16.xpose.msra.mxu1 %v2380_v1  ;;  %6660 = vmatprep.subr.bf16.mxu0 %v2381_v13 }
 0x387   : > { %v9388_v59 = vadd.f32 %v2083_v38, %v9363_v60  ;;  %6676 = vmatprep.mubr.bf16.mxu0 %v2379_v5  ;;  %v2085_v21 = vpop.f32.mrb[5].mxu0  ;;  %v2198_v28 = vpop.f32.mrb[5].mxu1  ;;  %6661 = vmatpush3.bf16.xpose.msra.mxu0 %v2381_v13  ;;  %v2197_v26 = vadd.f32 %v2196_v41, %v9368_v54 }
 0x388   : > { %v9391_v10 = vadd.f32 %v2085_v21, %v9372_v56  ;;  %v2087_v53 = vpop.f32.mrb[6].mxu0  ;;  %v2200_v43 = vpop.f32.mrb[6].mxu1  ;;  %v2199_v58 = vadd.f32 %v2198_v28, %v9377_v9 }
 0x389   : > { %v9395_v18 = vadd.f32 %v2087_v53, %v9363_v60  ;;  %v2201_v35 = vadd.f32 %v2200_v43, %v9368_v54  ;;  %v2089_v57 = vpop.f32.mrb[7].mxu0  ;;  %v2202_v49 = vpop.f32.mrb[7].mxu1 }
 0x38a   : > { %v9400_v45 = vadd.f32 %v2089_v57, %v9372_v56  ;;  %v2203_v24 = vadd.f32 %v2202_v49, %v9377_v9 }
 0x38b   : > { %v2384_v33 = vpack.c.bf16 %v9395_v18, %v9388_v59  ;;  %v2386_v17 = vpack.c.bf16 %v2201_v35, %v2197_v26 }
 0x38c   : > { %v2385_v48 = vpack.c.bf16 %v9400_v45, %v9391_v10  ;;  %v2387_v11 = vpack.c.bf16 %v2203_v24, %v2199_v58 }
 0x38d   : > { %6598 = vmatprep.subr.bf16.mxu1 %v2386_v17 }
 0x38e   : > { %v2093_v62 = vpop.f32.mrb[8].mxu0  ;;  %v2206_v61 = vpop.f32.mrb[8].mxu1  ;;  %6599 = vmatpush3.bf16.xpose.msra.mxu1 %v2386_v17  ;;  %6662 = vmatprep.subr.bf16.mxu0 %v2387_v11 }
 0x38f   : > { %v9408_v46 = vadd.f32 %v2093_v62, %v9363_v60  ;;  %v2095_v15 = vpop.f32.mrb[9].mxu0  ;;  %v2208_v7 = vpop.f32.mrb[9].mxu1  ;;  %6663 = vmatpush3.bf16.xpose.msra.mxu0 %v2387_v11  ;;  %v2207_v0 = vadd.f32 %v2206_v61, %v9368_v54 }
 0x390   : > { %v9411_v14 = vadd.f32 %v2095_v15, %v9372_v56  ;;  %v2097_v4 = vpop.f32.mrb[10].mxu0  ;;  %v2210_v55 = vpop.f32.mrb[10].mxu1  ;;  %v2209_v2 = vadd.f32 %v2208_v7, %v9377_v9 }
 0x391   : > { %v9415_v29 = vadd.f32 %v2097_v4, %v9363_v60  ;;  %v2211_v30 = vadd.f32 %v2210_v55, %v9368_v54  ;;  %v2099_v31 = vpop.f32.mrb[11].mxu0  ;;  %v2212_v23 = vpop.f32.mrb[11].mxu1 }
 0x392   : > { %v9420_v40 = vadd.f32 %v2099_v31, %v9372_v56  ;;  %v2213_v47 = vadd.f32 %v2212_v23, %v9377_v9 }
 0x393   : > { %v2390_v25 = vpack.c.bf16 %v9415_v29, %v9408_v46  ;;  %v2392_v36 = vpack.c.bf16 %v2211_v30, %v2207_v0 }
 0x394   : > { %v2391_v51 = vpack.c.bf16 %v9420_v40, %v9411_v14  ;;  %v2393_v39 = vpack.c.bf16 %v2213_v47, %v2209_v2 }
 0x395   : > { %6600 = vmatprep.subr.bf16.mxu1 %v2392_v36 }
 0x396   : > { %v2103_v44 = vpop.f32.mrb[12].mxu0  ;;  %v2216_v20 = vpop.f32.mrb[12].mxu1  ;;  %6601 = vmatpush3.bf16.xpose.msra.mxu1 %v2392_v36  ;;  %6664 = vmatprep.subr.bf16.mxu0 %v2393_v39 }
 0x397   : > { %v9428_v42 = vadd.f32 %v2103_v44, %v9363_v60  ;;  %v2105_v12 = vpop.f32.mrb[13].mxu0  ;;  %v2218_v32 = vpop.f32.mrb[13].mxu1  ;;  %6665 = vmatpush3.bf16.xpose.msra.mxu0 %v2393_v39  ;;  %v2217_v27 = vadd.f32 %v2216_v20, %v9368_v54 }
 0x398   : > { %v9431_v16 = vadd.f32 %v2105_v12, %v9372_v56  ;;  %v2107_v50 = vpop.f32.mrb[14].mxu0  ;;  %v2220_v34 = vpop.f32.mrb[14].mxu1  ;;  %v2219_v13 = vadd.f32 %v2218_v32, %v9377_v9 }
 0x399   : > { %v9435_v52 = vadd.f32 %v2107_v50, %v9363_v60  ;;  %v2221_v3 = vadd.f32 %v2220_v34, %v9368_v54  ;;  %v2109_v1 = vpop.f32.mrb[15].mxu0  ;;  %v2222_v5 = vpop.f32.mrb[15].mxu1 }
 0x39a   : > { %v9440_v38 = vadd.f32 %v2109_v1, %v9372_v56  ;;  %v2223_v41 = vadd.f32 %v2222_v5, %v9377_v9 }
 0x39b   : > { %v2396_v21 = vpack.c.bf16 %v9435_v52, %v9428_v42  ;;  %v2398_v28 = vpack.c.bf16 %v2221_v3, %v2217_v27 }
 0x39c   : > { %v2397_v53 = vpack.c.bf16 %v9440_v38, %v9431_v16  ;;  %v2399_v43 = vpack.c.bf16 %v2223_v41, %v2219_v13 }
 0x39d   : > { %6602 = vmatprep.subr.bf16.mxu1 %v2398_v28 }
 0x39e   : > { %v2113_v26 = vpop.f32.mrb[16].mxu0  ;;  %v2226_v35 = vpop.f32.mrb[16].mxu1  ;;  %6603 = vmatpush3.bf16.xpose.msra.mxu1 %v2398_v28  ;;  %6666 = vmatprep.subr.bf16.mxu0 %v2399_v43 }
 0x39f   : > { %v9448_v57 = vadd.f32 %v2113_v26, %v9363_v60  ;;  %v2115_v49 = vpop.f32.mrb[17].mxu0  ;;  %v2228_v58 = vpop.f32.mrb[17].mxu1  ;;  %6667 = vmatpush3.bf16.xpose.msra.mxu0 %v2399_v43  ;;  %v2227_v62 = vadd.f32 %v2226_v35, %v9368_v54 }
 0x3a0   : > { %v9451_v24 = vadd.f32 %v2115_v49, %v9372_v56  ;;  %v2117_v17 = vpop.f32.mrb[18].mxu0  ;;  %v2230_v11 = vpop.f32.mrb[18].mxu1  ;;  %v2229_v55 = vadd.f32 %v2228_v58, %v9377_v9 }
 0x3a1   : > { %v9455_v61 = vadd.f32 %v2117_v17, %v9363_v60  ;;  %v2231_v15 = vadd.f32 %v2230_v11, %v9368_v54  ;;  %v2119_v7 = vpop.f32.mrb[19].mxu0  ;;  %v2232_v4 = vpop.f32.mrb[19].mxu1 }
 0x3a2   : > { %v9460_v0 = vadd.f32 %v2119_v7, %v9372_v56  ;;  %v2233_v30 = vadd.f32 %v2232_v4, %v9377_v9 }
 0x3a3   : > { %v2402_v31 = vpack.c.bf16 %v9455_v61, %v9448_v57  ;;  %v2404_v23 = vpack.c.bf16 %v2231_v15, %v2227_v62 }
 0x3a4   : > { %v2403_v2 = vpack.c.bf16 %v9460_v0, %v9451_v24  ;;  %v2405_v47 = vpack.c.bf16 %v2233_v30, %v2229_v55 }
 0x3a5   : > { %6604 = vmatprep.subr.bf16.mxu1 %v2404_v23 }
 0x3a6   : > { %v2123_v36 = vpop.f32.mrb[20].mxu0  ;;  %v2236_v39 = vpop.f32.mrb[20].mxu1  ;;  %6605 = vmatpush3.bf16.xpose.msra.mxu1 %v2404_v23  ;;  %6668 = vmatprep.subr.bf16.mxu0 %v2405_v47 }
 0x3a7   : > { %v9468_v44 = vadd.f32 %v2123_v36, %v9363_v60  ;;  %v2125_v20 = vpop.f32.mrb[21].mxu0  ;;  %v2238_v12 = vpop.f32.mrb[21].mxu1  ;;  %6669 = vmatpush3.bf16.xpose.msra.mxu0 %v2405_v47  ;;  %v2237_v27 = vadd.f32 %v2236_v39, %v9368_v54 }
 0x3a8   : > { %v9471_v32 = vadd.f32 %v2125_v20, %v9372_v56  ;;  %v2127_v50 = vpop.f32.mrb[22].mxu0  ;;  %v2240_v34 = vpop.f32.mrb[22].mxu1  ;;  %v2239_v41 = vadd.f32 %v2238_v12, %v9377_v9 }
 0x3a9   : > { %v9475_v3 = vadd.f32 %v2127_v50, %v9363_v60  ;;  %v2241_v1 = vadd.f32 %v2240_v34, %v9368_v54  ;;  %v2129_v5 = vpop.f32.mrb[23].mxu0  ;;  %v2242_v13 = vpop.f32.mrb[23].mxu1 }
 0x3aa   : > { %v9480_v28 = vadd.f32 %v2129_v5, %v9372_v56  ;;  %v2243_v43 = vadd.f32 %v2242_v13, %v9377_v9 }
 0x3ab   : > { %v2408_v26 = vpack.c.bf16 %v9475_v3, %v9468_v44  ;;  %v2410_v35 = vpack.c.bf16 %v2241_v1, %v2237_v27 }
 0x3ac   : > { %v2409_v49 = vpack.c.bf16 %v9480_v28, %v9471_v32  ;;  %v2411_v58 = vpack.c.bf16 %v2243_v43, %v2239_v41 }
 0x3ad   : > { %6606 = vmatprep.subr.bf16.mxu1 %v2410_v35 }
 0x3ae   : > { %v2133_v17 = vpop.f32.mrb[24].mxu0  ;;  %v2246_v11 = vpop.f32.mrb[24].mxu1  ;;  %6607 = vmatpush3.bf16.xpose.msra.mxu1 %v2410_v35  ;;  %6670 = vmatprep.subr.bf16.mxu0 %v2411_v58 }
 0x3af   : > { %v9488_v62 = vadd.f32 %v2133_v17, %v9363_v60  ;;  %v2135_v15 = vpop.f32.mrb[25].mxu0  ;;  %v2248_v7 = vpop.f32.mrb[25].mxu1  ;;  %6671 = vmatpush3.bf16.xpose.msra.mxu0 %v2411_v58  ;;  %v2247_v23 = vadd.f32 %v2246_v11, %v9368_v54 }
 0x3b0   : > { %v9491_v4 = vadd.f32 %v2135_v15, %v9372_v56  ;;  %v2137_v55 = vpop.f32.mrb[26].mxu0  ;;  %v2250_v30 = vpop.f32.mrb[26].mxu1  ;;  %v2249_v12 = vadd.f32 %v2248_v7, %v9377_v9 }
 0x3b1   : > { %v9495_v47 = vadd.f32 %v2137_v55, %v9363_v60  ;;  %v2251_v36 = vadd.f32 %v2250_v30, %v9368_v54  ;;  %v2139_v39 = vpop.f32.mrb[27].mxu0  ;;  %v2252_v20 = vpop.f32.mrb[27].mxu1 }
 0x3b2   : > { %v9500_v50 = vadd.f32 %v2139_v39, %v9372_v56  ;;  %v2253_v34 = vadd.f32 %v2252_v20, %v9377_v9 }
 0x3b3   : > { %v2414_v27 = vpack.c.bf16 %v9495_v47, %v9488_v62  ;;  %v2416_v1 = vpack.c.bf16 %v2251_v36, %v2247_v23 }
 0x3b4   : > { %v2415_v5 = vpack.c.bf16 %v9500_v50, %v9491_v4  ;;  %v2417_v13 = vpack.c.bf16 %v2253_v34, %v2249_v12 }
 0x3b5   : > { %6608 = vmatprep.subr.bf16.mxu1 %v2416_v1 }
 0x3b6   : > { %v2143_v41 = vpop.f32.mrb[28].mxu0  ;;  %v2256_v43 = vpop.f32.mrb[28].mxu1  ;;  %6609 = vmatpush3.bf16.xpose.msra.mxu1 %v2416_v1  ;;  %6672 = vmatprep.subr.bf16.mxu0 %v2417_v13  ;;  %v1547_v1 = vsub.s32 4, %v9152_v19 }
 0x3b7   : > { %v9508_v35 = vadd.f32 %v2143_v41, %v9363_v60  ;;  %v2145_v58 = vpop.f32.mrb[29].mxu0  ;;  %v2258_v17 = vpop.f32.mrb[29].mxu1  ;;  %6673 = vmatpush3.bf16.xpose.msra.mxu0 %v2417_v13  ;;  %v2257_v55 = vadd.f32 %v2256_v43, %v9368_v54 }
 0x3b8   : > { %v9511_v11 = vadd.f32 %v2145_v58, %v9372_v56  ;;  %v2147_v15 = vpop.f32.mrb[30].mxu0  ;;  %v2260_v7 = vpop.f32.mrb[30].mxu1  ;;  %v2259_v20 = vadd.f32 %v2258_v17, %v9377_v9  ;;  %v9530_v58 = vrot.slane %v9358_v6, %v1547_v1 }
 0x3b9   : > { %v9515_v30 = vadd.f32 %v2147_v15, %v9363_v60  ;;  %v2261_v23 = vadd.f32 %v2260_v7, %v9368_v54  ;;  %v2149_v36 = vpop.f32.mrb[31].mxu0  ;;  %v2262_v39 = vpop.f32.mrb[31].mxu1  ;;  %v1551_v60 = vsub.s32 5, %v9152_v19 }
 0x3ba   : > { %v9520_v12 = vadd.f32 %v2149_v36, %v9372_v56  ;;  %v2263_v34 = vadd.f32 %v2262_v39, %v9377_v9 }
 0x3bb   : > { %v2420_v13 = vpack.c.bf16 %v9515_v30, %v9508_v35  ;;  %v2422_v41 = vpack.c.bf16 %v2261_v23, %v2257_v55  ;;  %v9533_v9 = vrot.slane %v9358_v6, %v1551_v60 }
 0x3bc   : > { %v2421_v54 = vpack.c.bf16 %v9520_v12, %v9511_v11  ;;  %v2423_v43 = vpack.c.bf16 %v2263_v34, %v2259_v20 }
 0x3bd   : > { %6610 = vmatprep.subr.bf16.mxu1 %v2422_v41 }
 0x3be   : > { %6611 = vmatpush3.bf16.xpose.msra.mxu1 %v2422_v41  ;;  %6674 = vmatprep.subr.bf16.mxu0 %v2423_v43 }
 0x3bf   : > { %v2299_v56 = vpop.f32.mrb[32].mxu0  ;;  %6675 = vmatpush3.bf16.xpose.msra.mxu0 %v2423_v43 }
 0x3c0   : > { %v2301_v17 = vpop.f32.mrb[33].mxu0  ;;  %v2300_v7 = vadd.f32 %v2299_v56, %v9530_v58 }
 0x3c1   : > { %v2303_v15 = vpop.f32.mrb[34].mxu0  ;;  %v2302_v36 = vadd.f32 %v2301_v17, %v9533_v9 }
 0x3c2   : > { %v2304_v55 = vadd.f32 %v2303_v15, %v9530_v58  ;;  %v2305_v23 = vpop.f32.mrb[35].mxu0 }
 0x3c3   : > { %v2306_v39 = vadd.f32 %v2305_v23, %v9533_v9 }
 0x3c4   : > { %v2382_v20 = vpack.c.bf16 %v2304_v55, %v2300_v7 }
 0x3c5   : > { %v2383_v34 = vpack.c.bf16 %v2306_v39, %v2302_v36  ;;  %6613 = vmatmul.mubr.bf16.vlgmr.msra.gmra.mrb[32].mxu1 %v2384_v33 }
 0x3c6   : > { %6628 = vmatprep.subr.bf16.mxu1 %v2382_v20  ;;  %6616 = vmatprep.mubr.bf16.mxu1 %v2390_v25 }
 0x3c7   : > { %v2309_v6 = vpop.f32.mrb[36].mxu0  ;;  %6629 = vmatpush3.bf16.msra.mxu1 %v2382_v20  ;;  %6677 = vmatmul.mubr.bf16.vlgmr.msra.gmra.mrb[64].mxu0 %v2385_v48 }
 0x3c8   : > { %6692 = vmatprep.subr.bf16.mxu0 %v2383_v34  ;;  %v2311_v1 = vpop.f32.mrb[37].mxu0  ;;  %6680 = vmatprep.mubr.bf16.mxu0 %v2391_v51  ;;  %v2310_v18 = vadd.f32 %v2309_v6, %v9530_v58 }
 0x3c9   : > { %6693 = vmatpush3.bf16.msra.mxu0 %v2383_v34  ;;  %v2313_v59 = vpop.f32.mrb[38].mxu0  ;;  %v2312_v29 = vadd.f32 %v2311_v1, %v9533_v9 }
 0x3ca   : > { %v2314_v33 = vadd.f32 %v2313_v59, %v9530_v58  ;;  %v2315_v46 = vpop.f32.mrb[39].mxu0 }
 0x3cb   : > { %v2316_v25 = vadd.f32 %v2315_v46, %v9533_v9 }
 0x3cc   : > { %v2388_v41 = vpack.c.bf16 %v2314_v33, %v2310_v18 }
 0x3cd   : > { %v2389_v10 = vpack.c.bf16 %v2316_v25, %v2312_v29  ;;  %6617 = vmatmul.mubr.bf16.gmra.mrb[36].mxu1 %v2396_v21 }
 0x3ce   : > { %6630 = vmatprep.subr.bf16.mxu1 %v2388_v41  ;;  %6620 = vmatprep.mubr.bf16.mxu1 %v2402_v31 }
 0x3cf   : > { %v2319_v45 = vpop.f32.mrb[40].mxu0  ;;  %6631 = vmatpush3.bf16.msra.mxu1 %v2388_v41  ;;  %6681 = vmatmul.mubr.bf16.gmra.mrb[68].mxu0 %v2397_v53 }
 0x3d0   : > { %6694 = vmatprep.subr.bf16.mxu0 %v2389_v10  ;;  %v2321_v48 = vpop.f32.mrb[41].mxu0  ;;  %6684 = vmatprep.mubr.bf16.mxu0 %v2403_v2  ;;  %v2320_v40 = vadd.f32 %v2319_v45, %v9530_v58 }
 0x3d1   : > { %6695 = vmatpush3.bf16.msra.mxu0 %v2389_v10  ;;  %v2323_v14 = vpop.f32.mrb[42].mxu0  ;;  %v2322_v52 = vadd.f32 %v2321_v48, %v9533_v9 }
 0x3d2   : > { %v2324_v51 = vadd.f32 %v2323_v14, %v9530_v58  ;;  %v2325_v42 = vpop.f32.mrb[43].mxu0 }
 0x3d3   : > { %v2326_v21 = vadd.f32 %v2325_v42, %v9533_v9 }
 0x3d4   : > { %v2394_v57 = vpack.c.bf16 %v2324_v51, %v2320_v40 }
 0x3d5   : > { %v2395_v16 = vpack.c.bf16 %v2326_v21, %v2322_v52  ;;  %6621 = vmatmul.mubr.bf16.gmra.mrb[40].mxu1 %v2408_v26 }
 0x3d6   : > { %6632 = vmatprep.subr.bf16.mxu1 %v2394_v57  ;;  %6624 = vmatprep.mubr.bf16.mxu1 %v2414_v27 }
 0x3d7   : > { %v2329_v38 = vpop.f32.mrb[44].mxu0  ;;  %6633 = vmatpush3.bf16.msra.mxu1 %v2394_v57  ;;  %6685 = vmatmul.mubr.bf16.gmra.mrb[72].mxu0 %v2409_v49 }
 0x3d8   : > { %6696 = vmatprep.subr.bf16.mxu0 %v2395_v16  ;;  %v2331_v53 = vpop.f32.mrb[45].mxu0  ;;  %6688 = vmatprep.mubr.bf16.mxu0 %v2415_v5  ;;  %v2330_v61 = vadd.f32 %v2329_v38, %v9530_v58 }
 0x3d9   : > { %6697 = vmatpush3.bf16.msra.mxu0 %v2395_v16  ;;  %v2333_v24 = vpop.f32.mrb[46].mxu0  ;;  %v2332_v2 = vadd.f32 %v2331_v53, %v9533_v9 }
 0x3da   : > { %v2334_v0 = vadd.f32 %v2333_v24, %v9530_v58  ;;  %v2335_v31 = vpop.f32.mrb[47].mxu0 }
 0x3db   : > { %v2336_v44 = vadd.f32 %v2335_v31, %v9533_v9 }
 0x3dc   : > { %v2400_v3 = vpack.c.bf16 %v2334_v0, %v2330_v61 }
 0x3dd   : > { %v2401_v32 = vpack.c.bf16 %v2336_v44, %v2332_v2  ;;  %6625 = vmatmul.mubr.bf16.gmra.mrb[44].mxu1 %v2420_v13 }
 0x3de   : > { %6634 = vmatprep.subr.bf16.mxu1 %v2400_v3 }
 0x3df   : > { %v2339_v28 = vpop.f32.mrb[48].mxu0  ;;  %6635 = vmatpush3.bf16.msra.mxu1 %v2400_v3  ;;  %6689 = vmatmul.mubr.bf16.gmra.mrb[76].mxu0 %v2421_v54 }
 0x3e0   : > { %6698 = vmatprep.subr.bf16.mxu0 %v2401_v32  ;;  %v2341_v26 = vpop.f32.mrb[49].mxu0  ;;  %v2340_v62 = vadd.f32 %v2339_v28, %v9530_v58 }
 0x3e1   : > { %6699 = vmatpush3.bf16.msra.mxu0 %v2401_v32  ;;  %v2343_v49 = vpop.f32.mrb[50].mxu0  ;;  %v2342_v50 = vadd.f32 %v2341_v26, %v9533_v9 }
 0x3e2   : > { %v2344_v4 = vadd.f32 %v2343_v49, %v9530_v58  ;;  %v2345_v47 = vpop.f32.mrb[51].mxu0 }
 0x3e3   : > { %v2346_v27 = vadd.f32 %v2345_v47, %v9533_v9 }
 0x3e4   : > { %v2406_v5 = vpack.c.bf16 %v2344_v4, %v2340_v62 }
 0x3e5   : > { %v2407_v35 = vpack.c.bf16 %v2346_v27, %v2342_v50 }
 0x3e6   : > { %6636 = vmatprep.subr.bf16.mxu1 %v2406_v5 }
 0x3e7   : > { %v2349_v30 = vpop.f32.mrb[52].mxu0  ;;  %6637 = vmatpush3.bf16.msra.mxu1 %v2406_v5  ;;  %6700 = vmatprep.subr.bf16.mxu0 %v2407_v35 }
 0x3e8   : > { %v2351_v11 = vpop.f32.mrb[53].mxu0  ;;  %6701 = vmatpush3.bf16.msra.mxu0 %v2407_v35  ;;  %v2350_v13 = vadd.f32 %v2349_v30, %v9530_v58 }
 0x3e9   : > { %v2353_v12 = vpop.f32.mrb[54].mxu0  ;;  %v2352_v43 = vadd.f32 %v2351_v11, %v9533_v9 }
 0x3ea   : > { %v2354_v60 = vadd.f32 %v2353_v12, %v9530_v58  ;;  %v2355_v54 = vpop.f32.mrb[55].mxu0 }
 0x3eb   : > { %v2356_v56 = vadd.f32 %v2355_v54, %v9533_v9 }
 0x3ec   : > { %v2412_v17 = vpack.c.bf16 %v2354_v60, %v2350_v13 }
 0x3ed   : > { %v2413_v15 = vpack.c.bf16 %v2356_v56, %v2352_v43 }
 0x3ee   : > { %6638 = vmatprep.subr.bf16.mxu1 %v2412_v17 }
 0x3ef   : > { %v2359_v7 = vpop.f32.mrb[56].mxu0  ;;  %6639 = vmatpush3.bf16.msra.mxu1 %v2412_v17  ;;  %6702 = vmatprep.subr.bf16.mxu0 %v2413_v15 }
 0x3f0   : > { %v2361_v55 = vpop.f32.mrb[57].mxu0  ;;  %6703 = vmatpush3.bf16.msra.mxu0 %v2413_v15  ;;  %v2360_v36 = vadd.f32 %v2359_v7, %v9530_v58 }
 0x3f1   : > { %v2363_v23 = vpop.f32.mrb[58].mxu0  ;;  %v2362_v34 = vadd.f32 %v2361_v55, %v9533_v9 }
 0x3f2   : > { %v2364_v39 = vadd.f32 %v2363_v23, %v9530_v58  ;;  %v2365_v20 = vpop.f32.mrb[59].mxu0 }
 0x3f3   : > { %v2366_v6 = vadd.f32 %v2365_v20, %v9533_v9 }
 0x3f4   : > { %v2418_v1 = vpack.c.bf16 %v2364_v39, %v2360_v36 }
 0x3f5   : > { %v2419_v59 = vpack.c.bf16 %v2366_v6, %v2362_v34 }
 0x3f6   : > { %6640 = vmatprep.subr.bf16.mxu1 %v2418_v1 }
 0x3f7   : > { %v2369_v18 = vpop.f32.mrb[60].mxu0  ;;  %6641 = vmatpush3.bf16.msra.mxu1 %v2418_v1  ;;  %6704 = vmatprep.subr.bf16.mxu0 %v2419_v59 }
 0x3f8   : > { %v2371_v33 = vpop.f32.mrb[61].mxu0  ;;  %6705 = vmatpush3.bf16.msra.mxu0 %v2419_v59  ;;  %v2370_v29 = vadd.f32 %v2369_v18, %v9530_v58 }
 0x3f9   : > { %v2373_v46 = vpop.f32.mrb[62].mxu0  ;;  %v2372_v10 = vadd.f32 %v2371_v33, %v9533_v9 }
 0x3fa   : > { %v2374_v25 = vadd.f32 %v2373_v46, %v9530_v58  ;;  %v2375_v41 = vpop.f32.mrb[63].mxu0 }
 0x3fb   : > { %v2376_v45 = vadd.f32 %v2375_v41, %v9533_v9 }
 0x3fc   : > { %v2424_v48 = vpack.c.bf16 %v2374_v25, %v2370_v29 }
 0x3fd   : > { %v2425_v14 = vpack.c.bf16 %v2376_v45, %v2372_v10 }
 0x3fe   : > { %6642 = vmatprep.subr.bf16.mxu1 %v2424_v48 }
 0x3ff   : > { %6643 = vmatpush3.bf16.msra.mxu1 %v2424_v48  ;;  %6706 = vmatprep.subr.bf16.mxu0 %v2425_v14 }
 0x400   : > { %6707 = vmatpush3.bf16.msra.mxu0 %v2425_v14 }
 0x498   : > { %v9609_v40 = vpop.f32.mrb[32].mxu1 }
 0x499   : > { %v9611_v51 = vpop.f32.mrb[33].mxu1 }
 0x49a   : > { %v9613_v42 = vpop.f32.mrb[64].mxu0  ;;  %2523 = vmax.xlane.f32.xlu0 %v9611_v51  ;;  %v9616_v58 = vpop.f32.mrb[34].mxu1 }
 0x49b   : > { %v9618_v52 = vpop.f32.mrb[65].mxu0  ;;  %v9620_v21 = vpop.f32.mrb[35].mxu1 }
 0x49c   : > { %v9622_v9 = vpop.f32.mrb[66].mxu0  ;;  %2525 = vmax.xlane.f32.xlu1 %v9620_v21 }
 0x49d   : > { %v9625_v57 = vpop.f32.mrb[67].mxu0 }
 0x49e   : > { %2873 = vmax.xlane.f32.xlu0 %v9613_v42 }
 0x4a0   : > { %v9628_v16 = vpop.f32.mrb[36].mxu1  ;;  %2875 = vmax.xlane.f32.xlu1 %v9622_v9 }
 0x4a1   : > { %v9631_v38 = vpop.f32.mrb[37].mxu1 }
 0x4a2   : > { %v9633_v53 = vpop.f32.mrb[68].mxu0  ;;  %v9635_v24 = vpop.f32.mrb[38].mxu1  ;;  %2869 = vmax.xlane.f32.xlu0 %v9618_v52 }
 0x4a3   : > { %v9638_v61 = vpop.f32.mrb[69].mxu0  ;;  %v9640_v0 = vpop.f32.mrb[39].mxu1 }
 0x4a4   : > { %v9642_v31 = vpop.f32.mrb[70].mxu0  ;;  %2871 = vmax.xlane.f32.xlu1 %v9625_v57 }
 0x4a5   : > { %v9645_v2 = vpop.f32.mrb[71].mxu0 }
 0x4a6   : > { %2527 = vmax.xlane.f32.xlu0 %v9609_v40 }
 0x4a8   : > { %v9648_v44 = vpop.f32.mrb[40].mxu1  ;;  %2529 = vmax.xlane.f32.xlu1 %v9616_v58 }
 0x4a9   : > { %v9651_v3 = vpop.f32.mrb[41].mxu1 }
 0x4aa   : > { %v9653_v32 = vpop.f32.mrb[72].mxu0  ;;  %v9655_v28 = vpop.f32.mrb[42].mxu1  ;;  %2531 = vmax.xlane.f32.xlu0 %v9631_v38 }
 0x4ab   : > { %v9658_v26 = vpop.f32.mrb[73].mxu0  ;;  %v9660_v49 = vpop.f32.mrb[43].mxu1 }
 0x4ac   : > { %v9662_v62 = vpop.f32.mrb[74].mxu0  ;;  %2533 = vmax.xlane.f32.xlu1 %v9640_v0 }
 0x4ad   : > { %v9665_v4 = vpop.f32.mrb[75].mxu0 }
 0x4ae   : > { %2881 = vmax.xlane.f32.xlu0 %v9633_v53 }
 0x4b0   : > { %2883 = vmax.xlane.f32.xlu1 %v9642_v31  ;;  %v9669_v47 = vpop.f32.mrb[44].mxu1 }
 0x4b1   : > { %v9671_v50 = vpop.f32.mrb[45].mxu1 }
 0x4b2   : > { %v9673_v27 = vpop.f32.mrb[76].mxu0  ;;  %2877 = vmax.xlane.f32.xlu0 %v9638_v61  ;;  %v9676_v5 = vpop.f32.mrb[46].mxu1 }
 0x4b3   : > { %v9678_v35 = vpop.f32.mrb[77].mxu0  ;;  %v9680_v30 = vpop.f32.mrb[47].mxu1 }
 0x4b4   : > { %v9682_v11 = vpop.f32.mrb[78].mxu0  ;;  %2879 = vmax.xlane.f32.xlu1 %v9645_v2 }
 0x4b5   : > { %v9685_v12 = vpop.f32.mrb[79].mxu0 }
 0x4b6   : > { %2535 = vmax.xlane.f32.xlu0 %v9628_v16 }
 0x4b8   : > { %2537 = vmax.xlane.f32.xlu1 %v9635_v24 }
 0x4ba   : > { %2539 = vmax.xlane.f32.xlu0 %v9651_v3 }
 0x4bc   : > { %2541 = vmax.xlane.f32.xlu1 %v9660_v49 }
 0x4be   : > { %2889 = vmax.xlane.f32.xlu0 %v9653_v32 }
 0x4c0   : > { %2891 = vmax.xlane.f32.xlu1 %v9662_v62 }
 0x4c2   : > { %2885 = vmax.xlane.f32.xlu0 %v9658_v26 }
 0x4c4   : > { %2887 = vmax.xlane.f32.xlu1 %v9665_v4 }
 0x4c6   : > { %2543 = vmax.xlane.f32.xlu0 %v9648_v44 }
 0x4c8   : > { %2545 = vmax.xlane.f32.xlu1 %v9655_v28 }
 0x4ca   : > { %2547 = vmax.xlane.f32.xlu0 %v9671_v50 }
 0x4cc   : > { %2549 = vmax.xlane.f32.xlu1 %v9680_v30 }
 0x4ce   : > { %2897 = vmax.xlane.f32.xlu0 %v9673_v27 }
 0x4d0   : > { %2899 = vmax.xlane.f32.xlu1 %v9682_v11 }
 0x4d2   : > { %2893 = vmax.xlane.f32.xlu0 %v9678_v35 }
 0x4d4   : > { %2895 = vmax.xlane.f32.xlu1 %v9685_v12 }
 0x4d6   : > { %2551 = vmax.xlane.f32.xlu0 %v9669_v47 }
 0x4d8   : > { %2553 = vmax.xlane.f32.xlu1 %v9676_v5 }
 0x527   : > { %v2524_v13 = vpop.xlane.xlu0 %2523 }
 0x528   : > { %v2555_v60 = vsub.f32 %v9611_v51, %v2524_v13 }
 0x529   : > { %v2526_v54 = vpop.xlane.xlu1 %2525 }
 0x52a   : > { %v2571_v43 = vmul.f32 1.442695, %v2555_v60  ;;  %v2556_v56 = vsub.f32 %v9620_v21, %v2526_v54 }
 0x52b   : > { %v2874_v17 = vpop.xlane.xlu0 %2873 }
 0x52c   : > { %v2573_v15 = vmul.f32 1.442695, %v2556_v56  ;;  %v2903_v7 = vsub.f32 %v9613_v42, %v2874_v17  ;;  %7375 = vpow2.f32 %v2571_v43 }
 0x52d   : > { %v2876_v55 = vpop.xlane.xlu1 %2875 }
 0x52e   : > { %7377 = vpow2.f32 %v2573_v15  ;;  %v2921_v23 = vmul.f32 1.442695, %v2903_v7  ;;  %v2904_v36 = vsub.f32 %v9622_v9, %v2876_v55 }
 0x52f   : > { %v2870_v39 = vpop.xlane.xlu0 %2869 }
 0x530   : > { %v2923_v20 = vmul.f32 1.442695, %v2904_v36  ;;  %v2901_v34 = vsub.f32 %v9618_v52, %v2870_v39  ;;  %7379 = vpow2.f32 %v2921_v23 }
 0x531   : > { %v2872_v6 = vpop.xlane.xlu1 %2871 }
 0x532   : > { %7381 = vpow2.f32 %v2923_v20  ;;  %v2917_v1 = vmul.f32 1.442695, %v2901_v34  ;;  %v2902_v59 = vsub.f32 %v9625_v57, %v2872_v6 }
 0x533   : > { %v2528_v18 = vpop.xlane.xlu0 %2527 }
 0x534   : > { %7383 = vpow2.f32 %v2917_v1  ;;  %v2919_v33 = vmul.f32 1.442695, %v2902_v59  ;;  %v2557_v46 = vsub.f32 %v9609_v40, %v2528_v18 }
 0x535   : > { %v2530_v29 = vpop.xlane.xlu1 %2529 }
 0x536   : > { %7385 = vpow2.f32 %v2919_v33  ;;  %v2575_v25 = vmul.f32 1.442695, %v2557_v46  ;;  %v2558_v41 = vsub.f32 %v9616_v58, %v2530_v29  ;;  %v7376_v10 = vpop.eup %7375 }
 0x537   : > { %v2532_v45 = vpop.xlane.xlu0 %2531 }
 0x538   : > { %v7378_v48 = vpop.eup %7377  ;;  %v2577_v14 = vmul.f32 1.442695, %v2558_v41  ;;  %v2559_v51 = vsub.f32 %v9631_v38, %v2532_v45  ;;  %7387 = vpow2.f32 %v2575_v25 }
 0x539   : > { %v2534_v42 = vpop.xlane.xlu1 %2533  ;;  %v2635_v52 = vpack.c.bf16 %v7378_v48, %v7376_v10 }
 0x53a   : > { %7389 = vpow2.f32 %v2577_v14  ;;  %v2579_v21 = vmul.f32 1.442695, %v2559_v51  ;;  %v2560_v9 = vsub.f32 %v9640_v0, %v2534_v42  ;;  %v7380_v57 = vpop.eup %7379 }
 0x53b   : > { %v2882_v40 = vpop.xlane.xlu0 %2881  ;;  %6644 = vmatprep.mubr.bf16.mxu1 %v2635_v52 }
 0x53c   : > { %v7382_v13 = vpop.eup %7381  ;;  %v2581_v60 = vmul.f32 1.442695, %v2560_v9  ;;  %v2907_v58 = vsub.f32 %v9633_v53, %v2882_v40  ;;  %7391 = vpow2.f32 %v2579_v21 }
 0x53d   : > { %v2884_v54 = vpop.xlane.xlu1 %2883  ;;  %v2982_v43 = vpack.c.bf16 %v7382_v13, %v7380_v57 }
 0x53e   : > { %v7384_v56 = vpop.eup %7383  ;;  %7393 = vpow2.f32 %v2581_v60  ;;  %v2929_v38 = vmul.f32 1.442695, %v2907_v58  ;;  %v2908_v17 = vsub.f32 %v9642_v31, %v2884_v54 }
 0x53f   : > { %v2878_v15 = vpop.xlane.xlu0 %2877  ;;  %2949 = vadd.xlane.f32.xlu0 %v7384_v56 }
 0x540   : > { %v7386_v7 = vpop.eup %7385  ;;  %v2931_v55 = vmul.f32 1.442695, %v2908_v17  ;;  %v2905_v0 = vsub.f32 %v9638_v61, %v2878_v15  ;;  %7395 = vpow2.f32 %v2929_v38 }
 0x541   : > { %v2880_v23 = vpop.xlane.xlu1 %2879  ;;  %2951 = vadd.xlane.f32.xlu1 %v7386_v7  ;;  %v2981_v36 = vpack.c.bf16 %v7386_v7, %v7384_v56 }
 0x542   : > { %7397 = vpow2.f32 %v2931_v55  ;;  %v2925_v53 = vmul.f32 1.442695, %v2905_v0  ;;  %v2906_v39 = vsub.f32 %v9645_v2, %v2880_v23  ;;  %v7388_v20 = vpop.eup %7387 }
 0x543   : > { %v2536_v34 = vpop.xlane.xlu0 %2535  ;;  %6708 = vmatprep.mubr.bf16.mxu0 %v2981_v36  ;;  %2603 = vadd.xlane.f32.xlu0 %v7376_v10 }
 0x544   : > { %v7390_v6 = vpop.eup %7389  ;;  %7399 = vpow2.f32 %v2925_v53  ;;  %v2927_v31 = vmul.f32 1.442695, %v2906_v39  ;;  %v2561_v1 = vsub.f32 %v9628_v16, %v2536_v34  ;;  %6709 = vmatmul.mubr.bf16.vlgmr.msra.gmra.mrb[80].mxu0 %v2982_v43 }
 0x545   : > { %v2538_v59 = vpop.xlane.xlu1 %2537  ;;  %2605 = vadd.xlane.f32.xlu1 %v7378_v48  ;;  %v2636_v61 = vpack.c.bf16 %v7390_v6, %v7388_v20 }
 0x546   : > { %7401 = vpow2.f32 %v2927_v31  ;;  %v2583_v18 = vmul.f32 1.442695, %v2561_v1  ;;  %v2562_v33 = vsub.f32 %v9635_v24, %v2538_v59  ;;  %v7392_v46 = vpop.eup %7391 }
 0x547   : > { %v2540_v29 = vpop.xlane.xlu0 %2539  ;;  %6645 = vmatmul.mubr.bf16.vlgmr.msra.gmra.mrb[48].mxu1 %v2636_v61  ;;  %2953 = vadd.xlane.f32.xlu0 %v7380_v57 }
 0x548   : > { %v7394_v2 = vpop.eup %7393  ;;  %v2585_v25 = vmul.f32 1.442695, %v2562_v33  ;;  %v2563_v41 = vsub.f32 %v9651_v3, %v2540_v29  ;;  %7403 = vpow2.f32 %v2583_v18 }
 0x549   : > { %v2542_v10 = vpop.xlane.xlu1 %2541  ;;  %2955 = vadd.xlane.f32.xlu1 %v7382_v13  ;;  %v2637_v16 = vpack.c.bf16 %v7394_v2, %v7392_v46 }
 0x54a   : > { %7405 = vpow2.f32 %v2585_v25  ;;  %v2587_v45 = vmul.f32 1.442695, %v2563_v41  ;;  %v2564_v48 = vsub.f32 %v9660_v49, %v2542_v10  ;;  %v7396_v14 = vpop.eup %7395 }
 0x54b   : > { %v2890_v51 = vpop.xlane.xlu0 %2889  ;;  %6648 = vmatprep.mubr.bf16.mxu1 %v2637_v16  ;;  %2607 = vadd.xlane.f32.xlu0 %v7388_v20 }
 0x54c   : > { %v7398_v24 = vpop.eup %7397  ;;  %v2589_v42 = vmul.f32 1.442695, %v2564_v48  ;;  %v2911_v52 = vsub.f32 %v9653_v32, %v2890_v51  ;;  %7407 = vpow2.f32 %v2587_v45  ;;  %v7103_v45 = vld [vmem:[%s8715_s9] ss:$8 sps:$4 sm:$0xff]   ;;  %v7105_v48 = vld [vmem:[%s8715_s9 + $0x4] ss:$8 sps:$4 sm:$0xff]  }
 0x54d   : > { %v2892_v21 = vpop.xlane.xlu1 %2891  ;;  %2609 = vadd.xlane.f32.xlu1 %v7390_v6  ;;  %v2984_v3 = vpack.c.bf16 %v7398_v24, %v7396_v14  ;;  %3338 = vmatprep.subr.bf16.mxu0 %v7105_v48 }
 0x54e   : > { %v7400_v9 = vpop.eup %7399  ;;  %7409 = vpow2.f32 %v2589_v42  ;;  %v2937_v57 = vmul.f32 1.442695, %v2911_v52  ;;  %v2912_v40 = vsub.f32 %v9662_v62, %v2892_v21  ;;  %3339 = vmatpush1.bf16.msra.mxu0 %v7103_v45 }
 0x54f   : > { %v2886_v13 = vpop.xlane.xlu0 %2885  ;;  %2957 = vadd.xlane.f32.xlu0 %v7400_v9 }
 0x550   : > { %v7402_v49 = vpop.eup %7401  ;;  %v2939_v60 = vmul.f32 1.442695, %v2912_v40  ;;  %v2909_v58 = vsub.f32 %v9658_v26, %v2886_v13  ;;  %7411 = vpow2.f32 %v2937_v57 }
 0x551   : > { %v2888_v54 = vpop.xlane.xlu1 %2887  ;;  %2959 = vadd.xlane.f32.xlu1 %v7402_v49  ;;  %v2983_v43 = vpack.c.bf16 %v7402_v49, %v7400_v9  ;;  %v7106_v9 = vld [vmem:[%s8715_s9 + $0x10] ss:$8 sps:$4 sm:$0xff]  }
 0x552   : > { %7413 = vpow2.f32 %v2939_v60  ;;  %v2933_v32 = vmul.f32 1.442695, %v2909_v58  ;;  %v2910_v56 = vsub.f32 %v9665_v4, %v2888_v54  ;;  %v7404_v38 = vpop.eup %7403  ;;  %v7109_v58 = vld [vmem:[%s8715_s9 + $0x20] ss:$8 sps:$4 sm:$0xff]   ;;  %v7111_v54 = vld [vmem:[%s8715_s9 + $0x24] ss:$8 sps:$4 sm:$0xff]  }
 0x553   : > { %v2544_v17 = vpop.xlane.xlu0 %2543  ;;  %6712 = vmatprep.mubr.bf16.mxu0 %v2983_v43  ;;  %2611 = vadd.xlane.f32.xlu0 %v7392_v46 }
 0x554   : > { %v7406_v15 = vpop.eup %7405  ;;  %7415 = vpow2.f32 %v2933_v32  ;;  %v2935_v62 = vmul.f32 1.442695, %v2910_v56  ;;  %v2565_v7 = vsub.f32 %v9648_v44, %v2544_v17  ;;  %6713 = vmatmul.mubr.bf16.gmra.mrb[84].mxu0 %v2984_v3  ;;  %v7112_v56 = vld [vmem:[%s8715_s9 + $0x30] ss:$8 sps:$4 sm:$0xff]  }
 0x555   : > { %v2546_v55 = vpop.xlane.xlu1 %2545  ;;  %2613 = vadd.xlane.f32.xlu1 %v7394_v2  ;;  %v2638_v26 = vpack.c.bf16 %v7406_v15, %v7404_v38 }
 0x556   : > { %7417 = vpow2.f32 %v2935_v62  ;;  %v2591_v0 = vmul.f32 1.442695, %v2565_v7  ;;  %v2566_v23 = vsub.f32 %v9655_v28, %v2546_v55  ;;  %v7408_v36 = vpop.eup %7407  ;;  %v7115_v7 = vld [vmem:[%s8715_s9 + $0x40] ss:$8 sps:$4 sm:$0xff]   ;;  %v7117_v55 = vld [vmem:[%s8715_s9 + $0x44] ss:$8 sps:$4 sm:$0xff]  }
 0x557   : > { %6649 = vmatmul.mubr.bf16.gmra.mrb[52].mxu1 %v2638_v26  ;;  %2961 = vadd.xlane.f32.xlu0 %v7396_v14  ;;  %v2548_v4 = vpop.xlane.xlu0 %2547 }
 0x558   : > { %v7410_v53 = vpop.eup %7409  ;;  %v2593_v39 = vmul.f32 1.442695, %v2566_v23  ;;  %v2567_v20 = vsub.f32 %v9671_v50, %v2548_v4  ;;  %7419 = vpow2.f32 %v2591_v0  ;;  %v7120_v4 = vld [vmem:[%s8715_s9 + $0x54] ss:$8 sps:$4 sm:$0xff]  }
 0x559   : > { %2963 = vadd.xlane.f32.xlu1 %v7398_v24  ;;  %v2550_v34 = vpop.xlane.xlu1 %2549  ;;  %v2639_v44 = vpack.c.bf16 %v7410_v53, %v7408_v36 }
 0x55a   : > { %7421 = vpow2.f32 %v2593_v39  ;;  %v2595_v6 = vmul.f32 1.442695, %v2567_v20  ;;  %v2568_v31 = vsub.f32 %v9680_v30, %v2550_v34  ;;  %v7412_v1 = vpop.eup %7411  ;;  %v7123_v39 = vld [vmem:[%s8715_s9 + $0x64] ss:$8 sps:$4 sm:$0xff]   ;;  %v7124_v20 = vld [vmem:[%s8715_s9 + $0x70] ss:$8 sps:$4 sm:$0xff]  }
 0x55b   : > { %6652 = vmatprep.mubr.bf16.mxu1 %v2639_v44  ;;  %2615 = vadd.xlane.f32.xlu0 %v7404_v38  ;;  %v2898_v28 = vpop.xlane.xlu0 %2897  ;;  %v7114_v38 = vld [vmem:[%s8715_s9 + $0x34] ss:$8 sps:$4 sm:$0xff]   ;;  %v7127_v44 = vld [vmem:[%s8715_s9 + $0x80] ss:$8 sps:$4 sm:$0xff]  }
 0x55c   : > { %v7414_v59 = vpop.eup %7413  ;;  %v2597_v61 = vmul.f32 1.442695, %v2568_v31  ;;  %v2915_v18 = vsub.f32 %v9673_v27, %v2898_v28  ;;  %7423 = vpow2.f32 %v2595_v6  ;;  %v7126_v34 = vld [vmem:[%s8715_s9 + $0x74] ss:$8 sps:$4 sm:$0xff]   ;;  %v7129_v6 = vld [vmem:[%s8715_s9 + $0x84] ss:$8 sps:$4 sm:$0xff]  }
 0x55d   : > { %2617 = vadd.xlane.f32.xlu1 %v7406_v15  ;;  %v2900_v50 = vpop.xlane.xlu1 %2899  ;;  %v2986_v33 = vpack.c.bf16 %v7414_v59, %v7412_v1  ;;  %v7130_v31 = vld [vmem:[%s8715_s9 + $0x90] ss:$8 sps:$4 sm:$0xff]   ;;  %v7133_v28 = vld [vmem:[%s8715_s9 + $0xa0] ss:$8 sps:$4 sm:$0xff]  }
 0x55e   : > { %v7416_v46 = vpop.eup %7415  ;;  %7425 = vpow2.f32 %v2597_v61  ;;  %v2945_v29 = vmul.f32 1.442695, %v2915_v18  ;;  %v2916_v2 = vsub.f32 %v9682_v11, %v2900_v50  ;;  %v7138_v61 = vld [vmem:[%s8715_s9 + $0xb4] ss:$8 sps:$4 sm:$0xff]   ;;  %v7136_v18 = vld [vmem:[%s8715_s9 + $0xb0] ss:$8 sps:$4 sm:$0xff]  }
 0x55f   : > { %2965 = vadd.xlane.f32.xlu0 %v7416_v46  ;;  %v2894_v30 = vpop.xlane.xlu0 %2893  ;;  %v7141_v50 = vld [vmem:[%s8715_s9 + $0xc4] ss:$8 sps:$4 sm:$0xff]  }
 0x560   : > { %v7418_v25 = vpop.eup %7417  ;;  %v2947_v41 = vmul.f32 1.442695, %v2916_v2  ;;  %v2913_v10 = vsub.f32 %v9678_v35, %v2894_v30  ;;  %7427 = vpow2.f32 %v2945_v29  ;;  %v7142_v29 = vld [vmem:[%s8715_s9 + $0xd0] ss:$8 sps:$4 sm:$0xff]   ;;  %v7145_v2 = vld [vmem:[%s8715_s9 + $0xe0] ss:$8 sps:$4 sm:$0xff]  }
 0x561   : > { %2967 = vadd.xlane.f32.xlu1 %v7418_v25  ;;  %v2896_v27 = vpop.xlane.xlu1 %2895  ;;  %v2985_v16 = vpack.c.bf16 %v7418_v25, %v7416_v46  ;;  %v7144_v46 = vld [vmem:[%s8715_s9 + $0xd4] ss:$8 sps:$4 sm:$0xff]   ;;  %v7147_v30 = vld [vmem:[%s8715_s9 + $0xe4] ss:$8 sps:$4 sm:$0xff]   ;;  %v7148_v25 = vld [vmem:[%s8715_s9 + $0xf0] ss:$8 sps:$4 sm:$0xff]  }
 0x562   : > { %7429 = vpow2.f32 %v2947_v41  ;;  %v2941_v14 = vmul.f32 1.442695, %v2913_v10  ;;  %v2914_v51 = vsub.f32 %v9685_v12, %v2896_v27  ;;  %v7420_v24 = vpop.eup %7419  ;;  %v7108_v12 = vld [vmem:[%s8715_s9 + $0x14] ss:$8 sps:$4 sm:$0xff]  }
 0x563   : > { %6716 = vmatprep.mubr.bf16.mxu0 %v2985_v16  ;;  %2619 = vadd.xlane.f32.xlu0 %v7408_v36  ;;  %v2552_v11 = vpop.xlane.xlu0 %2551  ;;  %v7118_v36 = vld [vmem:[%s8715_s9 + $0x50] ss:$8 sps:$4 sm:$0xff]   ;;  %v7150_v41 = vld [vmem:[%s8715_s9 + $0xf4] ss:$8 sps:$4 sm:$0xff]  }
 0x564   : > { %v7422_v42 = vpop.eup %7421  ;;  %7431 = vpow2.f32 %v2941_v14  ;;  %v2943_v52 = vmul.f32 1.442695, %v2914_v51  ;;  %v2569_v35 = vsub.f32 %v9669_v47, %v2552_v11  ;;  %6717 = vmatmul.mubr.bf16.gmra.mrb[88].mxu0 %v2986_v33  ;;  %3340 = vmatprep.subr.bf16.mxu0 %v7108_v12  ;;  %v7139_v33 = vld [vmem:[%s8715_s9 + $0xc0] ss:$8 sps:$4 sm:$0xff]  }
 0x565   : > { %2621 = vadd.xlane.f32.xlu1 %v7410_v53  ;;  %v2554_v21 = vpop.xlane.xlu1 %2553  ;;  %v2640_v3 = vpack.c.bf16 %v7422_v42, %v7420_v24  ;;  %3341 = vmatpush1.bf16.msra.mxu0 %v7106_v9  ;;  %v7121_v53 = vld [vmem:[%s8715_s9 + $0x60] ss:$8 sps:$4 sm:$0xff]  }
 0x566   : > { %7433 = vpow2.f32 %v2943_v52  ;;  %v2599_v57 = vmul.f32 1.442695, %v2569_v35  ;;  %v2570_v40 = vsub.f32 %v9676_v5, %v2554_v21  ;;  %v7424_v13 = vpop.eup %7423  ;;  %3342 = vmatprep.subr.bf16.mxu0 %v7111_v54 }
 0x567   : > { %6653 = vmatmul.mubr.bf16.gmra.mrb[56].mxu1 %v2640_v3  ;;  %2969 = vadd.xlane.f32.xlu0 %v7412_v1  ;;  %v7132_v1 = vld [vmem:[%s8715_s9 + $0x94] ss:$8 sps:$4 sm:$0xff]  }
 0x568   : > { %v7426_v49 = vpop.eup %7425  ;;  %v2601_v60 = vmul.f32 1.442695, %v2570_v40  ;;  %7435 = vpow2.f32 %v2599_v57 }
 0x569   : > { %2971 = vadd.xlane.f32.xlu1 %v7414_v59  ;;  %v2641_v47 = vpack.c.bf16 %v7426_v49, %v7424_v13  ;;  %3343 = vmatpush1.bf16.msra.mxu0 %v7109_v58  ;;  %v7135_v59 = vld [vmem:[%s8715_s9 + $0xa4] ss:$8 sps:$4 sm:$0xff]  }
 0x56a   : > { %7437 = vpow2.f32 %v2601_v60  ;;  %v7428_v43 = vpop.eup %7427  ;;  %3344 = vmatprep.subr.bf16.mxu0 %v7114_v38 }
 0x56b   : > { %2623 = vadd.xlane.f32.xlu0 %v7420_v24  ;;  %6656 = vmatprep.mubr.bf16.mxu1 %v2641_v47 }
 0x56c   : > { %v7430_v5 = vpop.eup %7429 }
 0x56d   : > { %2625 = vadd.xlane.f32.xlu1 %v7422_v42  ;;  %v2988_v32 = vpack.c.bf16 %v7430_v5, %v7428_v43  ;;  %3345 = vmatpush1.bf16.msra.mxu0 %v7112_v56 }
 0x56e   : > { %v7432_v17 = vpop.eup %7431  ;;  %3346 = vmatprep.subr.bf16.mxu0 %v7117_v55 }
 0x56f   : > { %2973 = vadd.xlane.f32.xlu0 %v7432_v17 }
 0x570   : > { %v7434_v15 = vpop.eup %7433 }
 0x571   : > { %2975 = vadd.xlane.f32.xlu1 %v7434_v15  ;;  %v2987_v62 = vpack.c.bf16 %v7434_v15, %v7432_v17  ;;  %3347 = vmatpush1.bf16.msra.mxu0 %v7115_v7 }
 0x572   : > { %v7436_v26 = vpop.eup %7435  ;;  %3348 = vmatprep.subr.bf16.mxu0 %v7120_v4 }
 0x573   : > { %2627 = vadd.xlane.f32.xlu0 %v7424_v13  ;;  %6720 = vmatprep.mubr.bf16.mxu0 %v2987_v62 }
 0x574   : > { %v7438_v0 = vpop.eup %7437  ;;  %6721 = vmatmul.mubr.bf16.gmra.mrb[92].mxu0 %v2988_v32 }
 0x575   : > { %2629 = vadd.xlane.f32.xlu1 %v7426_v49  ;;  %v2642_v23 = vpack.c.bf16 %v7438_v0, %v7436_v26  ;;  %3349 = vmatpush1.bf16.msra.mxu0 %v7118_v36 }
 0x576   : > { %3350 = vmatprep.subr.bf16.mxu0 %v7123_v39 }
 0x577   : > { %2977 = vadd.xlane.f32.xlu0 %v7428_v43  ;;  %6657 = vmatmul.mubr.bf16.gmra.mrb[60].mxu1 %v2642_v23 }
 0x579   : > { %2979 = vadd.xlane.f32.xlu1 %v7430_v5  ;;  %3351 = vmatpush1.bf16.msra.mxu0 %v7121_v53 }
 0x57a   : > { %3352 = vmatprep.subr.bf16.mxu0 %v7126_v34 }
 0x57b   : > { %2631 = vadd.xlane.f32.xlu0 %v7436_v26 }
 0x57d   : > { %2633 = vadd.xlane.f32.xlu1 %v7438_v0  ;;  %3353 = vmatpush1.bf16.msra.mxu0 %v7124_v20 }
 0x57e   : > { %3354 = vmatprep.subr.bf16.mxu0 %v7129_v6 }
 0x581   : > { %3355 = vmatpush1.bf16.msra.mxu0 %v7127_v44 }
 0x582   : > { %3356 = vmatprep.subr.bf16.mxu0 %v7132_v1 }
 0x585   : > { %3357 = vmatpush1.bf16.msra.mxu0 %v7130_v31 }
 0x586   : > { %3358 = vmatprep.subr.bf16.mxu0 %v7135_v59 }
 0x589   : > { %3359 = vmatpush1.bf16.msra.mxu0 %v7133_v28 }
 0x58a   : > { %3360 = vmatprep.subr.bf16.mxu0 %v7138_v61 }
 0x58d   : > { %3361 = vmatpush1.bf16.msra.mxu0 %v7136_v18 }
 0x58e   : > { %3362 = vmatprep.subr.bf16.mxu0 %v7141_v50 }
 0x591   : > { %3363 = vmatpush1.bf16.msra.mxu0 %v7139_v33 }
 0x592   : > { %3364 = vmatprep.subr.bf16.mxu0 %v7144_v46 }
 0x595   : > { %3365 = vmatpush1.bf16.msra.mxu0 %v7142_v29 }
 0x596   : > { %3366 = vmatprep.subr.bf16.mxu0 %v7147_v30 }
 0x599   : > { %3367 = vmatpush1.bf16.msra.mxu0 %v7145_v2 }
 0x59a   : > { %3368 = vmatprep.subr.bf16.mxu0 %v7150_v41 }
 0x59d   : > { %3369 = vmatpush1.bf16.msra.mxu0 %v7148_v25 }
 0x5cc   : > { %v2950_v10 = vpop.xlane.xlu0 %2949 }
 0x5cd   : > { %7439 = vrcp.f32 %v2950_v10 }
 0x5ce   : > { %v2952_v27 = vpop.xlane.xlu1 %2951 }
 0x5cf   : > { %7441 = vrcp.f32 %v2952_v27 }
 0x5d0   : > { %v2604_v16 = vpop.xlane.xlu0 %2603 }
 0x5d2   : > { %v2606_v45 = vpop.xlane.xlu1 %2605 }
 0x5d4   : > { %v2954_v48 = vpop.xlane.xlu0 %2953 }
 0x5d5   : > { %7443 = vrcp.f32 %v2954_v48 }
 0x5d6   : > { %v2956_v14 = vpop.xlane.xlu1 %2955 }
 0x5d7   : > { %7445 = vrcp.f32 %v2956_v14  ;;  %v7440_v13 = vpop.eup %7439 }
 0x5d8   : > { %v2608_v51 = vpop.xlane.xlu0 %2607  ;;  %7447 = vrcp.f32 %v2604_v16 }
 0x5d9   : > { %7449 = vrcp.f32 %v2608_v51  ;;  %v7442_v49 = vpop.eup %7441 }
 0x5da   : > { %v2610_v24 = vpop.xlane.xlu1 %2609 }
 0x5db   : > { %7451 = vrcp.f32 %v2610_v24 }
 0x5dc   : > { %v2958_v11 = vpop.xlane.xlu0 %2957  ;;  %7453 = vrcp.f32 %v2606_v45 }
 0x5dd   : > { %7455 = vrcp.f32 %v2958_v11 }
 0x5de   : > { %v2960_v42 = vpop.xlane.xlu1 %2959 }
 0x5df   : > { %v7444_v47 = vpop.eup %7443  ;;  %7457 = vrcp.f32 %v2960_v42 }
 0x5e0   : > { %v2612_v52 = vpop.xlane.xlu0 %2611 }
 0x5e1   : > { %v7446_v54 = vpop.eup %7445 }
 0x5e2   : > { %v2614_v35 = vpop.xlane.xlu1 %2613  ;;  %v7448_v32 = vpop.eup %7447 }
 0x5e3   : > { %v7450_v62 = vpop.eup %7449 }
 0x5e4   : > { %v2962_v21 = vpop.xlane.xlu0 %2961 }
 0x5e5   : > { %v7452_v23 = vpop.eup %7451  ;;  %7459 = vrcp.f32 %v2962_v21 }
 0x5e6   : > { %v2964_v3 = vpop.xlane.xlu1 %2963  ;;  %v7454_v53 = vpop.eup %7453 }
 0x5e7   : > { %7461 = vrcp.f32 %v2964_v3  ;;  %v7456_v18 = vpop.eup %7455 }
 0x5e8   : > { %v2616_v9 = vpop.xlane.xlu0 %2615  ;;  %7463 = vrcp.f32 %v2612_v52 }
 0x5e9   : > { %7465 = vrcp.f32 %v2616_v9  ;;  %v7458_v33 = vpop.eup %7457 }
 0x5ea   : > { %v2618_v12 = vpop.xlane.xlu1 %2617 }
 0x5eb   : > { %7467 = vrcp.f32 %v2618_v12 }
 0x5ec   : > { %v9769_v57 = vpop.xlane.xlu0 %2965  ;;  %7469 = vrcp.f32 %v2614_v35 }
 0x5ed   : > { %7471 = vrcp.f32 %v9769_v57 }
 0x5ee   : > { %v9771_v40 = vpop.xlane.xlu1 %2967 }
 0x5ef   : > { %v7460_v2 = vpop.eup %7459  ;;  %7473 = vrcp.f32 %v9771_v40 }
 0x5f0   : > { %v9773_v43 = vpop.xlane.xlu0 %2619 }
 0x5f1   : > { %v7462_v25 = vpop.eup %7461 }
 0x5f2   : > { %v9775_v7 = vpop.xlane.xlu1 %2621  ;;  %v7464_v10 = vpop.eup %7463 }
 0x5f3   : > { %v7466_v14 = vpop.eup %7465 }
 0x5f4   : > { %v2970_v28 = vpop.xlane.xlu0 %2969 }
 0x5f5   : > { %v7468_v42 = vpop.eup %7467  ;;  %7475 = vrcp.f32 %v2970_v28 }
 0x5f6   : > { %v2972_v61 = vpop.xlane.xlu1 %2971  ;;  %v7470_v3 = vpop.eup %7469 }
 0x5f7   : > { %7477 = vrcp.f32 %v2972_v61 }
 0x5f8   : > { %v2624_v50 = vpop.xlane.xlu0 %2623  ;;  %7479 = vrcp.f32 %v9773_v43 }
 0x5f9   : > { %7481 = vrcp.f32 %v2624_v50 }
 0x5fa   : > { %v2626_v46 = vpop.xlane.xlu1 %2625 }
 0x5fb   : > { %7483 = vrcp.f32 %v2626_v46 }
 0x5fc   : > { %v2974_v52 = vpop.xlane.xlu0 %2973  ;;  %7485 = vrcp.f32 %v9775_v7 }
 0x5fd   : > { %7487 = vrcp.f32 %v2974_v52 }
 0x5fe   : > { %v2976_v9 = vpop.xlane.xlu1 %2975 }
 0x5ff   : > { %7489 = vrcp.f32 %v2976_v9 }
 0x602   : > { %v2630_v40 = vpop.xlane.xlu1 %2629 }
 0x617   : > { %v6710_v60 = vpop.f32.mrb[80].mxu0 }
 0x618   : > { %v3023_v58 = vpop.f32.mrb[81].mxu0  ;;  %v3104_v56 = vmul.f32 %v7444_v47, %v6710_v60 }
 0x619   : > { %v6711_v5 = vpop.f32.mrb[82].mxu0  ;;  %v3102_v55 = vmul.f32 %v7440_v13, %v3023_v58 }
 0x61a   : > { %v3105_v38 = vmul.f32 %v7446_v54, %v6711_v5  ;;  %v6646_v17 = vpop.f32.mrb[48].mxu1  ;;  %v3026_v15 = vpop.f32.mrb[83].mxu0 }
 0x61b   : > { %v3103_v26 = vmul.f32 %v7442_v49, %v3026_v15  ;;  %v2677_v0 = vpop.f32.mrb[49].mxu1  ;;  %v2758_v39 = vmul.f32 %v7450_v62, %v6646_v17  ;;  %v2628_v5 = vpop.xlane.xlu0 %2627 }
 0x61c   : > { %v3121_v36 = vpack.c.bf16 %v3105_v38, %v3104_v56  ;;  %v6647_v4 = vpop.f32.mrb[50].mxu1  ;;  %v2756_v6 = vmul.f32 %v7448_v32, %v2677_v0  ;;  %v7472_v32 = vpop.eup %7471 }
 0x61d   : > { %v3119_v20 = vpack.c.bf16 %v3103_v26, %v3102_v55  ;;  %v2759_v34 = vmul.f32 %v7452_v23, %v6647_v4  ;;  %v2680_v44 = vpop.f32.mrb[51].mxu1  ;;  %v7474_v56 = vpop.eup %7473 }
 0x61e   : > { %v2757_v31 = vmul.f32 %v7454_v53, %v2680_v44  ;;  %v7476_v17 = vpop.eup %7475  ;;  %v2980_v26 = vpop.xlane.xlu1 %2979 }
 0x61f   : > { %v3120_v1 = vpack.c.bf16 %v2759_v34, %v2758_v39  ;;  %3370 = vmatprep.mubr.bf16.mxu0 %v3119_v20  ;;  %v2978_v15 = vpop.xlane.xlu0 %2977  ;;  %v7478_v55 = vpop.eup %7477 }
 0x620   : > { %v3118_v59 = vpack.c.bf16 %v2757_v31, %v2756_v6  ;;  %v7480_v23 = vpop.eup %7479  ;;  %7491 = vrcp.f32 %v2978_v15 }
 0x621   : > { %v7482_v39 = vpop.eup %7481  ;;  %7493 = vrcp.f32 %v2980_v26 }
 0x622   : > { %3371 = vmatmul.mubr.bf16.vlgmr.msra.gmra.mrb[96].mxu0 %v3118_v59  ;;  %v7484_v44 = vpop.eup %7483  ;;  %7495 = vrcp.f32 %v2628_v5 }
 0x623   : > { %3380 = vmatprep.mubr.bf16.mxu0 %v3121_v36  ;;  %v2632_v50 = vpop.xlane.xlu0 %2631 }
 0x624   : > { %7497 = vrcp.f32 %v2632_v50 }
 0x627   : > { %v6714_v29 = vpop.f32.mrb[84].mxu0 }
 0x628   : > { %v3039_v30 = vpop.f32.mrb[85].mxu0  ;;  %v3108_v27 = vmul.f32 %v7460_v2, %v6714_v29  ;;  %v2634_v29 = vpop.xlane.xlu1 %2633 }
 0x629   : > { %v6715_v41 = vpop.f32.mrb[86].mxu0  ;;  %v3106_v51 = vmul.f32 %v7456_v18, %v3039_v30  ;;  %7499 = vrcp.f32 %v2634_v29 }
 0x62a   : > { %v3109_v16 = vmul.f32 %v7462_v25, %v6715_v41  ;;  %v6650_v45 = vpop.f32.mrb[52].mxu1  ;;  %v3042_v48 = vpop.f32.mrb[87].mxu0  ;;  %3381 = vmatmul.mubr.bf16.gmra.mrb[100].mxu0 %v3120_v1  ;;  %7501 = vrcp.f32 %v2630_v40 }
 0x62b   : > { %v3107_v24 = vmul.f32 %v7458_v33, %v3042_v48  ;;  %v2693_v11 = vpop.f32.mrb[53].mxu1  ;;  %v2762_v12 = vmul.f32 %v7466_v14, %v6650_v45  ;;  %v7486_v1 = vpop.eup %7485 }
 0x62c   : > { %v3125_v35 = vpack.c.bf16 %v3109_v16, %v3108_v27  ;;  %v6651_v21 = vpop.f32.mrb[54].mxu1  ;;  %v2760_v47 = vmul.f32 %v7464_v10, %v2693_v11  ;;  %v7488_v25 = vpop.eup %7487 }
 0x62d   : > { %v3123_v13 = vpack.c.bf16 %v3107_v24, %v3106_v51  ;;  %v2763_v49 = vmul.f32 %v7468_v42, %v6651_v21  ;;  %v2696_v60 = vpop.f32.mrb[55].mxu1  ;;  %v7490_v41 = vpop.eup %7489 }
 0x62e   : > { %v2761_v58 = vmul.f32 %v7470_v3, %v2696_v60  ;;  %v7492_v27 = vpop.eup %7491 }
 0x62f   : > { %v3124_v54 = vpack.c.bf16 %v2763_v49, %v2762_v12  ;;  %3390 = vmatprep.mubr.bf16.mxu0 %v3123_v13  ;;  %v7494_v45 = vpop.eup %7493 }
 0x630   : > { %v3122_v57 = vpack.c.bf16 %v2761_v58, %v2760_v47  ;;  %v7496_v14 = vpop.eup %7495 }
 0x631   : > { %v7498_v52 = vpop.eup %7497 }
 0x632   : > { %3391 = vmatmul.mubr.bf16.gmra.mrb[104].mxu0 %v3122_v57 }
 0x633   : > { %3400 = vmatprep.mubr.bf16.mxu0 %v3125_v35  ;;  %v7500_v9 = vpop.eup %7499 }
 0x634   : > { %v7502_v49 = vpop.eup %7501 }
 0x637   : > { %v6718_v38 = vpop.f32.mrb[88].mxu0 }
 0x638   : > { %v3055_v62 = vpop.f32.mrb[89].mxu0  ;;  %v3112_v43 = vmul.f32 %v7476_v17, %v6718_v38 }
 0x639   : > { %v6719_v0 = vpop.f32.mrb[90].mxu0  ;;  %v3110_v20 = vmul.f32 %v7472_v32, %v3055_v62 }
 0x63a   : > { %v3113_v36 = vmul.f32 %v7478_v55, %v6719_v0  ;;  %v6654_v4 = vpop.f32.mrb[56].mxu1  ;;  %v3058_v53 = vpop.f32.mrb[91].mxu0  ;;  %3401 = vmatmul.mubr.bf16.gmra.mrb[108].mxu0 %v3124_v54 }
 0x63b   : > { %v3111_v7 = vmul.f32 %v7474_v56, %v3058_v53  ;;  %v2709_v34 = vpop.f32.mrb[57].mxu1  ;;  %v2766_v28 = vmul.f32 %v7482_v39, %v6654_v4  ;;  %v3166_v56 = vld [vmem:[%s11733_s20] sm:$0x3]  ;;  %v7664_v53 = vld [vmem:[%s8797_s17 + $0x8] sm:$0xff] }
 0x63c   : > { %v3129_v6 = vpack.c.bf16 %v3113_v36, %v3112_v43  ;;  %v6655_v31 = vpop.f32.mrb[58].mxu1  ;;  %v2764_v33 = vmul.f32 %v7480_v23, %v2709_v34  ;;  %v9787_v38 = vrot.slane %v3166_v56, %v9158_v22  ;;  %v9790_v17 = vrot.slane %v3166_v56, %v9155_v63  ;;  %v7663_v23 = vld [vmem:[%s8797_s17] sm:$0xff] }
 0x63d   : > { %v3127_v59 = vpack.c.bf16 %v3111_v7, %v3110_v20  ;;  %v2767_v61 = vmul.f32 %v7484_v44, %v6655_v31  ;;  %v2712_v18 = vpop.f32.mrb[59].mxu1  ;;  %v7665_v7 = vld [vmem:[%s8797_s17 + $0x10] sm:$0xff]  ;;  %v7666_v44 = vld [vmem:[%s8797_s17 + $0x18] sm:$0xff] }
 0x63e   : > { %v2765_v46 = vmul.f32 %v7486_v1, %v2712_v18 }
 0x63f   : > { %v3128_v2 = vpack.c.bf16 %v2767_v61, %v2766_v28  ;;  %3410 = vmatprep.mubr.bf16.mxu0 %v3127_v59 }
 0x640   : > { %v3126_v30 = vpack.c.bf16 %v2765_v46, %v2764_v33  ;;  %v7667_v33 = vld [vmem:[%s8797_s17 + $0x20] sm:$0xff] }
 0x642   : > { %3411 = vmatmul.mubr.bf16.gmra.mrb[112].mxu0 %v3126_v30  ;;  %v7668_v30 = vld [vmem:[%s8797_s17 + $0x28] sm:$0xff] }
 0x643   : > { %3420 = vmatprep.mubr.bf16.mxu0 %v3129_v6 }
 0x647   : > { %v6722_v10 = vpop.f32.mrb[92].mxu0 }
 0x648   : > { %v3071_v16 = vpop.f32.mrb[93].mxu0  ;;  %v3116_v51 = vmul.f32 %v7492_v27, %v6722_v10  ;;  %v7669_v10 = vld [vmem:[%s8797_s17 + $0x30] sm:$0xff] }
 0x649   : > { %v6723_v48 = vpop.f32.mrb[94].mxu0  ;;  %v3114_v35 = vmul.f32 %v7488_v25, %v3071_v16  ;;  %v7670_v16 = vld [vmem:[%s8797_s17 + $0x38] sm:$0xff] }
 0x64a   : > { %v3117_v24 = vmul.f32 %v7494_v45, %v6723_v48  ;;  %v6658_v11 = vpop.f32.mrb[60].mxu1  ;;  %v3074_v42 = vpop.f32.mrb[95].mxu0  ;;  %3421 = vmatmul.mubr.bf16.gmra.mrb[116].mxu0 %v3128_v2 }
 0x64b   : > { %v3115_v21 = vmul.f32 %v7490_v41, %v3074_v42  ;;  %v2725_v3 = vpop.f32.mrb[61].mxu1  ;;  %v2770_v60 = vmul.f32 %v7498_v52, %v6658_v11 }
 0x64c   : > { %v3133_v12 = vpack.c.bf16 %v3117_v24, %v3116_v51  ;;  %v6659_v13 = vpop.f32.mrb[62].mxu1  ;;  %v2768_v57 = vmul.f32 %v7496_v14, %v2725_v3 }
 0x64d   : > { %v3131_v47 = vpack.c.bf16 %v3115_v21, %v3114_v35  ;;  %v2771_v58 = vmul.f32 %v7500_v9, %v6659_v13  ;;  %v2728_v54 = vpop.f32.mrb[63].mxu1  ;;  %v7671_v35 = vld [vmem:[%s8797_s17 + $0x40] sm:$0xff] }
 0x64e   : > { %v2769_v5 = vmul.f32 %v7502_v49, %v2728_v54 }
 0x64f   : > { %v3132_v40 = vpack.c.bf16 %v2771_v58, %v2770_v60  ;;  %3430 = vmatprep.mubr.bf16.mxu0 %v3131_v47  ;;  %v7673_v60 = vld [vmem:[%s8797_s17 + $0x50] sm:$0xff]  ;;  %v7674_v58 = vld [vmem:[%s8797_s17 + $0x58] sm:$0xff] }
 0x650   : > { %v3130_v32 = vpack.c.bf16 %v2769_v5, %v2768_v57 }
 0x652   : > { %3431 = vmatmul.mubr.bf16.gmra.mrb[120].mxu0 %v3130_v32 }
 0x653   : > { %3440 = vmatprep.mubr.bf16.mxu0 %v3133_v12  ;;  %v7672_v12 = vld [vmem:[%s8797_s17 + $0x48] sm:$0xff] }
 0x65a   : > { %3441 = vmatmul.mubr.bf16.gmra.mrb[124].mxu0 %v3132_v40 }
 0x6f5   : > { %v3372_v15 = vpop.f32.mrb[96].mxu0 }
 0x6f6   : > { %v3373_v62 = vadd.f32 %v3372_v15, %v9787_v38  ;;  %v3374_v55 = vpop.f32.mrb[97].mxu0 }
 0x6f7   : > { %v3375_v26 = vadd.f32 %v3374_v55, %v9790_v17  ;;  %v3376_v0 = vpop.f32.mrb[98].mxu0  ;;  %v7675_v55 = vld [vmem:[%s8797_s17 + $0x60] sm:$0xff] }
 0x6f8   : > { %v9795_v43 = vadd.f32 %v7663_v23, %v3373_v62  ;;  %v3377_v36 = vadd.f32 %v3376_v0, %v9787_v38  ;;  %v3378_v4 = vpop.f32.mrb[99].mxu0 }
 0x6f9   : > { %v9799_v39 = vadd.f32 %v7664_v53, %v3375_v26  ;;  %v3379_v20 = vadd.f32 %v3378_v4, %v9790_v17 }
 0x6fa   : > { %11734 = vst [vmem:[#allocation40_spill] sm:$0xff] %v9795_v43  ;;  %v9803_v34 = vadd.f32 %v7665_v7, %v3377_v36  ;;  %v7676_v36 = vld [vmem:[%s8797_s17 + $0x68] sm:$0xff] }
 0x6fb   : > { %11735 = vst [vmem:[#allocation41_spill] sm:$0xff] %v9799_v39  ;;  %v9806_v6 = vadd.f32 %v7666_v44, %v3379_v20  ;;  %v3485_v31 = vadd.f32 %v9799_v39, %v9795_v43  ;;  %v7677_v20 = vld [vmem:[%s8797_s17 + $0x70] sm:$0xff]  ;;  %v7678_v44 = vld [vmem:[%s8797_s17 + $0x78] sm:$0xff] }
 0x6fc   : > { %11736 = vst [vmem:[#allocation42_spill] sm:$0xff] %v9803_v34 }
 0x6fd   : > { %11737 = vst [vmem:[#allocation43_spill] sm:$0xff] %v9806_v6  ;;  %v3382_v1 = vpop.f32.mrb[100].mxu0  ;;  %3486 = vadd.xlane.f32.xlu0 %v3485_v31  ;;  %v3488_v28 = vadd.f32 %v9806_v6, %v9803_v34 }
 0x6fe   : > { %v3383_v59 = vadd.f32 %v3382_v1, %v9787_v38  ;;  %v3384_v61 = vpop.f32.mrb[101].mxu0 }
 0x6ff   : > { %v3385_v18 = vadd.f32 %v3384_v61, %v9790_v17  ;;  %v3386_v50 = vpop.f32.mrb[102].mxu0  ;;  %3489 = vadd.xlane.f32.xlu1 %v3488_v28 }
 0x700   : > { %v9815_v46 = vadd.f32 %v7667_v33, %v3383_v59  ;;  %v3387_v29 = vadd.f32 %v3386_v50, %v9787_v38  ;;  %v3388_v2 = vpop.f32.mrb[103].mxu0 }
 0x701   : > { %v9819_v25 = vadd.f32 %v7668_v30, %v3385_v18  ;;  %v3389_v41 = vadd.f32 %v3388_v2, %v9790_v17 }
 0x702   : > { %11738 = vst [vmem:[#allocation44_spill] sm:$0xff] %v9815_v46  ;;  %v9823_v27 = vadd.f32 %v7669_v10, %v3387_v29  ;;  %v7679_v29 = vld [vmem:[%s8797_s17 + $0x80] sm:$0xff]  ;;  %v7680_v10 = vld [vmem:[%s8797_s17 + $0x88] sm:$0xff] }
 0x703   : > { %11739 = vst [vmem:[#allocation45_spill] sm:$0xff] %v9819_v25  ;;  %v9826_v45 = vadd.f32 %v7670_v16, %v3389_v41  ;;  %v3491_v48 = vadd.f32 %v9819_v25, %v9815_v46 }
 0x704   : > { %11740 = vst [vmem:[#allocation46_spill] sm:$0xff] %v9823_v27 }
 0x705   : > { %11741 = vst [vmem:[#allocation47_spill] sm:$0xff] %v9826_v45  ;;  %3492 = vadd.xlane.f32.xlu0 %v3491_v48  ;;  %v3392_v14 = vpop.f32.mrb[104].mxu0  ;;  %v3494_v51 = vadd.f32 %v9826_v45, %v9823_v27 }
 0x706   : > { %v3393_v24 = vadd.f32 %v3392_v14, %v9787_v38  ;;  %v3394_v11 = vpop.f32.mrb[105].mxu0  ;;  %v7681_v14 = vld [vmem:[%s8797_s17 + $0x90] sm:$0xff] }
 0x707   : > { %v3395_v42 = vadd.f32 %v3394_v11, %v9790_v17  ;;  %3495 = vadd.xlane.f32.xlu1 %v3494_v51  ;;  %v3396_v52 = vpop.f32.mrb[106].mxu0 }
 0x708   : > { %v9835_v21 = vadd.f32 %v7671_v35, %v3393_v24  ;;  %v3397_v3 = vadd.f32 %v3396_v52, %v9787_v38  ;;  %v3398_v9 = vpop.f32.mrb[107].mxu0  ;;  %v7682_v24 = vld [vmem:[%s8797_s17 + $0x98] sm:$0xff] }
 0x709   : > { %v9839_v13 = vadd.f32 %v7672_v12, %v3395_v42  ;;  %v3399_v49 = vadd.f32 %v3398_v9, %v9790_v17 }
 0x70a   : > { %11742 = vst [vmem:[#allocation48_spill] sm:$0xff] %v9835_v21  ;;  %v9843_v47 = vadd.f32 %v7673_v60, %v3397_v3  ;;  %v7683_v60 = vld [vmem:[%s8797_s17 + $0xa0] sm:$0xff] }
 0x70b   : > { %11743 = vst [vmem:[#allocation49_spill] sm:$0xff] %v9839_v13  ;;  %v9846_v54 = vadd.f32 %v7674_v58, %v3399_v49  ;;  %v3497_v57 = vadd.f32 %v9839_v13, %v9835_v21 }
 0x70c   : > { %11744 = vst [vmem:[#allocation50_spill] sm:$0xff] %v9843_v47 }
 0x70d   : > { %11745 = vst [vmem:[#allocation51_spill] sm:$0xff] %v9846_v54  ;;  %v3402_v5 = vpop.f32.mrb[108].mxu0  ;;  %3498 = vadd.xlane.f32.xlu0 %v3497_v57  ;;  %v3500_v40 = vadd.f32 %v9846_v54, %v9843_v47 }
 0x70e   : > { %v3403_v32 = vadd.f32 %v3402_v5, %v9787_v38  ;;  %v3404_v56 = vpop.f32.mrb[109].mxu0 }
 0x70f   : > { %v3405_v15 = vadd.f32 %v3404_v56, %v9790_v17  ;;  %v3406_v62 = vpop.f32.mrb[110].mxu0  ;;  %3501 = vadd.xlane.f32.xlu1 %v3500_v40  ;;  %v7684_v40 = vld [vmem:[%s8797_s17 + $0xa8] sm:$0xff] }
 0x710   : > { %v9855_v26 = vadd.f32 %v7675_v55, %v3403_v32  ;;  %v3407_v0 = vadd.f32 %v3406_v62, %v9787_v38  ;;  %v3408_v23 = vpop.f32.mrb[111].mxu0  ;;  %v7686_v55 = vld [vmem:[%s8797_s17 + $0xb8] sm:$0xff] }
 0x711   : > { %v9859_v4 = vadd.f32 %v7676_v36, %v3405_v15  ;;  %v3409_v53 = vadd.f32 %v3408_v23, %v9790_v17  ;;  %v7685_v15 = vld [vmem:[%s8797_s17 + $0xb0] sm:$0xff] }
 0x712   : > { %11746 = vst [vmem:[#allocation52_spill] sm:$0xff] %v9855_v26  ;;  %v9863_v7 = vadd.f32 %v7677_v20, %v3407_v0 }
 0x713   : > { %11747 = vst [vmem:[#allocation53_spill] sm:$0xff] %v9859_v4  ;;  %v9866_v31 = vadd.f32 %v7678_v44, %v3409_v53  ;;  %v3503_v1 = vadd.f32 %v9859_v4, %v9855_v26 }
 0x714   : > { %11748 = vst [vmem:[#allocation54_spill] sm:$0xff] %v9863_v7 }
 0x715   : > { %11749 = vst [vmem:[#allocation55_spill] sm:$0xff] %v9866_v31  ;;  %3504 = vadd.xlane.f32.xlu0 %v3503_v1  ;;  %v3412_v28 = vpop.f32.mrb[112].mxu0  ;;  %v3506_v59 = vadd.f32 %v9866_v31, %v9863_v7 }
 0x716   : > { %v3413_v61 = vadd.f32 %v3412_v28, %v9787_v38  ;;  %v3414_v18 = vpop.f32.mrb[113].mxu0 }
 0x717   : > { %v3415_v50 = vadd.f32 %v3414_v18, %v9790_v17  ;;  %3507 = vadd.xlane.f32.xlu1 %v3506_v59  ;;  %v3416_v33 = vpop.f32.mrb[114].mxu0  ;;  %v7687_v59 = vld [vmem:[%s8797_s17 + $0xc0] sm:$0xff] }
 0x718   : > { %v9875_v2 = vadd.f32 %v7679_v29, %v3413_v61  ;;  %v3417_v30 = vadd.f32 %v3416_v33, %v9787_v38  ;;  %v3418_v41 = vpop.f32.mrb[115].mxu0  ;;  %v7688_v33 = vld [vmem:[%s8797_s17 + $0xc8] sm:$0xff] }
 0x719   : > { %v9879_v16 = vadd.f32 %v7680_v10, %v3415_v50  ;;  %v3419_v48 = vadd.f32 %v3418_v41, %v9790_v17  ;;  %v7689_v41 = vld [vmem:[%s8797_s17 + $0xd0] sm:$0xff] }
 0x71a   : > { %11750 = vst [vmem:[#allocation56_spill] sm:$0xff] %v9875_v2  ;;  %v9883_v51 = vadd.f32 %v7681_v14, %v3417_v30 }
 0x71b   : > { %11751 = vst [vmem:[#allocation57_spill] sm:$0xff] %v9879_v16  ;;  %v9886_v11 = vadd.f32 %v7682_v24, %v3419_v48  ;;  %v3509_v42 = vadd.f32 %v9879_v16, %v9875_v2  ;;  %v7690_v48 = vld [vmem:[%s8797_s17 + $0xd8] sm:$0xff] }
 0x71c   : > { %11752 = vst [vmem:[#allocation58_spill] sm:$0xff] %v9883_v51 }
 0x71d   : > { %11753 = vst [vmem:[#allocation59_spill] sm:$0xff] %v9886_v11  ;;  %v3422_v52 = vpop.f32.mrb[116].mxu0  ;;  %3510 = vadd.xlane.f32.xlu0 %v3509_v42  ;;  %v3512_v35 = vadd.f32 %v9886_v11, %v9883_v51 }
 0x71e   : > { %v3423_v3 = vadd.f32 %v3422_v52, %v9787_v38  ;;  %v3424_v9 = vpop.f32.mrb[117].mxu0 }
 0x71f   : > { %v3425_v12 = vadd.f32 %v3424_v9, %v9790_v17  ;;  %v3426_v49 = vpop.f32.mrb[118].mxu0  ;;  %3513 = vadd.xlane.f32.xlu1 %v3512_v35 }
 0x720   : > { %v9895_v58 = vadd.f32 %v7683_v60, %v3423_v3  ;;  %v3427_v57 = vadd.f32 %v3426_v49, %v9787_v38  ;;  %v3428_v5 = vpop.f32.mrb[119].mxu0  ;;  %v7691_v49 = vld [vmem:[%s8797_s17 + $0xe0] sm:$0xff] }
 0x721   : > { %v9899_v32 = vadd.f32 %v7684_v40, %v3425_v12  ;;  %v3429_v56 = vadd.f32 %v3428_v5, %v9790_v17  ;;  %v7692_v40 = vld [vmem:[%s8797_s17 + $0xe8] sm:$0xff] }
 0x722   : > { %11754 = vst [vmem:[#allocation60_spill] sm:$0xff] %v9895_v58  ;;  %v9903_v62 = vadd.f32 %v7685_v15, %v3427_v57 }
 0x723   : > { %11755 = vst [vmem:[#allocation61_spill] sm:$0xff] %v9899_v32  ;;  %v9906_v0 = vadd.f32 %v7686_v55, %v3429_v56  ;;  %v3515_v23 = vadd.f32 %v9899_v32, %v9895_v58  ;;  %v7693_v55 = vld [vmem:[%s8797_s17 + $0xf0] sm:$0xff] }
 0x724   : > { %11756 = vst [vmem:[#allocation62_spill] sm:$0xff] %v9903_v62 }
 0x725   : > { %11757 = vst [vmem:[#allocation63_spill] sm:$0xff] %v9906_v0  ;;  %3516 = vadd.xlane.f32.xlu0 %v3515_v23  ;;  %v3432_v36 = vpop.f32.mrb[120].mxu0  ;;  %v3518_v53 = vadd.f32 %v9906_v0, %v9903_v62 }
 0x726   : > { %v3433_v20 = vadd.f32 %v3432_v36, %v9787_v38  ;;  %v3434_v44 = vpop.f32.mrb[121].mxu0  ;;  %v7694_v36 = vld [vmem:[%s8797_s17 + $0xf8] sm:$0xff] }
 0x727   : > { %v3435_v1 = vadd.f32 %v3434_v44, %v9790_v17  ;;  %3519 = vadd.xlane.f32.xlu1 %v3518_v53  ;;  %v3436_v28 = vpop.f32.mrb[122].mxu0  ;;  %v7151_v44 = vld [vmem:[%s8717_s28] ss:$16 sps:$4 sm:$0xff]  }
 0x728   : > { %v9915_v61 = vadd.f32 %v7687_v59, %v3433_v20  ;;  %v3437_v18 = vadd.f32 %v3436_v28, %v9787_v38  ;;  %v3438_v50 = vpop.f32.mrb[123].mxu0  ;;  %v7156_v28 = vld [vmem:[%s8717_s28 + $0xc] ss:$16 sps:$4 sm:$0xff]   ;;  %v7159_v59 = vld [vmem:[%s8717_s28 + $0x24] ss:$16 sps:$4 sm:$0xff]  }
 0x729   : > { %v9919_v29 = vadd.f32 %v7688_v33, %v3435_v1  ;;  %v3439_v30 = vadd.f32 %v3438_v50, %v9790_v17  ;;  %v7154_v1 = vld [vmem:[%s8717_s28 + $0x8] ss:$16 sps:$4 sm:$0xff]   ;;  %4362 = vmatprep.subr.bf16.mxu0 %v7156_v28  ;;  %v7157_v50 = vld [vmem:[%s8717_s28 + $0x20] ss:$16 sps:$4 sm:$0xff]  }
 0x72a   : > { %11758 = vst [vmem:[#allocation64_spill] sm:$0xff] %v9915_v61  ;;  %v9923_v10 = vadd.f32 %v7689_v41, %v3437_v18  ;;  %v7162_v18 = vld [vmem:[%s8717_s28 + $0x2c] ss:$16 sps:$4 sm:$0xff]   ;;  %4363 = vmatpush1.bf16.msra.mxu0 %v7154_v1  ;;  %v7160_v33 = vld [vmem:[%s8717_s28 + $0x28] ss:$16 sps:$4 sm:$0xff]  }
 0x72b   : > { %11759 = vst [vmem:[#allocation65_spill] sm:$0xff] %v9919_v29  ;;  %v9926_v14 = vadd.f32 %v7690_v48, %v3439_v30  ;;  %v3521_v24 = vadd.f32 %v9919_v29, %v9915_v61  ;;  %v7165_v30 = vld [vmem:[%s8717_s28 + $0x44] ss:$16 sps:$4 sm:$0xff]   ;;  %4364 = vmatprep.subr.bf16.mxu0 %v7162_v18  ;;  %v7168_v41 = vld [vmem:[%s8717_s28 + $0x4c] ss:$16 sps:$4 sm:$0xff]  }
 0x72c   : > { %11760 = vst [vmem:[#allocation66_spill] sm:$0xff] %v9923_v10  ;;  %v7163_v48 = vld [vmem:[%s8717_s28 + $0x40] ss:$16 sps:$4 sm:$0xff]   ;;  %v7198_v1 = vld [vmem:[%s8717_s28 + $0xec] ss:$16 sps:$4 sm:$0xff]  }
 0x72d   : > { %11761 = vst [vmem:[#allocation67_spill] sm:$0xff] %v9926_v14  ;;  %v3442_v42 = vpop.f32.mrb[124].mxu0  ;;  %3522 = vadd.xlane.f32.xlu0 %v3521_v24  ;;  %v3524_v52 = vadd.f32 %v9926_v14, %v9923_v10  ;;  %v7166_v24 = vld [vmem:[%s8717_s28 + $0x48] ss:$16 sps:$4 sm:$0xff]   ;;  %v7193_v28 = vld [vmem:[%s8717_s28 + $0xe0] ss:$16 sps:$4 sm:$0xff]  }
 0x72e   : > { %v3443_v35 = vadd.f32 %v3442_v42, %v9787_v38  ;;  %v3444_v3 = vpop.f32.mrb[125].mxu0  ;;  %4365 = vmatpush1.bf16.msra.mxu0 %v7160_v33  ;;  %v7171_v42 = vld [vmem:[%s8717_s28 + $0x64] ss:$16 sps:$4 sm:$0xff]   ;;  %v7199_v33 = vld [vmem:[%s8717_s28 + $0x100] ss:$16 sps:$4 sm:$0xff]  }
 0x72f   : > { %v3445_v9 = vadd.f32 %v3444_v3, %v9790_v17  ;;  %v3446_v12 = vpop.f32.mrb[126].mxu0  ;;  %3525 = vadd.xlane.f32.xlu1 %v3524_v52  ;;  %4366 = vmatprep.subr.bf16.mxu0 %v7168_v41  ;;  %v7174_v52 = vld [vmem:[%s8717_s28 + $0x6c] ss:$16 sps:$4 sm:$0xff]   ;;  %v7172_v3 = vld [vmem:[%s8717_s28 + $0x68] ss:$16 sps:$4 sm:$0xff]  }
 0x730   : > { %v9935_v60 = vadd.f32 %v7691_v49, %v3443_v35  ;;  %v3447_v57 = vadd.f32 %v3446_v12, %v9787_v38  ;;  %v3448_v5 = vpop.f32.mrb[127].mxu0  ;;  %v7169_v35 = vld [vmem:[%s8717_s28 + $0x60] ss:$16 sps:$4 sm:$0xff]   ;;  %v7180_v12 = vld [vmem:[%s8717_s28 + $0x8c] ss:$16 sps:$4 sm:$0xff]  }
 0x731   : > { %v9939_v56 = vadd.f32 %v7692_v40, %v3445_v9  ;;  %v3449_v15 = vadd.f32 %v3448_v5, %v9790_v17  ;;  %v7153_v17 = vld [vmem:[%s8717_s28 + $0x4] ss:$16 sps:$4 sm:$0xff]   ;;  %v7175_v49 = vld [vmem:[%s8717_s28 + $0x80] ss:$16 sps:$4 sm:$0xff]   ;;  %v7186_v40 = vld [vmem:[%s8717_s28 + $0xac] ss:$16 sps:$4 sm:$0xff]  }
 0x732   : > { %11762 = vst [vmem:[#allocation68_spill] sm:$0xff] %v9935_v60  ;;  %v9943_v23 = vadd.f32 %v7693_v55, %v3447_v57  ;;  %4249 = vmatprep.subr.bf16.mxu1 %v7153_v17  ;;  %4367 = vmatpush1.bf16.msra.mxu0 %v7166_v24  ;;  %v7177_v9 = vld [vmem:[%s8717_s28 + $0x84] ss:$16 sps:$4 sm:$0xff]   ;;  %v7178_v57 = vld [vmem:[%s8717_s28 + $0x88] ss:$16 sps:$4 sm:$0xff]  }
 0x733   : > { %11763 = vst [vmem:[#allocation69_spill] sm:$0xff] %v9939_v56  ;;  %v9946_v53 = vadd.f32 %v7694_v36, %v3449_v15  ;;  %v3527_v20 = vadd.f32 %v9939_v56, %v9935_v60  ;;  %4250 = vmatpush1.bf16.msra.mxu1 %v7151_v44  ;;  %4368 = vmatprep.subr.bf16.mxu0 %v7174_v52  ;;  %v7183_v5 = vld [vmem:[%s8717_s28 + $0xa4] ss:$16 sps:$4 sm:$0xff]   ;;  %v7181_v15 = vld [vmem:[%s8717_s28 + $0xa0] ss:$16 sps:$4 sm:$0xff]  }
 0x734   : > { %11764 = vst [vmem:[#allocation70_spill] sm:$0xff] %v9943_v23  ;;  %4251 = vmatprep.subr.bf16.mxu1 %v7159_v59  ;;  %v7184_v55 = vld [vmem:[%s8717_s28 + $0xa8] ss:$16 sps:$4 sm:$0xff]   ;;  %v7189_v36 = vld [vmem:[%s8717_s28 + $0xc4] ss:$16 sps:$4 sm:$0xff]  }
 0x735   : > { %11765 = vst [vmem:[#allocation71_spill] sm:$0xff] %v9946_v53  ;;  %3528 = vadd.xlane.f32.xlu0 %v3527_v20  ;;  %v3530_v38 = vadd.f32 %v9946_v53, %v9943_v23  ;;  %v7192_v20 = vld [vmem:[%s8717_s28 + $0xcc] ss:$16 sps:$4 sm:$0xff]   ;;  %v7190_v44 = vld [vmem:[%s8717_s28 + $0xc8] ss:$16 sps:$4 sm:$0xff]  }
 0x736   : > { %4369 = vmatpush1.bf16.msra.mxu0 %v7172_v3  ;;  %v7195_v17 = vld [vmem:[%s8717_s28 + $0xe4] ss:$16 sps:$4 sm:$0xff]   ;;  %v7196_v59 = vld [vmem:[%s8717_s28 + $0xe8] ss:$16 sps:$4 sm:$0xff]   ;;  %v7205_v24 = vld [vmem:[%s8717_s28 + $0x120] ss:$16 sps:$4 sm:$0xff]  }
 0x737   : > { %3531 = vadd.xlane.f32.xlu1 %v3530_v38  ;;  %4252 = vmatpush1.bf16.msra.mxu1 %v7157_v50  ;;  %v7187_v38 = vld [vmem:[%s8717_s28 + $0xc0] ss:$16 sps:$4 sm:$0xff]   ;;  %v7201_v18 = vld [vmem:[%s8717_s28 + $0x104] ss:$16 sps:$4 sm:$0xff]   ;;  %v7204_v50 = vld [vmem:[%s8717_s28 + $0x10c] ss:$16 sps:$4 sm:$0xff]  }
 0x738   : > { %4253 = vmatprep.subr.bf16.mxu1 %v7165_v30  ;;  %4370 = vmatprep.subr.bf16.mxu0 %v7180_v12  ;;  %v7202_v30 = vld [vmem:[%s8717_s28 + $0x108] ss:$16 sps:$4 sm:$0xff]   ;;  %v7207_v41 = vld [vmem:[%s8717_s28 + $0x124] ss:$16 sps:$4 sm:$0xff]  }
 0x73a   : > { %4371 = vmatpush1.bf16.msra.mxu0 %v7178_v57 }
 0x73b   : > { %4254 = vmatpush1.bf16.msra.mxu1 %v7163_v48  ;;  %4372 = vmatprep.subr.bf16.mxu0 %v7186_v40  ;;  %v7210_v48 = vld [vmem:[%s8717_s28 + $0x12c] ss:$16 sps:$4 sm:$0xff]  }
 0x73c   : > { %4255 = vmatprep.subr.bf16.mxu1 %v7171_v42  ;;  %v7208_v42 = vld [vmem:[%s8717_s28 + $0x128] ss:$16 sps:$4 sm:$0xff]  }
 0x73e   : > { %4373 = vmatpush1.bf16.msra.mxu0 %v7184_v55 }
 0x73f   : > { %4256 = vmatpush1.bf16.msra.mxu1 %v7169_v35  ;;  %4374 = vmatprep.subr.bf16.mxu0 %v7192_v20 }
 0x740   : > { %4257 = vmatprep.subr.bf16.mxu1 %v7177_v9 }
 0x742   : > { %4375 = vmatpush1.bf16.msra.mxu0 %v7190_v44 }
 0x743   : > { %4258 = vmatpush1.bf16.msra.mxu1 %v7175_v49  ;;  %4376 = vmatprep.subr.bf16.mxu0 %v7198_v1 }
 0x744   : > { %4259 = vmatprep.subr.bf16.mxu1 %v7183_v5 }
 0x746   : > { %4377 = vmatpush1.bf16.msra.mxu0 %v7196_v59 }
 0x747   : > { %4260 = vmatpush1.bf16.msra.mxu1 %v7181_v15  ;;  %4378 = vmatprep.subr.bf16.mxu0 %v7204_v50 }
 0x748   : > { %4261 = vmatprep.subr.bf16.mxu1 %v7189_v36 }
 0x74a   : > { %4379 = vmatpush1.bf16.msra.mxu0 %v7202_v30 }
 0x74b   : > { %4262 = vmatpush1.bf16.msra.mxu1 %v7187_v38  ;;  %4380 = vmatprep.subr.bf16.mxu0 %v7210_v48 }
 0x74c   : > { %4263 = vmatprep.subr.bf16.mxu1 %v7195_v17 }
 0x74e   : > { %4381 = vmatpush1.bf16.msra.mxu0 %v7208_v42 }
 0x74f   : > { %4264 = vmatpush1.bf16.msra.mxu1 %v7193_v28 }
 0x750   : > { %4265 = vmatprep.subr.bf16.mxu1 %v7201_v18 }
 0x753   : > { %4266 = vmatpush1.bf16.msra.mxu1 %v7199_v33 }
 0x754   : > { %4267 = vmatprep.subr.bf16.mxu1 %v7207_v41 }
 0x757   : > { %4268 = vmatpush1.bf16.msra.mxu1 %v7205_v24 }
 0x78a   : > { %v3487_v52 = vpop.xlane.xlu0 %3486 }
 0x78b   : > { %v3533_v35 = vmul.f32 0.00390625, %v3487_v52 }
 0x78c   : > { %v3490_v3 = vpop.xlane.xlu1 %3489 }
 0x78d   : > { %v9993_v9 = vsub.f32 %v9795_v43, %v3533_v35  ;;  %v9996_v12 = vsub.f32 %v9799_v39, %v3533_v35  ;;  %v3534_v49 = vmul.f32 0.00390625, %v3490_v3 }
 0x78f   : > { %v3581_v57 = vmul.f32 %v9993_v9, %v9993_v9  ;;  %v3582_v5 = vmul.f32 %v9996_v12, %v9996_v12  ;;  %v10003_v40 = vsub.f32 %v9803_v34, %v3534_v49  ;;  %v10006_v15 = vsub.f32 %v9806_v6, %v3534_v49 }
 0x791   : > { %v3583_v55 = vmul.f32 %v10003_v40, %v10003_v40  ;;  %v3584_v36 = vmul.f32 %v10006_v15, %v10006_v15  ;;  %v3613_v20 = vadd.f32 %v3582_v5, %v3581_v57 }
 0x792   : > { %v3493_v38 = vpop.xlane.xlu0 %3492 }
 0x793   : > { %v3535_v44 = vmul.f32 0.00390625, %v3493_v38  ;;  %3614 = vadd.xlane.f32.xlu0 %v3613_v20  ;;  %v3616_v17 = vadd.f32 %v3584_v36, %v3583_v55 }
 0x794   : > { %v3496_v1 = vpop.xlane.xlu1 %3495 }
 0x795   : > { %v10013_v28 = vsub.f32 %v9815_v46, %v3535_v44  ;;  %v10016_v59 = vsub.f32 %v9819_v25, %v3535_v44  ;;  %v3536_v18 = vmul.f32 0.00390625, %v3496_v1  ;;  %3617 = vadd.xlane.f32.xlu1 %v3616_v17 }
 0x797   : > { %v3585_v50 = vmul.f32 %v10013_v28, %v10013_v28  ;;  %v3586_v33 = vmul.f32 %v10016_v59, %v10016_v59  ;;  %v10023_v30 = vsub.f32 %v9823_v27, %v3536_v18  ;;  %v10026_v41 = vsub.f32 %v9826_v45, %v3536_v18 }
 0x799   : > { %v3587_v48 = vmul.f32 %v10023_v30, %v10023_v30  ;;  %v3588_v24 = vmul.f32 %v10026_v41, %v10026_v41  ;;  %v3619_v42 = vadd.f32 %v3586_v33, %v3585_v50 }
 0x79a   : > { %v3499_v52 = vpop.xlane.xlu0 %3498 }
 0x79b   : > { %v3537_v35 = vmul.f32 0.00390625, %v3499_v52  ;;  %3620 = vadd.xlane.f32.xlu0 %v3619_v42  ;;  %v3622_v3 = vadd.f32 %v3588_v24, %v3587_v48 }
 0x79c   : > { %v3502_v49 = vpop.xlane.xlu1 %3501 }
 0x79d   : > { %v10033_v57 = vsub.f32 %v9835_v21, %v3537_v35  ;;  %v10036_v5 = vsub.f32 %v9839_v13, %v3537_v35  ;;  %v3538_v55 = vmul.f32 0.00390625, %v3502_v49  ;;  %3623 = vadd.xlane.f32.xlu1 %v3622_v3 }
 0x79f   : > { %v3589_v36 = vmul.f32 %v10033_v57, %v10033_v57  ;;  %v3590_v20 = vmul.f32 %v10036_v5, %v10036_v5  ;;  %v10043_v38 = vsub.f32 %v9843_v47, %v3538_v55  ;;  %v10046_v44 = vsub.f32 %v9846_v54, %v3538_v55 }
 0x7a1   : > { %v3591_v17 = vmul.f32 %v10043_v38, %v10043_v38  ;;  %v3592_v1 = vmul.f32 %v10046_v44, %v10046_v44  ;;  %v3625_v18 = vadd.f32 %v3590_v20, %v3589_v36 }
 0x7a2   : > { %v3505_v50 = vpop.xlane.xlu0 %3504 }
 0x7a3   : > { %v3539_v33 = vmul.f32 0.00390625, %v3505_v50  ;;  %3626 = vadd.xlane.f32.xlu0 %v3625_v18  ;;  %v3628_v48 = vadd.f32 %v3592_v1, %v3591_v17  ;;  %v7213_v18 = vld [vmem:[%s8717_s28 + $0x144] ss:$16 sps:$4 sm:$0xff]   ;;  %v7216_v50 = vld [vmem:[%s8717_s28 + $0x14c] ss:$16 sps:$4 sm:$0xff]  }
 0x7a4   : > { %v3508_v24 = vpop.xlane.xlu1 %3507  ;;  %4269 = vmatprep.subr.bf16.mxu1 %v7213_v18  ;;  %4382 = vmatprep.subr.bf16.mxu0 %v7216_v50 }
 0x7a5   : > { %v10053_v42 = vsub.f32 %v9855_v26, %v3539_v33  ;;  %v10056_v52 = vsub.f32 %v9859_v4, %v3539_v33  ;;  %v3540_v35 = vmul.f32 0.00390625, %v3508_v24  ;;  %3629 = vadd.xlane.f32.xlu1 %v3628_v48  ;;  %v7211_v48 = vld [vmem:[%s8717_s28 + $0x140] ss:$16 sps:$4 sm:$0xff]   ;;  %v7214_v24 = vld [vmem:[%s8717_s28 + $0x148] ss:$16 sps:$4 sm:$0xff]  }
 0x7a6   : > { %4270 = vmatpush1.bf16.msra.mxu1 %v7211_v48  ;;  %4383 = vmatpush1.bf16.msra.mxu0 %v7214_v24  ;;  %v7222_v4 = vld [vmem:[%s8717_s28 + $0x16c] ss:$16 sps:$4 sm:$0xff]   ;;  %v7225_v24 = vld [vmem:[%s8717_s28 + $0x184] ss:$16 sps:$4 sm:$0xff]   ;;  %v7241_v26 = vld [vmem:[%s8717_s28 + $0x1e0] ss:$16 sps:$4 sm:$0xff]  }
 0x7a7   : > { %v3593_v3 = vmul.f32 %v10053_v42, %v10053_v42  ;;  %v3594_v49 = vmul.f32 %v10056_v52, %v10056_v52  ;;  %v10063_v55 = vsub.f32 %v9863_v7, %v3540_v35  ;;  %v10066_v36 = vsub.f32 %v9866_v31, %v3540_v35  ;;  %v7219_v7 = vld [vmem:[%s8717_s28 + $0x164] ss:$16 sps:$4 sm:$0xff]   ;;  %4384 = vmatprep.subr.bf16.mxu0 %v7222_v4 }
 0x7a8   : > { %4271 = vmatprep.subr.bf16.mxu1 %v7219_v7 }
 0x7a9   : > { %v3595_v20 = vmul.f32 %v10063_v55, %v10063_v55  ;;  %v3596_v17 = vmul.f32 %v10066_v36, %v10066_v36  ;;  %v3631_v1 = vadd.f32 %v3594_v49, %v3593_v3 }
 0x7aa   : > { %v3511_v33 = vpop.xlane.xlu0 %3510 }
 0x7ab   : > { %v3541_v37 = vmul.f32 0.00390625, %v3511_v33  ;;  %3632 = vadd.xlane.f32.xlu0 %v3631_v1  ;;  %v3634_v35 = vadd.f32 %v3596_v17, %v3595_v20  ;;  %v7217_v33 = vld [vmem:[%s8717_s28 + $0x160] ss:$16 sps:$4 sm:$0xff]   ;;  %v7220_v20 = vld [vmem:[%s8717_s28 + $0x168] ss:$16 sps:$4 sm:$0xff]  }
 0x7ac   : > { %v3514_v8 = vpop.xlane.xlu1 %3513  ;;  %4272 = vmatpush1.bf16.msra.mxu1 %v7217_v33  ;;  %4385 = vmatpush1.bf16.msra.mxu0 %v7220_v20 }
 0x7ad   : > { %v10077_v31 = vsub.f32 %v9875_v2, %v3541_v37  ;;  %v10080_v3 = vsub.f32 %v9879_v16, %v3541_v37  ;;  %v3542_v49 = vmul.f32 0.00390625, %v3514_v8  ;;  %3635 = vadd.xlane.f32.xlu1 %v3634_v35  ;;  %v7228_v35 = vld [vmem:[%s8717_s28 + $0x18c] ss:$16 sps:$4 sm:$0xff]   ;;  %v7223_v16 = vld [vmem:[%s8717_s28 + $0x180] ss:$16 sps:$4 sm:$0xff]   ;;  %4273 = vmatprep.subr.bf16.mxu1 %v7225_v24 }
 0x7ae   : > { %4386 = vmatprep.subr.bf16.mxu0 %v7228_v35  ;;  %v7231_v2 = vld [vmem:[%s8717_s28 + $0x1a4] ss:$16 sps:$4 sm:$0xff]  }
 0x7af   : > { %v3597_v17 = vmul.f32 %v10077_v31, %v10077_v31  ;;  %v3598_v1 = vmul.f32 %v10080_v3, %v10080_v3  ;;  %v10091_v37 = vsub.f32 %v9883_v51, %v3542_v49  ;;  %v10094_v8 = vsub.f32 %v9886_v11, %v3542_v49  ;;  %v7226_v49 = vld [vmem:[%s8717_s28 + $0x188] ss:$16 sps:$4 sm:$0xff]   ;;  %v7229_v11 = vld [vmem:[%s8717_s28 + $0x1a0] ss:$16 sps:$4 sm:$0xff]   ;;  %v7237_v35 = vld [vmem:[%s8717_s28 + $0x1c4] ss:$16 sps:$4 sm:$0xff]  }
 0x7b0   : > { %4274 = vmatpush1.bf16.msra.mxu1 %v7223_v16  ;;  %4387 = vmatpush1.bf16.msra.mxu0 %v7226_v49  ;;  %v7235_v49 = vld [vmem:[%s8717_s28 + $0x1c0] ss:$16 sps:$4 sm:$0xff]  }
 0x7b1   : > { %v3599_v18 = vmul.f32 %v10091_v37, %v10091_v37  ;;  %v3600_v50 = vmul.f32 %v10094_v8, %v10094_v8  ;;  %v3637_v48 = vadd.f32 %v3598_v1, %v3597_v17  ;;  %4275 = vmatprep.subr.bf16.mxu1 %v7231_v2 }
 0x7b2   : > { %v3517_v51 = vpop.xlane.xlu0 %3516 }
 0x7b3   : > { %v3543_v7 = vmul.f32 0.00390625, %v3517_v51  ;;  %3638 = vadd.xlane.f32.xlu0 %v3637_v48  ;;  %v3640_v4 = vadd.f32 %v3600_v50, %v3599_v18  ;;  %v7232_v51 = vld [vmem:[%s8717_s28 + $0x1a8] ss:$16 sps:$4 sm:$0xff]   ;;  %v7234_v18 = vld [vmem:[%s8717_s28 + $0x1ac] ss:$16 sps:$4 sm:$0xff]  }
 0x7b4   : > { %v3520_v33 = vpop.xlane.xlu1 %3519  ;;  %4388 = vmatprep.subr.bf16.mxu0 %v7234_v18  ;;  %4276 = vmatpush1.bf16.msra.mxu1 %v7229_v11  ;;  %v7246_v18 = vld [vmem:[%s8717_s28 + $0x1ec] ss:$16 sps:$4 sm:$0xff]  }
 0x7b5   : > { %v10107_v20 = vsub.f32 %v9895_v58, %v3543_v7  ;;  %v10110_v17 = vsub.f32 %v9899_v32, %v3543_v7  ;;  %v3544_v1 = vmul.f32 0.00390625, %v3520_v33  ;;  %3641 = vadd.xlane.f32.xlu1 %v3640_v4  ;;  %v7240_v7 = vld [vmem:[%s8717_s28 + $0x1cc] ss:$16 sps:$4 sm:$0xff]   ;;  %4389 = vmatpush1.bf16.msra.mxu0 %v7232_v51 }
 0x7b6   : > { %4277 = vmatprep.subr.bf16.mxu1 %v7237_v35  ;;  %4390 = vmatprep.subr.bf16.mxu0 %v7240_v7 }
 0x7b7   : > { %v3601_v16 = vmul.f32 %v10107_v20, %v10107_v20  ;;  %v3602_v50 = vmul.f32 %v10110_v17, %v10110_v17  ;;  %v10119_v48 = vsub.f32 %v9903_v62, %v3544_v1  ;;  %v10122_v24 = vsub.f32 %v9906_v0, %v3544_v1  ;;  %v7238_v62 = vld [vmem:[%s8717_s28 + $0x1c8] ss:$16 sps:$4 sm:$0xff]   ;;  %v7243_v1 = vld [vmem:[%s8717_s28 + $0x1e4] ss:$16 sps:$4 sm:$0xff]  }
 0x7b8   : > { %4278 = vmatpush1.bf16.msra.mxu1 %v7235_v49 }
 0x7b9   : > { %v3603_v2 = vmul.f32 %v10119_v48, %v10119_v48  ;;  %v3604_v4 = vmul.f32 %v10122_v24, %v10122_v24  ;;  %v3643_v33 = vadd.f32 %v3602_v50, %v3601_v16  ;;  %4391 = vmatpush1.bf16.msra.mxu0 %v7238_v62  ;;  %v7244_v16 = vld [vmem:[%s8717_s28 + $0x1e8] ss:$16 sps:$4 sm:$0xff]   ;;  %4279 = vmatprep.subr.bf16.mxu1 %v7243_v1 }
 0x7ba   : > { %v3523_v32 = vpop.xlane.xlu0 %3522  ;;  %4392 = vmatprep.subr.bf16.mxu0 %v7246_v18 }
 0x7bb   : > { %v3545_v0 = vmul.f32 0.00390625, %v3523_v32  ;;  %3644 = vadd.xlane.f32.xlu0 %v3643_v33  ;;  %v3646_v11 = vadd.f32 %v3604_v4, %v3603_v2 }
 0x7bc   : > { %v3526_v58 = vpop.xlane.xlu1 %3525  ;;  %4280 = vmatpush1.bf16.msra.mxu1 %v7241_v26 }
 0x7bd   : > { %v10136_v54 = vsub.f32 %v9915_v61, %v3545_v0  ;;  %v10139_v47 = vsub.f32 %v9919_v29, %v3545_v0  ;;  %v3546_v51 = vmul.f32 0.00390625, %v3526_v58  ;;  %3647 = vadd.xlane.f32.xlu1 %v3646_v11  ;;  %4393 = vmatpush1.bf16.msra.mxu0 %v7244_v16 }
 0x7bf   : > { %v3605_v32 = vmul.f32 %v10136_v54, %v10136_v54  ;;  %v3606_v50 = vmul.f32 %v10139_v47, %v10139_v47  ;;  %v10147_v35 = vsub.f32 %v9923_v10, %v3546_v51  ;;  %v10150_v49 = vsub.f32 %v9926_v14, %v3546_v51 }
 0x7c1   : > { %v3607_v58 = vmul.f32 %v10147_v35, %v10147_v35  ;;  %v3608_v62 = vmul.f32 %v10150_v49, %v10150_v49  ;;  %v3649_v0 = vadd.f32 %v3606_v50, %v3605_v32 }
 0x7c2   : > { %v3529_v7 = vpop.xlane.xlu0 %3528 }
 0x7c3   : > { %v3547_v2 = vmul.f32 0.00390625, %v3529_v7  ;;  %3650 = vadd.xlane.f32.xlu0 %v3649_v0  ;;  %v3652_v4 = vadd.f32 %v3608_v62, %v3607_v58  ;;  %v7249_v7 = vld [vmem:[%s8719_s30 + $0x4] ss:$8 sps:$4 sm:$0xff]  }
 0x7c4   : > { %v3532_v33 = vpop.xlane.xlu1 %3531  ;;  %5223 = vmatprep.subr.bf16.mxu1 %v7249_v7 }
 0x7c5   : > { %v10157_v1 = vsub.f32 %v9935_v60, %v3547_v2  ;;  %v10160_v18 = vsub.f32 %v9939_v56, %v3547_v2  ;;  %v3548_v26 = vmul.f32 0.00390625, %v3532_v33  ;;  %3653 = vadd.xlane.f32.xlu1 %v3652_v4 }
 0x7c7   : > { %v3609_v11 = vmul.f32 %v10157_v1, %v10157_v1  ;;  %v3610_v51 = vmul.f32 %v10160_v18, %v10160_v18  ;;  %v10167_v16 = vsub.f32 %v9943_v23, %v3548_v26  ;;  %v10170_v32 = vsub.f32 %v9946_v53, %v3548_v26 }
 0x7c9   : > { %v3611_v50 = vmul.f32 %v10167_v16, %v10167_v16  ;;  %v3612_v58 = vmul.f32 %v10170_v32, %v10170_v32  ;;  %v3655_v62 = vadd.f32 %v3610_v51, %v3609_v11  ;;  %v3483_v11 = vld [vmem:[%s883_s13] sm:$0x3] }
 0x7cb   : > { %3656 = vadd.xlane.f32.xlu0 %v3655_v62  ;;  %v3658_v0 = vadd.f32 %v3612_v58, %v3611_v50  ;;  %v10183_v62 = vrot.slane %v3483_v11, %v9158_v22 }
 0x7cd   : > { %3659 = vadd.xlane.f32.xlu1 %v3658_v0 }
 0x820   : > { %v3615_v2 = vpop.xlane.xlu0 %3614 }
 0x821   : > { %v3661_v4 = vmul.f32 0.00390625, %v3615_v2 }
 0x822   : > { %v3618_v33 = vpop.xlane.xlu1 %3617 }
 0x823   : > { %v3677_v23 = vadd.f32 1e-06, %v3661_v4  ;;  %v3662_v26 = vmul.f32 0.00390625, %v3618_v33 }
 0x825   : > { %7503 = vrsqrt.f32 %v3677_v23  ;;  %v3678_v53 = vadd.f32 1e-06, %v3662_v26  ;;  %v3484_v23 = vld [vmem:[%s887_s22] sm:$0x3] }
 0x826   : > { %v10196_v4 = vrot.slane %v3484_v23, %v9158_v22  ;;  %v10199_v33 = vrot.slane %v3484_v23, %v9155_v63 }
 0x827   : > { %7505 = vrsqrt.f32 %v3678_v53 }
 0x828   : > { %v3621_v56 = vpop.xlane.xlu0 %3620 }
 0x829   : > { %v3663_v60 = vmul.f32 0.00390625, %v3621_v56  ;;  %v10191_v56 = vrot.slane %v3483_v11, %v9155_v63 }
 0x82a   : > { %v3624_v14 = vpop.xlane.xlu1 %3623 }
 0x82b   : > { %v3679_v51 = vadd.f32 1e-06, %v3663_v60  ;;  %v3664_v50 = vmul.f32 0.00390625, %v3624_v14 }
 0x82d   : > { %7507 = vrsqrt.f32 %v3679_v51  ;;  %v3680_v58 = vadd.f32 1e-06, %v3664_v50 }
 0x82f   : > { %v7504_v53 = vpop.eup %7503  ;;  %7509 = vrsqrt.f32 %v3680_v58 }
 0x830   : > { %v3709_v0 = vmul.f32 %v7504_v53, %v9993_v9  ;;  %v3627_v7 = vpop.xlane.xlu0 %3626  ;;  %v3710_v14 = vmul.f32 %v7504_v53, %v9996_v12 }
 0x831   : > { %v7506_v60 = vpop.eup %7505  ;;  %v3665_v2 = vmul.f32 0.00390625, %v3627_v7 }
 0x832   : > { %v3752_v26 = vmul.f32 %v10183_v62, %v3709_v0  ;;  %v3711_v11 = vmul.f32 %v7506_v60, %v10003_v40  ;;  %v3630_v51 = vpop.xlane.xlu1 %3629  ;;  %v3712_v50 = vmul.f32 %v7506_v60, %v10006_v15  ;;  %v3753_v9 = vmul.f32 %v10191_v56, %v3710_v14 }
 0x833   : > { %v3681_v58 = vadd.f32 1e-06, %v3665_v2  ;;  %v3666_v10 = vmul.f32 0.00390625, %v3630_v51 }
 0x834   : > { %v3754_v12 = vmul.f32 %v10183_v62, %v3711_v11  ;;  %v3755_v53 = vmul.f32 %v10191_v56, %v3712_v50  ;;  %v3796_v7 = vadd.f32 %v10199_v33, %v3753_v9  ;;  %v3795_v40 = vadd.f32 %v10196_v4, %v3752_v26  ;;  %v7252_v9 = vld [vmem:[%s8719_s30 + $0x14] ss:$8 sps:$4 sm:$0xff]  }
 0x835   : > { %7511 = vrsqrt.f32 %v3681_v58  ;;  %v3682_v23 = vadd.f32 1e-06, %v3666_v10  ;;  %v7247_v58 = vld [vmem:[%s8719_s30] ss:$8 sps:$4 sm:$0xff]  }
 0x836   : > { %v3798_v0 = vadd.f32 %v10199_v33, %v3755_v53  ;;  %v3797_v15 = vadd.f32 %v10196_v4, %v3754_v12 }
 0x837   : > { %v7508_v60 = vpop.eup %7507  ;;  %7513 = vrsqrt.f32 %v3682_v23 }
 0x838   : > { %v3633_v14 = vpop.xlane.xlu0 %3632  ;;  %v3828_v2 = vpack.c.bf16 %v3798_v0, %v3796_v7  ;;  %v3827_v51 = vpack.c.bf16 %v3797_v15, %v3795_v40  ;;  %v3714_v11 = vmul.f32 %v7508_v60, %v10016_v59  ;;  %v3713_v50 = vmul.f32 %v7508_v60, %v10013_v28  ;;  %v7250_v40 = vld [vmem:[%s8719_s30 + $0x10] ss:$8 sps:$4 sm:$0xff]  }
 0x839   : > { %v7510_v29 = vpop.eup %7509  ;;  %v3667_v10 = vmul.f32 0.00390625, %v3633_v14 }
 0x83a   : > { %v3636_v61 = vpop.xlane.xlu1 %3635  ;;  %4281 = vmatprep.mubr.bf16.mxu1 %v3828_v2  ;;  %4394 = vmatprep.mubr.bf16.mxu0 %v3828_v2  ;;  %v3716_v26 = vmul.f32 %v7510_v29, %v10026_v41  ;;  %v3757_v12 = vmul.f32 %v10191_v56, %v3714_v11  ;;  %v3715_v53 = vmul.f32 %v7510_v29, %v10023_v30  ;;  %v7255_v41 = vld [vmem:[%s8719_s30 + $0x24] ss:$8 sps:$4 sm:$0xff]  }
 0x83b   : > { %v3683_v23 = vadd.f32 1e-06, %v3667_v10  ;;  %v3668_v7 = vmul.f32 0.00390625, %v3636_v61  ;;  %4282 = vmatmul.mubr.bf16.vlgmr.msra.gmra.mrb[64].mxu1 %v3827_v51  ;;  %4395 = vmatmul.mubr.bf16.vlgmr.msra.gmra.mrb[128].mxu0 %v3827_v51  ;;  %v3756_v28 = vmul.f32 %v10183_v62, %v3713_v50  ;;  %v7253_v10 = vld [vmem:[%s8719_s30 + $0x20] ss:$8 sps:$4 sm:$0xff]  }
 0x83c   : > { %v3759_v59 = vmul.f32 %v10191_v56, %v3716_v26  ;;  %v3758_v0 = vmul.f32 %v10183_v62, %v3715_v53  ;;  %5224 = vmatpush1.bf16.msra.mxu1 %v7247_v58  ;;  %v3800_v60 = vadd.f32 %v10199_v33, %v3757_v12  ;;  %v7258_v12 = vld [vmem:[%s8719_s30 + $0x34] ss:$8 sps:$4 sm:$0xff]  }
 0x83d   : > { %7515 = vrsqrt.f32 %v3683_v23  ;;  %v3684_v15 = vadd.f32 1e-06, %v3668_v7  ;;  %5225 = vmatprep.subr.bf16.mxu1 %v7252_v9  ;;  %v3799_v29 = vadd.f32 %v10196_v4, %v3756_v28 }
 0x83e   : > { %v3802_v61 = vadd.f32 %v10199_v33, %v3759_v59  ;;  %v3801_v30 = vadd.f32 %v10196_v4, %v3758_v0 }
 0x83f   : > { %v7512_v14 = vpop.eup %7511  ;;  %7517 = vrsqrt.f32 %v3684_v15  ;;  %v7256_v15 = vld [vmem:[%s8719_s30 + $0x30] ss:$8 sps:$4 sm:$0xff]  }
 0x840   : > { %v3639_v2 = vpop.xlane.xlu0 %3638  ;;  %v3830_v51 = vpack.c.bf16 %v3802_v61, %v3800_v60  ;;  %v3829_v11 = vpack.c.bf16 %v3801_v30, %v3799_v29  ;;  %v3718_v50 = vmul.f32 %v7512_v14, %v10036_v5  ;;  %v3717_v58 = vmul.f32 %v7512_v14, %v10033_v57  ;;  %5226 = vmatpush1.bf16.msra.mxu1 %v7250_v40 }
 0x841   : > { %v7514_v9 = vpop.eup %7513  ;;  %v3669_v26 = vmul.f32 0.00390625, %v3639_v2  ;;  %5227 = vmatprep.subr.bf16.mxu1 %v7255_v41 }
 0x842   : > { %v3642_v53 = vpop.xlane.xlu1 %3641  ;;  %4291 = vmatprep.mubr.bf16.mxu1 %v3830_v51  ;;  %4404 = vmatprep.mubr.bf16.mxu0 %v3830_v51  ;;  %v3720_v23 = vmul.f32 %v7514_v9, %v10046_v44  ;;  %v3761_v7 = vmul.f32 %v10191_v56, %v3718_v50  ;;  %v3719_v28 = vmul.f32 %v7514_v9, %v10043_v38  ;;  %v7261_v44 = vld [vmem:[%s8719_s30 + $0x44] ss:$8 sps:$4 sm:$0xff]  }
 0x843   : > { %v3685_v5 = vadd.f32 1e-06, %v3669_v26  ;;  %v3670_v59 = vmul.f32 0.00390625, %v3642_v53  ;;  %4292 = vmatmul.mubr.bf16.gmra.mrb[68].mxu1 %v3829_v11  ;;  %4405 = vmatmul.mubr.bf16.gmra.mrb[132].mxu0 %v3829_v11  ;;  %v3760_v57 = vmul.f32 %v10183_v62, %v3717_v58  ;;  %v7259_v58 = vld [vmem:[%s8719_s30 + $0x40] ss:$8 sps:$4 sm:$0xff]  }
 0x844   : > { %v3763_v0 = vmul.f32 %v10191_v56, %v3720_v23  ;;  %v3762_v40 = vmul.f32 %v10183_v62, %v3719_v28  ;;  %5228 = vmatpush1.bf16.msra.mxu1 %v7253_v10  ;;  %v3804_v60 = vadd.f32 %v10199_v33, %v3761_v7  ;;  %v7264_v26 = vld [vmem:[%s8719_s30 + $0x54] ss:$8 sps:$4 sm:$0xff]  }
 0x845   : > { %7519 = vrsqrt.f32 %v3685_v5  ;;  %v3686_v41 = vadd.f32 1e-06, %v3670_v59  ;;  %5229 = vmatprep.subr.bf16.mxu1 %v7258_v12  ;;  %v3803_v61 = vadd.f32 %v10196_v4, %v3760_v57  ;;  %v7262_v57 = vld [vmem:[%s8719_s30 + $0x50] ss:$8 sps:$4 sm:$0xff]  }
 0x846   : > { %v3806_v38 = vadd.f32 %v10199_v33, %v3763_v0  ;;  %v3805_v29 = vadd.f32 %v10196_v4, %v3762_v40 }
 0x847   : > { %v7516_v30 = vpop.eup %7515  ;;  %7521 = vrsqrt.f32 %v3686_v41 }
 0x848   : > { %v3645_v14 = vpop.xlane.xlu0 %3644  ;;  %v3832_v2 = vpack.c.bf16 %v3806_v38, %v3804_v60  ;;  %v3831_v51 = vpack.c.bf16 %v3805_v29, %v3803_v61  ;;  %v3722_v11 = vmul.f32 %v7516_v30, %v10056_v52  ;;  %v3721_v50 = vmul.f32 %v7516_v30, %v10053_v42  ;;  %5230 = vmatpush1.bf16.msra.mxu1 %v7256_v15 }
 0x849   : > { %v7518_v10 = vpop.eup %7517  ;;  %v3671_v9 = vmul.f32 0.00390625, %v3645_v14  ;;  %5231 = vmatprep.subr.bf16.mxu1 %v7261_v44  ;;  %v7265_v14 = vld [vmem:[%s8719_s30 + $0x60] ss:$8 sps:$4 sm:$0xff]  }
 0x84a   : > { %v3648_v12 = vpop.xlane.xlu1 %3647  ;;  %4301 = vmatprep.mubr.bf16.mxu1 %v3832_v2  ;;  %4414 = vmatprep.mubr.bf16.mxu0 %v3832_v2  ;;  %v3724_v53 = vmul.f32 %v7518_v10, %v10066_v36  ;;  %v3765_v23 = vmul.f32 %v10191_v56, %v3722_v11  ;;  %v3723_v7 = vmul.f32 %v7518_v10, %v10063_v55  ;;  %v7267_v36 = vld [vmem:[%s8719_s30 + $0x64] ss:$8 sps:$4 sm:$0xff]   ;;  %v7270_v11 = vld [vmem:[%s8719_s30 + $0x74] ss:$8 sps:$4 sm:$0xff]  }
 0x84b   : > { %v3687_v52 = vadd.f32 1e-06, %v3671_v9  ;;  %v3672_v28 = vmul.f32 0.00390625, %v3648_v12  ;;  %4302 = vmatmul.mubr.bf16.gmra.mrb[72].mxu1 %v3831_v51  ;;  %4415 = vmatmul.mubr.bf16.gmra.mrb[136].mxu0 %v3831_v51  ;;  %v3764_v42 = vmul.f32 %v10183_v62, %v3721_v50 }
 0x84c   : > { %v3767_v5 = vmul.f32 %v10191_v56, %v3724_v53  ;;  %v3766_v59 = vmul.f32 %v10183_v62, %v3723_v7  ;;  %5232 = vmatpush1.bf16.msra.mxu1 %v7259_v58  ;;  %v3808_v40 = vadd.f32 %v10199_v33, %v3765_v23  ;;  %v7268_v23 = vld [vmem:[%s8719_s30 + $0x70] ss:$8 sps:$4 sm:$0xff]  }
 0x84d   : > { %7523 = vrsqrt.f32 %v3687_v52  ;;  %v3688_v0 = vadd.f32 1e-06, %v3672_v28  ;;  %5233 = vmatprep.subr.bf16.mxu1 %v7264_v26  ;;  %v3807_v15 = vadd.f32 %v10196_v4, %v3764_v42 }
 0x84e   : > { %v3810_v55 = vadd.f32 %v10199_v33, %v3767_v5  ;;  %v3809_v41 = vadd.f32 %v10196_v4, %v3766_v59 }
 0x84f   : > { %v7520_v44 = vpop.eup %7519  ;;  %7525 = vrsqrt.f32 %v3688_v0 }
 0x850   : > { %v3651_v60 = vpop.xlane.xlu0 %3650  ;;  %v3834_v38 = vpack.c.bf16 %v3810_v55, %v3808_v40  ;;  %v3833_v61 = vpack.c.bf16 %v3809_v41, %v3807_v15  ;;  %v3726_v29 = vmul.f32 %v7520_v44, %v10080_v3  ;;  %v3725_v30 = vmul.f32 %v7520_v44, %v10077_v31  ;;  %5234 = vmatpush1.bf16.msra.mxu1 %v7262_v57  ;;  %v7271_v55 = vld [vmem:[%s8719_s30 + $0x80] ss:$8 sps:$4 sm:$0xff]   ;;  %v7276_v44 = vld [vmem:[%s8719_s30 + $0x94] ss:$8 sps:$4 sm:$0xff]  }
 0x851   : > { %v7522_v2 = vpop.eup %7521  ;;  %v3673_v51 = vmul.f32 0.00390625, %v3651_v60  ;;  %5235 = vmatprep.subr.bf16.mxu1 %v7267_v36 }
 0x852   : > { %v3654_v50 = vpop.xlane.xlu1 %3653  ;;  %4311 = vmatprep.mubr.bf16.mxu1 %v3834_v38  ;;  %4424 = vmatprep.mubr.bf16.mxu0 %v3834_v38  ;;  %v3728_v58 = vmul.f32 %v7522_v2, %v10094_v8  ;;  %v3769_v10 = vmul.f32 %v10191_v56, %v3726_v29  ;;  %v3727_v9 = vmul.f32 %v7522_v2, %v10091_v37  ;;  %v7273_v8 = vld [vmem:[%s8719_s30 + $0x84] ss:$8 sps:$4 sm:$0xff]  }
 0x853   : > { %v3689_v3 = vadd.f32 1e-06, %v3673_v51  ;;  %v3674_v26 = vmul.f32 0.00390625, %v3654_v50  ;;  %4312 = vmatmul.mubr.bf16.gmra.mrb[76].mxu1 %v3833_v61  ;;  %4425 = vmatmul.mubr.bf16.gmra.mrb[140].mxu0 %v3833_v61  ;;  %v3768_v31 = vmul.f32 %v10183_v62, %v3725_v30  ;;  %v7274_v51 = vld [vmem:[%s8719_s30 + $0x90] ss:$8 sps:$4 sm:$0xff]  }
 0x854   : > { %v3771_v12 = vmul.f32 %v10191_v56, %v3728_v58  ;;  %v3770_v53 = vmul.f32 %v10183_v62, %v3727_v9  ;;  %5236 = vmatpush1.bf16.msra.mxu1 %v7265_v14  ;;  %v3812_v52 = vadd.f32 %v10199_v33, %v3769_v10 }
 0x855   : > { %7527 = vrsqrt.f32 %v3689_v3  ;;  %v3690_v7 = vadd.f32 1e-06, %v3674_v26  ;;  %5237 = vmatprep.subr.bf16.mxu1 %v7270_v11  ;;  %v3811_v28 = vadd.f32 %v10196_v4, %v3768_v31 }
 0x856   : > { %v3814_v37 = vadd.f32 %v10199_v33, %v3771_v12  ;;  %v3813_v42 = vadd.f32 %v10196_v4, %v3770_v53 }
 0x857   : > { %v7524_v5 = vpop.eup %7523  ;;  %7529 = vrsqrt.f32 %v3690_v7 }
 0x858   : > { %v3657_v59 = vpop.xlane.xlu0 %3656  ;;  %v3836_v57 = vpack.c.bf16 %v3814_v37, %v3812_v52  ;;  %v3835_v0 = vpack.c.bf16 %v3813_v42, %v3811_v28  ;;  %v3730_v36 = vmul.f32 %v7524_v5, %v10110_v17  ;;  %v3729_v40 = vmul.f32 %v7524_v5, %v10107_v20  ;;  %5238 = vmatpush1.bf16.msra.mxu1 %v7268_v23 }
 0x859   : > { %v7526_v15 = vpop.eup %7525  ;;  %v3675_v41 = vmul.f32 0.00390625, %v3657_v59  ;;  %5239 = vmatprep.subr.bf16.mxu1 %v7273_v8 }
 0x85a   : > { %v3660_v60 = vpop.xlane.xlu1 %3659  ;;  %4321 = vmatprep.mubr.bf16.mxu1 %v3836_v57  ;;  %4434 = vmatprep.mubr.bf16.mxu0 %v3836_v57  ;;  %v3732_v38 = vmul.f32 %v7526_v15, %v10122_v24  ;;  %v3773_v61 = vmul.f32 %v10191_v56, %v3730_v36  ;;  %v3731_v29 = vmul.f32 %v7526_v15, %v10119_v48 }
 0x85b   : > { %v3691_v30 = vadd.f32 1e-06, %v3675_v41  ;;  %v3676_v17 = vmul.f32 0.00390625, %v3660_v60  ;;  %4322 = vmatmul.mubr.bf16.gmra.mrb[80].mxu1 %v3835_v0  ;;  %4435 = vmatmul.mubr.bf16.gmra.mrb[144].mxu0 %v3835_v0  ;;  %v3772_v20 = vmul.f32 %v10183_v62, %v3729_v40 }
 0x85c   : > { %v3775_v14 = vmul.f32 %v10191_v56, %v3732_v38  ;;  %v3774_v2 = vmul.f32 %v10183_v62, %v3731_v29  ;;  %5240 = vmatpush1.bf16.msra.mxu1 %v7271_v55  ;;  %v3816_v24 = vadd.f32 %v10199_v33, %v3773_v61  ;;  %v7280_v61 = vld [vmem:[%s8719_s30 + $0xb0] ss:$8 sps:$4 sm:$0xff]   ;;  %v7283_v29 = vld [vmem:[%s8719_s30 + $0xc0] ss:$8 sps:$4 sm:$0xff]  }
 0x85d   : > { %7531 = vrsqrt.f32 %v3691_v30  ;;  %v3692_v11 = vadd.f32 1e-06, %v3676_v17  ;;  %5241 = vmatprep.subr.bf16.mxu1 %v7276_v44  ;;  %v3815_v48 = vadd.f32 %v10196_v4, %v3772_v20  ;;  %v7288_v30 = vld [vmem:[%s8719_s30 + $0xd4] ss:$8 sps:$4 sm:$0xff]   ;;  %v7286_v17 = vld [vmem:[%s8719_s30 + $0xd0] ss:$8 sps:$4 sm:$0xff]  }
 0x85e   : > { %v3818_v50 = vadd.f32 %v10199_v33, %v3775_v14  ;;  %v3817_v58 = vadd.f32 %v10196_v4, %v3774_v2  ;;  %v7291_v20 = vld [vmem:[%s8719_s30 + $0xe4] ss:$8 sps:$4 sm:$0xff]   ;;  %v7289_v14 = vld [vmem:[%s8719_s30 + $0xe0] ss:$8 sps:$4 sm:$0xff]   ;;  %v7294_v2 = vld [vmem:[%s8719_s30 + $0xf4] ss:$8 sps:$4 sm:$0xff]  }
 0x85f   : > { %v7528_v10 = vpop.eup %7527  ;;  %7533 = vrsqrt.f32 %v3692_v11  ;;  %v7297_v11 = vld [vmem:[%s8719_s30 + $0x104] ss:$8 sps:$4 sm:$0xff]  }
 0x860   : > { %v3838_v9 = vpack.c.bf16 %v3818_v50, %v3816_v24  ;;  %v3837_v3 = vpack.c.bf16 %v3817_v58, %v3815_v48  ;;  %v3734_v26 = vmul.f32 %v7528_v10, %v10139_v47  ;;  %v3733_v31 = vmul.f32 %v7528_v10, %v10136_v54  ;;  %5242 = vmatpush1.bf16.msra.mxu1 %v7274_v51  ;;  %v7292_v51 = vld [vmem:[%s8719_s30 + $0xf0] ss:$8 sps:$4 sm:$0xff]  }
 0x861   : > { %v7530_v12 = vpop.eup %7529  ;;  %v3907_v24 = vld [vmem:[%s8709_s25] sm:$0xf]  ;;  %v11768_v48 = vsub.s32 2, %v9152_v19 }
 0x862   : > { %4331 = vmatprep.mubr.bf16.mxu1 %v3838_v9  ;;  %4444 = vmatprep.mubr.bf16.mxu0 %v3838_v9  ;;  %v3736_v53 = vmul.f32 %v7530_v12, %v10150_v49  ;;  %v3777_v23 = vmul.f32 %v10191_v56, %v3734_v26  ;;  %v3735_v7 = vmul.f32 %v7530_v12, %v10147_v35  ;;  %v11769_v9 = vsub.s32 3, %v9152_v19 }
 0x863   : > { %4332 = vmatmul.mubr.bf16.gmra.mrb[84].mxu1 %v3837_v3  ;;  %4445 = vmatmul.mubr.bf16.gmra.mrb[148].mxu0 %v3837_v3  ;;  %v3776_v8 = vmul.f32 %v10183_v62, %v3733_v31  ;;  %v10329_v50 = vrot.slane %v3907_v24, %v9158_v22  ;;  %v10333_v58 = vrot.slane %v3907_v24, %v11768_v48 }
 0x864   : > { %v3779_v52 = vmul.f32 %v10191_v56, %v3736_v53  ;;  %v3778_v47 = vmul.f32 %v10183_v62, %v3735_v7  ;;  %v3820_v54 = vadd.f32 %v10199_v33, %v3777_v23  ;;  %v10336_v10 = vrot.slane %v3907_v24, %v9155_v63 }
 0x865   : > { %v3819_v28 = vadd.f32 %v10196_v4, %v3776_v8  ;;  %v10340_v3 = vrot.slane %v3907_v24, %v11769_v9 }
 0x866   : > { %v3822_v37 = vadd.f32 %v10199_v33, %v3779_v52  ;;  %v3821_v49 = vadd.f32 %v10196_v4, %v3778_v47 }
 0x867   : > { %v7532_v42 = vpop.eup %7531 }
 0x868   : > { %v3840_v5 = vpack.c.bf16 %v3822_v37, %v3820_v54  ;;  %v3839_v59 = vpack.c.bf16 %v3821_v49, %v3819_v28  ;;  %v3738_v35 = vmul.f32 %v7532_v42, %v10160_v18  ;;  %v3737_v57 = vmul.f32 %v7532_v42, %v10157_v1 }
 0x869   : > { %v7534_v0 = vpop.eup %7533 }
 0x86a   : > { %4341 = vmatprep.mubr.bf16.mxu1 %v3840_v5  ;;  %4454 = vmatprep.mubr.bf16.mxu0 %v3840_v5  ;;  %v3740_v36 = vmul.f32 %v7534_v0, %v10170_v32  ;;  %v3781_v40 = vmul.f32 %v10191_v56, %v3738_v35  ;;  %v3739_v55 = vmul.f32 %v7534_v0, %v10167_v16 }
 0x86b   : > { %4342 = vmatmul.mubr.bf16.gmra.mrb[88].mxu1 %v3839_v59  ;;  %4455 = vmatmul.mubr.bf16.gmra.mrb[152].mxu0 %v3839_v59  ;;  %v3780_v15 = vmul.f32 %v10183_v62, %v3737_v57 }
 0x86c   : > { %v3783_v41 = vmul.f32 %v10191_v56, %v3740_v36  ;;  %v3782_v1 = vmul.f32 %v10183_v62, %v3739_v55  ;;  %v3824_v18 = vadd.f32 %v10199_v33, %v3781_v40  ;;  %v7279_v62 = vld [vmem:[%s8719_s30 + $0xa4] ss:$8 sps:$4 sm:$0xff]   ;;  %v7277_v56 = vld [vmem:[%s8719_s30 + $0xa0] ss:$8 sps:$4 sm:$0xff]  }
 0x86d   : > { %v3823_v44 = vadd.f32 %v10196_v4, %v3780_v15  ;;  %5243 = vmatprep.subr.bf16.mxu1 %v7279_v62 }
 0x86e   : > { %v3826_v32 = vadd.f32 %v10199_v33, %v3783_v41  ;;  %v3825_v16 = vadd.f32 %v10196_v4, %v3782_v1  ;;  %5244 = vmatpush1.bf16.msra.mxu1 %v7277_v56  ;;  %v7282_v33 = vld [vmem:[%s8719_s30 + $0xb4] ss:$8 sps:$4 sm:$0xff]   ;;  %v7285_v4 = vld [vmem:[%s8719_s30 + $0xc4] ss:$8 sps:$4 sm:$0xff]  }
 0x86f   : > { %5245 = vmatprep.subr.bf16.mxu1 %v7282_v33 }
 0x870   : > { %v3842_v60 = vpack.c.bf16 %v3826_v32, %v3824_v18  ;;  %v3841_v38 = vpack.c.bf16 %v3825_v16, %v3823_v44 }
 0x872   : > { %4351 = vmatprep.mubr.bf16.mxu1 %v3842_v60  ;;  %4464 = vmatprep.mubr.bf16.mxu0 %v3842_v60 }
 0x873   : > { %4352 = vmatmul.mubr.bf16.gmra.mrb[92].mxu1 %v3841_v38  ;;  %4465 = vmatmul.mubr.bf16.gmra.mrb[156].mxu0 %v3841_v38 }
 0x874   : > { %5246 = vmatpush1.bf16.msra.mxu1 %v7280_v61 }
 0x875   : > { %5247 = vmatprep.subr.bf16.mxu1 %v7285_v4 }
 0x878   : > { %5248 = vmatpush1.bf16.msra.mxu1 %v7283_v29 }
 0x879   : > { %5249 = vmatprep.subr.bf16.mxu1 %v7288_v30 }
 0x87c   : > { %5250 = vmatpush1.bf16.msra.mxu1 %v7286_v17 }
 0x87d   : > { %5251 = vmatprep.subr.bf16.mxu1 %v7291_v20 }
 0x880   : > { %5252 = vmatpush1.bf16.msra.mxu1 %v7289_v14 }
 0x881   : > { %5253 = vmatprep.subr.bf16.mxu1 %v7294_v2 }
 0x884   : > { %5254 = vmatpush1.bf16.msra.mxu1 %v7292_v51 }
 0x885   : > { %5336 = vmatprep.subr.bf16.mxu1 %v7297_v11 }
 0x90e   : > { %v4283_v26 = vpop.f32.mrb[64].mxu1  ;;  %v4396_v31 = vpop.f32.mrb[128].mxu0 }
 0x90f   : > { %v4284_v12 = vadd.f32 %v4283_v26, %v10329_v50  ;;  %v4397_v53 = vadd.f32 %v4396_v31, %v10333_v58  ;;  %v4285_v23 = vpop.f32.mrb[65].mxu1  ;;  %v4398_v7 = vpop.f32.mrb[129].mxu0 }
 0x910   : > { %v4286_v8 = vadd.f32 %v4285_v23, %v10336_v10  ;;  %v4399_v52 = vadd.f32 %v4398_v7, %v10340_v3  ;;  %v4287_v47 = vpop.f32.mrb[66].mxu1  ;;  %v4400_v54 = vpop.f32.mrb[130].mxu0 }
 0x911   : > { %v4539_v37 = vmul.f32 0.70710677, %v4284_v12  ;;  %v4541_v28 = vmul.f32 0.70710677, %v4397_v53  ;;  %v4288_v42 = vadd.f32 %v4287_v47, %v10329_v50  ;;  %v4401_v5 = vadd.f32 %v4400_v54, %v10333_v58  ;;  %v4289_v59 = vpop.f32.mrb[67].mxu1  ;;  %v4402_v35 = vpop.f32.mrb[131].mxu0 }
 0x912   : > { %v4540_v49 = vmul.f32 0.70710677, %v4286_v8  ;;  %v4542_v19 = vmul.f32 0.70710677, %v4399_v52  ;;  %v4290_v57 = vadd.f32 %v4289_v59, %v10336_v10  ;;  %v4403_v0 = vadd.f32 %v4402_v35, %v10340_v3 }
 0x913   : > { %7535 = verf.f32 %v4539_v37  ;;  %v4543_v36 = vmul.f32 0.70710677, %v4288_v42  ;;  %v4545_v40 = vmul.f32 0.70710677, %v4401_v5  ;;  %v4475_v30 = vmul.f32 0.5, %v4284_v12 }
 0x914   : > { %7537 = verf.f32 %v4541_v28  ;;  %v4544_v55 = vmul.f32 0.70710677, %v4290_v57  ;;  %v4546_v41 = vmul.f32 0.70710677, %v4403_v0  ;;  %v4477_v14 = vmul.f32 0.5, %v4397_v53 }
 0x915   : > { %7539 = verf.f32 %v4540_v49  ;;  %v10356_v24 = vmul.f32 0.5, %v4286_v8  ;;  %v10358_v48 = vmul.f32 0.5, %v4399_v52  ;;  %v4479_v12 = vmul.f32 0.5, %v4288_v42 }
 0x916   : > { %7541 = verf.f32 %v4542_v19  ;;  %v4293_v15 = vpop.f32.mrb[68].mxu1  ;;  %v4406_v18 = vpop.f32.mrb[132].mxu0  ;;  %v4481_v23 = vmul.f32 0.5, %v4401_v5  ;;  %v10361_v54 = vmul.f32 0.5, %v4290_v57  ;;  %v10363_v37 = vmul.f32 0.5, %v4403_v0 }
 0x917   : > { %7543 = verf.f32 %v4543_v36  ;;  %v4294_v1 = vadd.f32 %v4293_v15, %v10329_v50  ;;  %v4295_v32 = vpop.f32.mrb[69].mxu1  ;;  %v4407_v44 = vadd.f32 %v4406_v18, %v10333_v58  ;;  %v4408_v60 = vpop.f32.mrb[133].mxu0 }
 0x918   : > { %7545 = verf.f32 %v4545_v40  ;;  %v4296_v16 = vadd.f32 %v4295_v32, %v10336_v10  ;;  %v4297_v38 = vpop.f32.mrb[70].mxu1  ;;  %v4409_v56 = vadd.f32 %v4408_v60, %v10340_v3  ;;  %v4410_v33 = vpop.f32.mrb[134].mxu0 }
 0x919   : > { %7547 = verf.f32 %v4544_v55  ;;  %v4547_v62 = vmul.f32 0.70710677, %v4294_v1  ;;  %v4299_v61 = vpop.f32.mrb[71].mxu1  ;;  %v4549_v4 = vmul.f32 0.70710677, %v4407_v44  ;;  %v4412_v29 = vpop.f32.mrb[135].mxu0  ;;  %v4298_v2 = vadd.f32 %v4297_v38, %v10329_v50 }
 0x91a   : > { %7549 = verf.f32 %v4546_v41  ;;  %v4548_v17 = vmul.f32 0.70710677, %v4296_v16  ;;  %v4550_v20 = vmul.f32 0.70710677, %v4409_v56  ;;  %v4411_v51 = vadd.f32 %v4410_v33, %v10333_v58 }
 0x91b   : > { %7551 = verf.f32 %v4547_v62  ;;  %v4300_v9 = vadd.f32 %v4299_v61, %v10336_v10  ;;  %v4551_v28 = vmul.f32 0.70710677, %v4298_v2  ;;  %v4413_v8 = vadd.f32 %v4412_v29, %v10340_v3 }
 0x91c   : > { %7553 = verf.f32 %v4549_v4  ;;  %v10366_v19 = vmul.f32 0.5, %v4294_v1  ;;  %v10368_v59 = vmul.f32 0.5, %v4407_v44  ;;  %v4553_v35 = vmul.f32 0.70710677, %v4411_v51 }
 0x91d   : > { %v7536_v11 = vpop.eup %7535  ;;  %7555 = verf.f32 %v4548_v17  ;;  %v10370_v55 = vmul.f32 0.5, %v4296_v16  ;;  %v4552_v57 = vmul.f32 0.70710677, %v4300_v9  ;;  %v10376_v1 = vmul.f32 0.5, %v4409_v56 }
 0x91e   : > { %v7538_v26 = vpop.eup %7537  ;;  %v4667_v31 = vadd.f32 1.0, %v7536_v11  ;;  %7557 = verf.f32 %v4550_v20  ;;  %v4303_v7 = vpop.f32.mrb[72].mxu1  ;;  %v4554_v33 = vmul.f32 0.70710677, %v4413_v8 }
 0x91f   : > { %v4416_v53 = vpop.f32.mrb[136].mxu0  ;;  %v7540_v47 = vpop.eup %7539  ;;  %v4669_v40 = vadd.f32 1.0, %v7538_v26  ;;  %7559 = verf.f32 %v4551_v28  ;;  %v4304_v16 = vadd.f32 %v4303_v7, %v10329_v50  ;;  %v10392_v7 = vmul.f32 0.5, %v4411_v51 }
 0x920   : > { %v4305_v52 = vpop.f32.mrb[73].mxu1  ;;  %v7542_v49 = vpop.eup %7541  ;;  %v10374_v18 = vmul.f32 %v4667_v31, %v4475_v30  ;;  %v4668_v32 = vadd.f32 1.0, %v7540_v47  ;;  %7561 = verf.f32 %v4553_v35  ;;  %v4417_v30 = vadd.f32 %v4416_v53, %v10333_v58 }
 0x921   : > { %v4418_v42 = vpop.f32.mrb[137].mxu0  ;;  %v4307_v5 = vpop.f32.mrb[74].mxu1  ;;  %v4670_v4 = vadd.f32 1.0, %v7542_v49  ;;  %v10384_v20 = vmul.f32 %v4669_v40, %v4477_v14  ;;  %7563 = verf.f32 %v4552_v57  ;;  %v4555_v11 = vmul.f32 0.70710677, %v4304_v16 }
 0x922   : > { %v7544_v36 = vpop.eup %7543  ;;  %v4420_v15 = vpop.f32.mrb[138].mxu0  ;;  %v10390_v47 = vmul.f32 0.5, %v4298_v2  ;;  %v10399_v35 = vmul.f32 0.5, %v4300_v9  ;;  %7565 = verf.f32 %v4554_v33  ;;  %v10404_v51 = vmul.f32 %v4668_v32, %v10356_v24 }
 0x923   : > { %v10372_v0 = vpop.f32.mrb[75].mxu1  ;;  %v7546_v41 = vpop.eup %7545  ;;  %v4671_v60 = vadd.f32 1.0, %v7544_v36  ;;  %11770 = vst [vmem:[#allocation72_spill] sm:$0xff] %v10384_v20  ;;  %v10409_v57 = vmul.f32 0.5, %v4413_v8  ;;  %7567 = verf.f32 %v4555_v11  ;;  %v4419_v33 = vadd.f32 %v4418_v42, %v10340_v3  ;;  %v7301_v20 = vld [vmem:[%s8719_s30 + $0x120] ss:$8 sps:$4 sm:$0xff]  }
 0x924   : > { %v10378_v44 = vpop.f32.mrb[139].mxu0  ;;  %v7548_v38 = vpop.eup %7547  ;;  %v4673_v62 = vadd.f32 1.0, %v7546_v41  ;;  %v4557_v41 = vmul.f32 0.70710677, %v4417_v30  ;;  %v4421_v8 = vadd.f32 %v4420_v15, %v10333_v58  ;;  %v10421_v45 = vmul.f32 0.5, %v4304_v16 }
 0x925   : > { %v7550_v61 = vpop.eup %7549  ;;  %v10381_v29 = vmul.f32 %v4671_v60, %v4479_v12  ;;  %v4306_v12 = vadd.f32 %v4305_v52, %v10336_v10  ;;  %v10407_v52 = vmul.f32 %v4670_v4, %v10358_v48  ;;  %v4308_v48 = vadd.f32 %v4307_v5, %v10329_v50 }
 0x926   : > { %v7552_v17 = vpop.eup %7551  ;;  %v10386_v56 = vmul.f32 %v4673_v62, %v4481_v23  ;;  %v4313_v28 = vpop.f32.mrb[76].mxu1  ;;  %v4672_v23 = vadd.f32 1.0, %v7548_v38  ;;  %v4674_v38 = vadd.f32 1.0, %v7550_v61  ;;  %v10423_v61 = vmul.f32 0.5, %v4417_v30 }
 0x927   : > { %v7554_v26 = vpop.eup %7553  ;;  %v10395_v49 = vpop.f32.mrb[140].mxu0  ;;  %11772 = vst [vmem:[#allocation74_spill] sm:$0xff] %v10407_v52  ;;  %v4675_v9 = vadd.f32 1.0, %v7552_v17  ;;  %v4556_v32 = vmul.f32 0.70710677, %v4306_v12  ;;  %7569 = verf.f32 %v4557_v41  ;;  %v10431_v5 = vmul.f32 0.5, %v4306_v12 }
 0x928   : > { %11771 = vst [vmem:[#allocation73_spill] sm:$0xff] %v10386_v56  ;;  %v7556_v53 = vpop.eup %7555  ;;  %v4315_v36 = vpop.f32.mrb[77].mxu1  ;;  %v4677_v24 = vadd.f32 1.0, %v7554_v26  ;;  %v4736_v4 = vmul.f32 %v4672_v23, %v10361_v54  ;;  %v4558_v42 = vmul.f32 0.70710677, %v4419_v33  ;;  %v10426_v27 = vmul.f32 %v4674_v38, %v10363_v37 }
 0x929   : > { %v10401_v40 = vpop.f32.mrb[141].mxu0  ;;  %v7558_v2 = vpop.eup %7557  ;;  %v4676_v13 = vadd.f32 1.0, %v7556_v53  ;;  %v4559_v17 = vmul.f32 0.70710677, %v4308_v48  ;;  %v10429_v26 = vmul.f32 %v4675_v9, %v10366_v19  ;;  %v4561_v15 = vmul.f32 0.70710677, %v4421_v8 }
 0x92a   : > { %v4317_v60 = vpop.f32.mrb[78].mxu1  ;;  %v10411_v62 = vpop.f32.mrb[142].mxu0  ;;  %v4678_v21 = vadd.f32 1.0, %v7558_v2  ;;  %11773 = vst [vmem:[#allocation75_spill] sm:$0xff] %v10426_v27  ;;  %v10434_v53 = vmul.f32 %v4677_v24, %v10368_v59  ;;  %7571 = verf.f32 %v4556_v32  ;;  %v4310_v16 = vadd.f32 %v10372_v0, %v10336_v10 }
 0x92b   : > { %v10414_v14 = vpop.f32.mrb[79].mxu1  ;;  %v10416_v31 = vpop.f32.mrb[143].mxu0  ;;  %v4423_v30 = vadd.f32 %v10378_v44, %v10340_v3  ;;  %v10445_v12 = vmul.f32 %v4676_v13, %v10370_v55  ;;  %7573 = verf.f32 %v4558_v42  ;;  %v4314_v59 = vadd.f32 %v4313_v28, %v10329_v50 }
 0x92c   : > { %v7560_v11 = vpop.eup %7559  ;;  %11774 = vst [vmem:[#allocation76_spill] sm:$0xff] %v10434_v53  ;;  %v10448_v2 = vmul.f32 %v4678_v21, %v10376_v1  ;;  %v10455_v44 = vmul.f32 0.5, %v4419_v33  ;;  %7575 = verf.f32 %v4559_v17  ;;  %v4560_v9 = vmul.f32 0.70710677, %v4310_v16 }
 0x92d   : > { %v7562_v54 = vpop.eup %7561  ;;  %v4679_v38 = vadd.f32 1.0, %v7560_v11  ;;  %7577 = verf.f32 %v4561_v15  ;;  %v4562_v55 = vmul.f32 0.70710677, %v4423_v30  ;;  %v4563_v1 = vmul.f32 0.70710677, %v4314_v59 }
 0x92e   : > { %v10440_v23 = vpop.f32.mrb[80].mxu1  ;;  %v10442_v37 = vpop.f32.mrb[144].mxu0  ;;  %11775 = vst [vmem:[#allocation77_spill] sm:$0xff] %v10448_v2  ;;  %v4681_v21 = vadd.f32 1.0, %v7562_v54  ;;  %7579 = verf.f32 %v4560_v9  ;;  %v4427_v33 = vadd.f32 %v10395_v49, %v10333_v58  ;;  %v4316_v17 = vadd.f32 %v4315_v36, %v10336_v10  ;;  %v7300_v36 = vld [vmem:[%s8719_s30 + $0x114] ss:$8 sps:$4 sm:$0xff]  }
 0x92f   : > { %v7564_v19 = vpop.eup %7563  ;;  %v10451_v41 = vpop.f32.mrb[81].mxu1  ;;  %7581 = verf.f32 %v4562_v55  ;;  %v4429_v15 = vadd.f32 %v10401_v40, %v10340_v3  ;;  %v4796_v54 = vpack.c.bf16 %v4736_v4, %v10404_v51  ;;  %v10472_v46 = vadd.f32 %v4317_v60, %v10329_v50  ;;  %v7298_v51 = vld [vmem:[%s8719_s30 + $0x110] ss:$8 sps:$4 sm:$0xff]  }
 0x930   : > { %v10453_v0 = vpop.f32.mrb[145].mxu0  ;;  %v10457_v24 = vpop.f32.mrb[82].mxu1  ;;  %v4680_v42 = vadd.f32 1.0, %v7564_v19  ;;  %v7295_v19 = vld [vmem:[%s8719_s30 + $0x100] ss:$8 sps:$4 sm:$0xff]   ;;  %v10475_v6 = vmul.f32 0.5, %v4308_v48  ;;  %7583 = verf.f32 %v4563_v1  ;;  %v10479_v34 = vmul.f32 %v4679_v38, %v10390_v47 }
 0x931   : > { %v10459_v32 = vpop.f32.mrb[146].mxu0  ;;  %v7566_v13 = vpop.eup %7565  ;;  %v4565_v49 = vmul.f32 0.70710677, %v4427_v33  ;;  %v10482_v55 = vmul.f32 %v4681_v21, %v10392_v7  ;;  %v10484_v39 = vmul.f32 0.5, %v4421_v8  ;;  %v4564_v40 = vmul.f32 0.70710677, %v4316_v17  ;;  %5255 = vmatprep.mubr.bf16.mxu1 %v4796_v54 }
 0x932   : > { %v10461_v28 = vpop.f32.mrb[83].mxu1  ;;  %v10466_v11 = vpop.f32.mrb[147].mxu0  ;;  %v4682_v9 = vadd.f32 1.0, %v7566_v13  ;;  %v10488_v4 = vmul.f32 %v4680_v42, %v10399_v35  ;;  %v10490_v13 = vmul.f32 0.5, %v4310_v16  ;;  %v4566_v1 = vmul.f32 0.70710677, %v4429_v15 }
 0x933   : > { %v7568_v25 = vpop.eup %7567  ;;  %11776 = vst [vmem:[#allocation78_spill] sm:$0xff] %v10482_v55  ;;  %v11777_v47 = vpack.c.bf16 %v10381_v29, %v10374_v18  ;;  %v10499_v38 = vmul.f32 0.5, %v4423_v30  ;;  %7585 = verf.f32 %v4565_v49  ;;  %v4567_v21 = vmul.f32 0.70710677, %v10472_v46  ;;  %v7303_v54 = vld [vmem:[%s8719_s30 + $0x124] ss:$8 sps:$4 sm:$0xff]  }
 0x934   : > { %v7570_v60 = vpop.eup %7569  ;;  %v4683_v48 = vadd.f32 1.0, %v7568_v25  ;;  %v4431_v25 = vadd.f32 %v10411_v62, %v10333_v58  ;;  %v10509_v29 = vmul.f32 %v4682_v9, %v10409_v57  ;;  %7587 = verf.f32 %v4564_v40 }
 0x935   : > { %5256 = vmatmul.mubr.bf16.vlgmr.msra.gmra.mrb[96].mxu1 %v11777_v47  ;;  %v7572_v18 = vpop.eup %7571  ;;  %v4320_v30 = vadd.f32 %v10414_v14, %v10336_v10  ;;  %v4433_v42 = vadd.f32 %v10416_v31, %v10340_v3  ;;  %v4685_v47 = vadd.f32 1.0, %v7570_v60  ;;  %v10520_v43 = vmul.f32 0.5, %v4314_v59 }
 0x936   : > { %v10495_v7 = vpop.f32.mrb[84].mxu1  ;;  %v10497_v8 = vpop.f32.mrb[148].mxu0  ;;  %5337 = vmatpush1.bf16.msra.mxu1 %v7295_v19  ;;  %11778 = vst [vmem:[#allocation79_spill] sm:$0xff] %v10509_v29  ;;  %7589 = verf.f32 %v4566_v1  ;;  %v4569_v57 = vmul.f32 0.70710677, %v4431_v25  ;;  %v10527_v31 = vmul.f32 %v4683_v48, %v10421_v45  ;;  %v4684_v60 = vadd.f32 1.0, %v7572_v18 }
 0x937   : > { %v10504_v35 = vpop.f32.mrb[85].mxu1  ;;  %v10506_v16 = vpop.f32.mrb[149].mxu0  ;;  %5338 = vmatprep.subr.bf16.mxu1 %v7300_v36  ;;  %v10529_v36 = vmul.f32 0.5, %v4427_v33  ;;  %7591 = verf.f32 %v4567_v21  ;;  %v4568_v63 = vmul.f32 0.70710677, %v4320_v30  ;;  %v10531_v59 = vmul.f32 0.5, %v4316_v17 }
 0x938   : > { %v10516_v49 = vpop.f32.mrb[86].mxu1  ;;  %v10518_v62 = vpop.f32.mrb[150].mxu0  ;;  %7593 = verf.f32 %v4569_v57  ;;  %v4570_v1 = vmul.f32 0.70710677, %v4433_v42  ;;  %v10534_v53 = vmul.f32 0.5, %v4429_v15  ;;  %v4324_v45 = vadd.f32 %v10440_v23, %v10329_v50 }
 0x939   : > { %v7574_v19 = vpop.eup %7573  ;;  %v10522_v9 = vpop.f32.mrb[87].mxu1  ;;  %7595 = verf.f32 %v4568_v63  ;;  %v7306_v33 = vld [vmem:[%s8719_s30 + $0x134] ss:$8 sps:$4 sm:$0xff]   ;;  %v10540_v21 = vmul.f32 %v4685_v47, %v10423_v61  ;;  %v10543_v17 = vmul.f32 0.5, %v10472_v46  ;;  %v7304_v18 = vld [vmem:[%s8719_s30 + $0x130] ss:$8 sps:$4 sm:$0xff]   ;;  %v4326_v23 = vadd.f32 %v10451_v41, %v10336_v10 }
 0x93a   : > { %v10524_v40 = vpop.f32.mrb[151].mxu0  ;;  %v7576_v14 = vpop.eup %7575  ;;  %5339 = vmatpush1.bf16.msra.mxu1 %v7298_v51  ;;  %v4686_v55 = vadd.f32 1.0, %v7574_v19  ;;  %7597 = verf.f32 %v4570_v1  ;;  %v4437_v51 = vadd.f32 %v10442_v37, %v10333_v58  ;;  %v4571_v57 = vmul.f32 0.70710677, %v4324_v45 }
 0x93b   : > { %v7578_v22 = vpop.eup %7577  ;;  %5340 = vmatprep.subr.bf16.mxu1 %v7303_v54  ;;  %11779 = vst [vmem:[#allocation80_spill] sm:$0xff] %v10540_v21  ;;  %v4687_v19 = vadd.f32 1.0, %v7576_v14  ;;  %v10553_v61 = vmul.f32 %v4684_v60, %v10431_v5  ;;  %v10555_v46 = vmul.f32 0.5, %v4431_v25  ;;  %v10557_v47 = vmul.f32 0.5, %v4320_v30  ;;  %v7309_v25 = vld [vmem:[%s8719_s30 + $0x144] ss:$8 sps:$4 sm:$0xff]  }
 0x93c   : > { %v7580_v56 = vpop.eup %7579  ;;  %v4689_v63 = vadd.f32 1.0, %v7578_v22  ;;  %v10559_v1 = vmul.f32 0.5, %v4433_v42  ;;  %v10566_v14 = vmul.f32 %v4686_v55, %v10455_v44  ;;  %v4439_v5 = vadd.f32 %v10453_v0, %v10340_v3 }
 0x93d   : > { %v7582_v48 = vpop.eup %7581  ;;  %v4688_v41 = vadd.f32 1.0, %v7580_v56  ;;  %7599 = verf.f32 %v4571_v57  ;;  %v4573_v29 = vmul.f32 0.70710677, %v4437_v51  ;;  %v4800_v2 = vpack.c.bf16 %v10488_v4, %v10445_v12 }
 0x93e   : > { %v7584_v15 = vpop.eup %7583  ;;  %v10550_v54 = vpop.f32.mrb[88].mxu1  ;;  %5341 = vmatpush1.bf16.msra.mxu1 %v7301_v20  ;;  %11780 = vst [vmem:[#allocation81_spill] sm:$0xff] %v10566_v14  ;;  %v4690_v21 = vadd.f32 1.0, %v7582_v48  ;;  %v10582_v0 = vmul.f32 %v4687_v19, %v10475_v6  ;;  %v10587_v48 = vmul.f32 0.5, %v4324_v45  ;;  %v10591_v12 = vmul.f32 0.5, %v4437_v51 }
 0x93f   : > { %v10561_v37 = vpop.f32.mrb[152].mxu0  ;;  %v10563_v22 = vpop.f32.mrb[89].mxu1  ;;  %5342 = vmatprep.subr.bf16.mxu1 %v7306_v33  ;;  %v4691_v20 = vadd.f32 1.0, %v7584_v15  ;;  %v10585_v33 = vmul.f32 %v4689_v63, %v10484_v39  ;;  %v4572_v15 = vmul.f32 0.70710677, %v4326_v23  ;;  %5265 = vmatprep.mubr.bf16.mxu1 %v4800_v2  ;;  %v4328_v27 = vadd.f32 %v10457_v24, %v10329_v50 }
 0x940   : > { %v10571_v60 = vpop.f32.mrb[153].mxu0  ;;  %v10573_v30 = vpop.f32.mrb[90].mxu1  ;;  %v4574_v4 = vmul.f32 0.70710677, %v4439_v5  ;;  %v4441_v6 = vadd.f32 %v10459_v32, %v10333_v58  ;;  %v7307_v39 = vld [vmem:[%s8719_s30 + $0x140] ss:$8 sps:$4 sm:$0xff]   ;;  %v10599_v45 = vmul.f32 %v4688_v41, %v10490_v13  ;;  %v4799_v51 = vpack.c.bf16 %v10479_v34, %v10429_v26 }
 0x941   : > { %v7586_v42 = vpop.eup %7585  ;;  %v10577_v44 = vpop.f32.mrb[154].mxu0  ;;  %11781 = vst [vmem:[#allocation82_spill] sm:$0xff] %v10585_v33  ;;  %v10601_v33 = vmul.f32 0.5, %v4326_v23  ;;  %v7312_v2 = vld [vmem:[%s8719_s30 + $0x154] ss:$8 sps:$4 sm:$0xff]   ;;  %v10607_v24 = vmul.f32 %v4690_v21, %v10499_v38  ;;  %v10610_v32 = vmul.f32 %v4691_v20, %v10520_v43  ;;  %7601 = verf.f32 %v4573_v29 }
 0x942   : > { %v10579_v56 = vpop.f32.mrb[91].mxu1  ;;  %v7588_v55 = vpop.eup %7587  ;;  %5343 = vmatpush1.bf16.msra.mxu1 %v7304_v18  ;;  %v4693_v63 = vadd.f32 1.0, %v7586_v42  ;;  %v4575_v18 = vmul.f32 0.70710677, %v4328_v27  ;;  %7603 = verf.f32 %v4572_v15  ;;  %v4577_v23 = vmul.f32 0.70710677, %v4441_v6 }
 0x943   : > { %v10589_v57 = vpop.f32.mrb[155].mxu0  ;;  %v7590_v14 = vpop.eup %7589  ;;  %5344 = vmatprep.subr.bf16.mxu1 %v7309_v25  ;;  %11782 = vst [vmem:[#allocation83_spill] sm:$0xff] %v10607_v24  ;;  %v4692_v41 = vadd.f32 1.0, %v7588_v55  ;;  %5266 = vmatmul.mubr.bf16.gmra.mrb[100].mxu1 %v4799_v51  ;;  %v4330_v34 = vadd.f32 %v10461_v28, %v10336_v10  ;;  %v10618_v21 = vmul.f32 0.5, %v4439_v5  ;;  %7605 = verf.f32 %v4574_v4  ;;  %v7310_v42 = vld [vmem:[%s8719_s30 + $0x150] ss:$8 sps:$4 sm:$0xff]  }
 0x944   : > { %v7592_v19 = vpop.eup %7591  ;;  %v4443_v43 = vadd.f32 %v10466_v11, %v10340_v3  ;;  %v4334_v29 = vadd.f32 %v10495_v7, %v10329_v50  ;;  %v10630_v55 = vmul.f32 %v4693_v63, %v10529_v36  ;;  %v4694_v15 = vadd.f32 1.0, %v7590_v14  ;;  %v7315_v5 = vld [vmem:[%s8719_s30 + $0x164] ss:$8 sps:$4 sm:$0xff]  }
 0x945   : > { %v7594_v52 = vpop.eup %7593  ;;  %v4695_v51 = vadd.f32 1.0, %v7592_v19  ;;  %7607 = verf.f32 %v4575_v18  ;;  %v4576_v7 = vmul.f32 0.70710677, %v4330_v34  ;;  %v4447_v19 = vadd.f32 %v10497_v8, %v10333_v58 }
 0x946   : > { %v7596_v13 = vpop.eup %7595  ;;  %v10614_v26 = vpop.f32.mrb[92].mxu1  ;;  %5345 = vmatpush1.bf16.msra.mxu1 %v7307_v39  ;;  %11785 = vst [vmem:[#allocation86_spill] sm:$0xff] %v10630_v55  ;;  %v4697_v24 = vadd.f32 1.0, %v7594_v52  ;;  %7609 = verf.f32 %v4577_v23  ;;  %v4578_v39 = vmul.f32 0.70710677, %v4443_v43  ;;  %v4336_v18 = vadd.f32 %v10504_v35, %v10336_v10 }
 0x947   : > { %v10616_v25 = vpop.f32.mrb[156].mxu0  ;;  %v7598_v38 = vpop.eup %7597  ;;  %5346 = vmatprep.subr.bf16.mxu1 %v7312_v2  ;;  %v4696_v36 = vadd.f32 1.0, %v7596_v13  ;;  %7611 = verf.f32 %v4576_v7  ;;  %v4579_v52 = vmul.f32 0.70710677, %v4334_v29  ;;  %v10650_v23 = vadd.f32 %v10506_v16, %v10340_v3  ;;  %v7318_v7 = vld [vmem:[%s8719_s30 + $0x174] ss:$8 sps:$4 sm:$0xff]  }
 0x948   : > { %v10625_v20 = vpop.f32.mrb[93].mxu1  ;;  %v10627_v28 = vpop.f32.mrb[157].mxu0  ;;  %v4698_v14 = vadd.f32 1.0, %v7598_v38  ;;  %v10654_v13 = vmul.f32 %v4694_v15, %v10534_v53  ;;  %v10658_v8 = vmul.f32 0.5, %v4441_v6  ;;  %v4581_v38 = vmul.f32 0.70710677, %v4447_v19 }
 0x949   : > { %11783 = vst [vmem:[#allocation84_spill] sm:$0xff] %v10625_v20  ;;  %11784 = vst [vmem:[#allocation85_spill] sm:$0xff] %v10627_v28  ;;  %v10633_v4 = vpop.f32.mrb[94].mxu1  ;;  %v10635_v11 = vpop.f32.mrb[158].mxu0  ;;  %v10640_v28 = vmul.f32 %v4692_v41, %v10531_v59  ;;  %v7313_v59 = vld [vmem:[%s8719_s30 + $0x160] ss:$8 sps:$4 sm:$0xff]   ;;  %v10662_v55 = vmul.f32 %v4695_v51, %v10543_v17  ;;  %v10665_v35 = vmul.f32 %v4697_v24, %v10555_v46  ;;  %7613 = verf.f32 %v4578_v39 }
 0x94a   : > { %v10637_v20 = vpop.f32.mrb[95].mxu1  ;;  %v10644_v63 = vpop.f32.mrb[159].mxu0  ;;  %5347 = vmatpush1.bf16.msra.mxu1 %v7310_v42  ;;  %v10656_v41 = vmul.f32 0.5, %v4328_v27  ;;  %v10667_v16 = vmul.f32 0.5, %v4330_v34  ;;  %v10670_v53 = vmul.f32 %v4696_v36, %v10557_v47  ;;  %v10672_v6 = vmul.f32 0.5, %v4443_v43 }
 0x94b   : > { %v7600_v2 = vpop.eup %7599  ;;  %5348 = vmatprep.subr.bf16.mxu1 %v7315_v5  ;;  %v4580_v42 = vmul.f32 0.70710677, %v4336_v18  ;;  %v10675_v5 = vmul.f32 %v4698_v14, %v10559_v1  ;;  %7615 = verf.f32 %v4579_v52  ;;  %v4582_v17 = vmul.f32 0.70710677, %v10650_v23  ;;  %v7316_v24 = vld [vmem:[%s8719_s30 + $0x170] ss:$8 sps:$4 sm:$0xff]  }
 0x94c   : > { %v4699_v27 = vadd.f32 1.0, %v7600_v2  ;;  %v7602_v15 = vpop.eup %7601  ;;  %v4804_v46 = vpack.c.bf16 %v10599_v45, %v10553_v61  ;;  %7617 = verf.f32 %v4581_v38  ;;  %v4338_v47 = vadd.f32 %v10516_v49, %v10329_v50  ;;  %v7321_v51 = vld [vmem:[%s8719_s30 + $0x184] ss:$8 sps:$4 sm:$0xff]  }
 0x94d   : > { %v7604_v34 = vpop.eup %7603  ;;  %v4451_v43 = vadd.f32 %v10518_v62, %v10333_v58  ;;  %v4803_v1 = vpack.c.bf16 %v10582_v0, %v10527_v31  ;;  %v10688_v36 = vmul.f32 0.5, %v4334_v29  ;;  %7619 = verf.f32 %v4580_v42  ;;  %v7319_v29 = vld [vmem:[%s8719_s30 + $0x180] ss:$8 sps:$4 sm:$0xff]  }
 0x94e   : > { %5349 = vmatpush1.bf16.msra.mxu1 %v7313_v59  ;;  %v7606_v39 = vpop.eup %7605  ;;  %5275 = vmatprep.mubr.bf16.mxu1 %v4804_v46  ;;  %v4340_v61 = vadd.f32 %v10522_v9, %v10336_v10  ;;  %v4453_v49 = vadd.f32 %v10524_v40, %v10340_v3  ;;  %v10695_v62 = vmul.f32 %v4699_v27, %v10587_v48  ;;  %v4701_v14 = vadd.f32 1.0, %v7602_v15  ;;  %v7324_v48 = vld [vmem:[%s8719_s30 + $0x194] ss:$8 sps:$4 sm:$0xff]  }
 0x94f   : > { %5350 = vmatprep.subr.bf16.mxu1 %v7318_v7  ;;  %v7608_v45 = vpop.eup %7607  ;;  %v10697_v31 = vmul.f32 0.5, %v4447_v19  ;;  %v4583_v0 = vmul.f32 0.70710677, %v4338_v47  ;;  %5276 = vmatmul.mubr.bf16.gmra.mrb[104].mxu1 %v4803_v1  ;;  %v4700_v52 = vadd.f32 1.0, %v7604_v34  ;;  %7621 = verf.f32 %v4582_v17 }
 0x950   : > { %v7610_v2 = vpop.eup %7609  ;;  %v4585_v59 = vmul.f32 0.70710677, %v4451_v43  ;;  %v4584_v38 = vmul.f32 0.70710677, %v4340_v61  ;;  %v4702_v9 = vadd.f32 1.0, %v7606_v39  ;;  %v10700_v7 = vmul.f32 0.5, %v4336_v18 }
 0x951   : > { %7623 = verf.f32 %v4583_v0  ;;  %v4586_v40 = vmul.f32 0.70710677, %v4453_v49  ;;  %v7612_v27 = vpop.eup %7611  ;;  %v4703_v19 = vadd.f32 1.0, %v7608_v45  ;;  %v4344_v42 = vadd.f32 %v10550_v54, %v10329_v50 }
 0x952   : > { %5351 = vmatpush1.bf16.msra.mxu1 %v7316_v24  ;;  %7625 = verf.f32 %v4585_v59  ;;  %v4457_v15 = vadd.f32 %v10561_v37, %v10333_v58  ;;  %v10708_v17 = vmul.f32 %v4701_v14, %v10591_v12  ;;  %v4705_v18 = vadd.f32 1.0, %v7610_v2  ;;  %v7322_v37 = vld [vmem:[%s8719_s30 + $0x190] ss:$8 sps:$4 sm:$0xff]  }
 0x953   : > { %5352 = vmatprep.subr.bf16.mxu1 %v7321_v51  ;;  %7627 = verf.f32 %v4584_v38  ;;  %v10712_v46 = vadd.f32 %v10563_v22, %v10336_v10  ;;  %v7614_v24 = vpop.eup %7613  ;;  %v10715_v34 = vmul.f32 0.5, %v10650_v23  ;;  %v4587_v1 = vmul.f32 0.70710677, %v4344_v42  ;;  %v7327_v23 = vld [vmem:[%s8719_s30 + $0x1a4] ss:$8 sps:$4 sm:$0xff]  }
 0x954   : > { %7629 = verf.f32 %v4586_v40  ;;  %v10719_v54 = vadd.f32 %v10571_v60, %v10340_v3  ;;  %v10723_v12 = vmul.f32 %v4700_v52, %v10601_v33  ;;  %v10726_v51 = vmul.f32 %v4702_v9, %v10618_v21  ;;  %v7325_v40 = vld [vmem:[%s8719_s30 + $0x1a0] ss:$8 sps:$4 sm:$0xff]  }
 0x955   : > { %v4704_v22 = vadd.f32 1.0, %v7612_v27  ;;  %v10728_v39 = vmul.f32 0.5, %v4338_v47  ;;  %v7616_v45 = vpop.eup %7615  ;;  %v10732_v14 = vmul.f32 %v4703_v19, %v10656_v41  ;;  %v10734_v0 = vmul.f32 0.5, %v4451_v43 }
 0x956   : > { %5353 = vmatpush1.bf16.msra.mxu1 %v7319_v29  ;;  %v10736_v60 = vmul.f32 0.5, %v4340_v61  ;;  %v4589_v29 = vmul.f32 0.70710677, %v4457_v15  ;;  %v7618_v33 = vpop.eup %7617  ;;  %v10739_v2 = vmul.f32 %v4705_v18, %v10658_v8  ;;  %v4706_v21 = vadd.f32 1.0, %v7614_v24 }
 0x957   : > { %5354 = vmatprep.subr.bf16.mxu1 %v7324_v48  ;;  %v10741_v52 = vmul.f32 0.5, %v4453_v49  ;;  %v4588_v47 = vmul.f32 0.70710677, %v10712_v46  ;;  %v7620_v59 = vpop.eup %7619  ;;  %v10744_v38 = vmul.f32 0.5, %v4344_v42  ;;  %7631 = verf.f32 %v4587_v1 }
 0x958   : > { %v4590_v41 = vmul.f32 0.70710677, %v10719_v54  ;;  %v4808_v43 = vpack.c.bf16 %v10670_v53, %v10640_v28  ;;  %v10750_v61 = vmul.f32 %v4704_v22, %v10667_v16  ;;  %v4707_v8 = vadd.f32 1.0, %v7616_v45  ;;  %v7330_v53 = vld [vmem:[%s8719_s30 + $0x1b4] ss:$8 sps:$4 sm:$0xff]  }
 0x959   : > { %v4348_v49 = vadd.f32 %v10573_v30, %v10329_v50  ;;  %v4461_v9 = vadd.f32 %v10577_v44, %v10333_v58  ;;  %v7622_v48 = vpop.eup %7621  ;;  %v10757_v27 = vmul.f32 0.5, %v4457_v15  ;;  %7633 = verf.f32 %v4589_v29  ;;  %v7328_v22 = vld [vmem:[%s8719_s30 + $0x1b0] ss:$8 sps:$4 sm:$0xff]  }
 0x95a   : > { %5355 = vmatpush1.bf16.msra.mxu1 %v7322_v37  ;;  %5285 = vmatprep.mubr.bf16.mxu1 %v4808_v43  ;;  %v4807_v28 = vpack.c.bf16 %v10662_v55, %v10610_v32  ;;  %v4350_v16 = vadd.f32 %v10579_v56, %v10336_v10  ;;  %v4709_v42 = vadd.f32 1.0, %v7618_v33  ;;  %v4708_v30 = vadd.f32 1.0, %v7620_v59 }
 0x95b   : > { %5356 = vmatprep.subr.bf16.mxu1 %v7327_v23  ;;  %v7624_v19 = vpop.eup %7623  ;;  %7635 = verf.f32 %v4588_v47  ;;  %v4591_v44 = vmul.f32 0.70710677, %v4348_v49  ;;  %v10765_v24 = vmul.f32 %v4706_v21, %v10672_v6  ;;  %v4593_v15 = vmul.f32 0.70710677, %v4461_v9 }
 0x95c   : > { %v7626_v18 = vpop.eup %7625  ;;  %7637 = verf.f32 %v4590_v41  ;;  %5286 = vmatmul.mubr.bf16.gmra.mrb[108].mxu1 %v4807_v28  ;;  %v4592_v1 = vmul.f32 0.70710677, %v4350_v16  ;;  %v4710_v55 = vadd.f32 1.0, %v7622_v48  ;;  %v4463_v56 = vadd.f32 %v10589_v57, %v10340_v3  ;;  %v7333_v57 = vld [vmem:[%s8719_s30 + $0x1c4] ss:$8 sps:$4 sm:$0xff]   ;;  %v11787_v28 = vld [vmem:[#allocation85_spill] sm:$0xff] }
 0x95d   : > { %v7628_v32 = vpop.eup %7627  ;;  %7639 = verf.f32 %v4591_v44  ;;  %v10771_v37 = vadd.f32 %v10614_v26, %v10329_v50  ;;  %v10775_v6 = vmul.f32 %v4707_v8, %v10688_v36  ;;  %v10778_v45 = vmul.f32 0.5, %v10712_v46  ;;  %v7331_v8 = vld [vmem:[%s8719_s30 + $0x1c0] ss:$8 sps:$4 sm:$0xff]  }
 0x95e   : > { %5357 = vmatpush1.bf16.msra.mxu1 %v7325_v40  ;;  %v7630_v23 = vpop.eup %7629  ;;  %7641 = verf.f32 %v4593_v15  ;;  %v10782_v29 = vadd.f32 %v10616_v25, %v10333_v58  ;;  %v10786_v26 = vmul.f32 %v4709_v42, %v10697_v31  ;;  %v10789_v33 = vmul.f32 %v4708_v30, %v10700_v7  ;;  %v11786_v40 = vld [vmem:[#allocation84_spill] sm:$0xff] }
 0x95f   : > { %5358 = vmatprep.subr.bf16.mxu1 %v7330_v53  ;;  %v10792_v36 = vmul.f32 0.5, %v10719_v54  ;;  %7643 = verf.f32 %v4592_v1  ;;  %v4711_v46 = vadd.f32 1.0, %v7624_v19  ;;  %v4713_v21 = vadd.f32 1.0, %v7626_v18 }
 0x960   : > { %v4712_v47 = vadd.f32 1.0, %v7628_v32  ;;  %v4594_v59 = vmul.f32 0.70710677, %v4463_v56  ;;  %v10795_v25 = vmul.f32 %v4710_v55, %v10715_v34  ;;  %v4714_v41 = vadd.f32 1.0, %v7630_v23  ;;  %v7336_v34 = vld [vmem:[%s8719_s30 + $0x1d4] ss:$8 sps:$4 sm:$0xff]  }
 0x961   : > { %v4527_v43 = vmul.f32 0.5, %v4348_v49  ;;  %v4595_v31 = vmul.f32 0.70710677, %v10771_v37  ;;  %v7632_v7 = vpop.eup %7631  ;;  %v4597_v54 = vmul.f32 0.70710677, %v10782_v29  ;;  %v10802_v48 = vadd.f32 %v11786_v40, %v10336_v10 }
 0x962   : > { %5359 = vmatpush1.bf16.msra.mxu1 %v7328_v22  ;;  %7645 = verf.f32 %v4594_v59  ;;  %v10806_v53 = vadd.f32 %v11787_v28, %v10340_v3  ;;  %v4529_v19 = vmul.f32 0.5, %v4461_v9  ;;  %v4528_v49 = vmul.f32 0.5, %v4350_v16 }
 0x963   : > { %5360 = vmatprep.subr.bf16.mxu1 %v7333_v57  ;;  %v4812_v42 = vpack.c.bf16 %v10750_v61, %v10723_v12  ;;  %v10813_v30 = vadd.f32 %v10633_v4, %v10329_v50  ;;  %v7634_v44 = vpop.eup %7633  ;;  %v10816_v18 = vmul.f32 %v4711_v46, %v10728_v39  ;;  %v10819_v15 = vmul.f32 %v4713_v21, %v10734_v0  ;;  %v7334_v61 = vld [vmem:[%s8719_s30 + $0x1d0] ss:$8 sps:$4 sm:$0xff]  }
 0x964   : > { %v4776_v1 = vmul.f32 %v4712_v47, %v10736_v60  ;;  %v4530_v32 = vmul.f32 0.5, %v4463_v56  ;;  %v4715_v16 = vadd.f32 1.0, %v7632_v7  ;;  %7647 = verf.f32 %v4595_v31  ;;  %v7342_v7 = vld [vmem:[%s8719_s30 + $0x1f4] ss:$8 sps:$4 sm:$0xff]  }
 0x965   : > { %v7636_v9 = vpop.eup %7635  ;;  %v4596_v12 = vmul.f32 0.70710677, %v10802_v48  ;;  %v4598_v50 = vmul.f32 0.70710677, %v10806_v53  ;;  %5295 = vmatprep.mubr.bf16.mxu1 %v4812_v42  ;;  %v10825_v39 = vmul.f32 %v4714_v41, %v10741_v52  ;;  %7649 = verf.f32 %v4597_v54  ;;  %v7339_v52 = vld [vmem:[%s8719_s30 + $0x1e4] ss:$8 sps:$4 sm:$0xff]  }
 0x966   : > { %5361 = vmatpush1.bf16.msra.mxu1 %v7331_v8  ;;  %v7638_v4 = vpop.eup %7637  ;;  %v4599_v0 = vmul.f32 0.70710677, %v10813_v30  ;;  %v10830_v60 = vadd.f32 %v10635_v11, %v10333_v58  ;;  %v4717_v56 = vadd.f32 1.0, %v7634_v44  ;;  %v4811_v22 = vpack.c.bf16 %v10732_v14, %v10695_v62  ;;  %v7337_v41 = vld [vmem:[%s8719_s30 + $0x1e0] ss:$8 sps:$4 sm:$0xff]   ;;  %v11790_v44 = vld [vmem:[#allocation77_spill] sm:$0xff] }
 0x967   : > { %5362 = vmatprep.subr.bf16.mxu1 %v7336_v34  ;;  %v7640_v55 = vpop.eup %7639  ;;  %7651 = verf.f32 %v4596_v12  ;;  %v10837_v23 = vadd.f32 %v10637_v20, %v10336_v10  ;;  %v4716_v46 = vadd.f32 1.0, %v7636_v9  ;;  %v10842_v47 = vmul.f32 %v4715_v16, %v10744_v38  ;;  %v11788_v34 = vld [vmem:[#allocation74_spill] sm:$0xff]  ;;  %v11789_v42 = vld [vmem:[#allocation75_spill] sm:$0xff] }
 0x968   : > { %v7642_v57 = vpop.eup %7641  ;;  %v4719_v21 = vadd.f32 1.0, %v7640_v55  ;;  %7653 = verf.f32 %v4598_v50  ;;  %v4601_v58 = vmul.f32 0.70710677, %v10830_v60  ;;  %5296 = vmatmul.mubr.bf16.gmra.mrb[112].mxu1 %v4811_v22  ;;  %v10849_v14 = vadd.f32 %v10644_v63, %v10340_v3  ;;  %v11793_v9 = vld [vmem:[#allocation78_spill] sm:$0xff]  ;;  %v11794_v50 = vld [vmem:[#allocation81_spill] sm:$0xff] }
 0x969   : > { %v7644_v11 = vpop.eup %7643  ;;  %v4721_v59 = vadd.f32 1.0, %v7642_v57  ;;  %7655 = verf.f32 %v4599_v0  ;;  %v4600_v62 = vmul.f32 0.70710677, %v10837_v23  ;;  %v4718_v31 = vadd.f32 1.0, %v7638_v4  ;;  %v11795_v4 = vld [vmem:[#allocation83_spill] sm:$0xff]  ;;  %v11797_v57 = vld [vmem:[#allocation82_spill] sm:$0xff] }
 0x96a   : > { %v10845_v10 = vmul.f32 %v4719_v21, %v4527_v43  ;;  %v4720_v20 = vadd.f32 1.0, %v7644_v11  ;;  %7657 = verf.f32 %v4601_v58  ;;  %5363 = vmatpush1.bf16.msra.mxu1 %v7334_v61  ;;  %v4816_v38 = vpack.c.bf16 %v4776_v1, %v10789_v33  ;;  %v11791_v1 = vld [vmem:[#allocation79_spill] sm:$0xff]  ;;  %v11798_v11 = vld [vmem:[#allocation86_spill] sm:$0xff] }
 0x96b   : > { %7659 = verf.f32 %v4600_v62  ;;  %v4815_v8 = vpack.c.bf16 %v10816_v18, %v10775_v6  ;;  %5364 = vmatprep.subr.bf16.mxu1 %v7339_v52  ;;  %v4780_v54 = vmul.f32 %v4716_v46, %v10778_v45  ;;  %v4602_v28 = vmul.f32 0.70710677, %v10849_v14  ;;  %v11792_v18 = vld [vmem:[#allocation76_spill] sm:$0xff] }
 0x96c   : > { %v7646_v43 = vpop.eup %7645  ;;  %v4784_v40 = vmul.f32 %v4720_v20, %v4528_v49  ;;  %v4819_v3 = vpack.c.bf16 %v10845_v10, %v10842_v47  ;;  %5305 = vmatprep.mubr.bf16.mxu1 %v4816_v38  ;;  %v4798_v33 = vpack.c.bf16 %v11789_v42, %v11788_v34  ;;  %v4802_v6 = vpack.c.bf16 %v11791_v1, %v11790_v44  ;;  %v7340_v49 = vld [vmem:[%s8719_s30 + $0x1f0] ss:$8 sps:$4 sm:$0xff]   ;;  %v11804_v34 = vld [vmem:[#allocation38_spill] sm:$0xff] }
 0x96d   : > { %v4722_v63 = vadd.f32 1.0, %v7646_v43  ;;  %v4801_v16 = vpack.c.bf16 %v11793_v9, %v11792_v18  ;;  %v10866_v12 = vmul.f32 %v4721_v59, %v4529_v19  ;;  %7661 = verf.f32 %v4602_v28  ;;  %v11796_v52 = vld [vmem:[#allocation80_spill] sm:$0xff] }
 0x96e   : > { %v4820_v45 = vpack.c.bf16 %v4784_v40, %v4780_v54  ;;  %5365 = vmatpush1.bf16.msra.mxu1 %v7337_v41  ;;  %v4806_v0 = vpack.c.bf16 %v11795_v4, %v11794_v50  ;;  %v7648_v61 = vpop.eup %7647  ;;  %v10872_v55 = vmul.f32 %v4718_v31, %v10792_v36  ;;  %v4805_v46 = vpack.c.bf16 %v11797_v57, %v11796_v52  ;;  %v11805_v9 = vld [vmem:[#allocation40_spill] sm:$0xff]  ;;  %v11806_v57 = vld [vmem:[#allocation41_spill] sm:$0xff] }
 0x96f   : > { %v10874_v22 = vmul.f32 %v4722_v63, %v4530_v32  ;;  %5366 = vmatprep.subr.bf16.mxu1 %v7342_v7  ;;  %v4810_v19 = vpack.c.bf16 %v10675_v5, %v10654_v13  ;;  %v7650_v21 = vpop.eup %7649  ;;  %v4781_v58 = vmul.f32 %v4717_v56, %v10757_v27  ;;  %v4809_v47 = vpack.c.bf16 %v10665_v35, %v11798_v11  ;;  %v11808_v11 = vld [vmem:[#allocation43_spill] sm:$0xff] }
 0x970   : > { %v4814_v59 = vpack.c.bf16 %v10765_v24, %v10726_v51  ;;  %v4813_v36 = vpack.c.bf16 %v10739_v2, %v10708_v17  ;;  %5306 = vmatmul.mubr.bf16.gmra.mrb[116].mxu1 %v4815_v8  ;;  %v4818_v62 = vpack.c.bf16 %v10825_v39, %v10795_v25  ;;  %v4817_v13 = vpack.c.bf16 %v10819_v15, %v10786_v26 }
 0x971   : > { %v7652_v32 = vpop.eup %7651  ;;  %v4822_v5 = vpack.c.bf16 %v10874_v22, %v10872_v55  ;;  %v4723_v56 = vadd.f32 1.0, %v7648_v61  ;;  %5315 = vmatprep.mubr.bf16.mxu1 %v4820_v45  ;;  %v4821_v35 = vpack.c.bf16 %v10866_v12, %v4781_v58  ;;  %v4725_v24 = vadd.f32 1.0, %v7650_v21  ;;  %v11799_v61 = vld [vmem:[#allocation73_spill] sm:$0xff]  ;;  %v11800_v55 = vld [vmem:[#allocation72_spill] sm:$0xff]  ;;  %v11807_v21 = vld [vmem:[#allocation42_spill] sm:$0xff] }
 0x972   : > { %v7654_v27 = vpop.eup %7653  ;;  %5367 = vmatpush1.bf16.msra.mxu1 %v7340_v49  ;;  %v4531_v2 = vmul.f32 0.5, %v10771_v37  ;;  %v4724_v10 = vadd.f32 1.0, %v7652_v32  ;;  %v4535_v25 = vmul.f32 0.5, %v10813_v30  ;;  %v4533_v26 = vmul.f32 0.5, %v10782_v29 }
 0x973   : > { %v7656_v51 = vpop.eup %7655  ;;  %v4532_v15 = vmul.f32 0.5, %v10802_v48  ;;  %v4537_v41 = vmul.f32 0.5, %v10830_v60  ;;  %v4536_v7 = vmul.f32 0.5, %v10837_v23  ;;  %v4726_v40 = vadd.f32 1.0, %v7654_v27 }
 0x974   : > { %v7658_v17 = vpop.eup %7657  ;;  %v4727_v39 = vadd.f32 1.0, %v7656_v51  ;;  %v4787_v38 = vmul.f32 %v4723_v56, %v4531_v2  ;;  %v4789_v54 = vmul.f32 %v4725_v24, %v4533_v26  ;;  %v4534_v45 = vmul.f32 0.5, %v10806_v53  ;;  %v4891_v53 = vld [vmem:[%s895_s18] sm:$0x3]  ;;  %v11811_v2 = vld [vmem:[#allocation46_spill] sm:$0xff]  ;;  %s11837_s18 = sld [smem:[#allocation25_spill]] }
 0x975   : > { %v7660_v20 = vpop.eup %7659  ;;  %v4729_v31 = vadd.f32 1.0, %v7658_v17  ;;  %v4788_v63 = vmul.f32 %v4724_v10, %v4532_v15  ;;  %v4538_v29 = vmul.f32 0.5, %v10849_v14  ;;  %v11801_v22 = vpack.c.bf16 %v11799_v61, %v11800_v55  ;;  %v11803_v14 = vld [vmem:[#allocation39_spill] sm:$0xff]  ;;  %v11810_v51 = vld [vmem:[#allocation45_spill] sm:$0xff] }
 0x976   : > { %v4791_v8 = vmul.f32 %v4727_v39, %v4535_v25  ;;  %v4728_v43 = vadd.f32 1.0, %v7660_v20  ;;  %v4790_v50 = vmul.f32 %v4726_v40, %v4534_v45  ;;  %v10923_v42 = vrot.slane %v4891_v53, %v11804_v34  ;;  %v11812_v25 = vld [vmem:[#allocation47_spill] sm:$0xff]  ;;  %v11818_v55 = vld [vmem:[#allocation53_spill] sm:$0xff] }
 0x977   : > { %v4793_v37 = vmul.f32 %v4729_v31, %v4537_v41  ;;  %v7662_v28 = vpop.eup %7661 }
 0x978   : > { %v4792_v30 = vmul.f32 %v4728_v43, %v4536_v7  ;;  %v4823_v12 = vpack.c.bf16 %v4791_v8, %v4787_v38  ;;  %v4730_v48 = vadd.f32 1.0, %v7662_v28  ;;  %5316 = vmatmul.mubr.bf16.gmra.mrb[120].mxu1 %v4819_v3  ;;  %v10920_v3 = vrot.slane %v4891_v53, %v11803_v14  ;;  %v11813_v38 = vld [vmem:[#allocation48_spill] sm:$0xff]  ;;  %v11815_v28 = vld [vmem:[#allocation50_spill] sm:$0xff] }
 0x979   : > { %v4825_v60 = vpack.c.bf16 %v4793_v37, %v4789_v54  ;;  %v11814_v54 = vld [vmem:[#allocation49_spill] sm:$0xff]  ;;  %v11819_v14 = vld [vmem:[#allocation54_spill] sm:$0xff] }
 0x97a   : > { %v4824_v49 = vpack.c.bf16 %v4792_v30, %v4788_v63  ;;  %v4794_v4 = vmul.f32 %v4730_v48, %v4538_v29  ;;  %v11816_v30 = vld [vmem:[#allocation51_spill] sm:$0xff]  ;;  %p6511_p11 = scmp.ne.s32.totalorder %s11837_s18, 1 }
 0x97b   : > { %s11838_s10 = sld [smem:[#allocation101_spill]] (!%p6511_p11)  ;;  %s11839_s28 = sld [smem:[#allocation102_spill]] (!%p6511_p11) }
 0x97c   : > { %5325 = vmatprep.mubr.bf16.mxu1 %v4824_v49  ;;  %v4826_v23 = vpack.c.bf16 %v4794_v4, %v4790_v50  ;;  %v11817_v50 = vld [vmem:[#allocation52_spill] sm:$0xff]  ;;  %s11336_s24 = scalar_lea.vmem (!%p6511_p11), %s870_s23, %s6528_s2 [#allocation14] }
 0x980   : > { %5326 = vmatmul.mubr.bf16.gmra.mrb[124].mxu1 %v4823_v12 }
 0x981   : > { %5368 = vmatprep.mubr.bf16.mxu1 %v4798_v33 }
 0x988   : > { %5369 = vmatmul.mubr.bf16.vlgmr.msra.gmra.mrb[96].mxu1 %v11801_v22 }
 0x989   : > { %5378 = vmatprep.mubr.bf16.mxu1 %v4802_v6 }
 0x990   : > { %5379 = vmatmul.mubr.bf16.gmra.mrb[100].mxu1 %v4801_v16 }
 0x991   : > { %5388 = vmatprep.mubr.bf16.mxu1 %v4806_v0 }
 0x998   : > { %5389 = vmatmul.mubr.bf16.gmra.mrb[104].mxu1 %v4805_v46 }
 0x999   : > { %5398 = vmatprep.mubr.bf16.mxu1 %v4810_v19 }
 0x9a0   : > { %5399 = vmatmul.mubr.bf16.gmra.mrb[108].mxu1 %v4809_v47 }
 0x9a1   : > { %5408 = vmatprep.mubr.bf16.mxu1 %v4814_v59 }
 0x9a8   : > { %5409 = vmatmul.mubr.bf16.gmra.mrb[112].mxu1 %v4813_v36 }
 0x9a9   : > { %5418 = vmatprep.mubr.bf16.mxu1 %v4818_v62 }
 0x9b0   : > { %5419 = vmatmul.mubr.bf16.gmra.mrb[116].mxu1 %v4817_v13 }
 0x9b1   : > { %5428 = vmatprep.mubr.bf16.mxu1 %v4822_v5  ;;  %v11809_v5 = vld [vmem:[#allocation44_spill] sm:$0xff] }
 0x9b8   : > { %5429 = vmatmul.mubr.bf16.gmra.mrb[120].mxu1 %v4821_v35 }
 0x9b9   : > { %5438 = vmatprep.mubr.bf16.mxu1 %v4826_v23 }
 0x9c0   : > { %5439 = vmatmul.mubr.bf16.gmra.mrb[124].mxu1 %v4825_v60 }
 0xa5b   : > { %v5370_v33 = vpop.f32.mrb[96].mxu1 }
 0xa5c   : > { %v6724_v44 = vadd.f32 %v5370_v33, %v10920_v3  ;;  %v5372_v1 = vpop.f32.mrb[97].mxu1  ;;  %v11820_v33 = vld [vmem:[#allocation55_spill] sm:$0xff] }
 0xa5d   : > { %v6725_v6 = vadd.f32 %v5372_v1, %v10923_v42  ;;  %v5374_v18 = vpop.f32.mrb[98].mxu1 }
 0xa5e   : > { %v10928_v16 = vadd.f32 %v6724_v44, %v11805_v9  ;;  %v6726_v0 = vadd.f32 %v5374_v18, %v10920_v3  ;;  %v5376_v52 = vpop.f32.mrb[99].mxu1 }
 0xa5f   : > { %v10932_v46 = vadd.f32 %v6725_v6, %v11806_v57  ;;  %v6727_v19 = vadd.f32 %v5376_v52, %v10923_v42  ;;  %v11821_v52 = vld [vmem:[#allocation56_spill] sm:$0xff] }
 0xa60   : > { %5481 = vst [vmem:[%s8797_s17] sm:$0xff] %v10928_v16  ;;  %v10938_v58 = vadd.f32 %v6726_v0, %v11807_v21 }
 0xa61   : > { %5482 = vst [vmem:[%s8797_s17 + $0x8] sm:$0xff] %v10932_v46  ;;  %v10943_v47 = vadd.f32 %v6727_v19, %v11808_v11  ;;  %v11822_v11 = vld [vmem:[#allocation57_spill] sm:$0xff] }
 0xa62   : > { %5483 = vst [vmem:[%s8797_s17 + $0x10] sm:$0xff] %v10938_v58 }
 0xa63   : > { %5484 = vst [vmem:[%s8797_s17 + $0x18] sm:$0xff] %v10943_v47  ;;  %v5380_v59 = vpop.f32.mrb[100].mxu1 }
 0xa64   : > { %v6728_v36 = vadd.f32 %v5380_v59, %v10920_v3  ;;  %v5382_v32 = vpop.f32.mrb[101].mxu1 }
 0xa65   : > { %v6729_v62 = vadd.f32 %v5382_v32, %v10923_v42  ;;  %v5384_v13 = vpop.f32.mrb[102].mxu1  ;;  %v11823_v32 = vld [vmem:[#allocation58_spill] sm:$0xff] }
 0xa66   : > { %v10952_v27 = vadd.f32 %v6728_v36, %v11809_v5  ;;  %v6730_v56 = vadd.f32 %v5384_v13, %v10920_v3  ;;  %v5386_v35 = vpop.f32.mrb[103].mxu1  ;;  %v11824_v13 = vld [vmem:[#allocation59_spill] sm:$0xff] }
 0xa67   : > { %v10956_v24 = vadd.f32 %v6729_v62, %v11810_v51  ;;  %v6731_v17 = vadd.f32 %v5386_v35, %v10923_v42 }
 0xa68   : > { %5485 = vst [vmem:[%s8797_s17 + $0x20] sm:$0xff] %v10952_v27  ;;  %v10962_v10 = vadd.f32 %v6730_v56, %v11811_v2 }
 0xa69   : > { %5486 = vst [vmem:[%s8797_s17 + $0x28] sm:$0xff] %v10956_v24  ;;  %v10967_v39 = vadd.f32 %v6731_v17, %v11812_v25  ;;  %v11825_v25 = vld [vmem:[#allocation60_spill] sm:$0xff] }
 0xa6a   : > { %5487 = vst [vmem:[%s8797_s17 + $0x30] sm:$0xff] %v10962_v10 }
 0xa6b   : > { %5488 = vst [vmem:[%s8797_s17 + $0x38] sm:$0xff] %v10967_v39  ;;  %v5390_v20 = vpop.f32.mrb[104].mxu1 }
 0xa6c   : > { %v6732_v26 = vadd.f32 %v5390_v20, %v10920_v3  ;;  %v5392_v15 = vpop.f32.mrb[105].mxu1 }
 0xa6d   : > { %v6733_v41 = vadd.f32 %v5392_v15, %v10923_v42  ;;  %v5394_v31 = vpop.f32.mrb[106].mxu1 }
 0xa6e   : > { %v10976_v8 = vadd.f32 %v6732_v26, %v11813_v38  ;;  %v6734_v7 = vadd.f32 %v5394_v31, %v10920_v3  ;;  %v5396_v43 = vpop.f32.mrb[107].mxu1 }
 0xa6f   : > { %v10980_v40 = vadd.f32 %v6733_v41, %v11814_v54  ;;  %v6735_v37 = vadd.f32 %v5396_v43, %v10923_v42  ;;  %v11826_v41 = vld [vmem:[#allocation61_spill] sm:$0xff]  ;;  %v11828_v54 = vld [vmem:[#allocation63_spill] sm:$0xff] }
 0xa70   : > { %5489 = vst [vmem:[%s8797_s17 + $0x40] sm:$0xff] %v10976_v8  ;;  %v10986_v63 = vadd.f32 %v6734_v7, %v11815_v28  ;;  %v11827_v7 = vld [vmem:[#allocation62_spill] sm:$0xff] }
 0xa71   : > { %5490 = vst [vmem:[%s8797_s17 + $0x48] sm:$0xff] %v10980_v40  ;;  %v10991_v12 = vadd.f32 %v6735_v37, %v11816_v30 }
 0xa72   : > { %5491 = vst [vmem:[%s8797_s17 + $0x50] sm:$0xff] %v10986_v63 }
 0xa73   : > { %5492 = vst [vmem:[%s8797_s17 + $0x58] sm:$0xff] %v10991_v12  ;;  %v5400_v45 = vpop.f32.mrb[108].mxu1 }
 0xa74   : > { %v6736_v29 = vadd.f32 %v5400_v45, %v10920_v3  ;;  %v5402_v48 = vpop.f32.mrb[109].mxu1 }
 0xa75   : > { %v6737_v60 = vadd.f32 %v5402_v48, %v10923_v42  ;;  %v5404_v49 = vpop.f32.mrb[110].mxu1 }
 0xa76   : > { %v11000_v4 = vadd.f32 %v6736_v29, %v11817_v50  ;;  %v6738_v23 = vadd.f32 %v5404_v49, %v10920_v3  ;;  %v5406_v61 = vpop.f32.mrb[111].mxu1 }
 0xa77   : > { %v11004_v22 = vadd.f32 %v6737_v60, %v11818_v55  ;;  %v6739_v53 = vadd.f32 %v5406_v61, %v10923_v42  ;;  %v11829_v60 = vld [vmem:[#allocation64_spill] sm:$0xff]  ;;  %v11830_v61 = vld [vmem:[#allocation65_spill] sm:$0xff] }
 0xa78   : > { %5493 = vst [vmem:[%s8797_s17 + $0x60] sm:$0xff] %v11000_v4  ;;  %v11010_v34 = vadd.f32 %v6738_v23, %v11819_v14  ;;  %v11831_v14 = vld [vmem:[#allocation66_spill] sm:$0xff] }
 0xa79   : > { %5494 = vst [vmem:[%s8797_s17 + $0x68] sm:$0xff] %v11004_v22  ;;  %v11015_v44 = vadd.f32 %v6739_v53, %v11820_v33 }
 0xa7a   : > { %5495 = vst [vmem:[%s8797_s17 + $0x70] sm:$0xff] %v11010_v34 }
 0xa7b   : > { %5496 = vst [vmem:[%s8797_s17 + $0x78] sm:$0xff] %v11015_v44  ;;  %v5410_v1 = vpop.f32.mrb[112].mxu1 }
 0xa7c   : > { %v6740_v6 = vadd.f32 %v5410_v1, %v10920_v3  ;;  %v5412_v18 = vpop.f32.mrb[113].mxu1  ;;  %v11832_v1 = vld [vmem:[#allocation67_spill] sm:$0xff] }
 0xa7d   : > { %v6741_v9 = vadd.f32 %v5412_v18, %v10923_v42  ;;  %v5414_v0 = vpop.f32.mrb[114].mxu1 }
 0xa7e   : > { %v11024_v57 = vadd.f32 %v6740_v6, %v11821_v52  ;;  %v6742_v19 = vadd.f32 %v5414_v0, %v10920_v3  ;;  %v5416_v21 = vpop.f32.mrb[115].mxu1 }
 0xa7f   : > { %v11028_v59 = vadd.f32 %v6741_v9, %v11822_v11  ;;  %v6743_v36 = vadd.f32 %v5416_v21, %v10923_v42  ;;  %v11833_v21 = vld [vmem:[#allocation68_spill] sm:$0xff] }
 0xa80   : > { %5497 = vst [vmem:[%s8797_s17 + $0x80] sm:$0xff] %v11024_v57  ;;  %v11034_v62 = vadd.f32 %v6742_v19, %v11823_v32 }
 0xa81   : > { %5498 = vst [vmem:[%s8797_s17 + $0x88] sm:$0xff] %v11028_v59  ;;  %v11039_v5 = vadd.f32 %v6743_v36, %v11824_v13  ;;  %v11834_v13 = vld [vmem:[#allocation69_spill] sm:$0xff] }
 0xa82   : > { %5499 = vst [vmem:[%s8797_s17 + $0x90] sm:$0xff] %v11034_v62 }
 0xa83   : > { %5500 = vst [vmem:[%s8797_s17 + $0x98] sm:$0xff] %v11039_v5  ;;  %v5420_v56 = vpop.f32.mrb[116].mxu1 }
 0xa84   : > { %v6744_v35 = vadd.f32 %v5420_v56, %v10920_v3  ;;  %v5422_v51 = vpop.f32.mrb[117].mxu1 }
 0xa85   : > { %v6745_v17 = vadd.f32 %v5422_v51, %v10923_v42  ;;  %v5424_v2 = vpop.f32.mrb[118].mxu1  ;;  %v11835_v51 = vld [vmem:[#allocation70_spill] sm:$0xff] }
 0xa86   : > { %v11048_v20 = vadd.f32 %v6744_v35, %v11825_v25  ;;  %v6746_v26 = vadd.f32 %v5424_v2, %v10920_v3  ;;  %v5426_v15 = vpop.f32.mrb[119].mxu1  ;;  %v11836_v2 = vld [vmem:[#allocation71_spill] sm:$0xff] }
 0xa87   : > { %v11052_v31 = vadd.f32 %v6745_v17, %v11826_v41  ;;  %v6747_v38 = vadd.f32 %v5426_v15, %v10923_v42  ;;  %v5528_v15 = vadd.f32 (!%p6511_p11), %v10967_v39, %v10962_v10  ;;  %v5531_v41 = vadd.f32 (!%p6511_p11), %v10980_v40, %v10976_v8 }
 0xa88   : > { %5501 = vst [vmem:[%s8797_s17 + $0xa0] sm:$0xff] %v11048_v20  ;;  %v11058_v43 = vadd.f32 %v6746_v26, %v11827_v7  ;;  %v5522_v26 = vadd.f32 (!%p6511_p11), %v10943_v47, %v10938_v58  ;;  %v5537_v7 = vadd.f32 (!%p6511_p11), %v11004_v22, %v11000_v4 }
 0xa89   : > { %5502 = vst [vmem:[%s8797_s17 + $0xa8] sm:$0xff] %v11052_v31  ;;  %v11063_v37 = vadd.f32 %v6747_v38, %v11828_v54  ;;  %v5534_v38 = vadd.f32 (!%p6511_p11), %v10991_v12, %v10986_v63  ;;  %v5540_v54 = vadd.f32 (!%p6511_p11), %v11015_v44, %v11010_v34 }
 0xa8a   : > { %5503 = vst [vmem:[%s8797_s17 + $0xb0] sm:$0xff] %v11058_v43 }
 0xa8b   : > { %5504 = vst [vmem:[%s8797_s17 + $0xb8] sm:$0xff] %v11063_v37  ;;  %v5430_v28 = vpop.f32.mrb[120].mxu1 }
 0xa8c   : > { %v6748_v30 = vadd.f32 %v5430_v28, %v10920_v3  ;;  %v5432_v45 = vpop.f32.mrb[121].mxu1  ;;  %v5543_v28 = vadd.f32 (!%p6511_p11), %v11028_v59, %v11024_v57 }
 0xa8d   : > { %v6749_v29 = vadd.f32 %v5432_v45, %v10923_v42  ;;  %v5434_v48 = vpop.f32.mrb[122].mxu1  ;;  %v5549_v45 = vadd.f32 (!%p6511_p11), %v11052_v31, %v11048_v20 }
 0xa8e   : > { %v11072_v49 = vadd.f32 %v6748_v30, %v11829_v60  ;;  %v6750_v50 = vadd.f32 %v5434_v48, %v10920_v3  ;;  %v5436_v23 = vpop.f32.mrb[123].mxu1  ;;  %v5546_v30 = vadd.f32 (!%p6511_p11), %v11039_v5, %v11034_v62 }
 0xa8f   : > { %v11076_v55 = vadd.f32 %v6749_v29, %v11830_v61  ;;  %v6751_v53 = vadd.f32 %v5436_v23, %v10923_v42  ;;  %v5552_v29 = vadd.f32 (!%p6511_p11), %v11063_v37, %v11058_v43 }
 0xa90   : > { %5505 = vst [vmem:[%s8797_s17 + $0xc0] sm:$0xff] %v11072_v49  ;;  %v11082_v33 = vadd.f32 %v6750_v50, %v11831_v14 }
 0xa91   : > { %5506 = vst [vmem:[%s8797_s17 + $0xc8] sm:$0xff] %v11076_v55  ;;  %v11087_v6 = vadd.f32 %v6751_v53, %v11832_v1  ;;  %v5555_v48 = vadd.f32 (!%p6511_p11), %v11076_v55, %v11072_v49 }
 0xa92   : > { %5507 = vst [vmem:[%s8797_s17 + $0xd0] sm:$0xff] %v11082_v33 }
 0xa93   : > { %5508 = vst [vmem:[%s8797_s17 + $0xd8] sm:$0xff] %v11087_v6  ;;  %v5440_v18 = vpop.f32.mrb[124].mxu1  ;;  %v5558_v60 = vadd.f32 (!%p6511_p11), %v11087_v6, %v11082_v33 }
 0xa94   : > { %v6752_v9 = vadd.f32 %v5440_v18, %v10920_v3  ;;  %v5442_v0 = vpop.f32.mrb[125].mxu1 }
 0xa95   : > { %v6753_v52 = vadd.f32 %v5442_v0, %v10923_v42  ;;  %v5444_v19 = vpop.f32.mrb[126].mxu1  ;;  %5516 = sbr.rel (%p6511_p11) target bundleno = 3063 (0xbf7), region = 124 }
 0xa96   : > { %v11096_v11 = vadd.f32 %v6752_v9, %v11833_v21  ;;  %v6754_v36 = vadd.f32 %v5444_v19, %v10920_v3  ;;  %v5446_v32 = vpop.f32.mrb[127].mxu1  ;;  %v5519_v3 = vadd.f32 (!%p6511_p11), %v10932_v46, %v10928_v16 }
 0xa97   : > { %v11100_v56 = vadd.f32 %v6753_v52, %v11834_v13  ;;  %v6755_v35 = vadd.f32 %v5446_v32, %v10923_v42  ;;  %v5525_v42 = vadd.f32 (!%p6511_p11), %v10956_v24, %v10952_v27 }
 0xa98   : > { %5509 = vst [vmem:[%s8797_s17 + $0xe0] sm:$0xff] %v11096_v11  ;;  %v11106_v17 = vadd.f32 %v6754_v36, %v11835_v51  ;;  %5520 = vadd.xlane.f32.xlu0 (!%p6511_p11), %v5519_v3 }
 0xa99   : > { %5510 = vst [vmem:[%s8797_s17 + $0xe8] sm:$0xff] %v11100_v56  ;;  %v11111_v25 = vadd.f32 %v6755_v35, %v11836_v2  ;;  %5526 = vadd.xlane.f32.xlu1 (!%p6511_p11), %v5525_v42  ;;  %v5561_v50 = vadd.f32 (!%p6511_p11), %v11100_v56, %v11096_v11 }
 0xa9a   : > { %5511 = vst [vmem:[%s8797_s17 + $0xf0] sm:$0xff] %v11106_v17 }
 0xa9b   : > { %5512 = vst [vmem:[%s8797_s17 + $0xf8] sm:$0xff] %v11111_v25  ;;  %v5564_v23 = vadd.f32 (!%p6511_p11), %v11111_v25, %v11106_v17 }
 0xa9c   : > { %5523 = vadd.xlane.f32.xlu0 %v5522_v26 }
 0xa9d   : > { %5529 = vadd.xlane.f32.xlu1 %v5528_v15 }
 0xaa0   : > { %5532 = vadd.xlane.f32.xlu0 %v5531_v41 }
 0xaa1   : > { %5535 = vadd.xlane.f32.xlu1 %v5534_v38 }
 0xaa4   : > { %5538 = vadd.xlane.f32.xlu0 %v5537_v7 }
 0xaa5   : > { %5541 = vadd.xlane.f32.xlu1 %v5540_v54 }
 0xaa8   : > { %5544 = vadd.xlane.f32.xlu0 %v5543_v28 }
 0xaa9   : > { %5547 = vadd.xlane.f32.xlu1 %v5546_v30 }
 0xaac   : > { %5550 = vadd.xlane.f32.xlu0 %v5549_v45 }
 0xaad   : > { %5553 = vadd.xlane.f32.xlu1 %v5552_v29 }
 0xab0   : > { %5556 = vadd.xlane.f32.xlu0 %v5555_v48 }
 0xab1   : > { %5559 = vadd.xlane.f32.xlu1 %v5558_v60 }
 0xab4   : > { %5562 = vadd.xlane.f32.xlu0 %v5561_v50 }
 0xab5   : > { %5565 = vadd.xlane.f32.xlu1 %v5564_v23 }
 0xb25   : > { %v5521_v61 = vpop.xlane.xlu0 %5520 }
 0xb26   : > { %v5527_v53 = vpop.xlane.xlu1 %5526  ;;  %v5567_v14 = vmul.f32 0.00390625, %v5521_v61 }
 0xb27   : > { %v5569_v1 = vmul.f32 0.00390625, %v5527_v53 }
 0xb28   : > { %v11151_v18 = vsub.f32 %v10928_v16, %v5567_v14  ;;  %v11154_v9 = vsub.f32 %v10932_v46, %v5567_v14 }
 0xb29   : > { %v11157_v0 = vsub.f32 %v10952_v27, %v5569_v1  ;;  %v11160_v52 = vsub.f32 %v10956_v24, %v5569_v1  ;;  %v5524_v19 = vpop.xlane.xlu0 %5523 }
 0xb2a   : > { %v5530_v21 = vpop.xlane.xlu1 %5529  ;;  %v5568_v36 = vmul.f32 0.00390625, %v5524_v19  ;;  %v5615_v13 = vmul.f32 %v11151_v18, %v11151_v18  ;;  %v5616_v16 = vmul.f32 %v11154_v9, %v11154_v9 }
 0xb2b   : > { %v5570_v32 = vmul.f32 0.00390625, %v5530_v21  ;;  %v5619_v46 = vmul.f32 %v11157_v0, %v11157_v0  ;;  %v5620_v27 = vmul.f32 %v11160_v52, %v11160_v52 }
 0xb2c   : > { %v11171_v35 = vsub.f32 %v10938_v58, %v5568_v36  ;;  %v11174_v24 = vsub.f32 %v10943_v47, %v5568_v36  ;;  %v5647_v42 = vadd.f32 %v5616_v16, %v5615_v13 }
 0xb2d   : > { %v11177_v51 = vsub.f32 %v10962_v10, %v5570_v32  ;;  %v11180_v2 = vsub.f32 %v10967_v39, %v5570_v32  ;;  %v5533_v3 = vpop.xlane.xlu0 %5532  ;;  %v5653_v47 = vadd.f32 %v5620_v27, %v5619_v46 }
 0xb2e   : > { %v5536_v26 = vpop.xlane.xlu1 %5535  ;;  %v5571_v15 = vmul.f32 0.00390625, %v5533_v3  ;;  %v5617_v38 = vmul.f32 %v11171_v35, %v11171_v35  ;;  %v5618_v58 = vmul.f32 %v11174_v24, %v11174_v24  ;;  %5648 = vadd.xlane.f32.xlu0 %v5647_v42 }
 0xb2f   : > { %v5572_v41 = vmul.f32 0.00390625, %v5536_v26  ;;  %v5621_v10 = vmul.f32 %v11177_v51, %v11177_v51  ;;  %v5622_v39 = vmul.f32 %v11180_v2, %v11180_v2 }
 0xb30   : > { %v11191_v7 = vsub.f32 %v10976_v8, %v5571_v15  ;;  %v11194_v54 = vsub.f32 %v10980_v40, %v5571_v15  ;;  %v5650_v29 = vadd.f32 %v5618_v58, %v5617_v38 }
 0xb31   : > { %v11197_v28 = vsub.f32 %v10986_v63, %v5572_v41  ;;  %v11200_v30 = vsub.f32 %v10991_v12, %v5572_v41  ;;  %v5539_v45 = vpop.xlane.xlu0 %5538  ;;  %v5656_v40 = vadd.f32 %v5622_v39, %v5621_v10 }
 0xb32   : > { %v5542_v48 = vpop.xlane.xlu1 %5541  ;;  %v5573_v60 = vmul.f32 0.00390625, %v5539_v45  ;;  %v5623_v23 = vmul.f32 %v11191_v7, %v11191_v7  ;;  %v5624_v8 = vmul.f32 %v11194_v54, %v11194_v54  ;;  %5654 = vadd.xlane.f32.xlu0 %v5653_v47  ;;  %5651 = vadd.xlane.f32.xlu1 %v5650_v29 }
 0xb33   : > { %v5574_v50 = vmul.f32 0.00390625, %v5542_v48  ;;  %v5625_v63 = vmul.f32 %v11197_v28, %v11197_v28  ;;  %v5626_v12 = vmul.f32 %v11200_v30, %v11200_v30 }
 0xb34   : > { %v11211_v61 = vsub.f32 %v11000_v4, %v5573_v60  ;;  %v11214_v53 = vsub.f32 %v11004_v22, %v5573_v60  ;;  %v5659_v21 = vadd.f32 %v5624_v8, %v5623_v23 }
 0xb35   : > { %v11217_v14 = vsub.f32 %v11010_v34, %v5574_v50  ;;  %v11220_v1 = vsub.f32 %v11015_v44, %v5574_v50  ;;  %v5545_v19 = vpop.xlane.xlu0 %5544  ;;  %v5662_v22 = vadd.f32 %v5626_v12, %v5625_v63 }
 0xb36   : > { %v5548_v36 = vpop.xlane.xlu1 %5547  ;;  %v5575_v32 = vmul.f32 0.00390625, %v5545_v19  ;;  %v5627_v16 = vmul.f32 %v11211_v61, %v11211_v61  ;;  %v5628_v4 = vmul.f32 %v11214_v53, %v11214_v53  ;;  %5657 = vadd.xlane.f32.xlu1 %v5656_v40  ;;  %5660 = vadd.xlane.f32.xlu0 %v5659_v21 }
 0xb37   : > { %v5576_v13 = vmul.f32 0.00390625, %v5548_v36  ;;  %v5629_v34 = vmul.f32 %v11217_v14, %v11217_v14  ;;  %v5630_v44 = vmul.f32 %v11220_v1, %v11220_v1 }
 0xb38   : > { %v11231_v46 = vsub.f32 %v11024_v57, %v5575_v32  ;;  %v11234_v27 = vsub.f32 %v11028_v59, %v5575_v32  ;;  %v5665_v15 = vadd.f32 %v5628_v4, %v5627_v16 }
 0xb39   : > { %v11237_v3 = vsub.f32 %v11034_v62, %v5576_v13  ;;  %v11240_v42 = vsub.f32 %v11039_v5, %v5576_v13  ;;  %v5551_v26 = vpop.xlane.xlu0 %5550  ;;  %v5668_v59 = vadd.f32 %v5630_v44, %v5629_v34 }
 0xb3a   : > { %v5554_v41 = vpop.xlane.xlu1 %5553  ;;  %v5577_v38 = vmul.f32 0.00390625, %v5551_v26  ;;  %v5631_v47 = vmul.f32 %v11231_v46, %v11231_v46  ;;  %v5632_v57 = vmul.f32 %v11234_v27, %v11234_v27  ;;  %5663 = vadd.xlane.f32.xlu1 %v5662_v22  ;;  %5666 = vadd.xlane.f32.xlu0 %v5665_v15 }
 0xb3b   : > { %v5578_v58 = vmul.f32 0.00390625, %v5554_v41  ;;  %v5633_v62 = vmul.f32 %v11237_v3, %v11237_v3  ;;  %v5634_v5 = vmul.f32 %v11240_v42, %v11240_v42 }
 0xb3c   : > { %v11251_v10 = vsub.f32 %v11048_v20, %v5577_v38  ;;  %v11254_v39 = vsub.f32 %v11052_v31, %v5577_v38  ;;  %v5671_v60 = vadd.f32 %v5632_v57, %v5631_v47 }
 0xb3d   : > { %v11257_v45 = vsub.f32 %v11058_v43, %v5578_v58  ;;  %v11260_v29 = vsub.f32 %v11063_v37, %v5578_v58  ;;  %v5557_v48 = vpop.xlane.xlu0 %5556  ;;  %v5674_v31 = vadd.f32 %v5634_v5, %v5633_v62 }
 0xb3e   : > { %v5560_v50 = vpop.xlane.xlu1 %5559  ;;  %v5579_v23 = vmul.f32 0.00390625, %v5557_v48  ;;  %v5635_v40 = vmul.f32 %v11251_v10, %v11251_v10  ;;  %v5636_v20 = vmul.f32 %v11254_v39, %v11254_v39  ;;  %5669 = vadd.xlane.f32.xlu1 %v5668_v59  ;;  %5672 = vadd.xlane.f32.xlu0 %v5671_v60 }
 0xb3f   : > { %v5580_v8 = vmul.f32 0.00390625, %v5560_v50  ;;  %v5637_v43 = vmul.f32 %v11257_v45, %v11257_v45  ;;  %v5638_v37 = vmul.f32 %v11260_v29, %v11260_v29 }
 0xb40   : > { %v11271_v63 = vsub.f32 %v11072_v49, %v5579_v23  ;;  %v11274_v12 = vsub.f32 %v11076_v55, %v5579_v23  ;;  %v5677_v32 = vadd.f32 %v5636_v20, %v5635_v40 }
 0xb41   : > { %v11277_v19 = vsub.f32 %v11082_v33, %v5580_v8  ;;  %v11280_v21 = vsub.f32 %v11087_v6, %v5580_v8  ;;  %v5563_v36 = vpop.xlane.xlu0 %5562  ;;  %v5680_v55 = vadd.f32 %v5638_v37, %v5637_v43  ;;  %v5517_v37 = vld [vmem:[%s11838_s10] sm:$0x3] }
 0xb42   : > { %v5566_v13 = vpop.xlane.xlu1 %5565  ;;  %v5581_v16 = vmul.f32 0.00390625, %v5563_v36  ;;  %v5639_v22 = vmul.f32 %v11271_v63, %v11271_v63  ;;  %v5640_v49 = vmul.f32 %v11274_v12, %v11274_v12  ;;  %5675 = vadd.xlane.f32.xlu1 %v5674_v31  ;;  %5678 = vadd.xlane.f32.xlu0 %v5677_v32 }
 0xb43   : > { %v5582_v4 = vmul.f32 0.00390625, %v5566_v13  ;;  %v5641_v33 = vmul.f32 %v11277_v19, %v11277_v19  ;;  %v5642_v6 = vmul.f32 %v11280_v21, %v11280_v21 }
 0xb44   : > { %v11291_v34 = vsub.f32 %v11096_v11, %v5581_v16  ;;  %v11294_v44 = vsub.f32 %v11100_v56, %v5581_v16  ;;  %v5683_v41 = vadd.f32 %v5640_v49, %v5639_v22 }
 0xb45   : > { %v11297_v26 = vsub.f32 %v11106_v17, %v5582_v4  ;;  %v11300_v15 = vsub.f32 %v11111_v25, %v5582_v4  ;;  %v5686_v11 = vadd.f32 %v5642_v6, %v5641_v33  ;;  %v5518_v4 = vld [vmem:[%s11839_s28] sm:$0x3]  ;;  %v11841_v6 = vld [vmem:[#allocation38_spill] sm:$0xff] }
 0xb46   : > { %v5643_v38 = vmul.f32 %v11291_v34, %v11291_v34  ;;  %v5644_v58 = vmul.f32 %v11294_v44, %v11294_v44  ;;  %5681 = vadd.xlane.f32.xlu1 %v5680_v55  ;;  %5684 = vadd.xlane.f32.xlu0 %v5683_v41  ;;  %v11840_v55 = vld [vmem:[#allocation39_spill] sm:$0xff]  ;;  %v11320_v41 = vrot.slane %v5517_v37, %v11841_v6 }
 0xb47   : > { %v5645_v56 = vmul.f32 %v11297_v26, %v11297_v26  ;;  %v5646_v17 = vmul.f32 %v11300_v15, %v11300_v15  ;;  %v11317_v33 = vrot.slane %v5517_v37, %v11840_v55 }
 0xb48   : > { %v5689_v47 = vadd.f32 %v5644_v58, %v5643_v38 }
 0xb49   : > { %v5692_v25 = vadd.f32 %v5646_v17, %v5645_v56 }
 0xb4a   : > { %5687 = vadd.xlane.f32.xlu1 %v5686_v11  ;;  %5690 = vadd.xlane.f32.xlu0 %v5689_v47  ;;  %v11325_v47 = vrot.slane %v5518_v4, %v11840_v55 }
 0xb4e   : > { %5693 = vadd.xlane.f32.xlu1 %v5692_v25  ;;  %v11328_v25 = vrot.slane %v5518_v4, %v11841_v6 }
 0xbbb   : > { %v5649_v57 = vpop.xlane.xlu0 %5648 }
 0xbbc   : > { %v5695_v59 = vmul.f32 0.00390625, %v5649_v57 }
 0xbbe   : > { %v5711_v62 = vadd.f32 1e-06, %v5695_v59 }
 0xbbf   : > { %v5652_v5 = vpop.xlane.xlu1 %5651  ;;  %v5655_v48 = vpop.xlane.xlu0 %5654 }
 0xbc0   : > { %7695 = vrsqrt.f32 %v5711_v62  ;;  %v5696_v60 = vmul.f32 0.00390625, %v5652_v5  ;;  %v5697_v50 = vmul.f32 0.00390625, %v5655_v48 }
 0xbc2   : > { %v5712_v23 = vadd.f32 1e-06, %v5696_v60  ;;  %v5713_v8 = vadd.f32 1e-06, %v5697_v50 }
 0xbc3   : > { %v5658_v40 = vpop.xlane.xlu1 %5657  ;;  %v5661_v20 = vpop.xlane.xlu0 %5660 }
 0xbc4   : > { %7697 = vrsqrt.f32 %v5712_v23  ;;  %v5698_v31 = vmul.f32 0.00390625, %v5658_v40  ;;  %v5699_v43 = vmul.f32 0.00390625, %v5661_v20 }
 0xbc5   : > { %7699 = vrsqrt.f32 %v5713_v8 }
 0xbc6   : > { %v5714_v36 = vadd.f32 1e-06, %v5698_v31  ;;  %v5715_v32 = vadd.f32 1e-06, %v5699_v43 }
 0xbc7   : > { %v5664_v13 = vpop.xlane.xlu1 %5663  ;;  %v5667_v16 = vpop.xlane.xlu0 %5666 }
 0xbc8   : > { %7701 = vrsqrt.f32 %v5714_v36  ;;  %v5700_v22 = vmul.f32 0.00390625, %v5664_v13  ;;  %v5701_v49 = vmul.f32 0.00390625, %v5667_v16 }
 0xbc9   : > { %7703 = vrsqrt.f32 %v5715_v32 }
 0xbca   : > { %v7696_v38 = vpop.eup %7695  ;;  %v5716_v58 = vadd.f32 1e-06, %v5700_v22  ;;  %v5717_v11 = vadd.f32 1e-06, %v5701_v49 }
 0xbcb   : > { %v5743_v56 = vmul.f32 %v7696_v38, %v11151_v18  ;;  %v5744_v17 = vmul.f32 %v7696_v38, %v11154_v9  ;;  %v5670_v57 = vpop.xlane.xlu1 %5669  ;;  %v5673_v59 = vpop.xlane.xlu0 %5672 }
 0xbcc   : > { %7705 = vrsqrt.f32 %v5716_v58  ;;  %v5702_v62 = vmul.f32 0.00390625, %v5670_v57  ;;  %v5703_v5 = vmul.f32 0.00390625, %v5673_v59 }
 0xbcd   : > { %v5786_v48 = vmul.f32 %v11317_v33, %v5743_v56  ;;  %v5787_v60 = vmul.f32 %v11320_v41, %v5744_v17  ;;  %7707 = vrsqrt.f32 %v5717_v11 }
 0xbce   : > { %v7698_v50 = vpop.eup %7697  ;;  %v5718_v18 = vadd.f32 1e-06, %v5702_v62  ;;  %v5719_v9 = vadd.f32 1e-06, %v5703_v5 }
 0xbcf   : > { %v7700_v23 = vpop.eup %7699  ;;  %v5829_v8 = vadd.f32 %v11325_v47, %v5786_v48  ;;  %v5830_v40 = vadd.f32 %v11328_v25, %v5787_v60  ;;  %v5745_v20 = vmul.f32 %v7698_v50, %v11171_v35  ;;  %v5746_v31 = vmul.f32 %v7698_v50, %v11174_v24  ;;  %v5676_v43 = vpop.xlane.xlu1 %5675 }
 0xbd0   : > { %v5679_v37 = vpop.xlane.xlu0 %5678  ;;  %v5747_v36 = vmul.f32 %v7700_v23, %v11157_v0  ;;  %v5748_v32 = vmul.f32 %v7700_v23, %v11160_v52  ;;  %7709 = vrsqrt.f32 %v5718_v18  ;;  %v5704_v13 = vmul.f32 0.00390625, %v5676_v43 }
 0xbd1   : > { %5863 = vst [vmem:[%s11336_s24] sm:$0xff] %v5829_v8  ;;  %5864 = vst [vmem:[%s11336_s24 + $0x8] sm:$0xff] %v5830_v40  ;;  %v5788_v16 = vmul.f32 %v11317_v33, %v5745_v20  ;;  %v5789_v4 = vmul.f32 %v11320_v41, %v5746_v31  ;;  %7711 = vrsqrt.f32 %v5719_v9  ;;  %v5705_v22 = vmul.f32 0.00390625, %v5679_v37 }
 0xbd2   : > { %v7702_v35 = vpop.eup %7701  ;;  %v5790_v24 = vmul.f32 %v11317_v33, %v5747_v36  ;;  %v5791_v49 = vmul.f32 %v11320_v41, %v5748_v32  ;;  %v5720_v0 = vadd.f32 1e-06, %v5704_v13 }
 0xbd3   : > { %v7704_v55 = vpop.eup %7703  ;;  %v5831_v52 = vadd.f32 %v11325_v47, %v5788_v16  ;;  %v5832_v6 = vadd.f32 %v11328_v25, %v5789_v4  ;;  %v5749_v38 = vmul.f32 %v7702_v35, %v11177_v51  ;;  %v5750_v58 = vmul.f32 %v7702_v35, %v11180_v2  ;;  %v5682_v11 = vpop.xlane.xlu1 %5681 }
 0xbd4   : > { %v5685_v56 = vpop.xlane.xlu0 %5684  ;;  %v5833_v17 = vadd.f32 %v11325_v47, %v5790_v24  ;;  %v5834_v57 = vadd.f32 %v11328_v25, %v5791_v49  ;;  %v5751_v59 = vmul.f32 %v7704_v55, %v11191_v7  ;;  %v5752_v62 = vmul.f32 %v7704_v55, %v11194_v54 }
 0xbd5   : > { %5865 = vst [vmem:[%s11336_s24 + $0x10] sm:$0xff] %v5831_v52  ;;  %5866 = vst [vmem:[%s11336_s24 + $0x18] sm:$0xff] %v5832_v6  ;;  %v5792_v5 = vmul.f32 %v11317_v33, %v5749_v38  ;;  %v5793_v48 = vmul.f32 %v11320_v41, %v5750_v58  ;;  %7713 = vrsqrt.f32 %v5720_v0  ;;  %v5721_v51 = vadd.f32 1e-06, %v5705_v22 }
 0xbd6   : > { %v7706_v60 = vpop.eup %7705  ;;  %5867 = vst [vmem:[%s11336_s24 + $0x20] sm:$0xff] %v5833_v17  ;;  %5868 = vst [vmem:[%s11336_s24 + $0x28] sm:$0xff] %v5834_v57  ;;  %v5794_v2 = vmul.f32 %v11317_v33, %v5751_v59  ;;  %v5795_v50 = vmul.f32 %v11320_v41, %v5752_v62  ;;  %v5706_v7 = vmul.f32 0.00390625, %v5682_v11  ;;  %v5707_v18 = vmul.f32 0.00390625, %v5685_v56 }
 0xbd7   : > { %v7708_v54 = vpop.eup %7707  ;;  %v5835_v9 = vadd.f32 %v11325_v47, %v5792_v5  ;;  %v5836_v23 = vadd.f32 %v11328_v25, %v5793_v48  ;;  %v5753_v8 = vmul.f32 %v7706_v60, %v11197_v28  ;;  %v5754_v40 = vmul.f32 %v7706_v60, %v11200_v30  ;;  %v5688_v20 = vpop.xlane.xlu1 %5687 }
 0xbd8   : > { %v5837_v31 = vadd.f32 %v11325_v47, %v5794_v2  ;;  %v5838_v43 = vadd.f32 %v11328_v25, %v5795_v50  ;;  %v5755_v37 = vmul.f32 %v7708_v54, %v11211_v61  ;;  %v5756_v36 = vmul.f32 %v7708_v54, %v11214_v53  ;;  %v5691_v55 = vpop.xlane.xlu0 %5690 }
 0xbd9   : > { %5869 = vst [vmem:[%s11336_s24 + $0x30] sm:$0xff] %v5835_v9  ;;  %5870 = vst [vmem:[%s11336_s24 + $0x38] sm:$0xff] %v5836_v23  ;;  %v5796_v32 = vmul.f32 %v11317_v33, %v5753_v8  ;;  %v5797_v13 = vmul.f32 %v11320_v41, %v5754_v40  ;;  %7715 = vrsqrt.f32 %v5721_v51  ;;  %v5722_v16 = vadd.f32 1e-06, %v5706_v7 }
 0xbda   : > { %v7710_v28 = vpop.eup %7709  ;;  %5871 = vst [vmem:[%s11336_s24 + $0x40] sm:$0xff] %v5837_v31  ;;  %5872 = vst [vmem:[%s11336_s24 + $0x48] sm:$0xff] %v5838_v43  ;;  %v5798_v30 = vmul.f32 %v11317_v33, %v5755_v37  ;;  %v5799_v4 = vmul.f32 %v11320_v41, %v5756_v36  ;;  %v5723_v61 = vadd.f32 1e-06, %v5707_v18  ;;  %v5708_v22 = vmul.f32 0.00390625, %v5688_v20 }
 0xbdb   : > { %v7712_v53 = vpop.eup %7711  ;;  %v5839_v35 = vadd.f32 %v11325_v47, %v5796_v32  ;;  %v5840_v24 = vadd.f32 %v11328_v25, %v5797_v13  ;;  %v5757_v49 = vmul.f32 %v7710_v28, %v11217_v14  ;;  %v5758_v0 = vmul.f32 %v7710_v28, %v11220_v1  ;;  %v5694_v11 = vpop.xlane.xlu1 %5693 }
 0xbdc   : > { %v5841_v52 = vadd.f32 %v11325_v47, %v5798_v30  ;;  %v5842_v6 = vadd.f32 %v11328_v25, %v5799_v4  ;;  %v5759_v38 = vmul.f32 %v7712_v53, %v11231_v46  ;;  %v5760_v58 = vmul.f32 %v7712_v53, %v11234_v27 }
 0xbdd   : > { %5873 = vst [vmem:[%s11336_s24 + $0x50] sm:$0xff] %v5839_v35  ;;  %5874 = vst [vmem:[%s11336_s24 + $0x58] sm:$0xff] %v5840_v24  ;;  %v5800_v56 = vmul.f32 %v11317_v33, %v5757_v49  ;;  %v5801_v17 = vmul.f32 %v11320_v41, %v5758_v0  ;;  %7717 = vrsqrt.f32 %v5722_v16  ;;  %v5724_v14 = vadd.f32 1e-06, %v5708_v22 }
 0xbde   : > { %5875 = vst [vmem:[%s11336_s24 + $0x60] sm:$0xff] %v5841_v52  ;;  %5876 = vst [vmem:[%s11336_s24 + $0x68] sm:$0xff] %v5842_v6  ;;  %v5802_v1 = vmul.f32 %v11317_v33, %v5759_v38  ;;  %v5803_v57 = vmul.f32 %v11320_v41, %v5760_v58  ;;  %7719 = vrsqrt.f32 %v5723_v61  ;;  %v5709_v46 = vmul.f32 0.00390625, %v5691_v55 }
 0xbdf   : > { %v7714_v27 = vpop.eup %7713  ;;  %v5843_v59 = vadd.f32 %v11325_v47, %v5800_v56  ;;  %v5844_v62 = vadd.f32 %v11328_v25, %v5801_v17  ;;  %7721 = vrsqrt.f32 %v5724_v14  ;;  %v5710_v5 = vmul.f32 0.00390625, %v5694_v11 }
 0xbe0   : > { %v5845_v48 = vadd.f32 %v11325_v47, %v5802_v1  ;;  %v5846_v51 = vadd.f32 %v11328_v25, %v5803_v57  ;;  %v5761_v60 = vmul.f32 %v7714_v27, %v11237_v3  ;;  %v5762_v2 = vmul.f32 %v7714_v27, %v11240_v42 }
 0xbe1   : > { %5877 = vst [vmem:[%s11336_s24 + $0x70] sm:$0xff] %v5843_v59  ;;  %5878 = vst [vmem:[%s11336_s24 + $0x78] sm:$0xff] %v5844_v62  ;;  %v5725_v50 = vadd.f32 1e-06, %v5709_v46  ;;  %v5726_v7 = vadd.f32 1e-06, %v5710_v5 }
 0xbe2   : > { %5879 = vst [vmem:[%s11336_s24 + $0x80] sm:$0xff] %v5845_v48  ;;  %5880 = vst [vmem:[%s11336_s24 + $0x88] sm:$0xff] %v5846_v51  ;;  %v5804_v18 = vmul.f32 %v11317_v33, %v5761_v60  ;;  %v5805_v54 = vmul.f32 %v11320_v41, %v5762_v2 }
 0xbe3   : > { %v7716_v9 = vpop.eup %7715  ;;  %7723 = vrsqrt.f32 %v5725_v50 }
 0xbe4   : > { %v5847_v23 = vadd.f32 %v11325_v47, %v5804_v18  ;;  %v5848_v3 = vadd.f32 %v11328_v25, %v5805_v54  ;;  %v5763_v42 = vmul.f32 %v7716_v9, %v11251_v10  ;;  %v5764_v8 = vmul.f32 %v7716_v9, %v11254_v39 }
 0xbe5   : > { %7725 = vrsqrt.f32 %v5726_v7 }
 0xbe6   : > { %5881 = vst [vmem:[%s11336_s24 + $0x90] sm:$0xff] %v5847_v23  ;;  %5882 = vst [vmem:[%s11336_s24 + $0x98] sm:$0xff] %v5848_v3  ;;  %v5806_v40 = vmul.f32 %v11317_v33, %v5763_v42  ;;  %v5807_v20 = vmul.f32 %v11320_v41, %v5764_v8 }
 0xbe7   : > { %v7718_v31 = vpop.eup %7717 }
 0xbe8   : > { %v7720_v43 = vpop.eup %7719  ;;  %v5849_v37 = vadd.f32 %v11325_v47, %v5806_v40  ;;  %v5850_v36 = vadd.f32 %v11328_v25, %v5807_v20  ;;  %v5765_v32 = vmul.f32 %v7718_v31, %v11257_v45  ;;  %v5766_v10 = vmul.f32 %v7718_v31, %v11260_v29 }
 0xbe9   : > { %v7722_v13 = vpop.eup %7721  ;;  %v5767_v39 = vmul.f32 %v7720_v43, %v11271_v63  ;;  %v5768_v16 = vmul.f32 %v7720_v43, %v11274_v12 }
 0xbea   : > { %5883 = vst [vmem:[%s11336_s24 + $0xa0] sm:$0xff] %v5849_v37  ;;  %5884 = vst [vmem:[%s11336_s24 + $0xa8] sm:$0xff] %v5850_v36  ;;  %v5808_v28 = vmul.f32 %v11317_v33, %v5765_v32  ;;  %v5809_v30 = vmul.f32 %v11320_v41, %v5766_v10  ;;  %v5769_v4 = vmul.f32 %v7722_v13, %v11277_v19 }
 0xbeb   : > { %v5770_v61 = vmul.f32 %v7722_v13, %v11280_v21  ;;  %v5810_v45 = vmul.f32 %v11317_v33, %v5767_v39  ;;  %v5811_v29 = vmul.f32 %v11320_v41, %v5768_v16 }
 0xbec   : > { %v5851_v63 = vadd.f32 %v11325_v47, %v5808_v28  ;;  %v5852_v12 = vadd.f32 %v11328_v25, %v5809_v30  ;;  %v5812_v22 = vmul.f32 %v11317_v33, %v5769_v4 }
 0xbed   : > { %v5813_v53 = vmul.f32 %v11320_v41, %v5770_v61  ;;  %v7724_v35 = vpop.eup %7723  ;;  %v5853_v19 = vadd.f32 %v11325_v47, %v5810_v45  ;;  %v5854_v21 = vadd.f32 %v11328_v25, %v5811_v29 }
 0xbee   : > { %5885 = vst [vmem:[%s11336_s24 + $0xb0] sm:$0xff] %v5851_v63  ;;  %5886 = vst [vmem:[%s11336_s24 + $0xb8] sm:$0xff] %v5852_v12  ;;  %v5855_v24 = vadd.f32 %v11325_v47, %v5812_v22  ;;  %v5771_v0 = vmul.f32 %v7724_v35, %v11291_v34  ;;  %v5772_v55 = vmul.f32 %v7724_v35, %v11294_v44 }
 0xbef   : > { %v5856_v49 = vadd.f32 %v11328_v25, %v5813_v53  ;;  %v7726_v52 = vpop.eup %7725  ;;  %5887 = vst [vmem:[%s11336_s24 + $0xc0] sm:$0xff] %v5853_v19  ;;  %5888 = vst [vmem:[%s11336_s24 + $0xc8] sm:$0xff] %v5854_v21 }
 0xbf0   : > { %5889 = vst [vmem:[%s11336_s24 + $0xd0] sm:$0xff] %v5855_v24  ;;  %v5814_v6 = vmul.f32 %v11317_v33, %v5771_v0  ;;  %v5815_v38 = vmul.f32 %v11320_v41, %v5772_v55  ;;  %v5773_v58 = vmul.f32 %v7726_v52, %v11297_v26  ;;  %v5774_v11 = vmul.f32 %v7726_v52, %v11300_v15 }
 0xbf1   : > { %5890 = vst [vmem:[%s11336_s24 + $0xd8] sm:$0xff] %v5856_v49 }
 0xbf2   : > { %v5857_v34 = vadd.f32 %v11325_v47, %v5814_v6  ;;  %v5858_v56 = vadd.f32 %v11328_v25, %v5815_v38  ;;  %v5816_v44 = vmul.f32 %v11317_v33, %v5773_v58  ;;  %v5817_v17 = vmul.f32 %v11320_v41, %v5774_v11 }
 0xbf4   : > { %5891 = vst [vmem:[%s11336_s24 + $0xe0] sm:$0xff] %v5857_v34  ;;  %5892 = vst [vmem:[%s11336_s24 + $0xe8] sm:$0xff] %v5858_v56  ;;  %v5859_v14 = vadd.f32 %v11325_v47, %v5816_v44  ;;  %v5860_v1 = vadd.f32 %v11328_v25, %v5817_v17 }
 0xbf6   : > { %5893 = vst [vmem:[%s11336_s24 + $0xf0] sm:$0xff] %v5859_v14  ;;  %5894 = vst [vmem:[%s11336_s24 + $0xf8] sm:$0xff] %v5860_v1 }
 0xbf7 PF: > { %s11843_s6 = sld [smem:[#allocation26_spill]]  ;;  %s11844_s7 = sld [smem:[#allocation22_spill]] }
 0xbf8   : > { %s11845_s21 = sld [smem:[#allocation36_spill]]  ;;  %s11846_s17 = sld [smem:[#allocation103_spill]] }
 0xbf9   : > { %s5910_s5 = sshll.u32 %s870_s23, 4  ;;  %s8127_s16 = smov [#allocation14]   ;;  %s11470_s5 = int_to_ptr.vmem [resolvable:$true] %s5910_s5 }
 0xbfa   : > { %s7965_s26 = scalar_lea.vmem %s11470_s5, 8192  ;;  %s7969_s15 = sshll.u32 %s8127_s16, 4  ;;  %s7970_s15 = int_to_ptr.vmem [resolvable:$false] %s7969_s15 }
 0xbfb   : > { %p7966_p10 = scmp.ne.s32.totalorder %s11470_s5, %s7965_s26  ;;  %s7971_s3 = scalar_lea.vmem %s7970_s15, 16384 }
 0xbfc   : > { %p7972_p12 = scmp.lt.s32.totalorder %s11470_s5, %s7970_s15  ;;  %p7973_p0 = scmp.lt.s32.totalorder %s7971_s3, %s7965_s26 }
 0xbfd   : > { %s6531_s14 = sshll.u32 %s11843_s6, 13  ;;  %s11848_s20 = sand.u32 1, %s11844_s7  }
 0xbfe   : > { %s11847_s19 = smov %s11846_s17  ;;  %s11466_s0 = scalar_lea.hbm %s11846_s17, %s6531_s14 }
 0xbff   : > { %s11474_s8 = scalar_lea.sflag [#allocation5], %s11848_s20  ;;  %p11849_p8 = scmp.ne.s32.totalorder %s11845_s21, 0 }
 0xc00   : > { %p7974_p4 = por %p7973_p0, %p7972_p12 }
 0xc01   : > { %p7967_p5 = pnand %p7966_p10, %p11849_p8 }
 0xc03   : > { %p7968_p1 = pneg %p7967_p5 }
 0xc05   : > { %p7975_p3 = pnand %p7974_p4, %p7968_p1 }
 0xc07   : > { %7978 = shalt.err (!%p7975_p3)
}
 0xc08   : > { %s7979_s11 = scalar_lea.hbm %s11466_s0, 8192  ;;  %s7983_s22 = scalar_lea.hbm %s11847_s19, 16384 }
 0xc09   : > { %p7980_p13 = scmp.ne.s32.totalorder %s11466_s0, %s7979_s11  ;;  %p7984_p6 = scmp.lt.u32.totalorder %s11466_s0, %s11847_s19 }
 0xc0a   : > { %p7985_p7 = scmp.lt.u32.totalorder %s7983_s22, %s7979_s11  ;;  %p7987_p10 = scmp.lt.u32.totalorder %s7979_s11, %s11466_s0 }
 0xc0b   : > { %p7981_p2 = pnand %p7980_p13, %p11849_p8 }
 0xc0c   : > { %p7986_p11 = por %p7985_p7, %p7984_p6 }
 0xc0d   : > { %p7982_p9 = pneg %p7981_p2 }
 0xc0e   : > { %p7988_p5 = por %p7987_p10, %p7986_p11 }
 0xc10   : > { %p7989_p1 = pnand %p7988_p5, %p7982_p9 }
 0xc12   : > { %7992 = shalt.err (!%p7989_p1)
}
 0xc13   : > { %s8128_s18 = smov 256   ;;  %s8129_s29 = smov 16  }
 0xc14   : > { %6810 = dma.vmem_to_hbm [thread:$0]  (%p11849_p8), %s11470_s5, 8192, %s11466_s0, %s11474_s8, %s8128_s18, %s8128_s18, %s8129_s29  }
 0xc15 PF: > { %s11850_s4 = sld [smem:[#allocation30_spill]]  ;;  %s11851_s10 = sld [smem:[#allocation21_spill]] }
 0xc16   : > { %s11852_s12 = sld [smem:[#allocation37_spill]] }
 0xc1b   : > { %p6845_p12 = scmp.ge.s32.totalorder %s11850_s4, 2  ;;  %s5925_s9 = sand.u32 1, %s11851_s10  }
 0xc1c   : > { %p11853_p0 = scmp.ne.s32.totalorder %s11852_s12, 0  ;;  %s5926_s28 = scalar_lea.sflag [#allocation5], %s5925_s9 }
 0xc1e   : > { %p6839_p4 = pnand %p6845_p12, %p11853_p0 }
 0xc20   : > { %8058 = dma.done.wait (!%p6839_p4), %s5926_s28, 8192  }
 0xc21   : > { %8060 = vsyncadd (!%p6839_p4), %s5926_s28, 4294959104  ;;  %s33_s18 = sadd.s32 1, %s11850_s4   ;;  %s11855_s21 = sld [smem:[#allocation19_spill]] }
 0xc22   : > { %p11503_p3 = scmp.ge.s32.totalorder %s33_s18, 10   ;;  %s11856_s22 = sld [smem:[#allocation20_spill]] }
 0xc23   : > { %s11857_s23 = sld [smem:[#allocation35_spill]]  ;;  %s11858_s24 = sld [smem:[#allocation22_spill]] }
 0xc24   : > { %s11859_s25 = sld [smem:[#allocation23_spill]]  ;;  %s11860_s26 = sld [smem:[#allocation34_spill]] }
 0xc25   : > { %s11861_s27 = sld [smem:[#allocation27_spill]]  ;;  %s11862_s28 = sld [smem:[#allocation28_spill]] }
 0xc26   : > { %s11863_s29 = sld [smem:[#allocation29_spill]]  ;;  %s11864_s6 = sld [smem:[#allocation31_spill]] }
 0xc27   : > { %s11865_s0 = sld [smem:[#allocation32_spill]]  ;;  %s11866_s17 = sld [smem:[#allocation33_spill]] }
 0xc28   :  { %32 = sbr.rel (!%p11503_p3) target bundleno = 29 (0x1d), region = 229 }
 0xc2c   : > { %s11868_s30 = smov %s11864_s6 }
 0xc2f   :  { %5931 = vsyncpa [#allocation4], 1 }
 0xc30   :  { %5933 = vsyncpa [#allocation4 + $0x1], 1 }
 0xc31   :  { %5934 = vsyncpa [#allocation7], 1 }
 0xc32   :  { %5935 = vsyncpa [#allocation5], 1 }
 0xc33   :  { %5937 = vsyncpa [#allocation5 + $0x1], 1 }

</bundles_post_ra>
